<compile_context>
chip_gen: v5e
topology: v5e:2x2
jax: 0.10.0
libtpu: 0.0.40
codegen_flags: <defaults>
</compile_context>

<pallas_src>
import functools

import jax
import jax.numpy as jnp
from jax.experimental import pallas as pl
from jax.experimental.pallas import tpu as pltpu

EPS = 1e-5
LANES = 128


def _round_up(x, m):
    return (x + m - 1) // m * m


def _vmem_limit_bytes():
    cap = 128 * 1024 * 1024
    try:
        cap = int(pltpu.get_tpu_info().vmem_capacity_bytes)
    except Exception:
        pass
    # leave headroom for compiler-internal scratch / double buffers / semaphores
    return max(32 * 1024 * 1024, min(3 * cap // 4, 96 * 1024 * 1024))


# ----------------------------------------------------------------------------
# Pallas kernels
# ----------------------------------------------------------------------------
def _conv1_stats_kernel(x_ref, w_ref, mask_ref, y_ref, sum_ref, ssq_ref):
    """Conv1 as one dense GEMM (K = 9*Cin) + per-image BN1 partial statistics.

    x_ref   : (R, K1) bf16 mini-im2col rows (R = H*Wp; 2 garbage rows per Wp group)
    w_ref   : (K1, Cpad) bf16
    mask_ref: (R, 1) f32, 1.0 on real output pixels, 0.0 on garbage columns
    y_ref   : (R, Cpad) bf16 raw conv1 output
    sum_ref, ssq_ref : (1, Cpad) f32 per-image partial sums (reduced on host)
    """
    acc = jnp.dot(x_ref[...], w_ref[...], preferred_element_type=jnp.float32)
    y_ref[...] = acc.astype(jnp.bfloat16)
    accm = acc * mask_ref[...]
    sum_ref[...] = jnp.sum(accm, axis=0, keepdims=True)
    ssq_ref[...] = jnp.sum(accm * acc, axis=0, keepdims=True)


def _bnrelu_conv2_stats_kernel(y1_ref, a_ref, b_ref, wp_ref, wl_ref, mask_ref,
                               y2_ref, sum_ref, ssq_ref, scr_ref, *, Wp, base):
    """BN1 affine (y*a+b) + ReLU + conv2 (K-stacked shifted GEMMs) + BN2 partial stats.

    y1_ref : (R, Cpad) bf16 raw conv1 output
    a_ref, b_ref : (1, Cpad) f32 BN1 scale / shift
    wp_ref : (3, 2*Cpad, Cpad) bf16   taps (dh,0)+(dh,1) stacked along K
    wl_ref : (3, Cpad, Cpad)   bf16   tap  (dh,2)
    y2_ref : (R, Cpad) bf16 raw conv2 output
    scr_ref: (rows, 2*Cpad) f32 scratch holding the zero-padded BN1 feature map;
             lanes [0,C) hold padflat[p], lanes [C,2C) hold padflat[p+1].
    """
    R, C = y1_ref.shape
    rows, two_c = scr_ref.shape

    mask = mask_ref[...]
    # BN1 affine + ReLU; zero the 2 garbage columns per image row (they act as the
    # left/right spatial zero-pads of the flat layout).
    y1n = jnp.maximum(y1_ref[...].astype(jnp.float32) * a_ref[...] + b_ref[...],
                      0.0) * mask                              # (R, C) f32

    # refresh only the small pad regions each step (cheap; megacore-safe)
    scr_ref[pl.ds(0, base), :] = jnp.zeros((base, two_c), jnp.float32)
    tail = rows - (base + R - 1)
    scr_ref[pl.ds(base + R - 1, tail), :] = jnp.zeros((tail, two_c), jnp.float32)

    # place the padded conv2 input twice: lanes [0,C) at row `base`, lanes [C,2C)
    # shifted by -1 row, so one slab read yields taps dw=0 and dw=1 stacked to K=2C.
    scr_ref[pl.ds(base, R), pl.ds(0, C)] = y1n
    scr_ref[pl.ds(base - 1, R), pl.ds(C, C)] = y1n

    acc = None
    for dh in range(3):
        s0 = base - (Wp + 1) + dh * Wp
        pair = scr_ref[pl.ds(s0, R), :].astype(jnp.bfloat16)          # (R, 2C)
        part = jnp.dot(pair, wp_ref[dh], preferred_element_type=jnp.float32)
        last = scr_ref[pl.ds(s0 + 2, R), pl.ds(0, C)].astype(jnp.bfloat16)
        part = part + jnp.dot(last, wl_ref[dh], preferred_element_type=jnp.float32)
        acc = part if acc is None else acc + part

    y2_ref[...] = acc.astype(jnp.bfloat16)
    accm = acc * mask
    sum_ref[...] = jnp.sum(accm, axis=0, keepdims=True)
    ssq_ref[...] = jnp.sum(accm * acc, axis=0, keepdims=True)


def _bnrelu_pool_kernel(y_ref, a_ref, b_ref, o_ref):
    """BN2 affine + ReLU + 2x2 max-pool, fused; writes only the real Cout channels.

    y_ref : (H, Wo+1, 2, Cpad) bf16 raw conv2 ((Wo+1)-th w-pair is garbage)
    o_ref : (Ho, Wo, Cout) f32
    """
    _, wq, _, c = y_ref.shape
    ho, wo, cout = o_ref.shape
    yn = jnp.maximum(y_ref[...].astype(jnp.float32) * a_ref[...] + b_ref[...], 0.0)
    yn = yn.reshape(ho, 2, wq, 2, c)                           # leading-dim split only
    hmax = jnp.maximum(yn[:, :, :, 0, :], yn[:, :, :, 1, :])   # max over w-parity
    pooled = jnp.maximum(hmax[:, 0], hmax[:, 1])               # max over h-parity
    o_ref[...] = pooled[:, :wo, :cout]                         # drop garbage pair + pad chans


# ----------------------------------------------------------------------------
# Host-side helpers (thin XLA glue: layout/padding + BN moment finalize)
# ----------------------------------------------------------------------------
def _bn_affine(s, ss, gamma_p, beta_p, count):
    # s, ss: (N, 1, Cpad) per-image partials -> reduce here (keeps the grid "parallel")
    s = jnp.sum(s, axis=0)
    ss = jnp.sum(ss, axis=0)
    mean = s / count
    var = jnp.maximum(ss / count - mean * mean, 0.0)
    a = gamma_p.reshape(1, -1) * jax.lax.rsqrt(var + EPS)
    b = beta_p.reshape(1, -1) - mean * a
    return a, b


def encoder_block_v1_forward(x_nchw, params):
    # NCHW in (PyTorch convention), NCHW out; channels-last padded layout inside.
    (w1, b1, g1, be1, w2, b2, g2, be2) = params   # conv biases b1/b2 cancel inside BN
    N, Cin, H, W = x_nchw.shape
    Cout = w1.shape[0]
    assert H % 2 == 0 and W % 2 == 0, "MaxPool2d(2) path assumes even H, W"

    Cpad = _round_up(Cout, LANES)
    Hp, Wp = H + 3, W + 2          # 1 top / 2 bottom pad rows, 1 left / 1 right pad col
    R = H * Wp                     # conv-output rows per image (2 garbage cols per row)
    row0 = Wp + 1                  # flat index of the first interior pixel
    Ho, Wo = H // 2, W // 2
    count = float(N * H * W)
    K1 = _round_up(9 * Cin, 8)
    rows_scr = _round_up(row0 + R + Wp + 1, 8)
    vmem = _vmem_limit_bytes()

    # ---- layout plumbing (cheap XLA ops; Cin is tiny so the mini-im2col is cheap) ----
    x = jnp.transpose(x_nchw, (0, 2, 3, 1)).astype(jnp.float32)         # NHWC
    xf = jnp.pad(x, ((0, 0), (1, 2), (1, 1), (0, 0))).reshape(N, Hp * Wp, Cin)
    cols = [xf[:, dh * Wp + dw: dh * Wp + dw + R, :]
            for dh in range(3) for dw in range(3)]
    x_im2 = jnp.concatenate(cols, axis=-1)                               # (N, R, 9*Cin)
    x_im2 = jnp.pad(x_im2, ((0, 0), (0, 0), (0, K1 - 9 * Cin))).astype(jnp.bfloat16)

    w1t = jnp.transpose(w1, (2, 3, 1, 0)).reshape(9 * Cin, Cout)         # (tap*Cin, Cout)
    w1r = jnp.pad(w1t, ((0, K1 - 9 * Cin), (0, Cpad - Cout))).astype(jnp.bfloat16)

    w2t = jnp.transpose(w2, (2, 3, 1, 0))                                # (3,3,Cin2,Cout)
    w2t = jnp.pad(w2t, ((0, 0), (0, 0), (0, Cpad - w2.shape[1]), (0, Cpad - Cout)))
    w2p = jnp.concatenate([w2t[:, 0], w2t[:, 1]], axis=1).astype(jnp.bfloat16)  # (3,2Cpad,Cpad)
    w2l = w2t[:, 2].astype(jnp.bfloat16)                                         # (3,Cpad,Cpad)

    g1p, be1p = jnp.pad(g1, (0, Cpad - Cout)), jnp.pad(be1, (0, Cpad - Cout))
    g2p, be2p = jnp.pad(g2, (0, Cpad - Cout)), jnp.pad(be2, (0, Cpad - Cout))

    # hoisted garbage-column mask (constant across the grid)
    mask = (jnp.arange(R) % Wp < W).astype(jnp.float32).reshape(R, 1)

    stats_shape = jax.ShapeDtypeStruct((N, 1, Cpad), jnp.float32)
    stats_spec = pl.BlockSpec((None, 1, Cpad), lambda n: (n, 0, 0))

    # ---- stage 1: conv1 (single K=9*Cin GEMM) + BN1 partial statistics ----
    y1, s1, ss1 = pl.pallas_call(
        _conv1_stats_kernel,
        grid=(N,),
        in_specs=[
            pl.BlockSpec((None, R, K1), lambda n: (n, 0, 0)),
            pl.BlockSpec((K1, Cpad), lambda n: (0, 0)),
            pl.BlockSpec((R, 1), lambda n: (0, 0)),
        ],
        out_specs=[
            pl.BlockSpec((None, R, Cpad), lambda n: (n, 0, 0)),
            stats_spec, stats_spec,
        ],
        out_shape=[
            jax.ShapeDtypeStruct((N, R, Cpad), jnp.bfloat16),
            stats_shape, stats_shape,
        ],
        compiler_params=pltpu.CompilerParams(
            dimension_semantics=("parallel",), vmem_limit_bytes=vmem),
    )(x_im2, w1r, mask)
    a1, bb1 = _bn_affine(s1, ss1, g1p, be1p, count)

    # ---- stage 2: BN1+ReLU fused with conv2 (K-stacked taps) + BN2 partial stats ----
    y2, s2, ss2 = pl.pallas_call(
        functools.partial(_bnrelu_conv2_stats_kernel, Wp=Wp, base=row0),
        grid=(N,),
        in_specs=[
            pl.BlockSpec((None, R, Cpad), lambda n: (n, 0, 0)),
            pl.BlockSpec((1, Cpad), lambda n: (0, 0)),
            pl.BlockSpec((1, Cpad), lambda n: (0, 0)),
            pl.BlockSpec((3, 2 * Cpad, Cpad), lambda n: (0, 0, 0)),
            pl.BlockSpec((3, Cpad, Cpad), lambda n: (0, 0, 0)),
            pl.BlockSpec((R, 1), lambda n: (0, 0)),
        ],
        out_specs=[
            pl.BlockSpec((None, R, Cpad), lambda n: (n, 0, 0)),
            stats_spec, stats_spec,
        ],
        out_shape=[
            jax.ShapeDtypeStruct((N, R, Cpad), jnp.bfloat16),
            stats_shape, stats_shape,
        ],
        scratch_shapes=[pltpu.VMEM((rows_scr, 2 * Cpad), jnp.float32)],
        compiler_params=pltpu.CompilerParams(
            dimension_semantics=("parallel",), vmem_limit_bytes=vmem),
    )(y1, a1, bb1, w2p, w2l, mask)
    a2, bb2 = _bn_affine(s2, ss2, g2p, be2p, count)

    # ---- BN2 + ReLU + MaxPool2d(2), fused; corner selection via layout only ----
    y2v = y2.reshape(N, H, Wo + 1, 2, Cpad)        # free reshape: R = H*(Wo+1)*2
    pooled = pl.pallas_call(
        _bnrelu_pool_kernel,
        grid=(N,),
        in_specs=[
            pl.BlockSpec((None, H, Wo + 1, 2, Cpad), lambda n: (n, 0, 0, 0, 0)),
            pl.BlockSpec((1, Cpad), lambda n: (0, 0)),
            pl.BlockSpec((1, Cpad), lambda n: (0, 0)),
        ],
        out_specs=pl.BlockSpec((None, Ho, Wo, Cout), lambda n: (n, 0, 0, 0)),
        out_shape=jax.ShapeDtypeStruct((N, Ho, Wo, Cout), jnp.float32),
        compiler_params=pltpu.CompilerParams(
            dimension_semantics=("parallel",), vmem_limit_bytes=vmem),
    )(y2v, a2, bb2)

    return jnp.transpose(pooled, (0, 3, 1, 2))     # NCHW (tiny, Cout channels only)


# ----------------------------------------------------------------------------
# Deterministic parameter init (shapes from EncoderBlockv1.__init__)
# ----------------------------------------------------------------------------
def init_params(key, in_chs, out_chs):
    ks = jax.random.split(key, 8)
    w1 = 0.2 * jax.random.normal(ks[0], (out_chs, in_chs, 3, 3), jnp.float32)
    b1 = 0.1 * jax.random.normal(ks[1], (out_chs,), jnp.float32)
    g1 = 1.0 + 0.1 * jax.random.normal(ks[2], (out_chs,), jnp.float32)
    be1 = 0.1 * jax.random.normal(ks[3], (out_chs,), jnp.float32)
    w2 = 0.2 * jax.random.normal(ks[4], (out_chs, out_chs, 3, 3), jnp.float32)
    b2 = 0.1 * jax.random.normal(ks[5], (out_chs,), jnp.float32)
    g2 = 1.0 + 0.1 * jax.random.normal(ks[6], (out_chs,), jnp.float32)
    be2 = 0.1 * jax.random.normal(ks[7], (out_chs,), jnp.float32)
    return (w1, b1, g1, be1, w2, b2, g2, be2)


# ----------------------------------------------------------------------------
# Pure-JAX reference (independent path, includes the conv biases)
# ----------------------------------------------------------------------------
def reference_forward(x_nchw, params):
    (w1, b1, g1, be1, w2, b2, g2, be2) = params

    def conv(x, w, b):
        y = jax.lax.conv_general_dilated(
            x, w, window_strides=(1, 1), padding=((1, 1), (1, 1)),
            dimension_numbers=("NCHW", "OIHW", "NCHW"),
            precision=jax.lax.Precision.HIGHEST)
        return y + b.reshape(1, -1, 1, 1)

    def bn(x, g, be):
        mean = jnp.mean(x, axis=(0, 2, 3), keepdims=True)
        var = jnp.mean((x - mean) ** 2, axis=(0, 2, 3), keepdims=True)
        return ((x - mean) * jax.lax.rsqrt(var + EPS)
                * g.reshape(1, -1, 1, 1) + be.reshape(1, -1, 1, 1))

    y = jax.nn.relu(bn(conv(x_nchw, w1, b1), g1, be1))
    y = jax.nn.relu(bn(conv(y, w2, b2), g2, be2))
    N, C, H, W = y.shape
    return y.reshape(N, C, H // 2, 2, W // 2, 2).max(axis=(3, 5))


if __name__ == "__main__":
    key = jax.random.PRNGKey(0)
    kx, kp = jax.random.split(key)
    N, Cin, Cout, H, W = 2, 4, 8, 16, 16
    x = jax.random.normal(kx, (N, Cin, H, W), jnp.float32)
    params = init_params(kp, Cin, Cout)

    out = jax.jit(encoder_block_v1_forward)(x, params)
    out = jax.block_until_ready(out)
    assert out.shape == (N, Cout, H // 2, W // 2), out.shape

    ref = reference_forward(x, params)
    if not jnp.allclose(out, ref, atol=5e-2, rtol=5e-2):
        raise AssertionError(
            f"mismatch: max abs diff = {float(jnp.max(jnp.abs(out - ref)))}")
    print("KERNEL_OK")
</pallas_src>

<mosaic_0001>
module attributes {stable_mosaic.version = 11 : i64} {
  func.func @_conv1_stats_kernel(%arg0: i32, %arg1: memref<1x288x40xbf16, #tpu.memory_space<vmem>>, %arg2: memref<40x128xbf16, #tpu.memory_space<vmem>>, %arg3: memref<288x1xf32, #tpu.memory_space<vmem>>, %arg4: memref<1x288x128xbf16, #tpu.memory_space<vmem>>, %arg5: memref<1x1x128xf32, #tpu.memory_space<vmem>>, %arg6: memref<1x1x128xf32, #tpu.memory_space<vmem>>) attributes {dimension_semantics = [#tpu.dimension_semantics<parallel>], iteration_bounds = array<i64: 2>, scalar_prefetch = 0 : i64, scratch_operands = 0 : i64, tpu.core_type = #tpu.core_type<tc>, window_params = [{transform_indices = @transform_0, window_bounds = array<i64: 1, 288, 40>}, {pipeline_mode = #tpu.pipeline_mode<synchronous>, transform_indices = @transform_1, window_bounds = array<i64: 40, 128>}, {pipeline_mode = #tpu.pipeline_mode<synchronous>, transform_indices = @transform_2, window_bounds = array<i64: 288, 1>}, {transform_indices = @transform_3, window_bounds = array<i64: 1, 288, 128>}, {transform_indices = @transform_4, window_bounds = array<i64: 1, 1, 128>}, {transform_indices = @transform_5, window_bounds = array<i64: 1, 1, 128>}]} {
    %c0 = arith.constant 0 : index
    %c0_0 = arith.constant 0 : index
    %c0_1 = arith.constant 0 : index
    %0 = vector.load %arg1[%c0, %c0_0, %c0_1] : memref<1x288x40xbf16, #tpu.memory_space<vmem>>, vector<1x288x40xbf16>
    %1 = vector.shape_cast %0 : vector<1x288x40xbf16> to vector<288x40xbf16>
    %c0_2 = arith.constant 0 : index
    %c0_3 = arith.constant 0 : index
    %2 = vector.load %arg2[%c0_2, %c0_3] : memref<40x128xbf16, #tpu.memory_space<vmem>>, vector<40x128xbf16>
    %cst = arith.constant dense<0.000000e+00> : vector<288x128xf32>
    %3 = tpu.matmul %1, %2, %cst {dimension_numbers = #tpu.dot_dimension_numbers<[1], [0], [0], [1], [0, 0, 1, 1], [], []>} : vector<288x40xbf16>, vector<40x128xbf16>, vector<288x128xf32> -> vector<288x128xf32>
    %4 = arith.truncf %3 : vector<288x128xf32> to vector<288x128xbf16>
    %c0_4 = arith.constant 0 : index
    %c0_5 = arith.constant 0 : index
    %c0_6 = arith.constant 0 : index
    %5 = vector.load %arg4[%c0_4, %c0_5, %c0_6] : memref<1x288x128xbf16, #tpu.memory_space<vmem>>, vector<1x288x128xbf16>
    %6 = vector.shape_cast %5 : vector<1x288x128xbf16> to vector<288x128xbf16>
    %7 = vector.shape_cast %4 : vector<288x128xbf16> to vector<1x288x128xbf16>
    tpu.vector_store %arg4[%c0_4, %c0_5, %c0_6], %7 {strides = array<i32>} : memref<1x288x128xbf16, #tpu.memory_space<vmem>>, vector<1x288x128xbf16>,
    %c0_7 = arith.constant 0 : index
    %c0_8 = arith.constant 0 : index
    %8 = vector.load %arg3[%c0_7, %c0_8] : memref<288x1xf32, #tpu.memory_space<vmem>>, vector<288x1xf32>
    %9 = vector.broadcast %8 : vector<288x1xf32> to vector<288x128xf32>
    %10 = arith.mulf %3, %9 : vector<288x128xf32>
    %cst_9 = arith.constant dense<0.000000e+00> : vector<128xf32>
    %11 = vector.multi_reduction <add>, %10, %cst_9 [0] : vector<288x128xf32> to vector<128xf32>
    %12 = vector.shape_cast %11 : vector<128xf32> to vector<1x128xf32>
    %c0_10 = arith.constant 0 : index
    %c0_11 = arith.constant 0 : index
    %c0_12 = arith.constant 0 : index
    %13 = vector.load %arg5[%c0_10, %c0_11, %c0_12] : memref<1x1x128xf32, #tpu.memory_space<vmem>>, vector<1x1x128xf32>
    %14 = vector.shape_cast %13 : vector<1x1x128xf32> to vector<1x128xf32>
    %15 = vector.shape_cast %12 : vector<1x128xf32> to vector<1x1x128xf32>
    tpu.vector_store %arg5[%c0_10, %c0_11, %c0_12], %15 {strides = array<i32>} : memref<1x1x128xf32, #tpu.memory_space<vmem>>, vector<1x1x128xf32>,
    %16 = arith.mulf %10, %3 : vector<288x128xf32>
    %cst_13 = arith.constant dense<0.000000e+00> : vector<128xf32>
    %17 = vector.multi_reduction <add>, %16, %cst_13 [0] : vector<288x128xf32> to vector<128xf32>
    %18 = vector.shape_cast %17 : vector<128xf32> to vector<1x128xf32>
    %c0_14 = arith.constant 0 : index
    %c0_15 = arith.constant 0 : index
    %c0_16 = arith.constant 0 : index
    %19 = vector.load %arg6[%c0_14, %c0_15, %c0_16] : memref<1x1x128xf32, #tpu.memory_space<vmem>>, vector<1x1x128xf32>
    %20 = vector.shape_cast %19 : vector<1x1x128xf32> to vector<1x128xf32>
    %21 = vector.shape_cast %18 : vector<1x128xf32> to vector<1x1x128xf32>
    tpu.vector_store %arg6[%c0_14, %c0_15, %c0_16], %21 {strides = array<i32>} : memref<1x1x128xf32, #tpu.memory_space<vmem>>, vector<1x1x128xf32>,
    return
  }
  func.func @transform_0(%arg0: i32) -> (i32, i32, i32) {
    %c0_i32 = arith.constant 0 : i32
    %c0_i32_0 = arith.constant 0 : i32
    %c0_i32_1 = arith.constant 0 : i32
    return %arg0, %c0_i32, %c0_i32_0 : i32, i32, i32
  }
  func.func @transform_1(%arg0: i32) -> (i32, i32) {
    %c0_i32 = arith.constant 0 : i32
    %c0_i32_0 = arith.constant 0 : i32
    %c0_i32_1 = arith.constant 0 : i32
    return %c0_i32, %c0_i32_0 : i32, i32
  }
  func.func @transform_2(%arg0: i32) -> (i32, i32) {
    %c0_i32 = arith.constant 0 : i32
    %c0_i32_0 = arith.constant 0 : i32
    %c0_i32_1 = arith.constant 0 : i32
    return %c0_i32, %c0_i32_0 : i32, i32
  }
  func.func @transform_3(%arg0: i32) -> (i32, i32, i32) {
    %c0_i32 = arith.constant 0 : i32
    %c0_i32_0 = arith.constant 0 : i32
    %c0_i32_1 = arith.constant 0 : i32
    return %arg0, %c0_i32, %c0_i32_0 : i32, i32, i32
  }
  func.func @transform_4(%arg0: i32) -> (i32, i32, i32) {
    %c0_i32 = arith.constant 0 : i32
    %c0_i32_0 = arith.constant 0 : i32
    %c0_i32_1 = arith.constant 0 : i32
    return %arg0, %c0_i32, %c0_i32_0 : i32, i32, i32
  }
  func.func @transform_5(%arg0: i32) -> (i32, i32, i32) {
    %c0_i32 = arith.constant 0 : i32
    %c0_i32_0 = arith.constant 0 : i32
    %c0_i32_1 = arith.constant 0 : i32
    return %arg0, %c0_i32, %c0_i32_0 : i32, i32, i32
  }
}

module attributes {stable_mosaic.version = 11 : i64} {
  func.func @_bnrelu_conv2_stats_kernel(%arg0: i32, %arg1: memref<1x288x128xbf16, #tpu.memory_space<vmem>>, %arg2: memref<1x128xf32, #tpu.memory_space<vmem>>, %arg3: memref<1x128xf32, #tpu.memory_space<vmem>>, %arg4: memref<3x256x128xbf16, #tpu.memory_space<vmem>>, %arg5: memref<3x128x128xbf16, #tpu.memory_space<vmem>>, %arg6: memref<288x1xf32, #tpu.memory_space<vmem>>, %arg7: memref<1x288x128xbf16, #tpu.memory_space<vmem>>, %arg8: memref<1x1x128xf32, #tpu.memory_space<vmem>>, %arg9: memref<1x1x128xf32, #tpu.memory_space<vmem>>, %arg10: memref<328x256xf32, #tpu.memory_space<vmem>>) attributes {dimension_semantics = [#tpu.dimension_semantics<parallel>], iteration_bounds = array<i64: 2>, scalar_prefetch = 0 : i64, scratch_operands = 1 : i64, tpu.core_type = #tpu.core_type<tc>, window_params = [{transform_indices = @transform_0, window_bounds = array<i64: 1, 288, 128>}, {pipeline_mode = #tpu.pipeline_mode<synchronous>, transform_indices = @transform_1, window_bounds = array<i64: 1, 128>}, {pipeline_mode = #tpu.pipeline_mode<synchronous>, transform_indices = @transform_2, window_bounds = array<i64: 1, 128>}, {pipeline_mode = #tpu.pipeline_mode<synchronous>, transform_indices = @transform_3, window_bounds = array<i64: 3, 256, 128>}, {pipeline_mode = #tpu.pipeline_mode<synchronous>, transform_indices = @transform_4, window_bounds = array<i64: 3, 128, 128>}, {pipeline_mode = #tpu.pipeline_mode<synchronous>, transform_indices = @transform_5, window_bounds = array<i64: 288, 1>}, {transform_indices = @transform_6, window_bounds = array<i64: 1, 288, 128>}, {transform_indices = @transform_7, window_bounds = array<i64: 1, 1, 128>}, {transform_indices = @transform_8, window_bounds = array<i64: 1, 1, 128>}]} {
    %c0 = arith.constant 0 : index
    %c0_0 = arith.constant 0 : index
    %0 = vector.load %arg6[%c0, %c0_0] : memref<288x1xf32, #tpu.memory_space<vmem>>, vector<288x1xf32>
    %c0_1 = arith.constant 0 : index
    %c0_2 = arith.constant 0 : index
    %c0_3 = arith.constant 0 : index
    %1 = vector.load %arg1[%c0_1, %c0_2, %c0_3] : memref<1x288x128xbf16, #tpu.memory_space<vmem>>, vector<1x288x128xbf16>
    %2 = vector.shape_cast %1 : vector<1x288x128xbf16> to vector<288x128xbf16>
    %3 = arith.extf %2 : vector<288x128xbf16> to vector<288x128xf32>
    %c0_4 = arith.constant 0 : index
    %c0_5 = arith.constant 0 : index
    %4 = vector.load %arg2[%c0_4, %c0_5] : memref<1x128xf32, #tpu.memory_space<vmem>>, vector<1x128xf32>
    %5 = vector.broadcast %4 : vector<1x128xf32> to vector<288x128xf32>
    %6 = arith.mulf %3, %5 : vector<288x128xf32>
    %c0_6 = arith.constant 0 : index
    %c0_7 = arith.constant 0 : index
    %7 = vector.load %arg3[%c0_6, %c0_7] : memref<1x128xf32, #tpu.memory_space<vmem>>, vector<1x128xf32>
    %8 = vector.broadcast %7 : vector<1x128xf32> to vector<288x128xf32>
    %9 = arith.addf %6, %8 : vector<288x128xf32>
    %cst = arith.constant 0.000000e+00 : f32
    %10 = vector.broadcast %cst : f32 to vector<288x128xf32>
    %11 = arith.maximumf %9, %10 : vector<288x128xf32>
    %12 = vector.broadcast %0 : vector<288x1xf32> to vector<288x128xf32>
    %13 = arith.mulf %11, %12 : vector<288x128xf32>
    %cst_8 = arith.constant 0.000000e+00 : f32
    %14 = vector.broadcast %cst_8 : f32 to vector<19x256xf32>
    %c0_9 = arith.constant 0 : index
    %c0_10 = arith.constant 0 : index
    %15 = vector.load %arg10[%c0_9, %c0_10] : memref<328x256xf32, #tpu.memory_space<vmem>>, vector<19x256xf32>
    tpu.vector_store %arg10[%c0_9, %c0_10], %14 {strides = array<i32>} : memref<328x256xf32, #tpu.memory_space<vmem>>, vector<19x256xf32>,
    %cst_11 = arith.constant 0.000000e+00 : f32
    %16 = vector.broadcast %cst_11 : f32 to vector<22x256xf32>
    %c306 = arith.constant 306 : index
    %c0_12 = arith.constant 0 : index
    %17 = vector.load %arg10[%c306, %c0_12] : memref<328x256xf32, #tpu.memory_space<vmem>>, vector<22x256xf32>
    tpu.vector_store %arg10[%c306, %c0_12], %16 {strides = array<i32>} : memref<328x256xf32, #tpu.memory_space<vmem>>, vector<22x256xf32>,
    %c19 = arith.constant 19 : index
    %c0_13 = arith.constant 0 : index
    %18 = vector.load %arg10[%c19, %c0_13] : memref<328x256xf32, #tpu.memory_space<vmem>>, vector<288x128xf32>
    tpu.vector_store %arg10[%c19, %c0_13], %13 {strides = array<i32>} : memref<328x256xf32, #tpu.memory_space<vmem>>, vector<288x128xf32>,
    %c18 = arith.constant 18 : index
    %c128 = arith.constant 128 : index
    %19 = vector.load %arg10[%c18, %c128] : memref<328x256xf32, #tpu.memory_space<vmem>>, vector<288x128xf32>
    tpu.vector_store %arg10[%c18, %c128], %13 {strides = array<i32>} : memref<328x256xf32, #tpu.memory_space<vmem>>, vector<288x128xf32>,
    %c0_14 = arith.constant 0 : index
    %c0_15 = arith.constant 0 : index
    %20 = vector.load %arg10[%c0_14, %c0_15] : memref<328x256xf32, #tpu.memory_space<vmem>>, vector<288x256xf32>
    %21 = arith.truncf %20 : vector<288x256xf32> to vector<288x256xbf16>
    %c0_16 = arith.constant 0 : index
    %c0_17 = arith.constant 0 : index
    %c0_18 = arith.constant 0 : index
    %22 = vector.load %arg4[%c0_16, %c0_17, %c0_18] : memref<3x256x128xbf16, #tpu.memory_space<vmem>>, vector<1x256x128xbf16>
    %23 = vector.shape_cast %22 : vector<1x256x128xbf16> to vector<256x128xbf16>
    %cst_19 = arith.constant dense<0.000000e+00> : vector<288x128xf32>
    %24 = tpu.matmul %21, %23, %cst_19 {dimension_numbers = #tpu.dot_dimension_numbers<[1], [0], [0], [1], [0, 0, 1, 1], [], []>} : vector<288x256xbf16>, vector<256x128xbf16>, vector<288x128xf32> -> vector<288x128xf32>
    %c2 = arith.constant 2 : index
    %c0_20 = arith.constant 0 : index
    %25 = vector.load %arg10[%c2, %c0_20] : memref<328x256xf32, #tpu.memory_space<vmem>>, vector<288x128xf32>
    %26 = arith.truncf %25 : vector<288x128xf32> to vector<288x128xbf16>
    %c0_21 = arith.constant 0 : index
    %c0_22 = arith.constant 0 : index
    %c0_23 = arith.constant 0 : index
    %27 = vector.load %arg5[%c0_21, %c0_22, %c0_23] : memref<3x128x128xbf16, #tpu.memory_space<vmem>>, vector<1x128x128xbf16>
    %28 = vector.shape_cast %27 : vector<1x128x128xbf16> to vector<128x128xbf16>
    %cst_24 = arith.constant dense<0.000000e+00> : vector<288x128xf32>
    %29 = tpu.matmul %26, %28, %cst_24 {dimension_numbers = #tpu.dot_dimension_numbers<[1], [0], [0], [1], [0, 0, 1, 1], [], []>} : vector<288x128xbf16>, vector<128x128xbf16>, vector<288x128xf32> -> vector<288x128xf32>
    %30 = arith.addf %24, %29 : vector<288x128xf32>
    %c18_25 = arith.constant 18 : index
    %c0_26 = arith.constant 0 : index
    %31 = vector.load %arg10[%c18_25, %c0_26] : memref<328x256xf32, #tpu.memory_space<vmem>>, vector<288x256xf32>
    %32 = arith.truncf %31 : vector<288x256xf32> to vector<288x256xbf16>
    %c1 = arith.constant 1 : index
    %c0_27 = arith.constant 0 : index
    %c0_28 = arith.constant 0 : index
    %33 = vector.load %arg4[%c1, %c0_27, %c0_28] : memref<3x256x128xbf16, #tpu.memory_space<vmem>>, vector<1x256x128xbf16>
    %34 = vector.shape_cast %33 : vector<1x256x128xbf16> to vector<256x128xbf16>
    %cst_29 = arith.constant dense<0.000000e+00> : vector<288x128xf32>
    %35 = tpu.matmul %32, %34, %cst_29 {dimension_numbers = #tpu.dot_dimension_numbers<[1], [0], [0], [1], [0, 0, 1, 1], [], []>} : vector<288x256xbf16>, vector<256x128xbf16>, vector<288x128xf32> -> vector<288x128xf32>
    %c20 = arith.constant 20 : index
    %c0_30 = arith.constant 0 : index
    %36 = vector.load %arg10[%c20, %c0_30] : memref<328x256xf32, #tpu.memory_space<vmem>>, vector<288x128xf32>
    %37 = arith.truncf %36 : vector<288x128xf32> to vector<288x128xbf16>
    %c1_31 = arith.constant 1 : index
    %c0_32 = arith.constant 0 : index
    %c0_33 = arith.constant 0 : index
    %38 = vector.load %arg5[%c1_31, %c0_32, %c0_33] : memref<3x128x128xbf16, #tpu.memory_space<vmem>>, vector<1x128x128xbf16>
    %39 = vector.shape_cast %38 : vector<1x128x128xbf16> to vector<128x128xbf16>
    %cst_34 = arith.constant dense<0.000000e+00> : vector<288x128xf32>
    %40 = tpu.matmul %37, %39, %cst_34 {dimension_numbers = #tpu.dot_dimension_numbers<[1], [0], [0], [1], [0, 0, 1, 1], [], []>} : vector<288x128xbf16>, vector<128x128xbf16>, vector<288x128xf32> -> vector<288x128xf32>
    %41 = arith.addf %35, %40 : vector<288x128xf32>
    %42 = arith.addf %30, %41 : vector<288x128xf32>
    %c36 = arith.constant 36 : index
    %c0_35 = arith.constant 0 : index
    %43 = vector.load %arg10[%c36, %c0_35] : memref<328x256xf32, #tpu.memory_space<vmem>>, vector<288x256xf32>
    %44 = arith.truncf %43 : vector<288x256xf32> to vector<288x256xbf16>
    %c2_36 = arith.constant 2 : index
    %c0_37 = arith.constant 0 : index
    %c0_38 = arith.constant 0 : index
    %45 = vector.load %arg4[%c2_36, %c0_37, %c0_38] : memref<3x256x128xbf16, #tpu.memory_space<vmem>>, vector<1x256x128xbf16>
    %46 = vector.shape_cast %45 : vector<1x256x128xbf16> to vector<256x128xbf16>
    %cst_39 = arith.constant dense<0.000000e+00> : vector<288x128xf32>
    %47 = tpu.matmul %44, %46, %cst_39 {dimension_numbers = #tpu.dot_dimension_numbers<[1], [0], [0], [1], [0, 0, 1, 1], [], []>} : vector<288x256xbf16>, vector<256x128xbf16>, vector<288x128xf32> -> vector<288x128xf32>
    %c38 = arith.constant 38 : index
    %c0_40 = arith.constant 0 : index
    %48 = vector.load %arg10[%c38, %c0_40] : memref<328x256xf32, #tpu.memory_space<vmem>>, vector<288x128xf32>
    %49 = arith.truncf %48 : vector<288x128xf32> to vector<288x128xbf16>
    %c2_41 = arith.constant 2 : index
    %c0_42 = arith.constant 0 : index
    %c0_43 = arith.constant 0 : index
    %50 = vector.load %arg5[%c2_41, %c0_42, %c0_43] : memref<3x128x128xbf16, #tpu.memory_space<vmem>>, vector<1x128x128xbf16>
    %51 = vector.shape_cast %50 : vector<1x128x128xbf16> to vector<128x128xbf16>
    %cst_44 = arith.constant dense<0.000000e+00> : vector<288x128xf32>
    %52 = tpu.matmul %49, %51, %cst_44 {dimension_numbers = #tpu.dot_dimension_numbers<[1], [0], [0], [1], [0, 0, 1, 1], [], []>} : vector<288x128xbf16>, vector<128x128xbf16>, vector<288x128xf32> -> vector<288x128xf32>
    %53 = arith.addf %47, %52 : vector<288x128xf32>
    %54 = arith.addf %42, %53 : vector<288x128xf32>
    %55 = arith.truncf %54 : vector<288x128xf32> to vector<288x128xbf16>
    %c0_45 = arith.constant 0 : index
    %c0_46 = arith.constant 0 : index
    %c0_47 = arith.constant 0 : index
    %56 = vector.load %arg7[%c0_45, %c0_46, %c0_47] : memref<1x288x128xbf16, #tpu.memory_space<vmem>>, vector<1x288x128xbf16>
    %57 = vector.shape_cast %56 : vector<1x288x128xbf16> to vector<288x128xbf16>
    %58 = vector.shape_cast %55 : vector<288x128xbf16> to vector<1x288x128xbf16>
    tpu.vector_store %arg7[%c0_45, %c0_46, %c0_47], %58 {strides = array<i32>} : memref<1x288x128xbf16, #tpu.memory_space<vmem>>, vector<1x288x128xbf16>,
    %59 = vector.broadcast %0 : vector<288x1xf32> to vector<288x128xf32>
    %60 = arith.mulf %54, %59 : vector<288x128xf32>
    %cst_48 = arith.constant dense<0.000000e+00> : vector<128xf32>
    %61 = vector.multi_reduction <add>, %60, %cst_48 [0] : vector<288x128xf32> to vector<128xf32>
    %62 = vector.shape_cast %61 : vector<128xf32> to vector<1x128xf32>
    %c0_49 = arith.constant 0 : index
    %c0_50 = arith.constant 0 : index
    %c0_51 = arith.constant 0 : index
    %63 = vector.load %arg8[%c0_49, %c0_50, %c0_51] : memref<1x1x128xf32, #tpu.memory_space<vmem>>, vector<1x1x128xf32>
    %64 = vector.shape_cast %63 : vector<1x1x128xf32> to vector<1x128xf32>
    %65 = vector.shape_cast %62 : vector<1x128xf32> to vector<1x1x128xf32>
    tpu.vector_store %arg8[%c0_49, %c0_50, %c0_51], %65 {strides = array<i32>} : memref<1x1x128xf32, #tpu.memory_space<vmem>>, vector<1x1x128xf32>,
    %66 = arith.mulf %60, %54 : vector<288x128xf32>
    %cst_52 = arith.constant dense<0.000000e+00> : vector<128xf32>
    %67 = vector.multi_reduction <add>, %66, %cst_52 [0] : vector<288x128xf32> to vector<128xf32>
    %68 = vector.shape_cast %67 : vector<128xf32> to vector<1x128xf32>
    %c0_53 = arith.constant 0 : index
    %c0_54 = arith.constant 0 : index
    %c0_55 = arith.constant 0 : index
    %69 = vector.load %arg9[%c0_53, %c0_54, %c0_55] : memref<1x1x128xf32, #tpu.memory_space<vmem>>, vector<1x1x128xf32>
    %70 = vector.shape_cast %69 : vector<1x1x128xf32> to vector<1x128xf32>
    %71 = vector.shape_cast %68 : vector<1x128xf32> to vector<1x1x128xf32>
    tpu.vector_store %arg9[%c0_53, %c0_54, %c0_55], %71 {strides = array<i32>} : memref<1x1x128xf32, #tpu.memory_space<vmem>>, vector<1x1x128xf32>,
    return
  }
  func.func @transform_0(%arg0: i32) -> (i32, i32, i32) {
    %c0_i32 = arith.constant 0 : i32
    %c0_i32_0 = arith.constant 0 : i32
    %c0_i32_1 = arith.constant 0 : i32
    return %arg0, %c0_i32, %c0_i32_0 : i32, i32, i32
  }
  func.func @transform_1(%arg0: i32) -> (i32, i32) {
    %c0_i32 = arith.constant 0 : i32
    %c0_i32_0 = arith.constant 0 : i32
    %c0_i32_1 = arith.constant 0 : i32
    return %c0_i32, %c0_i32_0 : i32, i32
  }
  func.func @transform_2(%arg0: i32) -> (i32, i32) {
    %c0_i32 = arith.constant 0 : i32
    %c0_i32_0 = arith.constant 0 : i32
    %c0_i32_1 = arith.constant 0 : i32
    return %c0_i32, %c0_i32_0 : i32, i32
  }
  func.func @transform_3(%arg0: i32) -> (i32, i32, i32) {
    %c0_i32 = arith.constant 0 : i32
    %c0_i32_0 = arith.constant 0 : i32
    %c0_i32_1 = arith.constant 0 : i32
    %c0_i32_2 = arith.constant 0 : i32
    return %c0_i32, %c0_i32_0, %c0_i32_1 : i32, i32, i32
  }
  func.func @transform_4(%arg0: i32) -> (i32, i32, i32) {
    %c0_i32 = arith.constant 0 : i32
    %c0_i32_0 = arith.constant 0 : i32
    %c0_i32_1 = arith.constant 0 : i32
    %c0_i32_2 = arith.constant 0 : i32
    return %c0_i32, %c0_i32_0, %c0_i32_1 : i32, i32, i32
  }
  func.func @transform_5(%arg0: i32) -> (i32, i32) {
    %c0_i32 = arith.constant 0 : i32
    %c0_i32_0 = arith.constant 0 : i32
    %c0_i32_1 = arith.constant 0 : i32
    return %c0_i32, %c0_i32_0 : i32, i32
  }
  func.func @transform_6(%arg0: i32) -> (i32, i32, i32) {
    %c0_i32 = arith.constant 0 : i32
    %c0_i32_0 = arith.constant 0 : i32
    %c0_i32_1 = arith.constant 0 : i32
    return %arg0, %c0_i32, %c0_i32_0 : i32, i32, i32
  }
  func.func @transform_7(%arg0: i32) -> (i32, i32, i32) {
    %c0_i32 = arith.constant 0 : i32
    %c0_i32_0 = arith.constant 0 : i32
    %c0_i32_1 = arith.constant 0 : i32
    return %arg0, %c0_i32, %c0_i32_0 : i32, i32, i32
  }
  func.func @transform_8(%arg0: i32) -> (i32, i32, i32) {
    %c0_i32 = arith.constant 0 : i32
    %c0_i32_0 = arith.constant 0 : i32
    %c0_i32_1 = arith.constant 0 : i32
    return %arg0, %c0_i32, %c0_i32_0 : i32, i32, i32
  }
}

module attributes {stable_mosaic.version = 11 : i64} {
  func.func @_bnrelu_pool_kernel(%arg0: i32, %arg1: memref<1x16x9x2x128xbf16, #tpu.memory_space<vmem>>, %arg2: memref<1x128xf32, #tpu.memory_space<vmem>>, %arg3: memref<1x128xf32, #tpu.memory_space<vmem>>, %arg4: memref<1x8x8x8xf32, #tpu.memory_space<vmem>>) attributes {dimension_semantics = [#tpu.dimension_semantics<parallel>], iteration_bounds = array<i64: 2>, scalar_prefetch = 0 : i64, scratch_operands = 0 : i64, tpu.core_type = #tpu.core_type<tc>, window_params = [{transform_indices = @transform_0, window_bounds = array<i64: 1, 16, 9, 2, 128>}, {pipeline_mode = #tpu.pipeline_mode<synchronous>, transform_indices = @transform_1, window_bounds = array<i64: 1, 128>}, {pipeline_mode = #tpu.pipeline_mode<synchronous>, transform_indices = @transform_2, window_bounds = array<i64: 1, 128>}, {transform_indices = @transform_3, window_bounds = array<i64: 1, 8, 8, 8>}]} {
    %c0 = arith.constant 0 : index
    %c0_0 = arith.constant 0 : index
    %c0_1 = arith.constant 0 : index
    %c0_2 = arith.constant 0 : index
    %c0_3 = arith.constant 0 : index
    %0 = vector.load %arg1[%c0, %c0_0, %c0_1, %c0_2, %c0_3] : memref<1x16x9x2x128xbf16, #tpu.memory_space<vmem>>, vector<1x16x9x2x128xbf16>
    %1 = vector.shape_cast %0 : vector<1x16x9x2x128xbf16> to vector<16x9x2x128xbf16>
    %2 = arith.extf %1 : vector<16x9x2x128xbf16> to vector<16x9x2x128xf32>
    %c0_4 = arith.constant 0 : index
    %c0_5 = arith.constant 0 : index
    %3 = vector.load %arg2[%c0_4, %c0_5] : memref<1x128xf32, #tpu.memory_space<vmem>>, vector<1x128xf32>
    %4 = vector.shape_cast %3 : vector<1x128xf32> to vector<1x1x1x128xf32>
    %5 = vector.broadcast %4 : vector<1x1x1x128xf32> to vector<16x9x2x128xf32>
    %6 = arith.mulf %2, %5 : vector<16x9x2x128xf32>
    %c0_6 = arith.constant 0 : index
    %c0_7 = arith.constant 0 : index
    %7 = vector.load %arg3[%c0_6, %c0_7] : memref<1x128xf32, #tpu.memory_space<vmem>>, vector<1x128xf32>
    %8 = vector.shape_cast %7 : vector<1x128xf32> to vector<1x1x1x128xf32>
    %9 = vector.broadcast %8 : vector<1x1x1x128xf32> to vector<16x9x2x128xf32>
    %10 = arith.addf %6, %9 : vector<16x9x2x128xf32>
    %cst = arith.constant 0.000000e+00 : f32
    %11 = vector.broadcast %cst : f32 to vector<16x9x2x128xf32>
    %12 = arith.maximumf %10, %11 : vector<16x9x2x128xf32>
    %13 = vector.shape_cast %12 : vector<16x9x2x128xf32> to vector<8x2x9x2x128xf32>
    %14 = vector.extract_strided_slice %13 {offsets = [0, 0, 0, 0, 0], sizes = [8, 2, 9, 1, 128], strides = [1, 1, 1, 1, 1]} : vector<8x2x9x2x128xf32> to vector<8x2x9x1x128xf32>
    %15 = vector.shape_cast %14 : vector<8x2x9x1x128xf32> to vector<8x2x9x128xf32>
    %16 = vector.extract_strided_slice %13 {offsets = [0, 0, 0, 1, 0], sizes = [8, 2, 9, 1, 128], strides = [1, 1, 1, 1, 1]} : vector<8x2x9x2x128xf32> to vector<8x2x9x1x128xf32>
    %17 = vector.shape_cast %16 : vector<8x2x9x1x128xf32> to vector<8x2x9x128xf32>
    %18 = arith.maximumf %15, %17 : vector<8x2x9x128xf32>
    %19 = vector.extract_strided_slice %18 {offsets = [0, 0, 0, 0], sizes = [8, 1, 9, 128], strides = [1, 1, 1, 1]} : vector<8x2x9x128xf32> to vector<8x1x9x128xf32>
    %20 = vector.shape_cast %19 : vector<8x1x9x128xf32> to vector<8x9x128xf32>
    %21 = vector.extract_strided_slice %18 {offsets = [0, 1, 0, 0], sizes = [8, 1, 9, 128], strides = [1, 1, 1, 1]} : vector<8x2x9x128xf32> to vector<8x1x9x128xf32>
    %22 = vector.shape_cast %21 : vector<8x1x9x128xf32> to vector<8x9x128xf32>
    %23 = arith.maximumf %20, %22 : vector<8x9x128xf32>
    %24 = vector.extract_strided_slice %23 {offsets = [0, 0, 0], sizes = [8, 8, 8], strides = [1, 1, 1]} : vector<8x9x128xf32> to vector<8x8x8xf32>
    %c0_8 = arith.constant 0 : index
    %c0_9 = arith.constant 0 : index
    %c0_10 = arith.constant 0 : index
    %c0_11 = arith.constant 0 : index
    %25 = vector.load %arg4[%c0_8, %c0_9, %c0_10, %c0_11] : memref<1x8x8x8xf32, #tpu.memory_space<vmem>>, vector<1x8x8x8xf32>
    %26 = vector.shape_cast %25 : vector<1x8x8x8xf32> to vector<8x8x8xf32>
    %27 = vector.shape_cast %24 : vector<8x8x8xf32> to vector<1x8x8x8xf32>
    tpu.vector_store %arg4[%c0_8, %c0_9, %c0_10, %c0_11], %27 {strides = array<i32>} : memref<1x8x8x8xf32, #tpu.memory_space<vmem>>, vector<1x8x8x8xf32>,
    return
  }
  func.func @transform_0(%arg0: i32) -> (i32, i32, i32, i32, i32) {
    %c0_i32 = arith.constant 0 : i32
    %c0_i32_0 = arith.constant 0 : i32
    %c0_i32_1 = arith.constant 0 : i32
    %c0_i32_2 = arith.constant 0 : i32
    %c0_i32_3 = arith.constant 0 : i32
    return %arg0, %c0_i32, %c0_i32_0, %c0_i32_1, %c0_i32_2 : i32, i32, i32, i32, i32
  }
  func.func @transform_1(%arg0: i32) -> (i32, i32) {
    %c0_i32 = arith.constant 0 : i32
    %c0_i32_0 = arith.constant 0 : i32
    %c0_i32_1 = arith.constant 0 : i32
    return %c0_i32, %c0_i32_0 : i32, i32
  }
  func.func @transform_2(%arg0: i32) -> (i32, i32) {
    %c0_i32 = arith.constant 0 : i32
    %c0_i32_0 = arith.constant 0 : i32
    %c0_i32_1 = arith.constant 0 : i32
    return %c0_i32, %c0_i32_0 : i32, i32
  }
  func.func @transform_3(%arg0: i32) -> (i32, i32, i32, i32) {
    %c0_i32 = arith.constant 0 : i32
    %c0_i32_0 = arith.constant 0 : i32
    %c0_i32_1 = arith.constant 0 : i32
    %c0_i32_2 = arith.constant 0 : i32
    return %arg0, %c0_i32, %c0_i32_0, %c0_i32_1 : i32, i32, i32, i32
  }
}

</mosaic_0001>

<bundles_post_ra>
// kernel: encoder_block_v1_forward.3
= control target key start
LH: loop header
LB: loop body
LE: loop exit
PB: predicated region body
PF: predicated region fallthrough
CT: control target
= control target key end

     0   :  { %s1391_s18 = smov 0   ;;  %s1775_s0 = inlined_call_operand.vmem [shape: bf16[2,288,40], index: 0, kind: input, shape index: {}]   ;;  %s1776_s1 = inlined_call_operand.vmem [shape: bf16[40,128], index: 1, kind: input, shape index: {}]   ;;  %s1777_s2 = inlined_call_operand.vmem [shape: f32[288,1], index: 2, kind: input, shape index: {}]   ;;  %s1778_s3 = inlined_call_operand.vmem [shape: bf16[2,288,128], index: 3, kind: output, shape index: {0}]   ;;  %s1779_s4 = inlined_call_operand.vmem [shape: f32[2,1,128], index: 4, kind: output, shape index: {1}]   ;;  %s1780_s5 = inlined_call_operand.vmem [shape: f32[2,1,128], index: 5, kind: output, shape index: {2}]  }
   0x1 LB: > { %s1096_s19 = sadd.s32 4294967295, %s1358_s18   ;;  %p1100_p0 = scmp.ge.s32.totalorder %s1358_s18, 1  ;;  %s1358_s18 = sphi %s1391_s18, %s16_s18  }
   0x2   : > { %p192_p1 = scmp.lt.s32.totalorder %s1358_s18, 3 }
   0x4   : > { %p193_p2 = pnand %p1100_p0, %p192_p1 }
   0x5   : > { %p226_p3 = scmp.lt.s32.totalorder (!%p193_p2), %s1096_s19, 1 }
   0x6   : > { %196 = sbr.rel (%p193_p2) target bundleno = 299 (0x12b), region = 32 }
   0xb   : > { %v623_v0 = vld [vmem:[%s1777_s2 + $0x20] sm:$0xff]  ;;  %v621_v1 = vld [vmem:[%s1777_s2 + $0x10] sm:$0xff]  ;;  %v1360_v3 = vmov 0   ;;  %vm444_vm0 = vcmask 1043456   ;;  %s1782_s19 = smov (!%p226_p3, %s1096_s19), 1  ;;  %v624_v8 = vld [vmem:[%s1777_s2 + $0x28] sm:$0xff] }
   0xc   : > { %v619_v2 = vld [vmem:[%s1777_s2] sm:$0xff]  ;;  %1351 = vset.pattern.permute.xlu2 %v1360_v3  ;;  %1350 = vset.pattern.permute.xlu1 %v1360_v3  ;;  %v283_v4 = vld [vmem:[%s1776_s1 + $0x10] sm:$0xf]  ;;  %v622_v9 = vld [vmem:[%s1777_s2 + $0x18] sm:$0xff]  ;;  %s1339_s11 = smul.u32 144, %s1782_s19  ;;  %vm389_vm1 = vcmask 326656   ;;  %s238_s17 = scalar_lea.vmem %s1779_s4, %s1782_s19 }
   0xd   : > { %1349 = vset.pattern.permute.xlu0 %v1360_v3  ;;  %677 = vperm.xlu2 %1351, %v623_v0   ;;  %v383_v5 = vunpack.c.l.b16 %v283_v4  ;;  %v620_v10 = vld [vmem:[%s1777_s2 + $0x8] sm:$0xff]  ;;  %v1221_v12 = vld [vmem:[%s1776_s1] sm:$0xff]  ;;  %v626_v18 = vld [vmem:[%s1777_s2 + $0x38] sm:$0xff]  ;;  %s241_s22 = scalar_lea.vmem %s1780_s5, %s1782_s19 }
   0xe   : > { %667 = vperm.xlu1 %1350, %v621_v1   ;;  %657 = vperm.xlu0 %1349, %v619_v2   ;;  %v1222_v11 = vld [vmem:[%s1776_s1 + $0x8] sm:$0xff]  ;;  %s1434_s16 = scalar_lea.vmem %s1775_s0, %s1339_s11  ;;  %v627_v15 = vld [vmem:[%s1777_s2 + $0x40] sm:$0xff]  ;;  %v625_v19 = vld [vmem:[%s1777_s2 + $0x30] sm:$0xff]  ;;  %s1579_s14 = scalar_lea.vmem %s1778_s3, %s1339_s11 }
   0xf   : > { %v386_v6 = vpack.c.b16 %v383_v5, %v383_v5  ;;  %v1203_v13 = vld [vmem:[%s1434_s16] sm:$0xff]  ;;  %v1208_v14 = vld [vmem:[%s1434_s16 + $0x28] sm:$0xff]  ;;  %v1213_v16 = vld [vmem:[%s1434_s16 + $0x50] sm:$0xff] }
  0x10   : > { %v1218_v17 = vld [vmem:[%s1434_s16 + $0x78] sm:$0xff]  ;;  %v629_v21 = vld [vmem:[%s1777_s2 + $0x50] sm:$0xff]  ;;  %v628_v22 = vld [vmem:[%s1777_s2 + $0x48] sm:$0xff] }
  0x11   : > { %v446_v7 = vsel %vm444_vm0, %v386_v6, 0  ;;  %v630_v20 = vld [vmem:[%s1777_s2 + $0x58] sm:$0xff]  ;;  %v1204_v23 = vld [vmem:[%s1434_s16 + $0x8] sm:$0xff]  ;;  %v1209_v24 = vld [vmem:[%s1434_s16 + $0x30] sm:$0xff] }
  0x12   : > { %453 = vmatpush.bf16.msra.mxu0 %v446_v7  ;;  %1330 = vmatpush.bf16.msra.mxu1 %v446_v7  ;;  %v633_v25 = vld [vmem:[%s1777_s2 + $0x70] sm:$0xff]  ;;  %v1214_v26 = vld [vmem:[%s1434_s16 + $0x58] sm:$0xff]  ;;  %v1219_v27 = vld [vmem:[%s1434_s16 + $0x80] sm:$0xff] }
  0x13   : > { %1331 = vmatpush.bf16.msra.mxu2 %v446_v7  ;;  %1332 = vmatpush.bf16.msra.mxu3 %v446_v7  ;;  %v632_v28 = vld [vmem:[%s1777_s2 + $0x68] sm:$0xff]  ;;  %v631_v29 = vld [vmem:[%s1777_s2 + $0x60] sm:$0xff]  ;;  %v634_v32 = vld [vmem:[%s1777_s2 + $0x78] sm:$0xff] }
  0x14   : > { %v636_v30 = vld [vmem:[%s1777_s2 + $0x88] sm:$0xff]  ;;  %v635_v31 = vld [vmem:[%s1777_s2 + $0x80] sm:$0xff]  ;;  %v1205_v33 = vld [vmem:[%s1434_s16 + $0x10] sm:$0xff] }
  0x15   : > { %682 = vperm.xlu2 %1351, %v624_v8   ;;  %v1210_v34 = vld [vmem:[%s1434_s16 + $0x38] sm:$0xff]  ;;  %v639_v35 = vld [vmem:[%s1777_s2 + $0xa0] sm:$0xff]  ;;  %v1220_v37 = vld [vmem:[%s1434_s16 + $0x88] sm:$0xff] }
  0x16   : > { %672 = vperm.xlu1 %1350, %v622_v9   ;;  %662 = vperm.xlu0 %1349, %v620_v10   ;;  %v1215_v36 = vld [vmem:[%s1434_s16 + $0x60] sm:$0xff]  ;;  %v638_v38 = vld [vmem:[%s1777_s2 + $0x98] sm:$0xff]  ;;  %v637_v39 = vld [vmem:[%s1777_s2 + $0x90] sm:$0xff] }
  0x17   : > { %454 = vmatpush.bf16.msra.mxu0 %v1222_v11  ;;  %1333 = vmatpush.bf16.msra.mxu1 %v1222_v11  ;;  %v642_v40 = vld [vmem:[%s1777_s2 + $0xb8] sm:$0xff]  ;;  %v641_v41 = vld [vmem:[%s1777_s2 + $0xb0] sm:$0xff]  ;;  %v640_v42 = vld [vmem:[%s1777_s2 + $0xa8] sm:$0xff] }
  0x18   : > { %1334 = vmatpush.bf16.msra.mxu2 %v1222_v11  ;;  %1335 = vmatpush.bf16.msra.mxu3 %v1222_v11  ;;  %v1206_v43 = vld [vmem:[%s1434_s16 + $0x18] sm:$0xff]  ;;  %v1211_v44 = vld [vmem:[%s1434_s16 + $0x40] sm:$0xff]  ;;  %v645_v45 = vld [vmem:[%s1777_s2 + $0xd0] sm:$0xff] }
  0x19   : > { %v1216_v46 = vld [vmem:[%s1434_s16 + $0x68] sm:$0xff]  ;;  %v643_v48 = vld [vmem:[%s1777_s2 + $0xc0] sm:$0xff]  ;;  %v646_v51 = vld [vmem:[%s1777_s2 + $0xd8] sm:$0xff] }
  0x1a   : > { %v644_v47 = vld [vmem:[%s1777_s2 + $0xc8] sm:$0xff]  ;;  %v647_v50 = vld [vmem:[%s1777_s2 + $0xe0] sm:$0xff]  ;;  %v1217_v55 = vld [vmem:[%s1434_s16 + $0x70] sm:$0xff] }
  0x1b   : > { %455 = vmatpush.bf16.msra.mxu0 %v1221_v12  ;;  %1336 = vmatpush.bf16.msra.mxu1 %v1221_v12  ;;  %v648_v49 = vld [vmem:[%s1777_s2 + $0xe8] sm:$0xff]  ;;  %v1207_v52 = vld [vmem:[%s1434_s16 + $0x20] sm:$0xff]  ;;  %v650_v56 = vld [vmem:[%s1777_s2 + $0xf8] sm:$0xff] }
  0x1c   : > { %1337 = vmatpush.bf16.msra.mxu2 %v1221_v12  ;;  %1338 = vmatpush.bf16.msra.mxu3 %v1221_v12  ;;  %v1212_v53 = vld [vmem:[%s1434_s16 + $0x48] sm:$0xff]  ;;  %v651_v54 = vld [vmem:[%s1777_s2 + $0x100] sm:$0xff]  ;;  %v649_v57 = vld [vmem:[%s1777_s2 + $0xf0] sm:$0xff] }
  0x1d   : > { %697 = vperm.xlu2 %1351, %v627_v15   ;;  %v654_v58 = vld [vmem:[%s1777_s2 + $0x118] sm:$0xff]  ;;  %v653_v59 = vld [vmem:[%s1777_s2 + $0x110] sm:$0xff]  ;;  %v652_v60 = vld [vmem:[%s1777_s2 + $0x108] sm:$0xff] }
  0x1e   : > { %1183 = vmatmul.msk.bf16.vlgmr.msra.gmra.mxu0 %vm389_vm1, %v1203_v13  ;;  %1188 = vmatmul.msk.bf16.vlgmr.msra.gmra.mxu1 %vm389_vm1, %v1208_v14 }
  0x1f   : > { %1193 = vmatmul.msk.bf16.vlgmr.msra.gmra.mxu2 %vm389_vm1, %v1213_v16  ;;  %1198 = vmatmul.msk.bf16.vlgmr.msra.gmra.mxu3 %vm389_vm1, %v1218_v17 }
  0x20   : > { %692 = vperm.xlu1 %1350, %v626_v18   ;;  %687 = vperm.xlu0 %1349, %v625_v19  }
  0x25   : > { %712 = vperm.xlu2 %1351, %v630_v20  }
  0x28   : > { %707 = vperm.xlu1 %1350, %v629_v21   ;;  %702 = vperm.xlu0 %1349, %v628_v22  }
  0x2d   : > { %727 = vperm.xlu2 %1351, %v633_v25  }
  0x2e   : > { %1184 = vmatmul.msk.bf16.gmra.mxu0 %vm389_vm1, %v1204_v23  ;;  %1189 = vmatmul.msk.bf16.gmra.mxu1 %vm389_vm1, %v1209_v24 }
  0x2f   : > { %1194 = vmatmul.msk.bf16.gmra.mxu2 %vm389_vm1, %v1214_v26  ;;  %1199 = vmatmul.msk.bf16.gmra.mxu3 %vm389_vm1, %v1219_v27 }
  0x30   : > { %722 = vperm.xlu1 %1350, %v632_v28   ;;  %717 = vperm.xlu0 %1349, %v631_v29  }
  0x35   : > { %742 = vperm.xlu2 %1351, %v636_v30  }
  0x38   : > { %737 = vperm.xlu1 %1350, %v635_v31   ;;  %732 = vperm.xlu0 %1349, %v634_v32  }
  0x3d   : > { %757 = vperm.xlu2 %1351, %v639_v35  }
  0x3e   : > { %1185 = vmatmul.msk.bf16.gmra.mxu0 %vm389_vm1, %v1205_v33  ;;  %1190 = vmatmul.msk.bf16.gmra.mxu1 %vm389_vm1, %v1210_v34 }
  0x3f   : > { %1195 = vmatmul.msk.bf16.gmra.mxu2 %vm389_vm1, %v1215_v36  ;;  %1200 = vmatmul.msk.bf16.gmra.mxu3 %vm389_vm1, %v1220_v37 }
  0x40   : > { %752 = vperm.xlu1 %1350, %v638_v38   ;;  %747 = vperm.xlu0 %1349, %v637_v39  }
  0x45   : > { %772 = vperm.xlu2 %1351, %v642_v40  }
  0x48   : > { %767 = vperm.xlu1 %1350, %v641_v41   ;;  %762 = vperm.xlu0 %1349, %v640_v42  }
  0x4d   : > { %787 = vperm.xlu2 %1351, %v645_v45  }
  0x4e   : > { %1186 = vmatmul.msk.bf16.gmra.mxu0 %vm389_vm1, %v1206_v43  ;;  %1191 = vmatmul.msk.bf16.gmra.mxu1 %vm389_vm1, %v1211_v44 }
  0x4f   : > { %1196 = vmatmul.msk.bf16.gmra.mxu2 %vm389_vm1, %v1216_v46 }
  0x50   : > { %782 = vperm.xlu1 %1350, %v644_v47   ;;  %777 = vperm.xlu0 %1349, %v643_v48  }
  0x55   : > { %802 = vperm.xlu2 %1351, %v648_v49  }
  0x58   : > { %797 = vperm.xlu1 %1350, %v647_v50   ;;  %792 = vperm.xlu0 %1349, %v646_v51  }
  0x5d   : > { %817 = vperm.xlu2 %1351, %v651_v54  }
  0x5e   : > { %1187 = vmatmul.msk.bf16.gmra.mxu0 %vm389_vm1, %v1207_v52  ;;  %1192 = vmatmul.msk.bf16.gmra.mxu1 %vm389_vm1, %v1212_v53 }
  0x5f   : > { %1197 = vmatmul.msk.bf16.gmra.mxu2 %vm389_vm1, %v1217_v55 }
  0x60   : > { %812 = vperm.xlu1 %1350, %v650_v56   ;;  %807 = vperm.xlu0 %1349, %v649_v57  }
  0x65   : > { %832 = vperm.xlu2 %1351, %v654_v58  }
  0x67   : > { %v1589_v7 = vpop.permute.xlu2 %677 }
  0x68   : > { %827 = vperm.xlu1 %1350, %v653_v59   ;;  %822 = vperm.xlu0 %1349, %v652_v60  }
  0x6f   : > { %v683_v16 = vpop.permute.xlu2 %682 }
  0x77   : > { %v1617_v25 = vpop.permute.xlu2 %697 }
  0x7f   : > { %v1641_v38 = vpop.permute.xlu2 %712 }
  0x80   : > { %v1566_v63 = vpop.permute.xlu1 %667  ;;  %v1568_v0 = vpop.permute.xlu0 %657 }
  0x87   : > { %v1662_v49 = vpop.permute.xlu2 %727 }
  0x88   : > { %v673_v8 = vpop.permute.xlu1 %672  ;;  %v663_v9 = vpop.permute.xlu0 %662 }
  0x92   : > { %v688_v21 = vpop.permute.xlu0 %687  ;;  %v1613_v24 = vpop.permute.xlu1 %692 }
  0x9a   : > { %v1630_v32 = vpop.permute.xlu0 %702  ;;  %v1633_v33 = vpop.permute.xlu1 %707 }
  0x9b   : > { %v1562_v61 = vpop.f32.mrf.mxu0  ;;  %v1564_v62 = vpop.f32.mrf.mxu1 }
  0x9c   : > { %v835_v51 = vmul.f32 %v1568_v0, %v1562_v61 }
  0x9e   : > { %v913_v60 = vmul.f32 %v835_v51, %v1562_v61 }
  0xa2   : > { %v1570_v1 = vpop.f32.mrf.mxu2  ;;  %v1572_v2 = vpop.f32.mrf.mxu3 }
  0xa3   : > { %v1581_v3 = vpop.f32.mrf.mxu0  ;;  %v1583_v4 = vpop.f32.mrf.mxu1 }
  0xa4   : > { %v1226_v5 = vpack.c.bf16 %v1581_v3, %v1562_v61  ;;  %v1251_v6 = vpack.c.bf16 %v1583_v4, %v1564_v62  ;;  %v1647_v41 = vpop.permute.xlu0 %717  ;;  %v1649_v42 = vpop.permute.xlu1 %722  ;;  %v836_v50 = vmul.f32 %v663_v9, %v1581_v3 }
  0xa6   : > { %1227 = vst [vmem:[%s1579_s14] sm:$0xff] %v1226_v5   ;;  %v914_v55 = vmul.f32 %v836_v50, %v1581_v3  ;;  %v871_v9 = vadd.f32 %v836_v50, %v835_v51 }
  0xa7   : > { %1317 = vst [vmem:[%s1579_s14 + $0x28] sm:$0xff] %v1251_v6  }
  0xaa   : > { %v1593_v10 = vpop.f32.mrf.mxu2  ;;  %v1595_v11 = vpop.f32.mrf.mxu3 }
  0xab   : > { %v1276_v12 = vpack.c.bf16 %v1593_v10, %v1570_v1  ;;  %v1301_v13 = vpack.c.bf16 %v1595_v11, %v1572_v2  ;;  %v462_v14 = vpop.f32.mrf.mxu0  ;;  %v1601_v15 = vpop.f32.mrf.mxu1 }
  0xac   : > { %v837_v52 = vmul.f32 %v1566_v63, %v462_v14  ;;  %v1669_v53 = vpop.permute.xlu0 %732  ;;  %v1677_v5 = vpop.permute.xlu1 %737 }
  0xad   : > { %1322 = vst [vmem:[%s1579_s14 + $0x50] sm:$0xff] %v1276_v12   ;;  %v949_v12 = vadd.f32 %v914_v55, %v913_v60 }
  0xae   : > { %1327 = vst [vmem:[%s1579_s14 + $0x78] sm:$0xff] %v1301_v13   ;;  %v915_v6 = vmul.f32 %v837_v52, %v462_v14 }
  0xb2   : > { %v1605_v17 = vpop.f32.mrf.mxu2  ;;  %v1607_v18 = vpop.f32.mrf.mxu3 }
  0xb3   : > { %v464_v19 = vpop.f32.mrf.mxu0  ;;  %v1609_v20 = vpop.f32.mrf.mxu1 }
  0xb4   : > { %v1231_v22 = vpack.c.bf16 %v464_v19, %v462_v14  ;;  %v1256_v23 = vpack.c.bf16 %v1609_v20, %v1601_v15  ;;  %v838_v56 = vmul.f32 %v673_v8, %v464_v19  ;;  %v1684_v8 = vpop.permute.xlu2 %742  ;;  %v748_v50 = vpop.permute.xlu0 %747 }
  0xb5   : > { %v753_v55 = vpop.permute.xlu1 %752 }
  0xb6   : > { %1313 = vst [vmem:[%s1579_s14 + $0x8] sm:$0xff] %v1231_v22   ;;  %v916_v13 = vmul.f32 %v838_v56, %v464_v19  ;;  %v872_v22 = vadd.f32 %v871_v9, %v837_v52 }
  0xb7   : > { %1318 = vst [vmem:[%s1579_s14 + $0x30] sm:$0xff] %v1256_v23   ;;  %v950_v23 = vadd.f32 %v949_v12, %v915_v6 }
  0xba   : > { %v1619_v26 = vpop.f32.mrf.mxu2  ;;  %v1621_v27 = vpop.f32.mrf.mxu3 }
  0xbb   : > { %v1281_v28 = vpack.c.bf16 %v1619_v26, %v1605_v17  ;;  %v1306_v29 = vpack.c.bf16 %v1621_v27, %v1607_v18  ;;  %v467_v30 = vpop.f32.mrf.mxu0  ;;  %v1627_v31 = vpop.f32.mrf.mxu1 }
  0xbc   : > { %v839_v0 = vmul.f32 %v1589_v7, %v467_v30  ;;  %v951_v7 = vadd.f32 %v950_v23, %v916_v13  ;;  %v758_v60 = vpop.permute.xlu2 %757  ;;  %v846_v23 = vmul.f32 %v1641_v38, %v1583_v4  ;;  %v848_v38 = vmul.f32 %v1649_v42, %v1609_v20 }
  0xbd   : > { %1323 = vst [vmem:[%s1579_s14 + $0x58] sm:$0xff] %v1281_v28  }
  0xbe   : > { %1328 = vst [vmem:[%s1579_s14 + $0x80] sm:$0xff] %v1306_v29   ;;  %v917_v61 = vmul.f32 %v839_v0, %v467_v30  ;;  %v873_v29 = vadd.f32 %v872_v22, %v838_v56 }
  0xc0   : > { %v952_v51 = vadd.f32 %v951_v7, %v917_v61  ;;  %v763_v7 = vpop.permute.xlu0 %762 }
  0xc2   : > { %v1635_v34 = vpop.f32.mrf.mxu2  ;;  %v1637_v35 = vpop.f32.mrf.mxu3 }
  0xc3   : > { %v469_v36 = vpop.f32.mrf.mxu0  ;;  %v1639_v37 = vpop.f32.mrf.mxu1 }
  0xc4   : > { %v1236_v39 = vpack.c.bf16 %v469_v36, %v467_v30  ;;  %v1261_v40 = vpack.c.bf16 %v1639_v37, %v1627_v31  ;;  %v840_v3 = vmul.f32 %v683_v16, %v469_v36  ;;  %v850_v42 = vmul.f32 %v1669_v53, %v1639_v37 }
  0xc6   : > { %1314 = vst [vmem:[%s1579_s14 + $0x10] sm:$0xff] %v1236_v39   ;;  %v918_v39 = vmul.f32 %v840_v3, %v469_v36 }
  0xc7   : > { %1319 = vst [vmem:[%s1579_s14 + $0x38] sm:$0xff] %v1261_v40  }
  0xc8   : > { %v953_v56 = vadd.f32 %v952_v51, %v918_v39  ;;  %v847_v39 = vmul.f32 %v1647_v41, %v1601_v15  ;;  %v849_v41 = vmul.f32 %v1662_v49, %v1627_v31  ;;  %v928_v49 = vmul.f32 %v850_v42, %v1639_v37 }
  0xc9   : > { %v855_v37 = vmul.f32 %v758_v60, %v1570_v1 }
  0xca   : > { %v1651_v43 = vpop.f32.mrf.mxu2  ;;  %v1653_v44 = vpop.f32.mrf.mxu3 }
  0xcb   : > { %v1286_v45 = vpack.c.bf16 %v1651_v43, %v1635_v34  ;;  %v1311_v46 = vpack.c.bf16 %v1653_v44, %v1637_v35  ;;  %v472_v47 = vpop.f32.mrf.mxu0  ;;  %v1659_v48 = vpop.f32.mrf.mxu1 }
  0xcc   : > { %v841_v28 = vmul.f32 %v688_v21, %v472_v47 }
  0xcd   : > { %1324 = vst [vmem:[%s1579_s14 + $0x60] sm:$0xff] %v1286_v45  }
  0xce   : > { %1329 = vst [vmem:[%s1579_s14 + $0x88] sm:$0xff] %v1311_v46   ;;  %v874_v46 = vadd.f32 %v873_v29, %v839_v0  ;;  %v919_v52 = vmul.f32 %v841_v28, %v472_v47  ;;  %v845_v0 = vmul.f32 %v1633_v33, %v1564_v62 }
  0xd0   : > { %v875_v30 = vadd.f32 %v874_v46, %v840_v3  ;;  %v923_v33 = vmul.f32 %v845_v0, %v1564_v62  ;;  %v925_v62 = vmul.f32 %v847_v39, %v1601_v15 }
  0xd2   : > { %v1671_v54 = vpop.f32.mrf.mxu2  ;;  %v876_v36 = vadd.f32 %v875_v30, %v841_v28 }
  0xd3   : > { %v474_v57 = vpop.f32.mrf.mxu0  ;;  %v1674_v58 = vpop.f32.mrf.mxu1 }
  0xd4   : > { %v1241_v59 = vpack.c.bf16 %v474_v57, %v472_v47  ;;  %v1266_v63 = vpack.c.bf16 %v1674_v58, %v1659_v48  ;;  %v842_v40 = vmul.f32 %v1613_v24, %v474_v57  ;;  %v954_v24 = vadd.f32 %v953_v56, %v919_v52 }
  0xd6   : > { %1315 = vst [vmem:[%s1579_s14 + $0x18] sm:$0xff] %v1241_v59   ;;  %v920_v59 = vmul.f32 %v842_v40, %v474_v57  ;;  %v877_v6 = vadd.f32 %v876_v36, %v842_v40 }
  0xd7   : > { %1320 = vst [vmem:[%s1579_s14 + $0x40] sm:$0xff] %v1266_v63  }
  0xd8   : > { %v955_v47 = vadd.f32 %v954_v24, %v920_v59  ;;  %v773_v59 = vpop.permute.xlu2 %772 }
  0xd9   : > { %v858_v60 = vmul.f32 %v773_v59, %v1619_v26 }
  0xda   : > { %v1686_v14 = vpop.f32.mrf.mxu2 }
  0xdb   : > { %v1291_v45 = vpack.c.bf16 %v1686_v14, %v1671_v54  ;;  %v477_v19 = vpop.f32.mrf.mxu0  ;;  %v1691_v16 = vpop.f32.mrf.mxu1 }
  0xdc   : > { %v843_v21 = vmul.f32 %v1617_v25, %v477_v19 }
  0xdd   : > { %1325 = vst [vmem:[%s1579_s14 + $0x68] sm:$0xff] %v1291_v45  }
  0xde   : > { %v921_v63 = vmul.f32 %v843_v21, %v477_v19  ;;  %v878_v3 = vadd.f32 %v877_v6, %v843_v21  ;;  %v927_v6 = vmul.f32 %v849_v41, %v1627_v31 }
  0xe0   : > { %v956_v61 = vadd.f32 %v955_v47, %v921_v63  ;;  %v851_v63 = vmul.f32 %v1677_v5, %v1659_v48  ;;  %v778_v47 = vpop.permute.xlu0 %777 }
  0xe2   : > { %v1695_v9 = vpop.f32.mrf.mxu2  ;;  %v929_v53 = vmul.f32 %v851_v63, %v1659_v48 }
  0xe3   : > { %v479_v12 = vpop.f32.mrf.mxu0  ;;  %v504_v13 = vpop.f32.mrf.mxu1 }
  0xe4   : > { %v1246_v25 = vpack.c.bf16 %v479_v12, %v477_v19  ;;  %v844_v22 = vmul.f32 %v1630_v32, %v479_v12  ;;  %v1271_v57 = vpack.c.bf16 %v504_v13, %v1691_v16  ;;  %v768_v32 = vpop.permute.xlu1 %767  ;;  %v924_v19 = vmul.f32 %v846_v23, %v1583_v4 }
  0xe5   : > { %v926_v4 = vmul.f32 %v848_v38, %v1609_v20  ;;  %v854_v5 = vmul.f32 %v753_v55, %v504_v13 }
  0xe6   : > { %1316 = vst [vmem:[%s1579_s14 + $0x20] sm:$0xff] %v1246_v25   ;;  %v879_v28 = vadd.f32 %v878_v3, %v844_v22  ;;  %v922_v29 = vmul.f32 %v844_v22, %v479_v12  ;;  %v852_v12 = vmul.f32 %v1684_v8, %v1674_v58  ;;  %v853_v22 = vmul.f32 %v748_v50, %v1691_v16 }
  0xe7   : > { %1321 = vst [vmem:[%s1579_s14 + $0x48] sm:$0xff] %v1271_v57   ;;  %v932_v48 = vmul.f32 %v854_v5, %v504_v13 }
  0xe8   : > { %v880_v40 = vadd.f32 %v879_v28, %v845_v0  ;;  %v957_v45 = vadd.f32 %v956_v61, %v922_v29  ;;  %v788_v29 = vpop.permute.xlu2 %787  ;;  %v793_v50 = vpop.permute.xlu0 %792 }
  0xea   : > { %v881_v46 = vadd.f32 %v880_v40, %v846_v23  ;;  %v958_v51 = vadd.f32 %v957_v45, %v923_v33  ;;  %v1711_v52 = vpop.f32.mrf.mxu2  ;;  %v930_v23 = vmul.f32 %v852_v12, %v1674_v58  ;;  %v931_v33 = vmul.f32 %v853_v22, %v1691_v16 }
  0xeb   : > { %v1296_v30 = vpack.c.bf16 %v1711_v52, %v1695_v9  ;;  %v856_v40 = vmul.f32 %v763_v7, %v1593_v10  ;;  %v857_v58 = vmul.f32 %v768_v32, %v1605_v17  ;;  %v859_v7 = vmul.f32 %v778_v47, %v1635_v34 }
  0xec   : > { %v882_v21 = vadd.f32 %v881_v46, %v847_v39  ;;  %v959_v56 = vadd.f32 %v958_v51, %v924_v19  ;;  %v783_v25 = vpop.permute.xlu1 %782 }
  0xed   : > { %1326 = vst [vmem:[%s1579_s14 + $0x70] sm:$0xff] %v1296_v30   ;;  %v934_v30 = vmul.f32 %v856_v40, %v1593_v10  ;;  %v860_v32 = vmul.f32 %v783_v25, %v1651_v43  ;;  %v861_v10 = vmul.f32 %v788_v29, %v1671_v54 }
  0xee   : > { %v883_v36 = vadd.f32 %v882_v21, %v848_v38  ;;  %v960_v24 = vadd.f32 %v959_v56, %v925_v62  ;;  %v933_v38 = vmul.f32 %v855_v37, %v1570_v1  ;;  %v936_v1 = vmul.f32 %v858_v60, %v1619_v26 }
  0xef   : > { %v939_v26 = vmul.f32 %v861_v10, %v1671_v54 }
  0xf0   : > { %v961_v15 = vadd.f32 %v960_v24, %v926_v4  ;;  %v884_v0 = vadd.f32 %v883_v36, %v849_v41  ;;  %v935_v41 = vmul.f32 %v857_v58, %v1605_v17  ;;  %v803_v56 = vpop.permute.xlu2 %802  ;;  %v937_v36 = vmul.f32 %v859_v7, %v1635_v34 }
  0xf1   : > { %v938_v17 = vmul.f32 %v860_v32, %v1651_v43 }
  0xf2   : > { %v885_v3 = vadd.f32 %v884_v0, %v850_v42  ;;  %v962_v20 = vadd.f32 %v961_v15, %v927_v6  ;;  %v808_v6 = vpop.permute.xlu0 %807 }
  0xf3   : > { %v865_v43 = vmul.f32 %v808_v6, %v1572_v2 }
  0xf4   : > { %v886_v57 = vadd.f32 %v885_v3, %v851_v63  ;;  %v963_v31 = vadd.f32 %v962_v20, %v928_v49  ;;  %v798_v51 = vpop.permute.xlu1 %797  ;;  %v862_v63 = vmul.f32 %v793_v50, %v1686_v14  ;;  %v864_v20 = vmul.f32 %v803_v56, %v1711_v52 }
  0xf5   : > { %v863_v49 = vmul.f32 %v798_v51, %v1695_v9 }
  0xf6   : > { %v887_v61 = vadd.f32 %v886_v57, %v852_v12  ;;  %v964_v28 = vadd.f32 %v963_v31, %v929_v53  ;;  %v940_v34 = vmul.f32 %v862_v63, %v1686_v14 }
  0xf7   : > { %v941_v57 = vmul.f32 %v863_v49, %v1695_v9 }
  0xf8   : > { %v888_v8 = vadd.f32 %v887_v61, %v853_v22  ;;  %v965_v39 = vadd.f32 %v964_v28, %v930_v23  ;;  %v818_v22 = vpop.permute.xlu2 %817  ;;  %v942_v61 = vmul.f32 %v864_v20, %v1711_v52 }
  0xf9   : > { %v867_v14 = vmul.f32 %v818_v22, %v1607_v18 }
  0xfa   : > { %v889_v45 = vadd.f32 %v888_v8, %v854_v5  ;;  %v966_v19 = vadd.f32 %v965_v39, %v931_v33  ;;  %v823_v29 = vpop.permute.xlu0 %822 }
  0xfb   : > { %v868_v9 = vmul.f32 %v823_v29, %v1621_v27 }
  0xfc   : > { %v890_v55 = vadd.f32 %v889_v45, %v855_v37  ;;  %v967_v46 = vadd.f32 %v966_v19, %v932_v48  ;;  %v813_v47 = vpop.permute.xlu1 %812  ;;  %v943_v37 = vmul.f32 %v865_v43, %v1572_v2  ;;  %v945_v19 = vmul.f32 %v867_v14, %v1607_v18 }
  0xfd   : > { %v866_v5 = vmul.f32 %v813_v47, %v1595_v11  ;;  %v946_v2 = vmul.f32 %v868_v9, %v1621_v27 }
  0xfe   : > { %v891_v16 = vadd.f32 %v890_v55, %v856_v40  ;;  %v968_v62 = vadd.f32 %v967_v46, %v933_v38 }
  0xff   : > { %v944_v40 = vmul.f32 %v866_v5, %v1595_v11 }
 0x100   : > { %v892_v13 = vadd.f32 %v891_v16, %v857_v58  ;;  %v969_v21 = vadd.f32 %v968_v62, %v934_v30  ;;  %v833_v58 = vpop.permute.xlu2 %832 }
 0x101   : > { %v870_v55 = vmul.f32 %v833_v58, %v1653_v44 }
 0x102   : > { %v893_v4 = vadd.f32 %v892_v13, %v858_v60  ;;  %v970_v42 = vadd.f32 %v969_v21, %v935_v41 }
 0x103   : > { %v948_v16 = vmul.f32 %v870_v55, %v1653_v44 }
 0x104   : > { %v971_v59 = vadd.f32 %v970_v42, %v936_v1  ;;  %v894_v24 = vadd.f32 %v893_v4, %v859_v7  ;;  %v828_v39 = vpop.permute.xlu1 %827 }
 0x105   : > { %v869_v50 = vmul.f32 %v828_v39, %v1637_v35 }
 0x106   : > { %v895_v15 = vadd.f32 %v894_v24, %v860_v32  ;;  %v972_v0 = vadd.f32 %v971_v59, %v937_v36 }
 0x107   : > { %v947_v30 = vmul.f32 %v869_v50, %v1637_v35 }
 0x108   : > { %v896_v12 = vadd.f32 %v895_v15, %v861_v10  ;;  %v973_v3 = vadd.f32 %v972_v0, %v938_v17 }
 0x10a   : > { %v897_v25 = vadd.f32 %v896_v12, %v862_v63  ;;  %v974_v53 = vadd.f32 %v973_v3, %v939_v26 }
 0x10c   : > { %v898_v31 = vadd.f32 %v897_v25, %v863_v49  ;;  %v975_v23 = vadd.f32 %v974_v53, %v940_v34 }
 0x10e   : > { %v899_v54 = vadd.f32 %v898_v31, %v864_v20  ;;  %v976_v28 = vadd.f32 %v975_v23, %v941_v57 }
 0x110   : > { %v900_v33 = vadd.f32 %v899_v54, %v865_v43  ;;  %v977_v8 = vadd.f32 %v976_v28, %v942_v61 }
 0x112   : > { %v901_v45 = vadd.f32 %v900_v33, %v866_v5  ;;  %v978_v48 = vadd.f32 %v977_v8, %v943_v37 }
 0x114   : > { %v902_v52 = vadd.f32 %v901_v45, %v867_v14  ;;  %v979_v38 = vadd.f32 %v978_v48, %v944_v40 }
 0x116   : > { %v903_v46 = vadd.f32 %v902_v52, %v868_v9  ;;  %v980_v51 = vadd.f32 %v979_v38, %v945_v19 }
 0x118   : > { %v904_v11 = vadd.f32 %v903_v46, %v869_v50  ;;  %v981_v60 = vadd.f32 %v980_v51, %v946_v2 }
 0x11a   : > { %v905_v18 = vadd.f32 %v904_v11, %v870_v55  ;;  %v982_v62 = vadd.f32 %v981_v60, %v947_v30 }
 0x11c   : > { %v906_v41 = vrot.slane %v905_v18, 4  ;;  %v983_v7 = vadd.f32 %v982_v62, %v948_v16 }
 0x11e   : > { %v907_v13 = vadd.f32 %v906_v41, %v905_v18  ;;  %v984_v21 = vrot.slane %v983_v7, 4 }
 0x120   : > { %v908_v56 = vrot.slane %v907_v13, 2  ;;  %v985_v1 = vadd.f32 %v984_v21, %v983_v7 }
 0x122   : > { %v909_v32 = vadd.f32 %v908_v56, %v907_v13  ;;  %v986_v27 = vrot.slane %v985_v1, 2 }
 0x124   : > { %v910_v4 = vrot.slane %v909_v32, 1  ;;  %v987_v42 = vadd.f32 %v986_v27, %v985_v1 }
 0x126   : > { %v911_v35 = vadd.f32 %v910_v4, %v909_v32  ;;  %v988_v36 = vrot.slane %v987_v42, 1 }
 0x128   : > { %912 = vst [vmem:[%s238_s17] sm:$0x1] %v911_v35  ;;  %v989_v44 = vadd.f32 %v988_v36, %v987_v42 }
 0x12a   : > { %990 = vst [vmem:[%s241_s22] sm:$0x1] %v989_v44 }
 0x12b PF: > { %s16_s18 = sadd.s32 1, %s1358_s18  }
 0x12c   : > { %p13_p4 = scmp.ge.s32.totalorder %s16_s18, 4  }
 0x12e   :  { %15 = sbr.rel (!%p13_p4) target bundleno = 1 (0x1), region = 86 }

// kernel: encoder_block_v1_forward.5
= control target key start
LH: loop header
LB: loop body
LE: loop exit
PB: predicated region body
PF: predicated region fallthrough
CT: control target
= control target key end

     0   :  { %s1960_s12 = smov 0   ;;  %s5366_s0 = inlined_call_operand.vmem [shape: bf16[2,16,9,2,128], index: 0, kind: input, shape index: {}]   ;;  %s5367_s1 = inlined_call_operand.vmem [shape: f32[1,128], index: 1, kind: input, shape index: {}]   ;;  %s5368_s2 = inlined_call_operand.vmem [shape: f32[1,128], index: 2, kind: input, shape index: {}]   ;;  %s5369_s3 = inlined_call_operand.vmem [shape: f32[2,8,8,8], index: 3, kind: output, shape index: {}]  }
   0x1 LB: > { %s1783_s13 = sadd.s32 4294967295, %s1938_s12   ;;  %p1787_p0 = scmp.ge.s32.totalorder %s1938_s12, 1  ;;  %s1938_s12 = sphi %s1960_s12, %s13_s12  }
   0x2   : > { %p136_p1 = scmp.lt.s32.totalorder %s1938_s12, 3 }
   0x4   : > { %p137_p2 = pnand %p1787_p0, %p136_p1 }
   0x6   : > { %140 = sbr.rel (%p137_p2) target bundleno = 576 (0x240), region = 32 }
   0xb   : > { %p159_p3 = scmp.lt.s32.totalorder %s1783_s13, 1  ;;  %vm1648_vm0 = vcmask 1041409   ;;  %vm1650_vm1 = vcmask 1042434   ;;  %vm1652_vm2 = vcmask 1043459   ;;  %vm1654_vm3 = vcmask 1044484  }
   0xc   : > { %vm1656_vm4 = vcmask 1045509   ;;  %vm1658_vm5 = vcmask 1046534   ;;  %vm1660_vm6 = vcmask 1047559   ;;  %vm1719_vm7 = vcmask 64512  }
   0xd   : > { %s7302_s13 = smov (!%p159_p3, %s1783_s13), 1 }
   0xe   : > { %s1921_s14 = smul.u32 144, %s7302_s13  ;;  %s1920_s22 = sshll.u32 %s7302_s13, 6 }
   0xf   : > { %s167_s25 = scalar_lea.vmem %s5369_s3, %s1920_s22 }
  0x10   : > { %s1974_s17 = scalar_lea.vmem %s5366_s0, %s1921_s14 }
  0x11   : > { %v1977_v0 = vld [vmem:[%s1974_s17] sm:$0x1]  ;;  %v1980_v1 = vld [vmem:[%s1974_s17 + $0x1] sm:$0x1]  ;;  %v1983_v2 = vld [vmem:[%s1974_s17 + $0x2] sm:$0x1] }
  0x12   : > { %v1986_v3 = vld [vmem:[%s1974_s17 + $0x3] sm:$0x1]  ;;  %v1989_v4 = vld [vmem:[%s1974_s17 + $0x4] sm:$0x1]  ;;  %v1992_v5 = vld [vmem:[%s1974_s17 + $0x5] sm:$0x1] }
  0x13   : > { %v1995_v6 = vld [vmem:[%s1974_s17 + $0x9] sm:$0x1]  ;;  %v1998_v7 = vld [vmem:[%s1974_s17 + $0x6] sm:$0x1]  ;;  %v2001_v8 = vld [vmem:[%s1974_s17 + $0x7] sm:$0x1] }
  0x14   : > { %v2004_v9 = vld [vmem:[%s1974_s17 + $0xa] sm:$0x1]  ;;  %v2007_v10 = vld [vmem:[%s1974_s17 + $0xb] sm:$0x1]  ;;  %v2010_v11 = vld [vmem:[%s1974_s17 + $0xc] sm:$0x1] }
  0x15   : > { %v2013_v12 = vld [vmem:[%s1974_s17 + $0xd] sm:$0x1]  ;;  %v2016_v13 = vld [vmem:[%s1974_s17 + $0xe] sm:$0x1]  ;;  %v2019_v14 = vld [vmem:[%s1974_s17 + $0xf] sm:$0x1] }
  0x16   : > { %v2022_v15 = vld [vmem:[%s1974_s17 + $0x10] sm:$0x1]  ;;  %v2025_v16 = vld [vmem:[%s1974_s17 + $0x12] sm:$0x1]  ;;  %v2028_v17 = vld [vmem:[%s1974_s17 + $0x13] sm:$0x1] }
  0x17   : > { %v2031_v18 = vld [vmem:[%s1974_s17 + $0x14] sm:$0x1]  ;;  %v2034_v19 = vld [vmem:[%s1974_s17 + $0x15] sm:$0x1]  ;;  %v2037_v20 = vld [vmem:[%s1974_s17 + $0x16] sm:$0x1] }
  0x18   : > { %v2040_v21 = vld [vmem:[%s1974_s17 + $0x17] sm:$0x1]  ;;  %v2043_v22 = vld [vmem:[%s1974_s17 + $0x18] sm:$0x1]  ;;  %v2046_v23 = vld [vmem:[%s1974_s17 + $0x19] sm:$0x1] }
  0x19   : > { %v2053_v28 = vld [vmem:[%s1974_s17 + $0x1b] sm:$0x1]  ;;  %v2056_v29 = vld [vmem:[%s1974_s17 + $0x1c] sm:$0x1]  ;;  %v2059_v30 = vld [vmem:[%s1974_s17 + $0x1d] sm:$0x1] }
  0x1a   : > { %v2062_v31 = vld [vmem:[%s1974_s17 + $0x1e] sm:$0x1]  ;;  %v2069_v36 = vld [vmem:[%s1974_s17 + $0x1f] sm:$0x1]  ;;  %v2072_v37 = vld [vmem:[%s1974_s17 + $0x20] sm:$0x1] }
  0x1b   : > { %v2075_v38 = vld [vmem:[%s1974_s17 + $0x21] sm:$0x1]  ;;  %v2078_v39 = vld [vmem:[%s1974_s17 + $0x22] sm:$0x1]  ;;  %v2085_v44 = vld [vmem:[%s1974_s17 + $0x24] sm:$0x1] }
  0x1c   : > { %5714 = vst [vmem:[#allocation2_spill] sm:$0xff] %v2078_v39  ;;  %v2088_v45 = vld [vmem:[%s1974_s17 + $0x25] sm:$0x1]  ;;  %v2091_v46 = vld [vmem:[%s1974_s17 + $0x26] sm:$0x1] }
  0x1d   : > { %5715 = vst [vmem:[#allocation3_spill] sm:$0xff] %v2085_v44  ;;  %v2094_v47 = vld [vmem:[%s1974_s17 + $0x27] sm:$0x1]  ;;  %v2101_v52 = vld [vmem:[%s1974_s17 + $0x28] sm:$0x1] }
  0x1e   : > { %5716 = vst [vmem:[#allocation4_spill] sm:$0xff] %v2088_v45  ;;  %v2104_v53 = vld [vmem:[%s1974_s17 + $0x29] sm:$0x1]  ;;  %v2107_v54 = vld [vmem:[%s1974_s17 + $0x2a] sm:$0x1] }
  0x1f   : > { %5717 = vst [vmem:[#allocation5_spill] sm:$0xff] %v2091_v46  ;;  %v2110_v55 = vld [vmem:[%s1974_s17 + $0x2b] sm:$0x1]  ;;  %v2117_v60 = vld [vmem:[%s1974_s17 + $0x2d] sm:$0x1] }
  0x20   : > { %5718 = vst [vmem:[#allocation6_spill] sm:$0xff] %v2094_v47  ;;  %v2120_v61 = vld [vmem:[%s1974_s17 + $0x2e] sm:$0x1]  ;;  %v2123_v62 = vld [vmem:[%s1974_s17 + $0x2f] sm:$0x1] }
  0x21   : > { %5719 = vst [vmem:[#allocation7_spill] sm:$0xff] %v2101_v52  ;;  %v2126_v63 = vld [vmem:[%s1974_s17 + $0x30] sm:$0x1]  ;;  %v2133_v51 = vld [vmem:[%s1974_s17 + $0x31] sm:$0x1] }
  0x22   : > { %5720 = vst [vmem:[#allocation8_spill] sm:$0xff] %v2104_v53  ;;  %v2136_v50 = vld [vmem:[%s1974_s17 + $0x32] sm:$0x1]  ;;  %v2139_v49 = vld [vmem:[%s1974_s17 + $0x33] sm:$0x1] }
  0x23   : > { %5721 = vst [vmem:[#allocation9_spill] sm:$0xff] %v2107_v54  ;;  %v2142_v48 = vld [vmem:[%s1974_s17 + $0x34] sm:$0x1]  ;;  %v2149_v43 = vld [vmem:[%s1974_s17 + $0x36] sm:$0x1] }
  0x24   : > { %5722 = vst [vmem:[#allocation10_spill] sm:$0xff] %v2110_v55  ;;  %v2152_v42 = vld [vmem:[%s1974_s17 + $0x37] sm:$0x1]  ;;  %v2155_v27 = vld [vmem:[%s1974_s17 + $0x38] sm:$0x1] }
  0x25   : > { %5723 = vst [vmem:[#allocation11_spill] sm:$0xff] %v2117_v60  ;;  %v2158_v26 = vld [vmem:[%s1974_s17 + $0x39] sm:$0x1]  ;;  %v2165_v41 = vld [vmem:[%s1974_s17 + $0x3a] sm:$0x1] }
  0x26   : > { %5724 = vst [vmem:[#allocation12_spill] sm:$0xff] %v2120_v61  ;;  %v2168_v40 = vld [vmem:[%s1974_s17 + $0x3b] sm:$0x1]  ;;  %v2171_v35 = vld [vmem:[%s1974_s17 + $0x3c] sm:$0x1] }
  0x27   : > { %5725 = vst [vmem:[#allocation13_spill] sm:$0xff] %v2123_v62  ;;  %v2174_v34 = vld [vmem:[%s1974_s17 + $0x3d] sm:$0x1]  ;;  %v2181_v33 = vld [vmem:[%s1974_s17 + $0x3f] sm:$0x1] }
  0x28   : > { %5726 = vst [vmem:[#allocation14_spill] sm:$0xff] %v2126_v63  ;;  %v2184_v32 = vld [vmem:[%s1974_s17 + $0x40] sm:$0x1]  ;;  %v2187_v25 = vld [vmem:[%s1974_s17 + $0x41] sm:$0x1] }
  0x29   : > { %5727 = vst [vmem:[#allocation15_spill] sm:$0xff] %v2133_v51  ;;  %v2190_v24 = vld [vmem:[%s1974_s17 + $0x42] sm:$0x1]  ;;  %v2197_v47 = vld [vmem:[%s1974_s17 + $0x43] sm:$0x1] }
  0x2a   : > { %5728 = vst [vmem:[#allocation16_spill] sm:$0xff] %v2136_v50  ;;  %v2200_v46 = vld [vmem:[%s1974_s17 + $0x44] sm:$0x1]  ;;  %v2203_v45 = vld [vmem:[%s1974_s17 + $0x45] sm:$0x1] }
  0x2b   : > { %5729 = vst [vmem:[#allocation17_spill] sm:$0xff] %v2139_v49  ;;  %v2206_v44 = vld [vmem:[%s1974_s17 + $0x46] sm:$0x1]  ;;  %v2213_v55 = vld [vmem:[%s1974_s17 + $0x48] sm:$0x1] }
  0x2c   : > { %5730 = vst [vmem:[#allocation18_spill] sm:$0xff] %v2142_v48  ;;  %v2216_v54 = vld [vmem:[%s1974_s17 + $0x49] sm:$0x1]  ;;  %v2219_v53 = vld [vmem:[%s1974_s17 + $0x4a] sm:$0x1] }
  0x2d   : > { %5731 = vst [vmem:[#allocation19_spill] sm:$0xff] %v2149_v43  ;;  %v2222_v52 = vld [vmem:[%s1974_s17 + $0x4b] sm:$0x1]  ;;  %v2229_v63 = vld [vmem:[%s1974_s17 + $0x4c] sm:$0x1] }
  0x2e   : > { %5732 = vst [vmem:[#allocation20_spill] sm:$0xff] %v2152_v42  ;;  %v2232_v62 = vld [vmem:[%s1974_s17 + $0x4d] sm:$0x1]  ;;  %v2235_v61 = vld [vmem:[%s1974_s17 + $0x4e] sm:$0x1] }
  0x2f   : > { %5733 = vst [vmem:[#allocation21_spill] sm:$0xff] %v2155_v27  ;;  %v2238_v60 = vld [vmem:[%s1974_s17 + $0x4f] sm:$0x1]  ;;  %v2245_v48 = vld [vmem:[%s1974_s17 + $0x51] sm:$0x1] }
  0x30   : > { %5734 = vst [vmem:[#allocation22_spill] sm:$0xff] %v2158_v26  ;;  %v2248_v49 = vld [vmem:[%s1974_s17 + $0x52] sm:$0x1]  ;;  %v2251_v50 = vld [vmem:[%s1974_s17 + $0x53] sm:$0x1] }
  0x31   : > { %5735 = vst [vmem:[#allocation23_spill] sm:$0xff] %v2165_v41  ;;  %v2254_v51 = vld [vmem:[%s1974_s17 + $0x54] sm:$0x1]  ;;  %v2261_v26 = vld [vmem:[%s1974_s17 + $0x55] sm:$0x1] }
  0x32   : > { %5736 = vst [vmem:[#allocation24_spill] sm:$0xff] %v2168_v40  ;;  %v2264_v27 = vld [vmem:[%s1974_s17 + $0x56] sm:$0x1]  ;;  %v2267_v42 = vld [vmem:[%s1974_s17 + $0x57] sm:$0x1] }
  0x33   : > { %5737 = vst [vmem:[#allocation25_spill] sm:$0xff] %v2171_v35  ;;  %v2270_v43 = vld [vmem:[%s1974_s17 + $0x58] sm:$0x1]  ;;  %v2280_v35 = vld [vmem:[%s1974_s17 + $0x5b] sm:$0x1] }
  0x34   : > { %5738 = vst [vmem:[#allocation26_spill] sm:$0xff] %v2174_v34  ;;  %v2277_v34 = vld [vmem:[%s1974_s17 + $0x5a] sm:$0x1]  ;;  %v2283_v40 = vld [vmem:[%s1974_s17 + $0x5c] sm:$0x1] }
  0x35   : > { %5739 = vst [vmem:[#allocation27_spill] sm:$0xff] %v2181_v33  ;;  %v2286_v41 = vld [vmem:[%s1974_s17 + $0x5d] sm:$0x1]  ;;  %v2302_v33 = vld [vmem:[%s1974_s17 + $0x61] sm:$0x1] }
  0x36   : > { %5740 = vst [vmem:[#allocation28_spill] sm:$0xff] %v2184_v32  ;;  %v2299_v32 = vld [vmem:[%s1974_s17 + $0x60] sm:$0x1]  ;;  %v2373_v59 = vld [vmem:[%s1974_s17 + $0x75] sm:$0x1] }
  0x37   : > { %5741 = vst [vmem:[#allocation29_spill] sm:$0xff] %v2187_v25  ;;  %v2296_v25 = vld [vmem:[%s1974_s17 + $0x5f] sm:$0x1]  ;;  %v2389_v57 = vld [vmem:[%s1974_s17 + $0x79] sm:$0x1] }
  0x38   : > { %5742 = vst [vmem:[#allocation30_spill] sm:$0xff] %v2190_v24  ;;  %v2293_v24 = vld [vmem:[%s1974_s17 + $0x5e] sm:$0x1]  ;;  %v2402_v39 = vld [vmem:[%s1974_s17 + $0x7c] sm:$0x1] }
  0x39   : > { %5743 = vst [vmem:[#allocation31_spill] sm:$0xff] %v2197_v47  ;;  %v2318_v47 = vld [vmem:[%s1974_s17 + $0x66] sm:$0x1]  ;;  %v2405_v58 = vld [vmem:[%s1974_s17 + $0x7e] sm:$0x1] }
  0x3a   : > { %5744 = vst [vmem:[#allocation32_spill] sm:$0xff] %v2200_v46  ;;  %v2315_v46 = vld [vmem:[%s1974_s17 + $0x65] sm:$0x1]  ;;  %v2418_v56 = vld [vmem:[%s1974_s17 + $0x81] sm:$0x1] }
  0x3b   : > { %5745 = vst [vmem:[#allocation33_spill] sm:$0xff] %v2203_v45  ;;  %v2312_v45 = vld [vmem:[%s1974_s17 + $0x64] sm:$0x1] }
  0x3c   : > { %5746 = vst [vmem:[#allocation34_spill] sm:$0xff] %v2206_v44  ;;  %v2309_v44 = vld [vmem:[%s1974_s17 + $0x63] sm:$0x1] }
  0x3d   : > { %5747 = vst [vmem:[#allocation35_spill] sm:$0xff] %v2213_v55  ;;  %v2334_v55 = vld [vmem:[%s1974_s17 + $0x6a] sm:$0x1] }
  0x3e   : > { %5748 = vst [vmem:[#allocation36_spill] sm:$0xff] %v2216_v54  ;;  %v2331_v54 = vld [vmem:[%s1974_s17 + $0x69] sm:$0x1] }
  0x3f   : > { %5749 = vst [vmem:[#allocation37_spill] sm:$0xff] %v2219_v53  ;;  %v2328_v53 = vld [vmem:[%s1974_s17 + $0x68] sm:$0x1] }
  0x40   : > { %5750 = vst [vmem:[#allocation38_spill] sm:$0xff] %v2222_v52  ;;  %v2325_v52 = vld [vmem:[%s1974_s17 + $0x67] sm:$0x1] }
  0x41   : > { %5751 = vst [vmem:[#allocation39_spill] sm:$0xff] %v2229_v63  ;;  %v2350_v63 = vld [vmem:[%s1974_s17 + $0x6f] sm:$0x1] }
  0x42   : > { %5752 = vst [vmem:[#allocation40_spill] sm:$0xff] %v2232_v62  ;;  %v2347_v62 = vld [vmem:[%s1974_s17 + $0x6e] sm:$0x1] }
  0x43   : > { %5753 = vst [vmem:[#allocation41_spill] sm:$0xff] %v2235_v61  ;;  %v2344_v61 = vld [vmem:[%s1974_s17 + $0x6d] sm:$0x1] }
  0x44   : > { %5754 = vst [vmem:[#allocation42_spill] sm:$0xff] %v2238_v60  ;;  %v2341_v60 = vld [vmem:[%s1974_s17 + $0x6c] sm:$0x1] }
  0x45   : > { %5755 = vst [vmem:[#allocation43_spill] sm:$0xff] %v2245_v48  ;;  %v2366_v48 = vld [vmem:[%s1974_s17 + $0x73] sm:$0x1] }
  0x46   : > { %5756 = vst [vmem:[#allocation44_spill] sm:$0xff] %v2248_v49  ;;  %v2363_v49 = vld [vmem:[%s1974_s17 + $0x72] sm:$0x1] }
  0x47   : > { %5757 = vst [vmem:[#allocation45_spill] sm:$0xff] %v2251_v50  ;;  %v2360_v50 = vld [vmem:[%s1974_s17 + $0x71] sm:$0x1] }
  0x48   : > { %5758 = vst [vmem:[#allocation46_spill] sm:$0xff] %v2254_v51  ;;  %v2357_v51 = vld [vmem:[%s1974_s17 + $0x70] sm:$0x1] }
  0x49   : > { %5759 = vst [vmem:[#allocation47_spill] sm:$0xff] %v2261_v26  ;;  %v2431_v26 = vld [vmem:[%s1974_s17 + $0x84] sm:$0x1] }
  0x4a   : > { %5760 = vst [vmem:[#allocation48_spill] sm:$0xff] %v2264_v27  ;;  %v2382_v27 = vld [vmem:[%s1974_s17 + $0x78] sm:$0x1] }
  0x4b   : > { %5761 = vst [vmem:[#allocation49_spill] sm:$0xff] %v2267_v42  ;;  %v2379_v42 = vld [vmem:[%s1974_s17 + $0x77] sm:$0x1] }
  0x4c   : > { %5762 = vst [vmem:[#allocation50_spill] sm:$0xff] %v2270_v43  ;;  %v2376_v43 = vld [vmem:[%s1974_s17 + $0x76] sm:$0x1] }
  0x4d   : > { %5763 = vst [vmem:[#allocation51_spill] sm:$0xff] %v2277_v34  ;;  %v2415_v34 = vld [vmem:[%s1974_s17 + $0x80] sm:$0x1] }
  0x4e   : > { %5764 = vst [vmem:[#allocation52_spill] sm:$0xff] %v2280_v35  ;;  %v2444_v35 = vld [vmem:[%s1974_s17 + $0x88] sm:$0x1] }
  0x4f   : > { %5765 = vst [vmem:[#allocation53_spill] sm:$0xff] %v2283_v40  ;;  %v2395_v40 = vld [vmem:[%s1974_s17 + $0x7b] sm:$0x1] }
  0x50   : > { %5766 = vst [vmem:[#allocation54_spill] sm:$0xff] %v2286_v41  ;;  %v2392_v41 = vld [vmem:[%s1974_s17 + $0x7a] sm:$0x1] }
  0x51   : > { %5767 = vst [vmem:[#allocation55_spill] sm:$0xff] %v2296_v25  ;;  %v2428_v25 = vld [vmem:[%s1974_s17 + $0x83] sm:$0x1] }
  0x52   : > { %5768 = vst [vmem:[#allocation56_spill] sm:$0xff] %v2299_v32  ;;  %v2460_v32 = vld [vmem:[%s1974_s17 + $0x8c] sm:$0x1] }
  0x53   : > { %5769 = vst [vmem:[#allocation57_spill] sm:$0xff] %v2302_v33  ;;  %v2408_v33 = vld [vmem:[%s1974_s17 + $0x7f] sm:$0x1] }
  0x54   : > { %5770 = vst [vmem:[#allocation58_spill] sm:$0xff] %v2312_v45  ;;  %v2441_v45 = vld [vmem:[%s1974_s17 + $0x87] sm:$0x1] }
  0x55   : > { %5771 = vst [vmem:[#allocation59_spill] sm:$0xff] %v2315_v46  ;;  %v2457_v46 = vld [vmem:[%s1974_s17 + $0x8b] sm:$0x1] }
  0x56   : > { %5772 = vst [vmem:[#allocation60_spill] sm:$0xff] %v2318_v47  ;;  %v2421_v47 = vld [vmem:[%s1974_s17 + $0x82] sm:$0x1] }
  0x57   : > { %5773 = vst [vmem:[#allocation61_spill] sm:$0xff] %v2328_v53  ;;  %v5790_v53 = vunpack.c.l.bf16 %v1980_v1  ;;  %v5794_v1 = vunpack.c.l.bf16 %v1992_v5  ;;  %v5798_v5 = vunpack.c.l.bf16 %v2004_v9  ;;  %v5802_v9 = vunpack.c.l.bf16 %v2016_v13 }
  0x58   : > { %5774 = vst [vmem:[#allocation62_spill] sm:$0xff] %v2331_v54  ;;  %v5806_v13 = vunpack.c.l.bf16 %v2028_v17  ;;  %v5810_v17 = vunpack.c.l.bf16 %v2040_v21  ;;  %v5814_v21 = vunpack.c.l.bf16 %v2056_v29  ;;  %v5819_v29 = vunpack.c.l.bf16 %v2072_v37 }
  0x59   : > { %5775 = vst [vmem:[#allocation63_spill] sm:$0xff] %v2334_v55  ;;  %v2434_v55 = vld [vmem:[%s1974_s17 + $0x85] sm:$0x1] }
  0x5a   : > { %5776 = vst [vmem:[#allocation64_spill] sm:$0xff] %v2344_v61  ;;  %v2470_v61 = vld [vmem:[%s1974_s17 + $0x8e] sm:$0x1] }
  0x5b   : > { %5777 = vst [vmem:[#allocation65_spill] sm:$0xff] %v2347_v62  ;;  %v5823_v62 = vld [vmem:[#allocation2_spill] sm:$0xff] }
  0x5c   : > { %5778 = vst [vmem:[#allocation66_spill] sm:$0xff] %v2350_v63  ;;  %v2447_v63 = vld [vmem:[%s1974_s17 + $0x89] sm:$0x1] }
  0x5d   : > { %5779 = vst [vmem:[#allocation67_spill] sm:$0xff] %v2357_v51 }
  0x5e   : > { %5780 = vst [vmem:[#allocation68_spill] sm:$0xff] %v2360_v50  ;;  %v2454_v50 = vld [vmem:[%s1974_s17 + $0x8a] sm:$0x1] }
  0x5f   : > { %5781 = vst [vmem:[#allocation69_spill] sm:$0xff] %v2363_v49  ;;  %v2479_v49 = vld [vmem:[%s5367_s1] ss:$0 sm:$0xff] }
  0x60   : > { %5782 = vst [vmem:[#allocation70_spill] sm:$0xff] %v2366_v48  ;;  %v5789_v48 = vunpack.c.l.bf16 %v1977_v0  ;;  %v2501_v54 = vmul.f32 %v2479_v49, %v5790_v53  ;;  %v5793_v0 = vunpack.c.l.bf16 %v1989_v4  ;;  %v2521_v53 = vmul.f32 %v2479_v49, %v5794_v1 }
  0x61   : > { %5783 = vst [vmem:[#allocation71_spill] sm:$0xff] %v2373_v59  ;;  %v2467_v59 = vld [vmem:[%s1974_s17 + $0x8d] sm:$0x1]  ;;  %v5797_v4 = vunpack.c.l.bf16 %v1995_v6  ;;  %v2541_v1 = vmul.f32 %v2479_v49, %v5798_v5  ;;  %v5801_v6 = vunpack.c.l.bf16 %v2013_v12  ;;  %v2561_v5 = vmul.f32 %v2479_v49, %v5802_v9 }
  0x62   : > { %5784 = vst [vmem:[#allocation72_spill] sm:$0xff] %v2379_v42  ;;  %v5791_v42 = vunpack.c.l.bf16 %v1983_v2  ;;  %v5795_v2 = vunpack.c.l.bf16 %v1998_v7  ;;  %v5799_v7 = vunpack.c.l.bf16 %v2007_v10  ;;  %v5803_v10 = vunpack.c.l.bf16 %v2019_v14 }
  0x63   : > { %5785 = vst [vmem:[#allocation73_spill] sm:$0xff] %v2382_v27  ;;  %v5805_v12 = vunpack.c.l.bf16 %v2025_v16  ;;  %v2581_v9 = vmul.f32 %v2479_v49, %v5806_v13  ;;  %v5807_v14 = vunpack.c.l.bf16 %v2031_v18  ;;  %v5809_v16 = vunpack.c.l.bf16 %v2037_v20  ;;  %v5826_v27 = vld [vmem:[#allocation3_spill] sm:$0xff] }
  0x64   : > { %5786 = vst [vmem:[#allocation74_spill] sm:$0xff] %v2402_v39  ;;  %v2496_v39 = vmul.f32 %v2479_v49, %v5789_v48  ;;  %v2516_v48 = vmul.f32 %v2479_v49, %v5793_v0  ;;  %v2536_v0 = vmul.f32 %v2479_v49, %v5797_v4  ;;  %v2556_v4 = vmul.f32 %v2479_v49, %v5801_v6 }
  0x65   : > { %5787 = vst [vmem:[#allocation75_spill] sm:$0xff] %v2415_v34  ;;  %v5792_v34 = vunpack.c.l.bf16 %v1986_v3  ;;  %v5796_v3 = vunpack.c.l.bf16 %v2001_v8  ;;  %v5800_v8 = vunpack.c.l.bf16 %v2010_v11  ;;  %v5804_v11 = vunpack.c.l.bf16 %v2022_v15 }
  0x66   : > { %5788 = vst [vmem:[#allocation76_spill] sm:$0xff] %v2418_v56  ;;  %v2506_v56 = vmul.f32 %v2479_v49, %v5791_v42  ;;  %v2526_v42 = vmul.f32 %v2479_v49, %v5795_v2  ;;  %v2546_v2 = vmul.f32 %v2479_v49, %v5799_v7  ;;  %v2566_v7 = vmul.f32 %v2479_v49, %v5803_v10 }
  0x67   : > { %v2511_v51 = vmul.f32 %v2479_v49, %v5792_v34  ;;  %v2531_v34 = vmul.f32 %v2479_v49, %v5796_v3  ;;  %v2551_v3 = vmul.f32 %v2479_v49, %v5800_v8  ;;  %v2571_v8 = vmul.f32 %v2479_v49, %v5804_v11 }
  0x68   : > { %v2576_v6 = vmul.f32 %v2479_v49, %v5805_v12  ;;  %v2586_v10 = vmul.f32 %v2479_v49, %v5807_v14  ;;  %v5808_v15 = vunpack.c.l.bf16 %v2034_v19  ;;  %v2596_v12 = vmul.f32 %v2479_v49, %v5809_v16 }
  0x69   : > { %v2601_v13 = vmul.f32 %v2479_v49, %v5810_v17  ;;  %v5811_v18 = vunpack.c.l.bf16 %v2043_v22  ;;  %v5812_v19 = vunpack.c.l.bf16 %v2046_v23  ;;  %v5813_v20 = vunpack.c.l.bf16 %v2053_v28 }
  0x6a   : > { %v2591_v11 = vmul.f32 %v2479_v49, %v5808_v15  ;;  %v2621_v17 = vmul.f32 %v2479_v49, %v5814_v21  ;;  %v5815_v22 = vunpack.c.l.bf16 %v2059_v30  ;;  %v5816_v23 = vunpack.c.l.bf16 %v2062_v31 }
  0x6b   : > { %v2606_v14 = vmul.f32 %v2479_v49, %v5811_v18  ;;  %v2611_v15 = vmul.f32 %v2479_v49, %v5812_v19  ;;  %v2616_v16 = vmul.f32 %v2479_v49, %v5813_v20  ;;  %v5817_v28 = vunpack.c.l.bf16 %v2069_v36 }
  0x6c   : > { %v2626_v18 = vmul.f32 %v2479_v49, %v5815_v22  ;;  %v2631_v19 = vmul.f32 %v2479_v49, %v5816_v23  ;;  %v2641_v21 = vmul.f32 %v2479_v49, %v5819_v29  ;;  %v5821_v30 = vunpack.c.l.bf16 %v2075_v38 }
  0x6d   : > { %v2636_v20 = vmul.f32 %v2479_v49, %v5817_v28  ;;  %v5824_v31 = vunpack.c.l.bf16 %v5823_v62  ;;  %v5827_v36 = vunpack.c.l.bf16 %v5826_v27 }
  0x6e   : > { %5820 = vst [vmem:[#allocation78_spill] sm:$0xff] %v2641_v21  ;;  %v2646_v22 = vmul.f32 %v2479_v49, %v5821_v30  ;;  %v5832_v21 = vld [vmem:[#allocation5_spill] sm:$0xff] }
  0x6f   : > { %5818 = vst [vmem:[#allocation77_spill] sm:$0xff] %v2636_v20  ;;  %v2651_v23 = vmul.f32 %v2479_v49, %v5824_v31  ;;  %v2656_v28 = vmul.f32 %v2479_v49, %v5827_v36  ;;  %v5829_v20 = vld [vmem:[#allocation4_spill] sm:$0xff]  ;;  %v5833_v38 = vunpack.c.l.bf16 %v5832_v21 }
  0x70   : > { %5822 = vst [vmem:[#allocation79_spill] sm:$0xff] %v2646_v22  ;;  %v5830_v37 = vunpack.c.l.bf16 %v5829_v20  ;;  %v5835_v22 = vld [vmem:[#allocation6_spill] sm:$0xff] }
  0x71   : > { %5825 = vst [vmem:[#allocation2_spill] sm:$0xff] %v2651_v23  ;;  %v2666_v30 = vmul.f32 %v2479_v49, %v5833_v38  ;;  %v5836_v62 = vunpack.c.l.bf16 %v5835_v22  ;;  %v5838_v23 = vld [vmem:[#allocation7_spill] sm:$0xff] }
  0x72   : > { %5828 = vst [vmem:[#allocation3_spill] sm:$0xff] %v2656_v28  ;;  %v2661_v29 = vmul.f32 %v2479_v49, %v5830_v37  ;;  %v5839_v27 = vunpack.c.l.bf16 %v5838_v23  ;;  %v5841_v28 = vld [vmem:[#allocation8_spill] sm:$0xff] }
  0x73   : > { %5834 = vst [vmem:[#allocation5_spill] sm:$0xff] %v2666_v30  ;;  %v2671_v31 = vmul.f32 %v2479_v49, %v5836_v62  ;;  %v5842_v20 = vunpack.c.l.bf16 %v5841_v28  ;;  %v5847_v30 = vld [vmem:[#allocation10_spill] sm:$0xff] }
  0x74   : > { %5831 = vst [vmem:[#allocation4_spill] sm:$0xff] %v2661_v29  ;;  %v2676_v36 = vmul.f32 %v2479_v49, %v5839_v27  ;;  %v5844_v29 = vld [vmem:[#allocation9_spill] sm:$0xff]  ;;  %v5848_v22 = vunpack.c.l.bf16 %v5847_v30 }
  0x75   : > { %5837 = vst [vmem:[#allocation6_spill] sm:$0xff] %v2671_v31  ;;  %v2681_v37 = vmul.f32 %v2479_v49, %v5842_v20  ;;  %v5845_v21 = vunpack.c.l.bf16 %v5844_v29  ;;  %v5850_v31 = vld [vmem:[#allocation11_spill] sm:$0xff] }
  0x76   : > { %5840 = vst [vmem:[#allocation7_spill] sm:$0xff] %v2676_v36  ;;  %v2691_v62 = vmul.f32 %v2479_v49, %v5848_v22  ;;  %v5851_v23 = vunpack.c.l.bf16 %v5850_v31  ;;  %v5853_v36 = vld [vmem:[#allocation12_spill] sm:$0xff] }
  0x77   : > { %5843 = vst [vmem:[#allocation8_spill] sm:$0xff] %v2681_v37  ;;  %v2686_v38 = vmul.f32 %v2479_v49, %v5845_v21  ;;  %v5854_v28 = vunpack.c.l.bf16 %v5853_v36  ;;  %v5856_v37 = vld [vmem:[#allocation13_spill] sm:$0xff] }
  0x78   : > { %5849 = vst [vmem:[#allocation10_spill] sm:$0xff] %v2691_v62  ;;  %v2696_v27 = vmul.f32 %v2479_v49, %v5851_v23  ;;  %v5857_v29 = vunpack.c.l.bf16 %v5856_v37  ;;  %v5862_v62 = vld [vmem:[#allocation15_spill] sm:$0xff] }
  0x79   : > { %5846 = vst [vmem:[#allocation9_spill] sm:$0xff] %v2686_v38  ;;  %v2701_v20 = vmul.f32 %v2479_v49, %v5854_v28  ;;  %v5859_v38 = vld [vmem:[#allocation14_spill] sm:$0xff]  ;;  %v5863_v31 = vunpack.c.l.bf16 %v5862_v62 }
  0x7a   : > { %5852 = vst [vmem:[#allocation11_spill] sm:$0xff] %v2696_v27  ;;  %v2706_v21 = vmul.f32 %v2479_v49, %v5857_v29  ;;  %v5860_v30 = vunpack.c.l.bf16 %v5859_v38  ;;  %v5865_v27 = vld [vmem:[#allocation16_spill] sm:$0xff] }
  0x7b   : > { %5855 = vst [vmem:[#allocation12_spill] sm:$0xff] %v2701_v20  ;;  %v2716_v23 = vmul.f32 %v2479_v49, %v5863_v31  ;;  %v5866_v36 = vunpack.c.l.bf16 %v5865_v27  ;;  %v5868_v20 = vld [vmem:[#allocation17_spill] sm:$0xff] }
  0x7c   : > { %5858 = vst [vmem:[#allocation13_spill] sm:$0xff] %v2706_v21  ;;  %v2711_v22 = vmul.f32 %v2479_v49, %v5860_v30  ;;  %v5869_v37 = vunpack.c.l.bf16 %v5868_v20  ;;  %v5871_v21 = vld [vmem:[#allocation18_spill] sm:$0xff] }
  0x7d   : > { %5864 = vst [vmem:[#allocation15_spill] sm:$0xff] %v2716_v23  ;;  %v2721_v28 = vmul.f32 %v2479_v49, %v5866_v36  ;;  %v5872_v38 = vunpack.c.l.bf16 %v5871_v21  ;;  %v5877_v23 = vld [vmem:[#allocation20_spill] sm:$0xff] }
  0x7e   : > { %5861 = vst [vmem:[#allocation14_spill] sm:$0xff] %v2711_v22  ;;  %v2726_v29 = vmul.f32 %v2479_v49, %v5869_v37  ;;  %v5874_v22 = vld [vmem:[#allocation19_spill] sm:$0xff]  ;;  %v5878_v27 = vunpack.c.l.bf16 %v5877_v23 }
  0x7f   : > { %5867 = vst [vmem:[#allocation16_spill] sm:$0xff] %v2721_v28  ;;  %v2731_v30 = vmul.f32 %v2479_v49, %v5872_v38  ;;  %v5875_v62 = vunpack.c.l.bf16 %v5874_v22  ;;  %v5880_v28 = vld [vmem:[#allocation21_spill] sm:$0xff] }
  0x80   : > { %5870 = vst [vmem:[#allocation17_spill] sm:$0xff] %v2726_v29  ;;  %v2741_v36 = vmul.f32 %v2479_v49, %v5878_v27  ;;  %v5881_v20 = vunpack.c.l.bf16 %v5880_v28  ;;  %v5883_v29 = vld [vmem:[#allocation22_spill] sm:$0xff] }
  0x81   : > { %5873 = vst [vmem:[#allocation18_spill] sm:$0xff] %v2731_v30  ;;  %v2736_v31 = vmul.f32 %v2479_v49, %v5875_v62  ;;  %v5884_v21 = vunpack.c.l.bf16 %v5883_v29  ;;  %v5886_v30 = vld [vmem:[#allocation23_spill] sm:$0xff] }
  0x82   : > { %5879 = vst [vmem:[#allocation20_spill] sm:$0xff] %v2741_v36  ;;  %v2746_v37 = vmul.f32 %v2479_v49, %v5881_v20  ;;  %v5887_v22 = vunpack.c.l.bf16 %v5886_v30  ;;  %v5892_v36 = vld [vmem:[#allocation25_spill] sm:$0xff] }
  0x83   : > { %5876 = vst [vmem:[#allocation19_spill] sm:$0xff] %v2736_v31  ;;  %v2751_v38 = vmul.f32 %v2479_v49, %v5884_v21  ;;  %v5889_v31 = vld [vmem:[#allocation24_spill] sm:$0xff]  ;;  %v5893_v28 = vunpack.c.l.bf16 %v5892_v36 }
  0x84   : > { %5882 = vst [vmem:[#allocation21_spill] sm:$0xff] %v2746_v37  ;;  %v2756_v62 = vmul.f32 %v2479_v49, %v5887_v22  ;;  %v5890_v23 = vunpack.c.l.bf16 %v5889_v31  ;;  %v5895_v37 = vld [vmem:[#allocation26_spill] sm:$0xff] }
  0x85   : > { %5885 = vst [vmem:[#allocation22_spill] sm:$0xff] %v2751_v38  ;;  %v2766_v20 = vmul.f32 %v2479_v49, %v5893_v28  ;;  %v5896_v29 = vunpack.c.l.bf16 %v5895_v37  ;;  %v5898_v38 = vld [vmem:[#allocation27_spill] sm:$0xff] }
  0x86   : > { %5888 = vst [vmem:[#allocation23_spill] sm:$0xff] %v2756_v62  ;;  %v2761_v27 = vmul.f32 %v2479_v49, %v5890_v23  ;;  %v5899_v30 = vunpack.c.l.bf16 %v5898_v38  ;;  %v5901_v62 = vld [vmem:[#allocation28_spill] sm:$0xff] }
  0x87   : > { %5894 = vst [vmem:[#allocation25_spill] sm:$0xff] %v2766_v20  ;;  %v2771_v21 = vmul.f32 %v2479_v49, %v5896_v29  ;;  %v5902_v31 = vunpack.c.l.bf16 %v5901_v62  ;;  %v5907_v20 = vld [vmem:[#allocation30_spill] sm:$0xff] }
  0x88   : > { %5891 = vst [vmem:[#allocation24_spill] sm:$0xff] %v2761_v27  ;;  %v2776_v22 = vmul.f32 %v2479_v49, %v5899_v30  ;;  %v5904_v27 = vld [vmem:[#allocation29_spill] sm:$0xff]  ;;  %v5908_v37 = vunpack.c.l.bf16 %v5907_v20 }
  0x89   : > { %5897 = vst [vmem:[#allocation26_spill] sm:$0xff] %v2771_v21  ;;  %v2781_v23 = vmul.f32 %v2479_v49, %v5902_v31  ;;  %v5905_v36 = vunpack.c.l.bf16 %v5904_v27  ;;  %v5910_v21 = vld [vmem:[#allocation31_spill] sm:$0xff] }
  0x8a   : > { %5900 = vst [vmem:[#allocation27_spill] sm:$0xff] %v2776_v22  ;;  %v2791_v29 = vmul.f32 %v2479_v49, %v5908_v37  ;;  %v5911_v38 = vunpack.c.l.bf16 %v5910_v21  ;;  %v5913_v22 = vld [vmem:[#allocation32_spill] sm:$0xff] }
  0x8b   : > { %5903 = vst [vmem:[#allocation28_spill] sm:$0xff] %v2781_v23  ;;  %v2786_v28 = vmul.f32 %v2479_v49, %v5905_v36  ;;  %v5914_v62 = vunpack.c.l.bf16 %v5913_v22  ;;  %v5916_v23 = vld [vmem:[#allocation33_spill] sm:$0xff] }
  0x8c   : > { %5909 = vst [vmem:[#allocation30_spill] sm:$0xff] %v2791_v29  ;;  %v2796_v30 = vmul.f32 %v2479_v49, %v5911_v38  ;;  %v5917_v27 = vunpack.c.l.bf16 %v5916_v23  ;;  %v5922_v29 = vld [vmem:[#allocation35_spill] sm:$0xff] }
  0x8d   : > { %5906 = vst [vmem:[#allocation29_spill] sm:$0xff] %v2786_v28  ;;  %v2801_v31 = vmul.f32 %v2479_v49, %v5914_v62  ;;  %v5919_v28 = vld [vmem:[#allocation34_spill] sm:$0xff]  ;;  %v5923_v21 = vunpack.c.l.bf16 %v5922_v29 }
  0x8e   : > { %5912 = vst [vmem:[#allocation31_spill] sm:$0xff] %v2796_v30  ;;  %v2806_v36 = vmul.f32 %v2479_v49, %v5917_v27  ;;  %v5920_v20 = vunpack.c.l.bf16 %v5919_v28  ;;  %v5925_v30 = vld [vmem:[#allocation36_spill] sm:$0xff] }
  0x8f   : > { %5915 = vst [vmem:[#allocation32_spill] sm:$0xff] %v2801_v31  ;;  %v2816_v38 = vmul.f32 %v2479_v49, %v5923_v21  ;;  %v5926_v22 = vunpack.c.l.bf16 %v5925_v30  ;;  %v5928_v31 = vld [vmem:[#allocation37_spill] sm:$0xff] }
  0x90   : > { %5918 = vst [vmem:[#allocation33_spill] sm:$0xff] %v2806_v36  ;;  %v2811_v37 = vmul.f32 %v2479_v49, %v5920_v20  ;;  %v5929_v23 = vunpack.c.l.bf16 %v5928_v31  ;;  %v5931_v36 = vld [vmem:[#allocation38_spill] sm:$0xff] }
  0x91   : > { %5924 = vst [vmem:[#allocation35_spill] sm:$0xff] %v2816_v38  ;;  %v2821_v62 = vmul.f32 %v2479_v49, %v5926_v22  ;;  %v5932_v28 = vunpack.c.l.bf16 %v5931_v36  ;;  %v5937_v38 = vld [vmem:[#allocation40_spill] sm:$0xff] }
  0x92   : > { %5921 = vst [vmem:[#allocation34_spill] sm:$0xff] %v2811_v37  ;;  %v2826_v27 = vmul.f32 %v2479_v49, %v5929_v23  ;;  %v5934_v37 = vld [vmem:[#allocation39_spill] sm:$0xff]  ;;  %v5938_v30 = vunpack.c.l.bf16 %v5937_v38 }
  0x93   : > { %5927 = vst [vmem:[#allocation36_spill] sm:$0xff] %v2821_v62  ;;  %v2831_v20 = vmul.f32 %v2479_v49, %v5932_v28  ;;  %v5935_v29 = vunpack.c.l.bf16 %v5934_v37  ;;  %v5940_v62 = vld [vmem:[#allocation41_spill] sm:$0xff] }
  0x94   : > { %5930 = vst [vmem:[#allocation37_spill] sm:$0xff] %v2826_v27  ;;  %v2841_v22 = vmul.f32 %v2479_v49, %v5938_v30  ;;  %v5941_v31 = vunpack.c.l.bf16 %v5940_v62  ;;  %v5943_v27 = vld [vmem:[#allocation42_spill] sm:$0xff] }
  0x95   : > { %5933 = vst [vmem:[#allocation38_spill] sm:$0xff] %v2831_v20  ;;  %v2836_v21 = vmul.f32 %v2479_v49, %v5935_v29  ;;  %v5944_v36 = vunpack.c.l.bf16 %v5943_v27  ;;  %v5946_v20 = vld [vmem:[#allocation43_spill] sm:$0xff] }
  0x96   : > { %5939 = vst [vmem:[#allocation40_spill] sm:$0xff] %v2841_v22  ;;  %v2846_v23 = vmul.f32 %v2479_v49, %v5941_v31  ;;  %v5947_v37 = vunpack.c.l.bf16 %v5946_v20  ;;  %v5952_v22 = vld [vmem:[#allocation45_spill] sm:$0xff] }
  0x97   : > { %5936 = vst [vmem:[#allocation39_spill] sm:$0xff] %v2836_v21  ;;  %v2851_v28 = vmul.f32 %v2479_v49, %v5944_v36  ;;  %v5949_v21 = vld [vmem:[#allocation44_spill] sm:$0xff]  ;;  %v5953_v62 = vunpack.c.l.bf16 %v5952_v22 }
  0x98   : > { %5942 = vst [vmem:[#allocation41_spill] sm:$0xff] %v2846_v23  ;;  %v2856_v29 = vmul.f32 %v2479_v49, %v5947_v37  ;;  %v5950_v38 = vunpack.c.l.bf16 %v5949_v21  ;;  %v5955_v23 = vld [vmem:[#allocation46_spill] sm:$0xff] }
  0x99   : > { %5945 = vst [vmem:[#allocation42_spill] sm:$0xff] %v2851_v28  ;;  %v2866_v31 = vmul.f32 %v2479_v49, %v5953_v62  ;;  %v5956_v27 = vunpack.c.l.bf16 %v5955_v23  ;;  %v5958_v28 = vld [vmem:[#allocation47_spill] sm:$0xff] }
  0x9a   : > { %5948 = vst [vmem:[#allocation43_spill] sm:$0xff] %v2856_v29  ;;  %v2861_v30 = vmul.f32 %v2479_v49, %v5950_v38  ;;  %v5959_v20 = vunpack.c.l.bf16 %v5958_v28  ;;  %v5961_v29 = vld [vmem:[#allocation48_spill] sm:$0xff] }
  0x9b   : > { %5954 = vst [vmem:[#allocation45_spill] sm:$0xff] %v2866_v31  ;;  %v2871_v36 = vmul.f32 %v2479_v49, %v5956_v27  ;;  %v5962_v21 = vunpack.c.l.bf16 %v5961_v29  ;;  %v5967_v31 = vld [vmem:[#allocation50_spill] sm:$0xff] }
  0x9c   : > { %5951 = vst [vmem:[#allocation44_spill] sm:$0xff] %v2861_v30  ;;  %v2876_v37 = vmul.f32 %v2479_v49, %v5959_v20  ;;  %v5964_v30 = vld [vmem:[#allocation49_spill] sm:$0xff]  ;;  %v5968_v23 = vunpack.c.l.bf16 %v5967_v31 }
  0x9d   : > { %5957 = vst [vmem:[#allocation46_spill] sm:$0xff] %v2871_v36  ;;  %v2881_v38 = vmul.f32 %v2479_v49, %v5962_v21  ;;  %v5965_v22 = vunpack.c.l.bf16 %v5964_v30  ;;  %v5969_v36 = vld [vmem:[#allocation51_spill] sm:$0xff] }
  0x9e   : > { %5960 = vst [vmem:[#allocation47_spill] sm:$0xff] %v2876_v37  ;;  %v2891_v27 = vmul.f32 %v2479_v49, %v5968_v23  ;;  %v5970_v28 = vunpack.c.l.bf16 %v5969_v36  ;;  %v5972_v37 = vld [vmem:[#allocation52_spill] sm:$0xff]  ;;  %v5980_v36 = vunpack.c.l.bf16 %v2293_v24  ;;  %v5990_v24 = vunpack.c.l.bf16 %v2309_v44 }
  0x9f   : > { %5963 = vst [vmem:[#allocation48_spill] sm:$0xff] %v2881_v38  ;;  %v2886_v62 = vmul.f32 %v2479_v49, %v5965_v22  ;;  %v5973_v29 = vunpack.c.l.bf16 %v5972_v37  ;;  %v5975_v38 = vld [vmem:[#allocation53_spill] sm:$0xff]  ;;  %v6000_v44 = vunpack.c.l.bf16 %v2325_v52  ;;  %v6011_v52 = vunpack.c.l.bf16 %v2341_v60 }
  0xa0   : > { %v2896_v20 = vmul.f32 %v2479_v49, %v5970_v28  ;;  %v5976_v30 = vunpack.c.l.bf16 %v5975_v38  ;;  %v2916_v28 = vmul.f32 %v2479_v49, %v5980_v36  ;;  %v2936_v36 = vmul.f32 %v2479_v49, %v5990_v24 }
  0xa1   : > { %5966 = vst [vmem:[#allocation49_spill] sm:$0xff] %v2886_v62  ;;  %v2901_v21 = vmul.f32 %v2479_v49, %v5973_v29  ;;  %v5978_v62 = vld [vmem:[#allocation54_spill] sm:$0xff]  ;;  %v2956_v24 = vmul.f32 %v2479_v49, %v6000_v44  ;;  %v2976_v44 = vmul.f32 %v2479_v49, %v6011_v52 }
  0xa2   : > { %5971 = vst [vmem:[#allocation50_spill] sm:$0xff] %v2896_v20  ;;  %v2906_v22 = vmul.f32 %v2479_v49, %v5976_v30  ;;  %v5979_v31 = vunpack.c.l.bf16 %v5978_v62  ;;  %v5982_v20 = vld [vmem:[#allocation55_spill] sm:$0xff] }
  0xa3   : > { %5974 = vst [vmem:[#allocation51_spill] sm:$0xff] %v2901_v21  ;;  %v5983_v37 = vunpack.c.l.bf16 %v5982_v20  ;;  %v5985_v21 = vld [vmem:[#allocation56_spill] sm:$0xff] }
  0xa4   : > { %5977 = vst [vmem:[#allocation52_spill] sm:$0xff] %v2906_v22  ;;  %v2911_v23 = vmul.f32 %v2479_v49, %v5979_v31  ;;  %v5986_v38 = vunpack.c.l.bf16 %v5985_v21  ;;  %v5988_v22 = vld [vmem:[#allocation57_spill] sm:$0xff] }
  0xa5   : > { %5981 = vst [vmem:[#allocation53_spill] sm:$0xff] %v2916_v28  ;;  %v2921_v29 = vmul.f32 %v2479_v49, %v5983_v37  ;;  %v5989_v62 = vunpack.c.l.bf16 %v5988_v22  ;;  %v5992_v28 = vld [vmem:[#allocation58_spill] sm:$0xff] }
  0xa6   : > { %v2926_v30 = vmul.f32 %v2479_v49, %v5986_v38  ;;  %5991 = vst [vmem:[#allocation56_spill] sm:$0xff] %v2936_v36  ;;  %v5993_v20 = vunpack.c.l.bf16 %v5992_v28  ;;  %v6002_v36 = vld [vmem:[#allocation61_spill] sm:$0xff] }
  0xa7   : > { %5984 = vst [vmem:[#allocation54_spill] sm:$0xff] %v2921_v29  ;;  %v2931_v31 = vmul.f32 %v2479_v49, %v5989_v62  ;;  %v5995_v29 = vld [vmem:[#allocation59_spill] sm:$0xff]  ;;  %v6003_v28 = vunpack.c.l.bf16 %v6002_v36 }
  0xa8   : > { %5987 = vst [vmem:[#allocation55_spill] sm:$0xff] %v2926_v30  ;;  %v2941_v37 = vmul.f32 %v2479_v49, %v5993_v20  ;;  %v5996_v21 = vunpack.c.l.bf16 %v5995_v29  ;;  %v5998_v30 = vld [vmem:[#allocation60_spill] sm:$0xff] }
  0xa9   : > { %v5999_v22 = vunpack.c.l.bf16 %v5998_v30  ;;  %6001 = vst [vmem:[#allocation59_spill] sm:$0xff] %v2956_v24  ;;  %v2961_v20 = vmul.f32 %v2479_v49, %v6003_v28  ;;  %v6013_v24 = vld [vmem:[#allocation64_spill] sm:$0xff] }
  0xaa   : > { %5994 = vst [vmem:[#allocation57_spill] sm:$0xff] %v2941_v37  ;;  %v2946_v38 = vmul.f32 %v2479_v49, %v5996_v21  ;;  %v6005_v37 = vld [vmem:[#allocation62_spill] sm:$0xff]  ;;  %v6014_v36 = vunpack.c.l.bf16 %v6013_v24 }
  0xab   : > { %v2951_v62 = vmul.f32 %v2479_v49, %v5999_v22  ;;  %6004 = vst [vmem:[#allocation60_spill] sm:$0xff] %v2961_v20  ;;  %v6006_v29 = vunpack.c.l.bf16 %v6005_v37  ;;  %v6016_v20 = vld [vmem:[#allocation65_spill] sm:$0xff] }
  0xac   : > { %5997 = vst [vmem:[#allocation58_spill] sm:$0xff] %v2946_v38  ;;  %v6008_v38 = vld [vmem:[#allocation63_spill] sm:$0xff]  ;;  %v2981_v28 = vmul.f32 %v2479_v49, %v6014_v36  ;;  %v6017_v37 = vunpack.c.l.bf16 %v6016_v20 }
  0xad   : > { %v2966_v21 = vmul.f32 %v2479_v49, %v6006_v29  ;;  %v6009_v30 = vunpack.c.l.bf16 %v6008_v38  ;;  %6012 = vst [vmem:[#allocation63_spill] sm:$0xff] %v2976_v44  ;;  %v6024_v44 = vld [vmem:[#allocation68_spill] sm:$0xff] }
  0xae   : > { %6015 = vst [vmem:[#allocation64_spill] sm:$0xff] %v2981_v28  ;;  %v2986_v29 = vmul.f32 %v2479_v49, %v6017_v37  ;;  %v6025_v24 = vunpack.c.l.bf16 %v6024_v44  ;;  %v6027_v28 = vld [vmem:[#allocation69_spill] sm:$0xff]  ;;  %v6034_v44 = vunpack.c.l.bf16 %v2376_v43  ;;  %v6041_v43 = vunpack.c.l.bf16 %v2392_v41 }
  0xaf   : > { %6007 = vst [vmem:[#allocation61_spill] sm:$0xff] %v2966_v21  ;;  %v2971_v22 = vmul.f32 %v2479_v49, %v6009_v30  ;;  %v6019_v21 = vld [vmem:[#allocation66_spill] sm:$0xff]  ;;  %v6028_v20 = vunpack.c.l.bf16 %v6027_v28  ;;  %v6048_v41 = vunpack.c.l.bf16 %v2408_v33  ;;  %v6054_v33 = vunpack.c.l.bf16 %v2421_v47 }
  0xb0   : > { %6018 = vst [vmem:[#allocation65_spill] sm:$0xff] %v2986_v29  ;;  %v6020_v38 = vunpack.c.l.bf16 %v6019_v21  ;;  %v3001_v36 = vmul.f32 %v2479_v49, %v6025_v24  ;;  %v6030_v29 = vld [vmem:[#allocation70_spill] sm:$0xff]  ;;  %v3021_v24 = vmul.f32 %v2479_v49, %v6034_v44  ;;  %v3041_v44 = vmul.f32 %v2479_v49, %v6041_v43 }
  0xb1   : > { %6010 = vst [vmem:[#allocation62_spill] sm:$0xff] %v2971_v22  ;;  %v6022_v22 = vld [vmem:[#allocation67_spill] sm:$0xff]  ;;  %v3006_v37 = vmul.f32 %v2479_v49, %v6028_v20  ;;  %v6031_v21 = vunpack.c.l.bf16 %v6030_v29  ;;  %v3061_v43 = vmul.f32 %v2479_v49, %v6048_v41  ;;  %v6058_v47 = vunpack.c.l.bf16 %v2441_v45 }
  0xb2   : > { %v2991_v30 = vmul.f32 %v2479_v49, %v6020_v38  ;;  %v6023_v60 = vunpack.c.l.bf16 %v6022_v22  ;;  %6026 = vst [vmem:[#allocation67_spill] sm:$0xff] %v3001_v36  ;;  %v6035_v36 = vld [vmem:[#allocation72_spill] sm:$0xff]  ;;  %v6062_v45 = vunpack.c.l.bf16 %v2457_v46 }
  0xb3   : > { %6029 = vst [vmem:[#allocation68_spill] sm:$0xff] %v3006_v37  ;;  %v3011_v38 = vmul.f32 %v2479_v49, %v6031_v21  ;;  %v6036_v28 = vunpack.c.l.bf16 %v6035_v36  ;;  %v6038_v37 = vld [vmem:[#allocation73_spill] sm:$0xff]  ;;  %v6043_v36 = vunpack.c.l.bf16 %v2395_v40 }
  0xb4   : > { %6021 = vst [vmem:[#allocation66_spill] sm:$0xff] %v2991_v30  ;;  %v2996_v52 = vmul.f32 %v2479_v49, %v6023_v60  ;;  %v6032_v30 = vld [vmem:[#allocation71_spill] sm:$0xff]  ;;  %v6039_v29 = vunpack.c.l.bf16 %v6038_v37 }
  0xb5   : > { %v6033_v22 = vunpack.c.l.bf16 %v6032_v30  ;;  %v3026_v20 = vmul.f32 %v2479_v49, %v6036_v28  ;;  %v6040_v30 = vunpack.c.l.bf16 %v2389_v57  ;;  %6042 = vst [vmem:[#allocation70_spill] sm:$0xff] %v3041_v44  ;;  %v3046_v28 = vmul.f32 %v2479_v49, %v6043_v36  ;;  %v6049_v44 = vld [vmem:[#allocation75_spill] sm:$0xff] }
  0xb6   : > { %v3031_v21 = vmul.f32 %v2479_v49, %v6039_v29  ;;  %v6047_v57 = vunpack.c.l.bf16 %v2405_v58  ;;  %v6050_v40 = vunpack.c.l.bf16 %v6049_v44  ;;  %v3076_v58 = vld [vmem:[%s5368_s2] ss:$0 sm:$0xff]  ;;  %v6055_v44 = vunpack.c.l.bf16 %v2428_v25 }
  0xb7   : > { %v3016_v60 = vmul.f32 %v2479_v49, %v6033_v22  ;;  %6037 = vst [vmem:[#allocation69_spill] sm:$0xff] %v3026_v20  ;;  %v3036_v22 = vmul.f32 %v2479_v49, %v6040_v30  ;;  %v6045_v20 = vld [vmem:[#allocation74_spill] sm:$0xff]  ;;  %v6059_v25 = vunpack.c.l.bf16 %v2444_v35  ;;  %v6063_v35 = vunpack.c.l.bf16 %v2460_v32 }
  0xb8   : > { %6044 = vst [vmem:[#allocation71_spill] sm:$0xff] %v3046_v28  ;;  %v6046_v37 = vunpack.c.l.bf16 %v6045_v20  ;;  %v3056_v30 = vmul.f32 %v2479_v49, %v6047_v57  ;;  %v3066_v36 = vmul.f32 %v2479_v49, %v6050_v40  ;;  %v6051_v28 = vld [vmem:[#allocation76_spill] sm:$0xff]  ;;  %v3081_v57 = vmul.f32 %v2479_v49, %v6054_v33 }
  0xb9   : > { %v6052_v20 = vunpack.c.l.bf16 %v6051_v28  ;;  %v3086_v41 = vmul.f32 %v2479_v49, %v6055_v44  ;;  %v6056_v28 = vunpack.c.l.bf16 %v2431_v26  ;;  %v3101_v33 = vmul.f32 %v2479_v49, %v6058_v47 }
  0xba   : > { %v3051_v29 = vmul.f32 %v2479_v49, %v6046_v37  ;;  %v3106_v44 = vmul.f32 %v2479_v49, %v6059_v25  ;;  %v6060_v26 = vunpack.c.l.bf16 %v2447_v63  ;;  %v3121_v47 = vmul.f32 %v2479_v49, %v6062_v45 }
  0xbb   : > { %v3071_v37 = vmul.f32 %v2479_v49, %v6052_v20  ;;  %v3091_v40 = vmul.f32 %v2479_v49, %v6056_v28  ;;  %v6057_v20 = vunpack.c.l.bf16 %v2434_v55  ;;  %v6061_v55 = vunpack.c.l.bf16 %v2454_v50 }
  0xbc   : > { %v3111_v28 = vmul.f32 %v2479_v49, %v6060_v26  ;;  %v3126_v25 = vmul.f32 %v2479_v49, %v6063_v35  ;;  %v6064_v63 = vunpack.c.l.bf16 %v2467_v59  ;;  %v6065_v50 = vunpack.c.l.bf16 %v2470_v61  ;;  %v6095_v35 = vld [vmem:[#allocation78_spill] sm:$0xff] }
  0xbd   : > { %6053 = vst [vmem:[#allocation72_spill] sm:$0xff] %v3071_v37  ;;  %v3096_v37 = vmul.f32 %v2479_v49, %v6057_v20  ;;  %v3116_v20 = vmul.f32 %v2479_v49, %v6061_v55  ;;  %v3140_v46 = vadd.f32 %v3076_v58, %v2496_v39  ;;  %v3144_v32 = vadd.f32 %v3076_v58, %v2501_v54 }
  0xbe   : > { %v3131_v26 = vmul.f32 %v2479_v49, %v6064_v63  ;;  %v3136_v55 = vmul.f32 %v2479_v49, %v6065_v50  ;;  %v3148_v45 = vadd.f32 %v3076_v58, %v2506_v56  ;;  %v3152_v59 = vadd.f32 %v3076_v58, %v2511_v51  ;;  %v6097_v63 = vld [vmem:[#allocation79_spill] sm:$0xff]  ;;  %v6099_v50 = vld [vmem:[#allocation2_spill] sm:$0xff] }
  0xbf   : > { %6066 = vst [vmem:[#allocation73_spill] sm:$0xff] %v3144_v32  ;;  %v3156_v49 = vadd.f32 %v3076_v58, %v2516_v48  ;;  %v3160_v39 = vadd.f32 %v3076_v58, %v2521_v53  ;;  %v3164_v54 = vadd.f32 %v3076_v58, %v2526_v42  ;;  %v3168_v56 = vadd.f32 %v3076_v58, %v2531_v34 }
  0xc0   : > { %6067 = vst [vmem:[#allocation74_spill] sm:$0xff] %v3148_v45  ;;  %v3172_v51 = vadd.f32 %v3076_v58, %v2536_v0  ;;  %v3176_v61 = vadd.f32 %v3076_v58, %v2541_v1  ;;  %v3180_v48 = vadd.f32 %v3076_v58, %v2546_v2  ;;  %v3184_v53 = vadd.f32 %v3076_v58, %v2551_v3 }
  0xc1   : > { %6068 = vst [vmem:[#allocation75_spill] sm:$0xff] %v3152_v59  ;;  %v3188_v42 = vadd.f32 %v3076_v58, %v2556_v4  ;;  %v3192_v34 = vadd.f32 %v3076_v58, %v2561_v5  ;;  %v3196_v0 = vadd.f32 %v3076_v58, %v2566_v7  ;;  %v3200_v1 = vadd.f32 %v3076_v58, %v2571_v8 }
  0xc2   : > { %6069 = vst [vmem:[#allocation76_spill] sm:$0xff] %v3156_v49  ;;  %v3204_v2 = vadd.f32 %v3076_v58, %v2576_v6  ;;  %v3208_v3 = vadd.f32 %v3076_v58, %v2581_v9  ;;  %v3212_v4 = vadd.f32 %v3076_v58, %v2586_v10  ;;  %v3216_v5 = vadd.f32 %v3076_v58, %v2591_v11 }
  0xc3   : > { %6070 = vst [vmem:[#allocation80_spill] sm:$0xff] %v3160_v39  ;;  %v3220_v7 = vadd.f32 %v3076_v58, %v2596_v12  ;;  %v3224_v8 = vadd.f32 %v3076_v58, %v2601_v13  ;;  %v3228_v6 = vadd.f32 %v3076_v58, %v2606_v14  ;;  %v3232_v9 = vadd.f32 %v3076_v58, %v2611_v15  ;;  %v6093_v14 = vld [vmem:[#allocation77_spill] sm:$0xff] }
  0xc4   : > { %6071 = vst [vmem:[#allocation81_spill] sm:$0xff] %v3164_v54  ;;  %v3236_v10 = vadd.f32 %v3076_v58, %v2616_v16  ;;  %v3240_v11 = vadd.f32 %v3076_v58, %v2621_v17  ;;  %v3244_v12 = vadd.f32 %v3076_v58, %v2626_v18  ;;  %v3248_v13 = vadd.f32 %v3076_v58, %v2631_v19 }
  0xc5   : > { %6072 = vst [vmem:[#allocation82_spill] sm:$0xff] %v3168_v56  ;;  %v3252_v15 = vadd.f32 %v3076_v58, %v6093_v14  ;;  %v3256_v16 = vadd.f32 %v3076_v58, %v6095_v35  ;;  %v3260_v17 = vadd.f32 %v3076_v58, %v6097_v63  ;;  %v3264_v18 = vadd.f32 %v3076_v58, %v6099_v50 }
  0xc6   : > { %6073 = vst [vmem:[#allocation83_spill] sm:$0xff] %v3172_v51 }
  0xc7   : > { %6074 = vst [vmem:[#allocation84_spill] sm:$0xff] %v3176_v61 }
  0xc8   : > { %6075 = vst [vmem:[#allocation85_spill] sm:$0xff] %v3180_v48 }
  0xc9   : > { %6076 = vst [vmem:[#allocation86_spill] sm:$0xff] %v3184_v53 }
  0xca   : > { %6077 = vst [vmem:[#allocation87_spill] sm:$0xff] %v3188_v42 }
  0xcb   : > { %6078 = vst [vmem:[#allocation88_spill] sm:$0xff] %v3192_v34 }
  0xcc   : > { %6079 = vst [vmem:[#allocation89_spill] sm:$0xff] %v3196_v0 }
  0xcd   : > { %6080 = vst [vmem:[#allocation90_spill] sm:$0xff] %v3200_v1 }
  0xce   : > { %6081 = vst [vmem:[#allocation91_spill] sm:$0xff] %v3204_v2 }
  0xcf   : > { %6082 = vst [vmem:[#allocation92_spill] sm:$0xff] %v3208_v3 }
  0xd0   : > { %6083 = vst [vmem:[#allocation93_spill] sm:$0xff] %v3212_v4 }
  0xd1   : > { %6084 = vst [vmem:[#allocation94_spill] sm:$0xff] %v3216_v5 }
  0xd2   : > { %6085 = vst [vmem:[#allocation95_spill] sm:$0xff] %v3220_v7 }
  0xd3   : > { %6086 = vst [vmem:[#allocation96_spill] sm:$0xff] %v3224_v8 }
  0xd4   : > { %6087 = vst [vmem:[#allocation97_spill] sm:$0xff] %v3228_v6 }
  0xd5   : > { %6088 = vst [vmem:[#allocation98_spill] sm:$0xff] %v3232_v9 }
  0xd6   : > { %6089 = vst [vmem:[#allocation99_spill] sm:$0xff] %v3236_v10 }
  0xd7   : > { %6090 = vst [vmem:[#allocation100_spill] sm:$0xff] %v3240_v11 }
  0xd8   : > { %6091 = vst [vmem:[#allocation101_spill] sm:$0xff] %v3244_v12  ;;  %v6101_v12 = vld [vmem:[#allocation3_spill] sm:$0xff] }
  0xd9   : > { %6092 = vst [vmem:[#allocation102_spill] sm:$0xff] %v3248_v13  ;;  %v3268_v19 = vadd.f32 %v3076_v58, %v6101_v12  ;;  %v6103_v13 = vld [vmem:[#allocation4_spill] sm:$0xff] }
  0xda   : > { %6094 = vst [vmem:[#allocation77_spill] sm:$0xff] %v3252_v15  ;;  %v3272_v14 = vadd.f32 %v3076_v58, %v6103_v13  ;;  %v6105_v15 = vld [vmem:[#allocation5_spill] sm:$0xff] }
  0xdb   : > { %6096 = vst [vmem:[#allocation78_spill] sm:$0xff] %v3256_v16  ;;  %v3276_v35 = vadd.f32 %v3076_v58, %v6105_v15  ;;  %v6107_v16 = vld [vmem:[#allocation6_spill] sm:$0xff] }
  0xdc   : > { %6098 = vst [vmem:[#allocation79_spill] sm:$0xff] %v3260_v17  ;;  %v3280_v63 = vadd.f32 %v3076_v58, %v6107_v16  ;;  %v6109_v17 = vld [vmem:[#allocation7_spill] sm:$0xff] }
  0xdd   : > { %6100 = vst [vmem:[#allocation2_spill] sm:$0xff] %v3264_v18  ;;  %v3284_v50 = vadd.f32 %v3076_v58, %v6109_v17  ;;  %v6111_v18 = vld [vmem:[#allocation8_spill] sm:$0xff] }
  0xde   : > { %6102 = vst [vmem:[#allocation3_spill] sm:$0xff] %v3268_v19  ;;  %v3288_v12 = vadd.f32 %v3076_v58, %v6111_v18  ;;  %v6113_v19 = vld [vmem:[#allocation9_spill] sm:$0xff] }
  0xdf   : > { %6104 = vst [vmem:[#allocation4_spill] sm:$0xff] %v3272_v14  ;;  %v3292_v13 = vadd.f32 %v3076_v58, %v6113_v19  ;;  %v6115_v14 = vld [vmem:[#allocation10_spill] sm:$0xff] }
  0xe0   : > { %6106 = vst [vmem:[#allocation5_spill] sm:$0xff] %v3276_v35  ;;  %v3296_v15 = vadd.f32 %v3076_v58, %v6115_v14  ;;  %v6117_v35 = vld [vmem:[#allocation11_spill] sm:$0xff] }
  0xe1   : > { %6108 = vst [vmem:[#allocation6_spill] sm:$0xff] %v3280_v63  ;;  %v3300_v16 = vadd.f32 %v3076_v58, %v6117_v35  ;;  %v6119_v63 = vld [vmem:[#allocation12_spill] sm:$0xff] }
  0xe2   : > { %6110 = vst [vmem:[#allocation7_spill] sm:$0xff] %v3284_v50  ;;  %v3304_v17 = vadd.f32 %v3076_v58, %v6119_v63  ;;  %v6121_v50 = vld [vmem:[#allocation13_spill] sm:$0xff] }
  0xe3   : > { %6112 = vst [vmem:[#allocation8_spill] sm:$0xff] %v3288_v12  ;;  %v3308_v18 = vadd.f32 %v3076_v58, %v6121_v50  ;;  %v6123_v12 = vld [vmem:[#allocation14_spill] sm:$0xff] }
  0xe4   : > { %6114 = vst [vmem:[#allocation9_spill] sm:$0xff] %v3292_v13  ;;  %v3312_v19 = vadd.f32 %v3076_v58, %v6123_v12  ;;  %v6125_v13 = vld [vmem:[#allocation15_spill] sm:$0xff] }
  0xe5   : > { %6116 = vst [vmem:[#allocation10_spill] sm:$0xff] %v3296_v15  ;;  %v3316_v14 = vadd.f32 %v3076_v58, %v6125_v13  ;;  %v6127_v15 = vld [vmem:[#allocation16_spill] sm:$0xff] }
  0xe6   : > { %6118 = vst [vmem:[#allocation11_spill] sm:$0xff] %v3300_v16  ;;  %v3320_v35 = vadd.f32 %v3076_v58, %v6127_v15  ;;  %v6129_v16 = vld [vmem:[#allocation17_spill] sm:$0xff] }
  0xe7   : > { %6120 = vst [vmem:[#allocation12_spill] sm:$0xff] %v3304_v17  ;;  %v3324_v63 = vadd.f32 %v3076_v58, %v6129_v16  ;;  %v6131_v17 = vld [vmem:[#allocation18_spill] sm:$0xff] }
  0xe8   : > { %6122 = vst [vmem:[#allocation13_spill] sm:$0xff] %v3308_v18  ;;  %v3328_v50 = vadd.f32 %v3076_v58, %v6131_v17  ;;  %v6133_v18 = vld [vmem:[#allocation19_spill] sm:$0xff] }
  0xe9   : > { %6124 = vst [vmem:[#allocation14_spill] sm:$0xff] %v3312_v19  ;;  %v3332_v12 = vadd.f32 %v3076_v58, %v6133_v18  ;;  %v6135_v19 = vld [vmem:[#allocation20_spill] sm:$0xff] }
  0xea   : > { %6126 = vst [vmem:[#allocation15_spill] sm:$0xff] %v3316_v14  ;;  %v3336_v13 = vadd.f32 %v3076_v58, %v6135_v19  ;;  %v6137_v14 = vld [vmem:[#allocation21_spill] sm:$0xff] }
  0xeb   : > { %6128 = vst [vmem:[#allocation16_spill] sm:$0xff] %v3320_v35  ;;  %v3340_v15 = vadd.f32 %v3076_v58, %v6137_v14  ;;  %v6139_v35 = vld [vmem:[#allocation22_spill] sm:$0xff] }
  0xec   : > { %6130 = vst [vmem:[#allocation17_spill] sm:$0xff] %v3324_v63  ;;  %v3344_v16 = vadd.f32 %v3076_v58, %v6139_v35  ;;  %v6141_v63 = vld [vmem:[#allocation23_spill] sm:$0xff] }
  0xed   : > { %6132 = vst [vmem:[#allocation18_spill] sm:$0xff] %v3328_v50  ;;  %v3348_v17 = vadd.f32 %v3076_v58, %v6141_v63  ;;  %v6143_v50 = vld [vmem:[#allocation24_spill] sm:$0xff] }
  0xee   : > { %6134 = vst [vmem:[#allocation19_spill] sm:$0xff] %v3332_v12  ;;  %v3352_v18 = vadd.f32 %v3076_v58, %v6143_v50  ;;  %v6145_v12 = vld [vmem:[#allocation25_spill] sm:$0xff] }
  0xef   : > { %6136 = vst [vmem:[#allocation20_spill] sm:$0xff] %v3336_v13  ;;  %v3356_v19 = vadd.f32 %v3076_v58, %v6145_v12  ;;  %v6147_v13 = vld [vmem:[#allocation26_spill] sm:$0xff] }
  0xf0   : > { %6138 = vst [vmem:[#allocation21_spill] sm:$0xff] %v3340_v15  ;;  %v3360_v14 = vadd.f32 %v3076_v58, %v6147_v13  ;;  %v6149_v15 = vld [vmem:[#allocation27_spill] sm:$0xff] }
  0xf1   : > { %6140 = vst [vmem:[#allocation22_spill] sm:$0xff] %v3344_v16  ;;  %v3364_v35 = vadd.f32 %v3076_v58, %v6149_v15  ;;  %v6151_v16 = vld [vmem:[#allocation28_spill] sm:$0xff] }
  0xf2   : > { %6142 = vst [vmem:[#allocation23_spill] sm:$0xff] %v3348_v17  ;;  %v3368_v63 = vadd.f32 %v3076_v58, %v6151_v16  ;;  %v6153_v17 = vld [vmem:[#allocation29_spill] sm:$0xff] }
  0xf3   : > { %6144 = vst [vmem:[#allocation24_spill] sm:$0xff] %v3352_v18  ;;  %v3372_v50 = vadd.f32 %v3076_v58, %v6153_v17  ;;  %v6155_v18 = vld [vmem:[#allocation30_spill] sm:$0xff] }
  0xf4   : > { %6146 = vst [vmem:[#allocation25_spill] sm:$0xff] %v3356_v19  ;;  %v3376_v12 = vadd.f32 %v3076_v58, %v6155_v18  ;;  %v6157_v19 = vld [vmem:[#allocation31_spill] sm:$0xff] }
  0xf5   : > { %6148 = vst [vmem:[#allocation26_spill] sm:$0xff] %v3360_v14  ;;  %v3380_v13 = vadd.f32 %v3076_v58, %v6157_v19  ;;  %v6159_v14 = vld [vmem:[#allocation32_spill] sm:$0xff] }
  0xf6   : > { %6150 = vst [vmem:[#allocation27_spill] sm:$0xff] %v3364_v35  ;;  %v3384_v15 = vadd.f32 %v3076_v58, %v6159_v14  ;;  %v6161_v35 = vld [vmem:[#allocation33_spill] sm:$0xff] }
  0xf7   : > { %6152 = vst [vmem:[#allocation28_spill] sm:$0xff] %v3368_v63  ;;  %v3388_v16 = vadd.f32 %v3076_v58, %v6161_v35  ;;  %v6163_v63 = vld [vmem:[#allocation34_spill] sm:$0xff] }
  0xf8   : > { %6154 = vst [vmem:[#allocation29_spill] sm:$0xff] %v3372_v50  ;;  %v3392_v17 = vadd.f32 %v3076_v58, %v6163_v63  ;;  %v6165_v50 = vld [vmem:[#allocation35_spill] sm:$0xff] }
  0xf9   : > { %6156 = vst [vmem:[#allocation30_spill] sm:$0xff] %v3376_v12  ;;  %v3396_v18 = vadd.f32 %v3076_v58, %v6165_v50  ;;  %v6167_v12 = vld [vmem:[#allocation36_spill] sm:$0xff] }
  0xfa   : > { %6158 = vst [vmem:[#allocation31_spill] sm:$0xff] %v3380_v13  ;;  %v3400_v19 = vadd.f32 %v3076_v58, %v6167_v12  ;;  %v6169_v13 = vld [vmem:[#allocation37_spill] sm:$0xff] }
  0xfb   : > { %6160 = vst [vmem:[#allocation32_spill] sm:$0xff] %v3384_v15  ;;  %v3404_v14 = vadd.f32 %v3076_v58, %v6169_v13  ;;  %v6171_v15 = vld [vmem:[#allocation38_spill] sm:$0xff] }
  0xfc   : > { %6162 = vst [vmem:[#allocation33_spill] sm:$0xff] %v3388_v16  ;;  %v3408_v35 = vadd.f32 %v3076_v58, %v6171_v15  ;;  %v6173_v16 = vld [vmem:[#allocation39_spill] sm:$0xff] }
  0xfd   : > { %6164 = vst [vmem:[#allocation34_spill] sm:$0xff] %v3392_v17  ;;  %v3412_v63 = vadd.f32 %v3076_v58, %v6173_v16  ;;  %v6175_v17 = vld [vmem:[#allocation40_spill] sm:$0xff] }
  0xfe   : > { %6166 = vst [vmem:[#allocation35_spill] sm:$0xff] %v3396_v18  ;;  %v3416_v50 = vadd.f32 %v3076_v58, %v6175_v17  ;;  %v6177_v18 = vld [vmem:[#allocation41_spill] sm:$0xff] }
  0xff   : > { %6168 = vst [vmem:[#allocation36_spill] sm:$0xff] %v3400_v19  ;;  %v3420_v12 = vadd.f32 %v3076_v58, %v6177_v18  ;;  %v6179_v19 = vld [vmem:[#allocation42_spill] sm:$0xff] }
 0x100   : > { %6170 = vst [vmem:[#allocation37_spill] sm:$0xff] %v3404_v14  ;;  %v3424_v13 = vadd.f32 %v3076_v58, %v6179_v19  ;;  %v6181_v14 = vld [vmem:[#allocation43_spill] sm:$0xff] }
 0x101   : > { %6172 = vst [vmem:[#allocation38_spill] sm:$0xff] %v3408_v35  ;;  %v3428_v15 = vadd.f32 %v3076_v58, %v6181_v14  ;;  %v6183_v35 = vld [vmem:[#allocation44_spill] sm:$0xff] }
 0x102   : > { %6174 = vst [vmem:[#allocation39_spill] sm:$0xff] %v3412_v63  ;;  %v3432_v16 = vadd.f32 %v3076_v58, %v6183_v35  ;;  %v6185_v63 = vld [vmem:[#allocation45_spill] sm:$0xff] }
 0x103   : > { %6176 = vst [vmem:[#allocation40_spill] sm:$0xff] %v3416_v50  ;;  %v3436_v17 = vadd.f32 %v3076_v58, %v6185_v63  ;;  %v6187_v50 = vld [vmem:[#allocation46_spill] sm:$0xff]  ;;  %v3456_v63 = vadd.f32 %v3076_v58, %v2891_v27  ;;  %v6303_v4 = vld [vmem:[#allocation33_spill] sm:$0xff] }
 0x104   : > { %6178 = vst [vmem:[#allocation41_spill] sm:$0xff] %v3420_v12  ;;  %v3440_v18 = vadd.f32 %v3076_v58, %v6187_v50  ;;  %v6189_v12 = vld [vmem:[#allocation47_spill] sm:$0xff] }
 0x105   : > { %6180 = vst [vmem:[#allocation42_spill] sm:$0xff] %v3424_v13  ;;  %v3444_v19 = vadd.f32 %v3076_v58, %v6189_v12  ;;  %v6191_v13 = vld [vmem:[#allocation48_spill] sm:$0xff] }
 0x106   : > { %6182 = vst [vmem:[#allocation43_spill] sm:$0xff] %v3428_v15  ;;  %v3448_v14 = vadd.f32 %v3076_v58, %v6191_v13  ;;  %v6193_v15 = vld [vmem:[#allocation49_spill] sm:$0xff] }
 0x107   : > { %6184 = vst [vmem:[#allocation44_spill] sm:$0xff] %v3432_v16  ;;  %v3452_v35 = vadd.f32 %v3076_v58, %v6193_v15  ;;  %v3472_v15 = vadd.f32 %v3076_v58, %v2911_v23  ;;  %v6307_v6 = vld [vmem:[#allocation37_spill] sm:$0xff] }
 0x108   : > { %6186 = vst [vmem:[#allocation45_spill] sm:$0xff] %v3436_v17  ;;  %v6196_v17 = vld [vmem:[#allocation50_spill] sm:$0xff] }
 0x109   : > { %6188 = vst [vmem:[#allocation46_spill] sm:$0xff] %v3440_v18  ;;  %v3460_v50 = vadd.f32 %v3076_v58, %v6196_v17  ;;  %v6198_v18 = vld [vmem:[#allocation51_spill] sm:$0xff] }
 0x10a   : > { %6190 = vst [vmem:[#allocation47_spill] sm:$0xff] %v3444_v19  ;;  %v3464_v12 = vadd.f32 %v3076_v58, %v6198_v18  ;;  %v6200_v19 = vld [vmem:[#allocation52_spill] sm:$0xff] }
 0x10b   : > { %6192 = vst [vmem:[#allocation48_spill] sm:$0xff] %v3448_v14  ;;  %v3468_v13 = vadd.f32 %v3076_v58, %v6200_v19  ;;  %v3488_v19 = vadd.f32 %v3076_v58, %v2931_v31 }
 0x10c   : > { %6194 = vst [vmem:[#allocation49_spill] sm:$0xff] %v3452_v35  ;;  %v6203_v35 = vld [vmem:[#allocation53_spill] sm:$0xff] }
 0x10d   : > { %6195 = vst [vmem:[#allocation103_spill] sm:$0xff] %v3456_v63  ;;  %v3476_v27 = vadd.f32 %v3076_v58, %v6203_v35  ;;  %v6205_v63 = vld [vmem:[#allocation54_spill] sm:$0xff] }
 0x10e   : > { %6197 = vst [vmem:[#allocation50_spill] sm:$0xff] %v3460_v50  ;;  %v3480_v17 = vadd.f32 %v3076_v58, %v6205_v63  ;;  %v6207_v50 = vld [vmem:[#allocation55_spill] sm:$0xff] }
 0x10f   : > { %6199 = vst [vmem:[#allocation51_spill] sm:$0xff] %v3464_v12  ;;  %v3484_v18 = vadd.f32 %v3076_v58, %v6207_v50  ;;  %v3504_v50 = vadd.f32 %v3076_v58, %v2951_v62  ;;  %v6314_v5 = vld [vmem:[#allocation45_spill] sm:$0xff] }
 0x110   : > { %6201 = vst [vmem:[#allocation52_spill] sm:$0xff] %v3468_v13  ;;  %v6210_v13 = vld [vmem:[#allocation56_spill] sm:$0xff] }
 0x111   : > { %6202 = vst [vmem:[#allocation104_spill] sm:$0xff] %v3472_v15  ;;  %v3492_v23 = vadd.f32 %v3076_v58, %v6210_v13  ;;  %v6212_v15 = vld [vmem:[#allocation57_spill] sm:$0xff] }
 0x112   : > { %6204 = vst [vmem:[#allocation53_spill] sm:$0xff] %v3476_v27  ;;  %v3496_v35 = vadd.f32 %v3076_v58, %v6212_v15  ;;  %v6214_v27 = vld [vmem:[#allocation58_spill] sm:$0xff] }
 0x113   : > { %6206 = vst [vmem:[#allocation54_spill] sm:$0xff] %v3480_v17  ;;  %v3500_v63 = vadd.f32 %v3076_v58, %v6214_v27 }
 0x114   : > { %6208 = vst [vmem:[#allocation55_spill] sm:$0xff] %v3484_v18  ;;  %v6217_v18 = vld [vmem:[#allocation59_spill] sm:$0xff] }
 0x115   : > { %6209 = vst [vmem:[#allocation105_spill] sm:$0xff] %v3488_v19  ;;  %v3508_v31 = vadd.f32 %v3076_v58, %v6217_v18  ;;  %v6219_v19 = vld [vmem:[#allocation60_spill] sm:$0xff] }
 0x116   : > { %6211 = vst [vmem:[#allocation56_spill] sm:$0xff] %v3492_v23  ;;  %v3512_v13 = vadd.f32 %v3076_v58, %v6219_v19  ;;  %v6221_v23 = vld [vmem:[#allocation61_spill] sm:$0xff] }
 0x117   : > { %6213 = vst [vmem:[#allocation57_spill] sm:$0xff] %v3496_v35  ;;  %v3516_v15 = vadd.f32 %v3076_v58, %v6221_v23  ;;  %v6223_v35 = vld [vmem:[#allocation62_spill] sm:$0xff] }
 0x118   : > { %6215 = vst [vmem:[#allocation58_spill] sm:$0xff] %v3500_v63  ;;  %v3520_v27 = vadd.f32 %v3076_v58, %v6223_v35  ;;  %v6225_v63 = vld [vmem:[#allocation63_spill] sm:$0xff]  ;;  %v3540_v35 = vadd.f32 %v3076_v58, %v2996_v52  ;;  %v3560_v52 = vadd.f32 %v3076_v58, %v3021_v24  ;;  %v6321_v3 = vld [vmem:[#allocation104_spill] sm:$0xff] }
 0x119   : > { %6216 = vst [vmem:[#allocation106_spill] sm:$0xff] %v3504_v50  ;;  %v3524_v62 = vadd.f32 %v3076_v58, %v6225_v63  ;;  %v6227_v50 = vld [vmem:[#allocation64_spill] sm:$0xff] }
 0x11a   : > { %6218 = vst [vmem:[#allocation59_spill] sm:$0xff] %v3508_v31  ;;  %v3528_v18 = vadd.f32 %v3076_v58, %v6227_v50  ;;  %v6229_v31 = vld [vmem:[#allocation65_spill] sm:$0xff] }
 0x11b   : > { %6220 = vst [vmem:[#allocation60_spill] sm:$0xff] %v3512_v13  ;;  %v3532_v19 = vadd.f32 %v3076_v58, %v6229_v31  ;;  %v6231_v13 = vld [vmem:[#allocation66_spill] sm:$0xff]  ;;  %v3552_v31 = vadd.f32 %v3076_v58, %v3011_v38  ;;  %v3572_v38 = vadd.f32 %v3076_v58, %v3036_v22  ;;  %v3592_v22 = vadd.f32 %v3076_v58, %v3061_v43  ;;  %v6323_v7 = vld [vmem:[#allocation55_spill] sm:$0xff] }
 0x11c   : > { %6222 = vst [vmem:[#allocation61_spill] sm:$0xff] %v3516_v15  ;;  %v3536_v23 = vadd.f32 %v3076_v58, %v6231_v13  ;;  %v3556_v13 = vadd.f32 %v3076_v58, %v3016_v60  ;;  %v3612_v43 = vadd.f32 %v3076_v58, %v3091_v40  ;;  %v3632_v40 = vadd.f32 %v3076_v58, %v3116_v20  ;;  %v6324_v8 = vld [vmem:[#allocation105_spill] sm:$0xff] }
 0x11d   : > { %6224 = vst [vmem:[#allocation62_spill] sm:$0xff] %v3520_v27  ;;  %v6234_v27 = vld [vmem:[#allocation67_spill] sm:$0xff]  ;;  %v6325_v14 = vld [vmem:[#allocation56_spill] sm:$0xff] }
 0x11e   : > { %6226 = vst [vmem:[#allocation63_spill] sm:$0xff] %v3524_v62  ;;  %v3544_v63 = vadd.f32 %v3076_v58, %v6234_v27  ;;  %v6236_v62 = vld [vmem:[#allocation68_spill] sm:$0xff] }
 0x11f   : > { %6228 = vst [vmem:[#allocation64_spill] sm:$0xff] %v3528_v18  ;;  %v3548_v50 = vadd.f32 %v3076_v58, %v6236_v62  ;;  %v3568_v62 = vadd.f32 %v3076_v58, %v3031_v21  ;;  %v3588_v21 = vadd.f32 %v3076_v58, %v3056_v30  ;;  %v3608_v30 = vadd.f32 %v3076_v58, %v3086_v41  ;;  %v6327_v10 = vld [vmem:[#allocation58_spill] sm:$0xff] }
 0x120   : > { %6230 = vst [vmem:[#allocation65_spill] sm:$0xff] %v3532_v19  ;;  %v3628_v41 = vadd.f32 %v3076_v58, %v3111_v28  ;;  %v3648_v28 = vadd.f32 %v3076_v58, %v3136_v55  ;;  %v6328_v11 = vld [vmem:[#allocation106_spill] sm:$0xff]  ;;  %v6343_v55 = vmax.f32 %v3144_v32, 0.0  ;;  %v6348_v32 = vmax.f32 %v3164_v54, 0.0 }
 0x121   : > { %6232 = vst [vmem:[#allocation66_spill] sm:$0xff] %v3536_v23  ;;  %v6354_v54 = vmax.f32 %v3184_v53, 0.0 }
 0x122   : > { %6233 = vst [vmem:[#allocation107_spill] sm:$0xff] %v3540_v35  ;;  %v6241_v35 = vld [vmem:[#allocation69_spill] sm:$0xff] }
 0x123   : > { %6235 = vst [vmem:[#allocation67_spill] sm:$0xff] %v3544_v63  ;;  %v3564_v27 = vadd.f32 %v3076_v58, %v6241_v35  ;;  %v3584_v35 = vadd.f32 %v3076_v58, %v3051_v29  ;;  %v3604_v29 = vadd.f32 %v3076_v58, %v3081_v57  ;;  %v3624_v57 = vadd.f32 %v3076_v58, %v3106_v44 }
 0x124   : > { %6237 = vst [vmem:[#allocation68_spill] sm:$0xff] %v3548_v50  ;;  %v3644_v44 = vadd.f32 %v3076_v58, %v3131_v26  ;;  %v6331_v16 = vld [vmem:[#allocation62_spill] sm:$0xff]  ;;  %v6347_v26 = vmax.f32 %v3160_v39, 0.0  ;;  %v6352_v39 = vmax.f32 %v3180_v48, 0.0  ;;  %v6362_v48 = vmax.f32 %v3200_v1, 0.0 }
 0x125   : > { %6238 = vst [vmem:[#allocation108_spill] sm:$0xff] %v3552_v31  ;;  %v6245_v31 = vld [vmem:[#allocation70_spill] sm:$0xff]  ;;  %v6332_v17 = vld [vmem:[#allocation63_spill] sm:$0xff] }
 0x126   : > { %6239 = vst [vmem:[#allocation109_spill] sm:$0xff] %v3556_v13  ;;  %v3576_v60 = vadd.f32 %v3076_v58, %v6245_v31  ;;  %v6247_v13 = vld [vmem:[#allocation71_spill] sm:$0xff]  ;;  %v3596_v31 = vadd.f32 %v3076_v58, %v3066_v36  ;;  %v3616_v36 = vadd.f32 %v3076_v58, %v3096_v37  ;;  %v3636_v37 = vadd.f32 %v3076_v58, %v3121_v47 }
 0x127   : > { %6240 = vst [vmem:[#allocation110_spill] sm:$0xff] %v3560_v52  ;;  %v3580_v24 = vadd.f32 %v3076_v58, %v6247_v13 }
 0x128   : > { %6242 = vst [vmem:[#allocation69_spill] sm:$0xff] %v3564_v27 }
 0x129   : > { %6243 = vst [vmem:[#allocation111_spill] sm:$0xff] %v3568_v62  ;;  %v6333_v9 = vld [vmem:[#allocation107_spill] sm:$0xff] }
 0x12a   : > { %6244 = vst [vmem:[#allocation112_spill] sm:$0xff] %v3572_v38 }
 0x12b   : > { %6246 = vst [vmem:[#allocation70_spill] sm:$0xff] %v3576_v60  ;;  %v6253_v60 = vld [vmem:[#allocation72_spill] sm:$0xff] }
 0x12c   : > { %6248 = vst [vmem:[#allocation71_spill] sm:$0xff] %v3580_v24  ;;  %v3600_v13 = vadd.f32 %v3076_v58, %v6253_v60  ;;  %v3620_v60 = vadd.f32 %v3076_v58, %v3101_v33  ;;  %v3640_v33 = vadd.f32 %v3076_v58, %v3126_v25  ;;  %v6334_v12 = vld [vmem:[#allocation108_spill] sm:$0xff]  ;;  %v3784_v58 = vrot.slane %v6343_v55, 9 }
 0x12d   : > { %6249 = vst [vmem:[#allocation113_spill] sm:$0xff] %v3584_v35  ;;  %v6335_v2 = vld [vmem:[#allocation109_spill] sm:$0xff]  ;;  %v3804_v55 = vrot.slane %v6348_v32, 9  ;;  %v3824_v32 = vrot.slane %v6354_v54, 9 }
 0x12e   : > { %6250 = vst [vmem:[#allocation114_spill] sm:$0xff] %v3588_v21  ;;  %v6338_v21 = vmov %v3632_v40 }
 0x12f   : > { %6251 = vst [vmem:[#allocation115_spill] sm:$0xff] %v3592_v22  ;;  %v6339_v22 = vmov %v3636_v37 }
 0x130   : > { %6252 = vst [vmem:[#allocation116_spill] sm:$0xff] %v3596_v31  ;;  %v6340_v31 = vmov %v3640_v33 }
 0x131   : > { %6254 = vst [vmem:[#allocation72_spill] sm:$0xff] %v3600_v13  ;;  %v6341_v13 = vmov %v3644_v44 }
 0x132   : > { %6255 = vst [vmem:[#allocation117_spill] sm:$0xff] %v3604_v29  ;;  %v6336_v19 = vld [vmem:[#allocation70_spill] sm:$0xff] }
 0x133   : > { %6256 = vst [vmem:[#allocation118_spill] sm:$0xff] %v3608_v30 }
 0x134   : > { %6257 = vst [vmem:[#allocation119_spill] sm:$0xff] %v3612_v43 }
 0x135   : > { %6258 = vst [vmem:[#allocation120_spill] sm:$0xff] %v3616_v36 }
 0x136   : > { %6259 = vst [vmem:[#allocation121_spill] sm:$0xff] %v3620_v60 }
 0x137   : > { %6260 = vst [vmem:[#allocation122_spill] sm:$0xff] %v3624_v57 }
 0x138   : > { %6261 = vst [vmem:[#allocation123_spill] sm:$0xff] %v3628_v41  ;;  %v6311_v41 = vld [vmem:[#allocation41_spill] sm:$0xff] }
 0x139   : > { %6262 = vst [vmem:[#allocation124_spill] sm:$0xff] %v3632_v40  ;;  %v6344_v40 = vmax.f32 %v3148_v45, 0.0  ;;  %v6349_v45 = vmax.f32 %v3168_v56, 0.0  ;;  %v6356_v56 = vmax.f32 %v3188_v42, 0.0 }
 0x13a   : > { %6263 = vst [vmem:[#allocation125_spill] sm:$0xff] %v3636_v37  ;;  %v6345_v37 = vmax.f32 %v3152_v59, 0.0  ;;  %v6350_v59 = vmax.f32 %v3172_v51, 0.0  ;;  %v6358_v51 = vmax.f32 %v3192_v34, 0.0 }
 0x13b   : > { %6264 = vst [vmem:[#allocation126_spill] sm:$0xff] %v3640_v33  ;;  %v3788_v20 = vrot.slane %v6344_v40, 9  ;;  %v6346_v33 = vmax.f32 %v3156_v49, 0.0  ;;  %v3808_v40 = vrot.slane %v6349_v45, 9  ;;  %v6351_v49 = vmax.f32 %v3176_v61, 0.0 }
 0x13c   : > { %6265 = vst [vmem:[#allocation127_spill] sm:$0xff] %v3644_v44  ;;  %v6342_v44 = vmax.f32 %v3140_v46, 0.0  ;;  %v3792_v47 = vrot.slane %v6345_v37, 9  ;;  %v3812_v37 = vrot.slane %v6350_v59, 9  ;;  %v3828_v45 = vrot.slane %v6356_v56, 9 }
 0x13d   : > { %6266 = vst [vmem:[#allocation128_spill] sm:$0xff] %v3648_v28  ;;  %v3796_v25 = vrot.slane %v6346_v33, 9  ;;  %v3816_v33 = vrot.slane %v6351_v49, 9  ;;  %v3832_v59 = vrot.slane %v6358_v51, 9  ;;  %v6360_v61 = vmax.f32 %v3196_v0, 0.0 }
 0x13e   : > { %v3780_v43 = vrot.slane %v6342_v44, 9  ;;  %v3800_v44 = vrot.slane %v6347_v26, 9  ;;  %v3820_v26 = vrot.slane %v6352_v39, 9  ;;  %6355 = vst [vmem:[#allocation130_spill] sm:$0xff] %v3824_v32  ;;  %v3840_v39 = vrot.slane %v6362_v48, 9  ;;  %v6367_v32 = vld [vmem:[#allocation92_spill] sm:$0xff] }
 0x13f   : > { %v6337_v35 = vld [vmem:[#allocation123_spill] sm:$0xff]  ;;  %6357 = vst [vmem:[#allocation131_spill] sm:$0xff] %v3828_v45  ;;  %v3836_v49 = vrot.slane %v6360_v61, 9  ;;  %v6368_v42 = vmax.f32 %v6367_v32, 0.0  ;;  %v6370_v45 = vld [vmem:[#allocation93_spill] sm:$0xff] }
 0x140   : > { %6353 = vst [vmem:[#allocation129_spill] sm:$0xff] %v3820_v26  ;;  %v6364_v26 = vld [vmem:[#allocation91_spill] sm:$0xff]  ;;  %v6371_v34 = vmax.f32 %v6370_v45, 0.0 }
 0x141   : > { %6359 = vst [vmem:[#allocation132_spill] sm:$0xff] %v3832_v59  ;;  %v6365_v53 = vmax.f32 %v6364_v26, 0.0  ;;  %v3848_v56 = vrot.slane %v6368_v42, 9  ;;  %v6373_v59 = vld [vmem:[#allocation94_spill] sm:$0xff] }
 0x142   : > { %6361 = vst [vmem:[#allocation133_spill] sm:$0xff] %v3836_v49  ;;  %v3852_v51 = vrot.slane %v6371_v34, 9  ;;  %v6374_v0 = vmax.f32 %v6373_v59, 0.0  ;;  %v6376_v49 = vld [vmem:[#allocation95_spill] sm:$0xff] }
 0x143   : > { %6363 = vst [vmem:[#allocation134_spill] sm:$0xff] %v3840_v39  ;;  %v3844_v54 = vrot.slane %v6365_v53, 9  ;;  %v6377_v1 = vmax.f32 %v6376_v49, 0.0  ;;  %v6379_v39 = vld [vmem:[#allocation96_spill] sm:$0xff] }
 0x144   : > { %6369 = vst [vmem:[#allocation136_spill] sm:$0xff] %v3848_v56  ;;  %v3856_v61 = vrot.slane %v6374_v0, 9  ;;  %v6380_v26 = vmax.f32 %v6379_v39, 0.0  ;;  %v6385_v56 = vld [vmem:[#allocation98_spill] sm:$0xff] }
 0x145   : > { %6366 = vst [vmem:[#allocation135_spill] sm:$0xff] %v3844_v54  ;;  %v3860_v48 = vrot.slane %v6377_v1, 9  ;;  %v6382_v54 = vld [vmem:[#allocation97_spill] sm:$0xff]  ;;  %v6386_v45 = vmax.f32 %v6385_v56, 0.0 }
 0x146   : > { %6372 = vst [vmem:[#allocation137_spill] sm:$0xff] %v3852_v51  ;;  %v3864_v53 = vrot.slane %v6380_v26, 9  ;;  %v6383_v32 = vmax.f32 %v6382_v54, 0.0  ;;  %v6388_v51 = vld [vmem:[#allocation99_spill] sm:$0xff] }
 0x147   : > { %6375 = vst [vmem:[#allocation138_spill] sm:$0xff] %v3856_v61  ;;  %v3872_v34 = vrot.slane %v6386_v45, 9  ;;  %v6389_v59 = vmax.f32 %v6388_v51, 0.0  ;;  %v6391_v61 = vld [vmem:[#allocation100_spill] sm:$0xff] }
 0x148   : > { %6378 = vst [vmem:[#allocation139_spill] sm:$0xff] %v3860_v48  ;;  %v3868_v42 = vrot.slane %v6383_v32, 9  ;;  %v6392_v49 = vmax.f32 %v6391_v61, 0.0  ;;  %v6394_v48 = vld [vmem:[#allocation101_spill] sm:$0xff] }
 0x149   : > { %6381 = vst [vmem:[#allocation140_spill] sm:$0xff] %v3864_v53  ;;  %v3876_v0 = vrot.slane %v6389_v59, 9  ;;  %v6395_v39 = vmax.f32 %v6394_v48, 0.0  ;;  %v6397_v53 = vld [vmem:[#allocation102_spill] sm:$0xff] }
 0x14a   : > { %6384 = vst [vmem:[#allocation141_spill] sm:$0xff] %v3868_v42  ;;  %v3880_v1 = vrot.slane %v6392_v49, 9  ;;  %v6398_v54 = vmax.f32 %v6397_v53, 0.0  ;;  %v6400_v42 = vld [vmem:[#allocation77_spill] sm:$0xff] }
 0x14b   : > { %6387 = vst [vmem:[#allocation142_spill] sm:$0xff] %v3872_v34  ;;  %v3884_v26 = vrot.slane %v6395_v39, 9  ;;  %v6401_v56 = vmax.f32 %v6400_v42, 0.0  ;;  %v6403_v34 = vld [vmem:[#allocation78_spill] sm:$0xff] }
 0x14c   : > { %6390 = vst [vmem:[#allocation143_spill] sm:$0xff] %v3876_v0  ;;  %v3888_v32 = vrot.slane %v6398_v54, 9  ;;  %v6404_v51 = vmax.f32 %v6403_v34, 0.0  ;;  %v6406_v0 = vld [vmem:[#allocation79_spill] sm:$0xff] }
 0x14d   : > { %6393 = vst [vmem:[#allocation144_spill] sm:$0xff] %v3880_v1  ;;  %v3892_v45 = vrot.slane %v6401_v56, 9  ;;  %v6407_v61 = vmax.f32 %v6406_v0, 0.0  ;;  %v6409_v1 = vld [vmem:[#allocation2_spill] sm:$0xff] }
 0x14e   : > { %6396 = vst [vmem:[#allocation145_spill] sm:$0xff] %v3884_v26  ;;  %v3896_v59 = vrot.slane %v6404_v51, 9  ;;  %v6410_v48 = vmax.f32 %v6409_v1, 0.0  ;;  %v6412_v26 = vld [vmem:[#allocation3_spill] sm:$0xff] }
 0x14f   : > { %6399 = vst [vmem:[#allocation146_spill] sm:$0xff] %v3888_v32  ;;  %v3900_v49 = vrot.slane %v6407_v61, 9  ;;  %v6413_v53 = vmax.f32 %v6412_v26, 0.0  ;;  %v6415_v32 = vld [vmem:[#allocation4_spill] sm:$0xff] }
 0x150   : > { %6402 = vst [vmem:[#allocation147_spill] sm:$0xff] %v3892_v45  ;;  %v3904_v39 = vrot.slane %v6410_v48, 9  ;;  %v6416_v42 = vmax.f32 %v6415_v32, 0.0  ;;  %v6418_v45 = vld [vmem:[#allocation5_spill] sm:$0xff] }
 0x151   : > { %6405 = vst [vmem:[#allocation148_spill] sm:$0xff] %v3896_v59  ;;  %v3908_v54 = vrot.slane %v6413_v53, 9  ;;  %v6419_v34 = vmax.f32 %v6418_v45, 0.0  ;;  %v6421_v59 = vld [vmem:[#allocation6_spill] sm:$0xff] }
 0x152   : > { %6408 = vst [vmem:[#allocation149_spill] sm:$0xff] %v3900_v49  ;;  %v3912_v56 = vrot.slane %v6416_v42, 9  ;;  %v6422_v0 = vmax.f32 %v6421_v59, 0.0  ;;  %v6424_v49 = vld [vmem:[#allocation7_spill] sm:$0xff] }
 0x153   : > { %6411 = vst [vmem:[#allocation150_spill] sm:$0xff] %v3904_v39  ;;  %v3916_v51 = vrot.slane %v6419_v34, 9  ;;  %v6425_v1 = vmax.f32 %v6424_v49, 0.0  ;;  %v6427_v39 = vld [vmem:[#allocation8_spill] sm:$0xff] }
 0x154   : > { %6414 = vst [vmem:[#allocation151_spill] sm:$0xff] %v3908_v54  ;;  %v3920_v61 = vrot.slane %v6422_v0, 9  ;;  %v6428_v26 = vmax.f32 %v6427_v39, 0.0  ;;  %v6430_v54 = vld [vmem:[#allocation9_spill] sm:$0xff] }
 0x155   : > { %6417 = vst [vmem:[#allocation152_spill] sm:$0xff] %v3912_v56  ;;  %v3924_v48 = vrot.slane %v6425_v1, 9  ;;  %v6431_v32 = vmax.f32 %v6430_v54, 0.0  ;;  %v6433_v56 = vld [vmem:[#allocation10_spill] sm:$0xff] }
 0x156   : > { %6420 = vst [vmem:[#allocation153_spill] sm:$0xff] %v3916_v51  ;;  %v3928_v53 = vrot.slane %v6428_v26, 9  ;;  %v6434_v45 = vmax.f32 %v6433_v56, 0.0  ;;  %v6436_v51 = vld [vmem:[#allocation11_spill] sm:$0xff] }
 0x157   : > { %6423 = vst [vmem:[#allocation154_spill] sm:$0xff] %v3920_v61  ;;  %v3932_v42 = vrot.slane %v6431_v32, 9  ;;  %v6437_v59 = vmax.f32 %v6436_v51, 0.0  ;;  %v6439_v61 = vld [vmem:[#allocation12_spill] sm:$0xff] }
 0x158   : > { %6426 = vst [vmem:[#allocation155_spill] sm:$0xff] %v3924_v48  ;;  %v3936_v34 = vrot.slane %v6434_v45, 9  ;;  %v6440_v49 = vmax.f32 %v6439_v61, 0.0  ;;  %v6442_v48 = vld [vmem:[#allocation13_spill] sm:$0xff] }
 0x159   : > { %6429 = vst [vmem:[#allocation156_spill] sm:$0xff] %v3928_v53  ;;  %v3940_v0 = vrot.slane %v6437_v59, 9  ;;  %v6443_v39 = vmax.f32 %v6442_v48, 0.0  ;;  %v6445_v53 = vld [vmem:[#allocation14_spill] sm:$0xff] }
 0x15a   : > { %6432 = vst [vmem:[#allocation157_spill] sm:$0xff] %v3932_v42  ;;  %v3944_v1 = vrot.slane %v6440_v49, 9  ;;  %v6446_v54 = vmax.f32 %v6445_v53, 0.0  ;;  %v6448_v42 = vld [vmem:[#allocation15_spill] sm:$0xff] }
 0x15b   : > { %6435 = vst [vmem:[#allocation158_spill] sm:$0xff] %v3936_v34  ;;  %v3948_v26 = vrot.slane %v6443_v39, 9  ;;  %v6449_v56 = vmax.f32 %v6448_v42, 0.0  ;;  %v6451_v34 = vld [vmem:[#allocation16_spill] sm:$0xff] }
 0x15c   : > { %6438 = vst [vmem:[#allocation159_spill] sm:$0xff] %v3940_v0  ;;  %v3952_v32 = vrot.slane %v6446_v54, 9  ;;  %v6452_v51 = vmax.f32 %v6451_v34, 0.0  ;;  %v6454_v0 = vld [vmem:[#allocation17_spill] sm:$0xff] }
 0x15d   : > { %6441 = vst [vmem:[#allocation160_spill] sm:$0xff] %v3944_v1  ;;  %v3956_v45 = vrot.slane %v6449_v56, 9  ;;  %v6455_v61 = vmax.f32 %v6454_v0, 0.0  ;;  %v6457_v1 = vld [vmem:[#allocation18_spill] sm:$0xff] }
 0x15e   : > { %6444 = vst [vmem:[#allocation161_spill] sm:$0xff] %v3948_v26  ;;  %v3960_v59 = vrot.slane %v6452_v51, 9  ;;  %v6458_v48 = vmax.f32 %v6457_v1, 0.0  ;;  %v6460_v26 = vld [vmem:[#allocation19_spill] sm:$0xff] }
 0x15f   : > { %6447 = vst [vmem:[#allocation162_spill] sm:$0xff] %v3952_v32  ;;  %v3964_v49 = vrot.slane %v6455_v61, 9  ;;  %v6461_v53 = vmax.f32 %v6460_v26, 0.0  ;;  %v6463_v32 = vld [vmem:[#allocation20_spill] sm:$0xff] }
 0x160   : > { %6450 = vst [vmem:[#allocation163_spill] sm:$0xff] %v3956_v45  ;;  %v3968_v39 = vrot.slane %v6458_v48, 9  ;;  %v6464_v42 = vmax.f32 %v6463_v32, 0.0  ;;  %v6466_v45 = vld [vmem:[#allocation21_spill] sm:$0xff] }
 0x161   : > { %6453 = vst [vmem:[#allocation164_spill] sm:$0xff] %v3960_v59  ;;  %v3972_v54 = vrot.slane %v6461_v53, 9  ;;  %v6467_v34 = vmax.f32 %v6466_v45, 0.0  ;;  %v6469_v59 = vld [vmem:[#allocation22_spill] sm:$0xff] }
 0x162   : > { %6456 = vst [vmem:[#allocation165_spill] sm:$0xff] %v3964_v49  ;;  %v3976_v56 = vrot.slane %v6464_v42, 9  ;;  %v6470_v0 = vmax.f32 %v6469_v59, 0.0  ;;  %v6472_v49 = vld [vmem:[#allocation23_spill] sm:$0xff] }
 0x163   : > { %6459 = vst [vmem:[#allocation166_spill] sm:$0xff] %v3968_v39  ;;  %v3980_v51 = vrot.slane %v6467_v34, 9  ;;  %v6473_v1 = vmax.f32 %v6472_v49, 0.0  ;;  %v6475_v39 = vld [vmem:[#allocation24_spill] sm:$0xff] }
 0x164   : > { %6462 = vst [vmem:[#allocation167_spill] sm:$0xff] %v3972_v54  ;;  %v3984_v61 = vrot.slane %v6470_v0, 9  ;;  %v6476_v26 = vmax.f32 %v6475_v39, 0.0  ;;  %v6478_v54 = vld [vmem:[#allocation25_spill] sm:$0xff] }
 0x165   : > { %6465 = vst [vmem:[#allocation168_spill] sm:$0xff] %v3976_v56  ;;  %v3988_v48 = vrot.slane %v6473_v1, 9  ;;  %v6479_v32 = vmax.f32 %v6478_v54, 0.0  ;;  %v6481_v56 = vld [vmem:[#allocation26_spill] sm:$0xff] }
 0x166   : > { %6468 = vst [vmem:[#allocation169_spill] sm:$0xff] %v3980_v51  ;;  %v3992_v53 = vrot.slane %v6476_v26, 9  ;;  %v6482_v45 = vmax.f32 %v6481_v56, 0.0  ;;  %v6484_v51 = vld [vmem:[#allocation27_spill] sm:$0xff] }
 0x167   : > { %6471 = vst [vmem:[#allocation170_spill] sm:$0xff] %v3984_v61  ;;  %v3996_v42 = vrot.slane %v6479_v32, 9  ;;  %v6485_v59 = vmax.f32 %v6484_v51, 0.0  ;;  %v6486_v61 = vld [vmem:[#allocation28_spill] sm:$0xff] }
 0x168   : > { %6474 = vst [vmem:[#allocation171_spill] sm:$0xff] %v3988_v48  ;;  %v4000_v34 = vrot.slane %v6482_v45, 9  ;;  %v6487_v49 = vmax.f32 %v6486_v61, 0.0  ;;  %v6489_v48 = vld [vmem:[#allocation29_spill] sm:$0xff]  ;;  %v6500_v61 = vmax.f32 %v6303_v4, 0.0 }
 0x169   : > { %6477 = vst [vmem:[#allocation172_spill] sm:$0xff] %v3992_v53  ;;  %v4004_v0 = vrot.slane %v6485_v59, 9  ;;  %v6490_v39 = vmax.f32 %v6489_v48, 0.0  ;;  %v6492_v53 = vld [vmem:[#allocation30_spill] sm:$0xff] }
 0x16a   : > { %6480 = vst [vmem:[#allocation173_spill] sm:$0xff] %v3996_v42  ;;  %v4008_v1 = vrot.slane %v6487_v49, 9  ;;  %v6493_v54 = vmax.f32 %v6492_v53, 0.0  ;;  %v6495_v42 = vld [vmem:[#allocation31_spill] sm:$0xff]  ;;  %v4028_v49 = vrot.slane %v6500_v61, 9 }
 0x16b   : > { %6483 = vst [vmem:[#allocation174_spill] sm:$0xff] %v4000_v34  ;;  %v4012_v26 = vrot.slane %v6490_v39, 9  ;;  %v6496_v56 = vmax.f32 %v6495_v42, 0.0  ;;  %v6497_v34 = vld [vmem:[#allocation32_spill] sm:$0xff] }
 0x16c   : > { %6488 = vst [vmem:[#allocation175_spill] sm:$0xff] %v4008_v1  ;;  %v4016_v32 = vrot.slane %v6493_v54, 9  ;;  %v6498_v51 = vmax.f32 %v6497_v34, 0.0  ;;  %v6502_v1 = vld [vmem:[#allocation34_spill] sm:$0xff]  ;;  %v6510_v34 = vmax.f32 %v6307_v6, 0.0 }
 0x16d   : > { %6491 = vst [vmem:[#allocation176_spill] sm:$0xff] %v4012_v26  ;;  %v4020_v45 = vrot.slane %v6496_v56, 9  ;;  %v6503_v48 = vmax.f32 %v6502_v1, 0.0  ;;  %v6505_v26 = vld [vmem:[#allocation35_spill] sm:$0xff] }
 0x16e   : > { %6494 = vst [vmem:[#allocation177_spill] sm:$0xff] %v4016_v32  ;;  %v4024_v59 = vrot.slane %v6498_v51, 9  ;;  %v6506_v53 = vmax.f32 %v6505_v26, 0.0  ;;  %v6507_v32 = vld [vmem:[#allocation36_spill] sm:$0xff]  ;;  %v4044_v51 = vrot.slane %v6510_v34, 9 }
 0x16f   : > { %6501 = vst [vmem:[#allocation179_spill] sm:$0xff] %v4028_v49  ;;  %v4032_v39 = vrot.slane %v6503_v48, 9  ;;  %v6508_v42 = vmax.f32 %v6507_v32, 0.0  ;;  %v6515_v49 = vld [vmem:[#allocation39_spill] sm:$0xff]  ;;  %v6520_v32 = vmax.f32 %v6311_v41, 0.0 }
 0x170   : > { %6499 = vst [vmem:[#allocation178_spill] sm:$0xff] %v4024_v59  ;;  %v4036_v54 = vrot.slane %v6506_v53, 9  ;;  %v6512_v59 = vld [vmem:[#allocation38_spill] sm:$0xff]  ;;  %v6516_v1 = vmax.f32 %v6515_v49, 0.0 }
 0x171   : > { %6504 = vst [vmem:[#allocation180_spill] sm:$0xff] %v4032_v39  ;;  %v4040_v56 = vrot.slane %v6508_v42, 9  ;;  %v6513_v4 = vmax.f32 %v6512_v59, 0.0  ;;  %v6517_v39 = vld [vmem:[#allocation40_spill] sm:$0xff]  ;;  %v4060_v42 = vrot.slane %v6520_v32, 9 }
 0x172   : > { %6511 = vst [vmem:[#allocation182_spill] sm:$0xff] %v4044_v51  ;;  %v4052_v48 = vrot.slane %v6516_v1, 9  ;;  %v6518_v26 = vmax.f32 %v6517_v39, 0.0  ;;  %v6525_v51 = vld [vmem:[#allocation43_spill] sm:$0xff]  ;;  %v6531_v39 = vmax.f32 %v6314_v5, 0.0 }
 0x173   : > { %6509 = vst [vmem:[#allocation181_spill] sm:$0xff] %v4040_v56  ;;  %v4048_v61 = vrot.slane %v6513_v4, 9  ;;  %v6522_v56 = vld [vmem:[#allocation42_spill] sm:$0xff]  ;;  %v6526_v59 = vmax.f32 %v6525_v51, 0.0 }
 0x174   : > { %v4056_v53 = vrot.slane %v6518_v26, 9  ;;  %6521 = vst [vmem:[#allocation185_spill] sm:$0xff] %v4060_v42  ;;  %v6523_v6 = vmax.f32 %v6522_v56, 0.0  ;;  %v4076_v26 = vrot.slane %v6531_v39, 9  ;;  %v6536_v42 = vld [vmem:[#allocation47_spill] sm:$0xff] }
 0x175   : > { %6514 = vst [vmem:[#allocation183_spill] sm:$0xff] %v4048_v61  ;;  %v4068_v4 = vrot.slane %v6526_v59, 9  ;;  %v6528_v61 = vld [vmem:[#allocation44_spill] sm:$0xff]  ;;  %v6537_v56 = vmax.f32 %v6536_v42, 0.0 }
 0x176   : > { %6519 = vst [vmem:[#allocation184_spill] sm:$0xff] %v4056_v53  ;;  %v4064_v34 = vrot.slane %v6523_v6, 9  ;;  %v6529_v49 = vmax.f32 %v6528_v61, 0.0  ;;  %v6533_v53 = vld [vmem:[#allocation46_spill] sm:$0xff] }
 0x177   : > { %6527 = vst [vmem:[#allocation187_spill] sm:$0xff] %v4068_v4  ;;  %v6534_v41 = vmax.f32 %v6533_v53, 0.0  ;;  %v4084_v6 = vrot.slane %v6537_v56, 9  ;;  %v6541_v4 = vld [vmem:[#allocation49_spill] sm:$0xff] }
 0x178   : > { %6524 = vst [vmem:[#allocation186_spill] sm:$0xff] %v4064_v34  ;;  %v4072_v1 = vrot.slane %v6529_v49, 9  ;;  %v6539_v34 = vld [vmem:[#allocation48_spill] sm:$0xff]  ;;  %v6542_v61 = vmax.f32 %v6541_v4, 0.0  ;;  %v6553_v4 = vmax.f32 %v6321_v3, 0.0  ;;  %v6563_v3 = vmax.f32 %v6325_v14, 0.0 }
 0x179   : > { %6532 = vst [vmem:[#allocation189_spill] sm:$0xff] %v4076_v26  ;;  %v4080_v32 = vrot.slane %v6534_v41, 9  ;;  %v6540_v51 = vmax.f32 %v6539_v34, 0.0  ;;  %v6547_v26 = vld [vmem:[#allocation50_spill] sm:$0xff] }
 0x17a   : > { %6530 = vst [vmem:[#allocation188_spill] sm:$0xff] %v4072_v1  ;;  %v4092_v49 = vrot.slane %v6542_v61, 9  ;;  %v6544_v1 = vld [vmem:[#allocation103_spill] sm:$0xff]  ;;  %v6548_v53 = vmax.f32 %v6547_v26, 0.0  ;;  %v4112_v61 = vrot.slane %v6553_v4, 9  ;;  %v4132_v4 = vrot.slane %v6563_v3, 9 }
 0x17b   : > { %6535 = vst [vmem:[#allocation190_spill] sm:$0xff] %v4080_v32  ;;  %v4088_v59 = vrot.slane %v6540_v51, 9  ;;  %v6545_v5 = vmax.f32 %v6544_v1, 0.0  ;;  %v6549_v32 = vld [vmem:[#allocation51_spill] sm:$0xff] }
 0x17c   : > { %6538 = vst [vmem:[#allocation191_spill] sm:$0xff] %v4084_v6  ;;  %v4100_v41 = vrot.slane %v6548_v53, 9  ;;  %v6550_v42 = vmax.f32 %v6549_v32, 0.0  ;;  %v6551_v6 = vld [vmem:[#allocation52_spill] sm:$0xff]  ;;  %v6559_v32 = vmax.f32 %v6323_v7, 0.0  ;;  %v6567_v7 = vmax.f32 %v6328_v11, 0.0 }
 0x17d   : > { %6543 = vst [vmem:[#allocation192_spill] sm:$0xff] %v4092_v49  ;;  %v4096_v39 = vrot.slane %v6545_v5, 9  ;;  %v6552_v34 = vmax.f32 %v6551_v6, 0.0  ;;  %v6555_v49 = vld [vmem:[#allocation53_spill] sm:$0xff]  ;;  %v6561_v6 = vmax.f32 %v6324_v8, 0.0  ;;  %v6575_v11 = vmax.f32 %v6332_v17, 0.0 }
 0x17e   : > { %v4104_v56 = vrot.slane %v6550_v42, 9  ;;  %6554 = vst [vmem:[#allocation194_spill] sm:$0xff] %v4112_v61  ;;  %v6556_v1 = vmax.f32 %v6555_v49, 0.0  ;;  %v4124_v42 = vrot.slane %v6559_v32, 9  ;;  %v6564_v61 = vld [vmem:[#allocation57_spill] sm:$0xff]  ;;  %v4144_v32 = vrot.slane %v6567_v7, 9 }
 0x17f   : > { %6546 = vst [vmem:[#allocation193_spill] sm:$0xff] %v4096_v39  ;;  %v4108_v51 = vrot.slane %v6552_v34, 9  ;;  %v6557_v39 = vld [vmem:[#allocation54_spill] sm:$0xff]  ;;  %v4128_v34 = vrot.slane %v6561_v6, 9  ;;  %v6565_v49 = vmax.f32 %v6564_v61, 0.0  ;;  %v6573_v61 = vmax.f32 %v3516_v15, 0.0 }
 0x180   : > { %v4116_v5 = vrot.slane %v6556_v1, 9  ;;  %v6558_v26 = vmax.f32 %v6557_v39, 0.0  ;;  %6560 = vst [vmem:[#allocation195_spill] sm:$0xff] %v4124_v42  ;;  %v6566_v39 = vmax.f32 %v6327_v10, 0.0  ;;  %v6568_v42 = vld [vmem:[#allocation59_spill] sm:$0xff]  ;;  %v6574_v10 = vmax.f32 %v6331_v16, 0.0 }
 0x181   : > { %6562 = vst [vmem:[#allocation196_spill] sm:$0xff] %v4128_v34  ;;  %v4136_v1 = vrot.slane %v6565_v49, 9  ;;  %v6569_v8 = vmax.f32 %v6568_v42, 0.0  ;;  %v6571_v34 = vld [vmem:[#allocation60_spill] sm:$0xff]  ;;  %v4156_v49 = vrot.slane %v6573_v61, 9  ;;  %v4164_v7 = vrot.slane %v6575_v11, 9 }
 0x182   : > { %v4120_v53 = vrot.slane %v6558_v26, 9  ;;  %v4140_v26 = vrot.slane %v6566_v39, 9  ;;  %v6572_v14 = vmax.f32 %v6571_v34, 0.0  ;;  %v4160_v39 = vrot.slane %v6574_v10, 9 }
 0x183   : > { %v4148_v6 = vrot.slane %v6569_v8, 9  ;;  %v6576_v42 = vmax.f32 %v3528_v18, 0.0  ;;  %v6579_v15 = vmax.f32 %v3536_v23, 0.0  ;;  %v6580_v16 = vmax.f32 %v6333_v9, 0.0 }
 0x184   : > { %v4152_v3 = vrot.slane %v6572_v14, 9  ;;  %v6581_v17 = vmax.f32 %v3544_v63, 0.0  ;;  %v6582_v18 = vmax.f32 %v3548_v50, 0.0  ;;  %v6584_v23 = vmax.f32 %v6335_v2, 0.0 }
 0x185   : > { %6570 = vst [vmem:[#allocation197_spill] sm:$0xff] %v4148_v6  ;;  %v4168_v8 = vrot.slane %v6576_v42, 9  ;;  %v6577_v6 = vld [vmem:[#allocation65_spill] sm:$0xff]  ;;  %v4176_v61 = vrot.slane %v6579_v15, 9  ;;  %v4180_v10 = vrot.slane %v6580_v16, 9  ;;  %v6585_v9 = vmax.f32 %v3560_v52, 0.0 }
 0x186   : > { %v6578_v34 = vmax.f32 %v6577_v6, 0.0  ;;  %v4184_v11 = vrot.slane %v6581_v17, 9  ;;  %v4188_v42 = vrot.slane %v6582_v18, 9  ;;  %v6583_v6 = vmax.f32 %v6334_v12, 0.0 }
 0x187   : > { %v4196_v15 = vrot.slane %v6584_v23, 9  ;;  %v4200_v16 = vrot.slane %v6585_v9, 9  ;;  %v6587_v63 = vmax.f32 %v3564_v27, 0.0  ;;  %v6589_v50 = vmax.f32 %v3568_v62, 0.0 }
 0x188   : > { %v4172_v14 = vrot.slane %v6578_v34, 9  ;;  %v4192_v34 = vrot.slane %v6583_v6, 9  ;;  %v6591_v12 = vmax.f32 %v3572_v38, 0.0  ;;  %v6593_v2 = vmax.f32 %v6336_v19, 0.0 }
 0x189   : > { %6586 = vst [vmem:[#allocation198_spill] sm:$0xff] %v4200_v16  ;;  %v4204_v17 = vrot.slane %v6587_v63, 9  ;;  %v4208_v18 = vrot.slane %v6589_v50, 9  ;;  %v6595_v52 = vmax.f32 %v3580_v24, 0.0  ;;  %v6596_v16 = vld [vmem:[#allocation113_spill] sm:$0xff] }
 0x18a   : > { %v4212_v6 = vrot.slane %v6591_v12, 9  ;;  %v4216_v23 = vrot.slane %v6593_v2, 9  ;;  %v6597_v27 = vmax.f32 %v6596_v16, 0.0  ;;  %v6607_v16 = vmax.f32 %v3604_v29, 0.0 }
 0x18b   : > { %6588 = vst [vmem:[#allocation199_spill] sm:$0xff] %v4204_v17  ;;  %v4220_v9 = vrot.slane %v6595_v52, 9  ;;  %v6598_v17 = vld [vmem:[#allocation114_spill] sm:$0xff]  ;;  %v6613_v29 = vmax.f32 %v3624_v57, 0.0  ;;  %v6619_v57 = vmax.f32 %v6341_v13, 0.0 }
 0x18c   : > { %6590 = vst [vmem:[#allocation200_spill] sm:$0xff] %v4208_v18  ;;  %v4224_v63 = vrot.slane %v6597_v27, 9  ;;  %v6599_v62 = vmax.f32 %v6598_v17, 0.0  ;;  %v6601_v18 = vld [vmem:[#allocation115_spill] sm:$0xff]  ;;  %v4244_v27 = vrot.slane %v6607_v16, 9  ;;  %v6608_v17 = vmax.f32 %v3608_v30, 0.0 }
 0x18d   : > { %6592 = vst [vmem:[#allocation201_spill] sm:$0xff] %v4212_v6  ;;  %v6602_v38 = vmax.f32 %v6601_v18, 0.0  ;;  %v6603_v6 = vld [vmem:[#allocation116_spill] sm:$0xff]  ;;  %v4264_v16 = vrot.slane %v6613_v29, 9  ;;  %v6614_v30 = vmax.f32 %v6337_v35, 0.0  ;;  %v4284_v29 = vrot.slane %v6619_v57, 9 }
 0x18e   : > { %6594 = vst [vmem:[#allocation202_spill] sm:$0xff] %v4216_v23  ;;  %v4228_v50 = vrot.slane %v6599_v62, 9  ;;  %v6604_v19 = vmax.f32 %v6603_v6, 0.0  ;;  %v6605_v23 = vld [vmem:[#allocation72_spill] sm:$0xff]  ;;  %v4248_v62 = vrot.slane %v6608_v17, 9  ;;  %v6611_v6 = vmax.f32 %v3616_v36, 0.0 }
 0x18f   : > { %v4232_v12 = vrot.slane %v6602_v38, 9  ;;  %v6606_v24 = vmax.f32 %v6605_v23, 0.0  ;;  %v6612_v23 = vmax.f32 %v3620_v60, 0.0  ;;  %v4268_v17 = vrot.slane %v6614_v30, 9  ;;  %v6630_v57 = vld [vmem:[#allocation75_spill] sm:$0xff] }
 0x190   : > { %6600 = vst [vmem:[#allocation203_spill] sm:$0xff] %v4228_v50  ;;  %v4236_v2 = vrot.slane %v6604_v19, 9  ;;  %v6609_v50 = vld [vmem:[#allocation119_spill] sm:$0xff]  ;;  %v4256_v19 = vrot.slane %v6611_v6, 9  ;;  %v6616_v36 = vmax.f32 %v6339_v22, 0.0  ;;  %v6618_v60 = vmax.f32 %v6340_v31, 0.0 }
 0x191   : > { %v4240_v52 = vrot.slane %v6606_v24, 9  ;;  %v6610_v18 = vmax.f32 %v6609_v50, 0.0  ;;  %v4260_v24 = vrot.slane %v6612_v23, 9  ;;  %v6615_v50 = vmax.f32 %v6338_v21, 0.0 }
 0x192   : > { %v4276_v6 = vrot.slane %v6616_v36, 9  ;;  %v4280_v23 = vrot.slane %v6618_v60, 9  ;;  %v6620_v35 = vmax.f32 %v3648_v28, 0.0  ;;  %v6624_v36 = vld [vmem:[#allocation73_spill] sm:$0xff]  ;;  %v6627_v60 = vld [vmem:[#allocation74_spill] sm:$0xff]  ;;  %v6631_v28 = vmax.f32 %v6630_v57, 0.0 }
 0x193   : > { %v4252_v38 = vrot.slane %v6610_v18, 9  ;;  %v4272_v18 = vrot.slane %v6615_v50, 9  ;;  %v6622_v50 = vmax.f32 %v3140_v46, 0.0  ;;  %v6625_v22 = vmax.f32 %v6624_v36, 0.0 }
 0x194   : > { %6617 = vst [vmem:[#allocation204_spill] sm:$0xff] %v4276_v6  ;;  %v4288_v30 = vrot.slane %v6620_v35, 9  ;;  %v6628_v31 = vmax.f32 %v6627_v60, 0.0  ;;  %v4308_v35 = vmax.f32 %v6631_v28, %v3792_v47  ;;  %v6645_v47 = vld [vmem:[#allocation83_spill] sm:$0xff] }
 0x195   : > { %v4293_v21 = vmax.f32 %v6622_v50, %v3780_v43  ;;  %v4298_v6 = vmax.f32 %v6625_v22, %v3784_v58  ;;  %v6636_v50 = vld [vmem:[#allocation80_spill] sm:$0xff]  ;;  %v6639_v58 = vld [vmem:[#allocation81_spill] sm:$0xff] }
 0x196   : > { %6621 = vst [vmem:[#allocation205_spill] sm:$0xff] %v4288_v30  ;;  %v4303_v13 = vmax.f32 %v6628_v31, %v3788_v20  ;;  %v6633_v30 = vld [vmem:[#allocation76_spill] sm:$0xff]  ;;  %v6637_v36 = vmax.f32 %v6636_v50, 0.0  ;;  %v6640_v60 = vmax.f32 %v6639_v58, 0.0  ;;  %v6642_v20 = vld [vmem:[#allocation82_spill] sm:$0xff] }
 0x197   : > { %6623 = vst [vmem:[#allocation206_spill] sm:$0xff] %v4293_v21  ;;  %v6634_v46 = vmax.f32 %v6633_v30, 0.0  ;;  %v6643_v57 = vmax.f32 %v6642_v20, 0.0  ;;  %v6646_v30 = vmax.f32 %v6645_v47, 0.0 }
 0x198   : > { %6626 = vst [vmem:[#allocation73_spill] sm:$0xff] %v4298_v6  ;;  %v4318_v22 = vmax.f32 %v6637_v36, %v3800_v44  ;;  %v4323_v31 = vmax.f32 %v6640_v60, %v3804_v55  ;;  %v6651_v36 = vld [vmem:[#allocation129_spill] sm:$0xff]  ;;  %v6655_v60 = vld [vmem:[#allocation130_spill] sm:$0xff] }
 0x199   : > { %6629 = vst [vmem:[#allocation74_spill] sm:$0xff] %v4303_v13  ;;  %v4313_v43 = vmax.f32 %v6634_v46, %v3796_v25  ;;  %v4328_v28 = vmax.f32 %v6643_v57, %v3808_v40  ;;  %v4333_v25 = vmax.f32 %v6646_v30, %v3812_v37  ;;  %v6648_v46 = vld [vmem:[#allocation84_spill] sm:$0xff]  ;;  %v6659_v57 = vld [vmem:[#allocation131_spill] sm:$0xff]  ;;  %v6672_v13 = vld [vmem:[#allocation90_spill] sm:$0xff] }
 0x19a   : > { %6632 = vst [vmem:[#allocation75_spill] sm:$0xff] %v4308_v35  ;;  %v6649_v50 = vmax.f32 %v6648_v46, 0.0  ;;  %v6663_v30 = vld [vmem:[#allocation132_spill] sm:$0xff]  ;;  %v6668_v35 = vld [vmem:[#allocation89_spill] sm:$0xff] }
 0x19b   : > { %6635 = vst [vmem:[#allocation76_spill] sm:$0xff] %v4313_v43  ;;  %v6664_v43 = vld [vmem:[#allocation88_spill] sm:$0xff] }
 0x19c   : > { %6638 = vst [vmem:[#allocation80_spill] sm:$0xff] %v4318_v22  ;;  %v4338_v44 = vmax.f32 %v6649_v50, %v3816_v33  ;;  %v6652_v22 = vld [vmem:[#allocation85_spill] sm:$0xff]  ;;  %v6665_v46 = vmax.f32 %v6664_v43, 0.0 }
 0x19d   : > { %6641 = vst [vmem:[#allocation81_spill] sm:$0xff] %v4323_v31  ;;  %v6653_v58 = vmax.f32 %v6652_v22, 0.0  ;;  %v6656_v31 = vld [vmem:[#allocation86_spill] sm:$0xff]  ;;  %v6667_v50 = vld [vmem:[#allocation133_spill] sm:$0xff]  ;;  %v6669_v22 = vmax.f32 %v6668_v35, 0.0 }
 0x19e   : > { %6644 = vst [vmem:[#allocation82_spill] sm:$0xff] %v4328_v28  ;;  %v6657_v20 = vmax.f32 %v6656_v31, 0.0  ;;  %v6660_v28 = vld [vmem:[#allocation87_spill] sm:$0xff]  ;;  %v4358_v33 = vmax.f32 %v6665_v46, %v6663_v30  ;;  %v6673_v31 = vmax.f32 %v6672_v13, 0.0  ;;  %v6683_v46 = vld [vmem:[#allocation137_spill] sm:$0xff] }
 0x19f   : > { %6647 = vst [vmem:[#allocation83_spill] sm:$0xff] %v4333_v25  ;;  %v4343_v55 = vmax.f32 %v6653_v58, %v6651_v36  ;;  %v6661_v47 = vmax.f32 %v6660_v28, 0.0  ;;  %v4363_v36 = vmax.f32 %v6669_v22, %v6667_v50  ;;  %v6671_v58 = vld [vmem:[#allocation134_spill] sm:$0xff] }
 0x1a0   : > { %6650 = vst [vmem:[#allocation84_spill] sm:$0xff] %v4338_v44  ;;  %v4348_v40 = vmax.f32 %v6657_v20, %v6655_v60  ;;  %v4368_v60 = vmax.f32 %v6673_v31, %v6671_v58  ;;  %v6675_v20 = vld [vmem:[#allocation135_spill] sm:$0xff]  ;;  %v6687_v22 = vld [vmem:[#allocation138_spill] sm:$0xff] }
 0x1a1   : > { %6654 = vst [vmem:[#allocation129_spill] sm:$0xff] %v4343_v55  ;;  %v4353_v37 = vmax.f32 %v6661_v47, %v6659_v57  ;;  %v6679_v47 = vld [vmem:[#allocation136_spill] sm:$0xff]  ;;  %v6691_v31 = vld [vmem:[#allocation139_spill] sm:$0xff] }
 0x1a2   : > { %6658 = vst [vmem:[#allocation85_spill] sm:$0xff] %v4348_v40  ;;  %v6676_v40 = vld [vmem:[#allocation91_spill] sm:$0xff] }
 0x1a3   : > { %6662 = vst [vmem:[#allocation130_spill] sm:$0xff] %v4353_v37  ;;  %v6677_v28 = vmax.f32 %v6676_v40, 0.0  ;;  %v6680_v37 = vld [vmem:[#allocation92_spill] sm:$0xff] }
 0x1a4   : > { %6666 = vst [vmem:[#allocation86_spill] sm:$0xff] %v4358_v33  ;;  %v6681_v43 = vmax.f32 %v6680_v37, 0.0  ;;  %v6684_v33 = vld [vmem:[#allocation93_spill] sm:$0xff] }
 0x1a5   : > { %6670 = vst [vmem:[#allocation131_spill] sm:$0xff] %v4363_v36  ;;  %v4373_v57 = vmax.f32 %v6677_v28, %v6675_v20  ;;  %v6685_v35 = vmax.f32 %v6684_v33, 0.0  ;;  %v6688_v36 = vld [vmem:[#allocation94_spill] sm:$0xff]  ;;  %v6695_v28 = vld [vmem:[#allocation140_spill] sm:$0xff] }
 0x1a6   : > { %6674 = vst [vmem:[#allocation87_spill] sm:$0xff] %v4368_v60  ;;  %v4378_v30 = vmax.f32 %v6681_v43, %v6679_v47  ;;  %v6689_v13 = vmax.f32 %v6688_v36, 0.0  ;;  %v6692_v60 = vld [vmem:[#allocation95_spill] sm:$0xff]  ;;  %v6699_v43 = vld [vmem:[#allocation141_spill] sm:$0xff] }
 0x1a7   : > { %6678 = vst [vmem:[#allocation132_spill] sm:$0xff] %v4373_v57  ;;  %v4383_v50 = vmax.f32 %v6685_v35, %v6683_v46  ;;  %v6693_v40 = vmax.f32 %v6692_v60, 0.0  ;;  %v6696_v57 = vld [vmem:[#allocation96_spill] sm:$0xff]  ;;  %v6703_v35 = vld [vmem:[#allocation142_spill] sm:$0xff] }
 0x1a8   : > { %6682 = vst [vmem:[#allocation88_spill] sm:$0xff] %v4378_v30  ;;  %v4388_v58 = vmax.f32 %v6689_v13, %v6687_v22  ;;  %v6697_v37 = vmax.f32 %v6696_v57, 0.0  ;;  %v6700_v30 = vld [vmem:[#allocation97_spill] sm:$0xff]  ;;  %v6707_v13 = vld [vmem:[#allocation143_spill] sm:$0xff] }
 0x1a9   : > { %6686 = vst [vmem:[#allocation133_spill] sm:$0xff] %v4383_v50  ;;  %v4393_v20 = vmax.f32 %v6693_v40, %v6691_v31  ;;  %v6701_v33 = vmax.f32 %v6700_v30, 0.0  ;;  %v6704_v50 = vld [vmem:[#allocation98_spill] sm:$0xff]  ;;  %v6711_v40 = vld [vmem:[#allocation144_spill] sm:$0xff] }
 0x1aa   : > { %6690 = vst [vmem:[#allocation89_spill] sm:$0xff] %v4388_v58  ;;  %v4398_v47 = vmax.f32 %v6697_v37, %v6695_v28  ;;  %v6705_v36 = vmax.f32 %v6704_v50, 0.0  ;;  %v6708_v58 = vld [vmem:[#allocation99_spill] sm:$0xff]  ;;  %v6715_v37 = vld [vmem:[#allocation145_spill] sm:$0xff] }
 0x1ab   : > { %6694 = vst [vmem:[#allocation134_spill] sm:$0xff] %v4393_v20  ;;  %v4403_v46 = vmax.f32 %v6701_v33, %v6699_v43  ;;  %v6709_v60 = vmax.f32 %v6708_v58, 0.0  ;;  %v6712_v20 = vld [vmem:[#allocation100_spill] sm:$0xff]  ;;  %v6719_v33 = vld [vmem:[#allocation146_spill] sm:$0xff] }
 0x1ac   : > { %6698 = vst [vmem:[#allocation90_spill] sm:$0xff] %v4398_v47  ;;  %v4408_v22 = vmax.f32 %v6705_v36, %v6703_v35  ;;  %v6713_v57 = vmax.f32 %v6712_v20, 0.0  ;;  %v6716_v47 = vld [vmem:[#allocation101_spill] sm:$0xff]  ;;  %v6723_v36 = vld [vmem:[#allocation147_spill] sm:$0xff] }
 0x1ad   : > { %6702 = vst [vmem:[#allocation135_spill] sm:$0xff] %v4403_v46  ;;  %v4413_v31 = vmax.f32 %v6709_v60, %v6707_v13  ;;  %v6717_v30 = vmax.f32 %v6716_v47, 0.0  ;;  %v6720_v46 = vld [vmem:[#allocation102_spill] sm:$0xff]  ;;  %v6727_v60 = vld [vmem:[#allocation148_spill] sm:$0xff] }
 0x1ae   : > { %6706 = vst [vmem:[#allocation91_spill] sm:$0xff] %v4408_v22  ;;  %v4418_v28 = vmax.f32 %v6713_v57, %v6711_v40  ;;  %v6721_v50 = vmax.f32 %v6720_v46, 0.0  ;;  %v6724_v22 = vld [vmem:[#allocation77_spill] sm:$0xff] }
 0x1af   : > { %6710 = vst [vmem:[#allocation136_spill] sm:$0xff] %v4413_v31  ;;  %v4423_v43 = vmax.f32 %v6717_v30, %v6715_v37  ;;  %v6725_v58 = vmax.f32 %v6724_v22, 0.0  ;;  %v6728_v31 = vld [vmem:[#allocation78_spill] sm:$0xff]  ;;  %v6731_v57 = vld [vmem:[#allocation149_spill] sm:$0xff] }
 0x1b0   : > { %6714 = vst [vmem:[#allocation92_spill] sm:$0xff] %v4418_v28  ;;  %v4428_v35 = vmax.f32 %v6721_v50, %v6719_v33  ;;  %v6729_v20 = vmax.f32 %v6728_v31, 0.0  ;;  %v6732_v28 = vld [vmem:[#allocation79_spill] sm:$0xff]  ;;  %v6735_v30 = vld [vmem:[#allocation150_spill] sm:$0xff] }
 0x1b1   : > { %6718 = vst [vmem:[#allocation137_spill] sm:$0xff] %v4423_v43  ;;  %v4433_v13 = vmax.f32 %v6725_v58, %v6723_v36  ;;  %v6733_v47 = vmax.f32 %v6732_v28, 0.0  ;;  %v6736_v43 = vld [vmem:[#allocation2_spill] sm:$0xff]  ;;  %v6739_v50 = vld [vmem:[#allocation151_spill] sm:$0xff]  ;;  %v6743_v58 = vld [vmem:[#allocation152_spill] sm:$0xff] }
 0x1b2   : > { %6722 = vst [vmem:[#allocation93_spill] sm:$0xff] %v4428_v35  ;;  %v4438_v40 = vmax.f32 %v6729_v20, %v6727_v60  ;;  %v6737_v46 = vmax.f32 %v6736_v43, 0.0  ;;  %v6740_v35 = vld [vmem:[#allocation3_spill] sm:$0xff]  ;;  %v6747_v20 = vld [vmem:[#allocation153_spill] sm:$0xff] }
 0x1b3   : > { %6726 = vst [vmem:[#allocation138_spill] sm:$0xff] %v4433_v13  ;;  %v4443_v37 = vmax.f32 %v6733_v47, %v6731_v57  ;;  %v6741_v22 = vmax.f32 %v6740_v35, 0.0  ;;  %v6744_v13 = vld [vmem:[#allocation4_spill] sm:$0xff]  ;;  %v6751_v47 = vld [vmem:[#allocation154_spill] sm:$0xff] }
 0x1b4   : > { %6730 = vst [vmem:[#allocation94_spill] sm:$0xff] %v4438_v40  ;;  %v4448_v33 = vmax.f32 %v6737_v46, %v6735_v30  ;;  %v6745_v31 = vmax.f32 %v6744_v13, 0.0  ;;  %v6748_v40 = vld [vmem:[#allocation5_spill] sm:$0xff]  ;;  %v6755_v46 = vld [vmem:[#allocation155_spill] sm:$0xff] }
 0x1b5   : > { %6734 = vst [vmem:[#allocation139_spill] sm:$0xff] %v4443_v37  ;;  %v4453_v36 = vmax.f32 %v6741_v22, %v6739_v50  ;;  %v6749_v28 = vmax.f32 %v6748_v40, 0.0  ;;  %v6752_v37 = vld [vmem:[#allocation6_spill] sm:$0xff]  ;;  %v6759_v22 = vld [vmem:[#allocation156_spill] sm:$0xff] }
 0x1b6   : > { %6738 = vst [vmem:[#allocation95_spill] sm:$0xff] %v4448_v33  ;;  %v4458_v60 = vmax.f32 %v6745_v31, %v6743_v58  ;;  %v6753_v43 = vmax.f32 %v6752_v37, 0.0  ;;  %v6756_v33 = vld [vmem:[#allocation7_spill] sm:$0xff]  ;;  %v6763_v31 = vld [vmem:[#allocation157_spill] sm:$0xff] }
 0x1b7   : > { %6742 = vst [vmem:[#allocation140_spill] sm:$0xff] %v4453_v36  ;;  %v4463_v57 = vmax.f32 %v6749_v28, %v6747_v20  ;;  %v6757_v35 = vmax.f32 %v6756_v33, 0.0  ;;  %v6760_v36 = vld [vmem:[#allocation8_spill] sm:$0xff]  ;;  %v6767_v28 = vld [vmem:[#allocation158_spill] sm:$0xff] }
 0x1b8   : > { %6746 = vst [vmem:[#allocation96_spill] sm:$0xff] %v4458_v60  ;;  %v4468_v30 = vmax.f32 %v6753_v43, %v6751_v47  ;;  %v6761_v13 = vmax.f32 %v6760_v36, 0.0  ;;  %v6764_v60 = vld [vmem:[#allocation9_spill] sm:$0xff]  ;;  %v6771_v43 = vld [vmem:[#allocation159_spill] sm:$0xff] }
 0x1b9   : > { %6750 = vst [vmem:[#allocation141_spill] sm:$0xff] %v4463_v57  ;;  %v4473_v50 = vmax.f32 %v6757_v35, %v6755_v46  ;;  %v6765_v40 = vmax.f32 %v6764_v60, 0.0  ;;  %v6768_v57 = vld [vmem:[#allocation10_spill] sm:$0xff]  ;;  %v6775_v35 = vld [vmem:[#allocation160_spill] sm:$0xff] }
 0x1ba   : > { %6754 = vst [vmem:[#allocation97_spill] sm:$0xff] %v4468_v30  ;;  %v4478_v58 = vmax.f32 %v6761_v13, %v6759_v22  ;;  %v6769_v37 = vmax.f32 %v6768_v57, 0.0  ;;  %v6772_v30 = vld [vmem:[#allocation11_spill] sm:$0xff]  ;;  %v6779_v13 = vld [vmem:[#allocation161_spill] sm:$0xff] }
 0x1bb   : > { %6758 = vst [vmem:[#allocation142_spill] sm:$0xff] %v4473_v50  ;;  %v4483_v20 = vmax.f32 %v6765_v40, %v6763_v31  ;;  %v6773_v33 = vmax.f32 %v6772_v30, 0.0  ;;  %v6776_v50 = vld [vmem:[#allocation12_spill] sm:$0xff]  ;;  %v6783_v40 = vld [vmem:[#allocation162_spill] sm:$0xff] }
 0x1bc   : > { %6762 = vst [vmem:[#allocation98_spill] sm:$0xff] %v4478_v58  ;;  %v4488_v47 = vmax.f32 %v6769_v37, %v6767_v28  ;;  %v6777_v36 = vmax.f32 %v6776_v50, 0.0  ;;  %v6780_v58 = vld [vmem:[#allocation13_spill] sm:$0xff]  ;;  %v6787_v37 = vld [vmem:[#allocation163_spill] sm:$0xff] }
 0x1bd   : > { %6766 = vst [vmem:[#allocation143_spill] sm:$0xff] %v4483_v20  ;;  %v4493_v46 = vmax.f32 %v6773_v33, %v6771_v43  ;;  %v6781_v60 = vmax.f32 %v6780_v58, 0.0  ;;  %v6784_v20 = vld [vmem:[#allocation14_spill] sm:$0xff]  ;;  %v6791_v33 = vld [vmem:[#allocation164_spill] sm:$0xff] }
 0x1be   : > { %6770 = vst [vmem:[#allocation99_spill] sm:$0xff] %v4488_v47  ;;  %v4498_v22 = vmax.f32 %v6777_v36, %v6775_v35  ;;  %v6785_v57 = vmax.f32 %v6784_v20, 0.0  ;;  %v6788_v47 = vld [vmem:[#allocation15_spill] sm:$0xff]  ;;  %v6795_v36 = vld [vmem:[#allocation165_spill] sm:$0xff]  ;;  %v7087_v55 = vld [vmem:[#allocation140_spill] sm:$0xff] }
 0x1bf   : > { %6774 = vst [vmem:[#allocation144_spill] sm:$0xff] %v4493_v46  ;;  %v4503_v31 = vmax.f32 %v6781_v60, %v6779_v13  ;;  %v6789_v30 = vmax.f32 %v6788_v47, 0.0  ;;  %v6792_v46 = vld [vmem:[#allocation16_spill] sm:$0xff]  ;;  %v6799_v60 = vld [vmem:[#allocation166_spill] sm:$0xff] }
 0x1c0   : > { %6778 = vst [vmem:[#allocation100_spill] sm:$0xff] %v4498_v22  ;;  %v4508_v28 = vmax.f32 %v6785_v57, %v6783_v40  ;;  %v6793_v50 = vmax.f32 %v6792_v46, 0.0  ;;  %v6796_v22 = vld [vmem:[#allocation17_spill] sm:$0xff]  ;;  %v6803_v57 = vld [vmem:[#allocation167_spill] sm:$0xff] }
 0x1c1   : > { %6782 = vst [vmem:[#allocation145_spill] sm:$0xff] %v4503_v31  ;;  %v4513_v43 = vmax.f32 %v6789_v30, %v6787_v37  ;;  %v6797_v58 = vmax.f32 %v6796_v22, 0.0  ;;  %v6800_v31 = vld [vmem:[#allocation18_spill] sm:$0xff]  ;;  %v6807_v30 = vld [vmem:[#allocation168_spill] sm:$0xff] }
 0x1c2   : > { %6786 = vst [vmem:[#allocation101_spill] sm:$0xff] %v4508_v28  ;;  %v4518_v35 = vmax.f32 %v6793_v50, %v6791_v33  ;;  %v6801_v20 = vmax.f32 %v6800_v31, 0.0  ;;  %v6804_v28 = vld [vmem:[#allocation19_spill] sm:$0xff]  ;;  %v6811_v50 = vld [vmem:[#allocation169_spill] sm:$0xff] }
 0x1c3   : > { %6790 = vst [vmem:[#allocation146_spill] sm:$0xff] %v4513_v43  ;;  %v4523_v13 = vmax.f32 %v6797_v58, %v6795_v36  ;;  %v6805_v47 = vmax.f32 %v6804_v28, 0.0  ;;  %v6808_v43 = vld [vmem:[#allocation20_spill] sm:$0xff]  ;;  %v6815_v58 = vld [vmem:[#allocation170_spill] sm:$0xff] }
 0x1c4   : > { %6794 = vst [vmem:[#allocation102_spill] sm:$0xff] %v4518_v35  ;;  %v4528_v40 = vmax.f32 %v6801_v20, %v6799_v60  ;;  %v6809_v46 = vmax.f32 %v6808_v43, 0.0  ;;  %v6812_v35 = vld [vmem:[#allocation21_spill] sm:$0xff]  ;;  %v6819_v20 = vld [vmem:[#allocation171_spill] sm:$0xff] }
 0x1c5   : > { %6798 = vst [vmem:[#allocation147_spill] sm:$0xff] %v4523_v13  ;;  %v4533_v37 = vmax.f32 %v6805_v47, %v6803_v57  ;;  %v6813_v22 = vmax.f32 %v6812_v35, 0.0  ;;  %v6816_v13 = vld [vmem:[#allocation22_spill] sm:$0xff]  ;;  %v6823_v47 = vld [vmem:[#allocation172_spill] sm:$0xff]  ;;  %v7101_v6 = vld [vmem:[#allocation99_spill] sm:$0xff] }
 0x1c6   : > { %6802 = vst [vmem:[#allocation77_spill] sm:$0xff] %v4528_v40  ;;  %v4538_v33 = vmax.f32 %v6809_v46, %v6807_v30  ;;  %v6817_v31 = vmax.f32 %v6816_v13, 0.0  ;;  %v6820_v40 = vld [vmem:[#allocation23_spill] sm:$0xff]  ;;  %v6827_v46 = vld [vmem:[#allocation173_spill] sm:$0xff] }
 0x1c7   : > { %6806 = vst [vmem:[#allocation148_spill] sm:$0xff] %v4533_v37  ;;  %v4543_v36 = vmax.f32 %v6813_v22, %v6811_v50  ;;  %v6821_v28 = vmax.f32 %v6820_v40, 0.0  ;;  %v6824_v37 = vld [vmem:[#allocation24_spill] sm:$0xff]  ;;  %v6831_v22 = vld [vmem:[#allocation174_spill] sm:$0xff] }
 0x1c8   : > { %6810 = vst [vmem:[#allocation78_spill] sm:$0xff] %v4538_v33  ;;  %v4548_v60 = vmax.f32 %v6817_v31, %v6815_v58  ;;  %v6825_v43 = vmax.f32 %v6824_v37, 0.0  ;;  %v6828_v33 = vld [vmem:[#allocation25_spill] sm:$0xff]  ;;  %v6835_v31 = vld [vmem:[#allocation27_spill] sm:$0xff] }
 0x1c9   : > { %6814 = vst [vmem:[#allocation149_spill] sm:$0xff] %v4543_v36  ;;  %v4553_v57 = vmax.f32 %v6821_v28, %v6819_v20  ;;  %v6829_v35 = vmax.f32 %v6828_v33, 0.0  ;;  %v6832_v36 = vld [vmem:[#allocation26_spill] sm:$0xff]  ;;  %v6836_v40 = vmax.f32 %v6835_v31, 0.0  ;;  %v6838_v28 = vld [vmem:[#allocation175_spill] sm:$0xff] }
 0x1ca   : > { %6818 = vst [vmem:[#allocation79_spill] sm:$0xff] %v4548_v60  ;;  %v4558_v30 = vmax.f32 %v6825_v43, %v6823_v47  ;;  %v6833_v13 = vmax.f32 %v6832_v36, 0.0  ;;  %v6842_v43 = vld [vmem:[#allocation176_spill] sm:$0xff]  ;;  %v6858_v60 = vld [vmem:[#allocation33_spill] sm:$0xff] }
 0x1cb   : > { %6822 = vst [vmem:[#allocation150_spill] sm:$0xff] %v4553_v57  ;;  %v4563_v50 = vmax.f32 %v6829_v35, %v6827_v46  ;;  %v4573_v20 = vmax.f32 %v6836_v40, %v4004_v0  ;;  %v6839_v57 = vld [vmem:[#allocation28_spill] sm:$0xff]  ;;  %v6846_v35 = vld [vmem:[#allocation177_spill] sm:$0xff]  ;;  %v6853_v40 = vld [vmem:[#allocation178_spill] sm:$0xff] }
 0x1cc   : > { %6826 = vst [vmem:[#allocation2_spill] sm:$0xff] %v4558_v30  ;;  %v4568_v58 = vmax.f32 %v6833_v13, %v6831_v22  ;;  %v6840_v37 = vmax.f32 %v6839_v57, 0.0  ;;  %v6843_v30 = vld [vmem:[#allocation29_spill] sm:$0xff]  ;;  %v6850_v13 = vld [vmem:[#allocation31_spill] sm:$0xff] }
 0x1cd   : > { %6830 = vst [vmem:[#allocation151_spill] sm:$0xff] %v4563_v50  ;;  %v6844_v33 = vmax.f32 %v6843_v30, 0.0  ;;  %v6847_v50 = vld [vmem:[#allocation30_spill] sm:$0xff]  ;;  %v6851_v31 = vmax.f32 %v6850_v13, 0.0  ;;  %v6859_v30 = vmax.f32 %v6858_v60, 0.0 }
 0x1ce   : > { %6834 = vst [vmem:[#allocation3_spill] sm:$0xff] %v4568_v58  ;;  %v4578_v47 = vmax.f32 %v6840_v37, %v6838_v28  ;;  %v6848_v36 = vmax.f32 %v6847_v50, 0.0  ;;  %v6854_v58 = vld [vmem:[#allocation32_spill] sm:$0xff]  ;;  %v6857_v37 = vld [vmem:[#allocation179_spill] sm:$0xff] }
 0x1cf   : > { %6837 = vst [vmem:[#allocation152_spill] sm:$0xff] %v4573_v20  ;;  %v4583_v46 = vmax.f32 %v6844_v33, %v6842_v43  ;;  %v4593_v0 = vmax.f32 %v6851_v31, %v4020_v45  ;;  %v6855_v57 = vmax.f32 %v6854_v58, 0.0  ;;  %v4603_v43 = vmax.f32 %v6859_v30, %v6857_v37  ;;  %v6861_v33 = vld [vmem:[#allocation180_spill] sm:$0xff]  ;;  %v6868_v31 = vld [vmem:[#allocation181_spill] sm:$0xff]  ;;  %v6876_v30 = vld [vmem:[#allocation183_spill] sm:$0xff] }
 0x1d0   : > { %6841 = vst [vmem:[#allocation4_spill] sm:$0xff] %v4578_v47  ;;  %v4588_v22 = vmax.f32 %v6848_v36, %v6846_v35  ;;  %v6865_v36 = vld [vmem:[#allocation35_spill] sm:$0xff] }
 0x1d1   : > { %6845 = vst [vmem:[#allocation153_spill] sm:$0xff] %v4583_v46  ;;  %v4598_v28 = vmax.f32 %v6855_v57, %v6853_v40  ;;  %v6862_v46 = vld [vmem:[#allocation34_spill] sm:$0xff]  ;;  %v6866_v13 = vmax.f32 %v6865_v36, 0.0 }
 0x1d2   : > { %6849 = vst [vmem:[#allocation5_spill] sm:$0xff] %v4588_v22  ;;  %v6863_v50 = vmax.f32 %v6862_v46, 0.0  ;;  %v6872_v57 = vld [vmem:[#allocation182_spill] sm:$0xff] }
 0x1d3   : > { %6852 = vst [vmem:[#allocation154_spill] sm:$0xff] %v4593_v0  ;;  %v4613_v45 = vmax.f32 %v6866_v13, %v4036_v54  ;;  %v6869_v0 = vld [vmem:[#allocation36_spill] sm:$0xff] }
 0x1d4   : > { %6856 = vst [vmem:[#allocation6_spill] sm:$0xff] %v4598_v28  ;;  %v4608_v35 = vmax.f32 %v6863_v50, %v6861_v33  ;;  %v6870_v58 = vmax.f32 %v6869_v0, 0.0  ;;  %v6873_v28 = vld [vmem:[#allocation37_spill] sm:$0xff]  ;;  %v6880_v50 = vld [vmem:[#allocation39_spill] sm:$0xff]  ;;  %v6883_v13 = vld [vmem:[#allocation184_spill] sm:$0xff] }
 0x1d5   : > { %6860 = vst [vmem:[#allocation155_spill] sm:$0xff] %v4603_v43  ;;  %v6874_v60 = vmax.f32 %v6873_v28, 0.0  ;;  %v6877_v43 = vld [vmem:[#allocation38_spill] sm:$0xff]  ;;  %v6881_v36 = vmax.f32 %v6880_v50, 0.0 }
 0x1d6   : > { %6864 = vst [vmem:[#allocation7_spill] sm:$0xff] %v4608_v35  ;;  %v4618_v40 = vmax.f32 %v6870_v58, %v6868_v31  ;;  %v6878_v46 = vmax.f32 %v6877_v43, 0.0  ;;  %v6887_v58 = vld [vmem:[#allocation185_spill] sm:$0xff] }
 0x1d7   : > { %6867 = vst [vmem:[#allocation156_spill] sm:$0xff] %v4613_v45  ;;  %v4623_v37 = vmax.f32 %v6874_v60, %v6872_v57  ;;  %v4633_v54 = vmax.f32 %v6881_v36, %v4052_v48  ;;  %v6884_v45 = vld [vmem:[#allocation40_spill] sm:$0xff]  ;;  %v6891_v60 = vld [vmem:[#allocation186_spill] sm:$0xff] }
 0x1d8   : > { %6871 = vst [vmem:[#allocation8_spill] sm:$0xff] %v4618_v40  ;;  %v4628_v33 = vmax.f32 %v6878_v46, %v6876_v30  ;;  %v6885_v0 = vmax.f32 %v6884_v45, 0.0  ;;  %v6888_v40 = vld [vmem:[#allocation41_spill] sm:$0xff]  ;;  %v6895_v46 = vld [vmem:[#allocation187_spill] sm:$0xff]  ;;  %v6899_v36 = vld [vmem:[#allocation188_spill] sm:$0xff] }
 0x1d9   : > { %6875 = vst [vmem:[#allocation157_spill] sm:$0xff] %v4623_v37  ;;  %v6889_v28 = vmax.f32 %v6888_v40, 0.0  ;;  %v6892_v37 = vld [vmem:[#allocation42_spill] sm:$0xff] }
 0x1da   : > { %6879 = vst [vmem:[#allocation9_spill] sm:$0xff] %v4628_v33  ;;  %v4638_v31 = vmax.f32 %v6885_v0, %v6883_v13  ;;  %v6893_v43 = vmax.f32 %v6892_v37, 0.0  ;;  %v6896_v33 = vld [vmem:[#allocation43_spill] sm:$0xff]  ;;  %v6903_v0 = vld [vmem:[#allocation189_spill] sm:$0xff] }
 0x1db   : > { %6882 = vst [vmem:[#allocation158_spill] sm:$0xff] %v4633_v54  ;;  %v4643_v57 = vmax.f32 %v6889_v28, %v6887_v58  ;;  %v6897_v50 = vmax.f32 %v6896_v33, 0.0  ;;  %v6900_v54 = vld [vmem:[#allocation44_spill] sm:$0xff]  ;;  %v6907_v28 = vld [vmem:[#allocation190_spill] sm:$0xff] }
 0x1dc   : > { %6886 = vst [vmem:[#allocation10_spill] sm:$0xff] %v4638_v31  ;;  %v4648_v30 = vmax.f32 %v6893_v43, %v6891_v60  ;;  %v6901_v45 = vmax.f32 %v6900_v54, 0.0  ;;  %v6904_v31 = vld [vmem:[#allocation45_spill] sm:$0xff]  ;;  %v6911_v43 = vld [vmem:[#allocation191_spill] sm:$0xff] }
 0x1dd   : > { %6890 = vst [vmem:[#allocation159_spill] sm:$0xff] %v4643_v57  ;;  %v4653_v48 = vmax.f32 %v6897_v50, %v6895_v46  ;;  %v6905_v40 = vmax.f32 %v6904_v31, 0.0  ;;  %v6908_v57 = vld [vmem:[#allocation46_spill] sm:$0xff]  ;;  %v6914_v50 = vld [vmem:[#allocation48_spill] sm:$0xff] }
 0x1de   : > { %6894 = vst [vmem:[#allocation11_spill] sm:$0xff] %v4648_v30  ;;  %v4658_v13 = vmax.f32 %v6901_v45, %v6899_v36  ;;  %v6909_v37 = vmax.f32 %v6908_v57, 0.0  ;;  %v6912_v30 = vld [vmem:[#allocation47_spill] sm:$0xff]  ;;  %v6915_v54 = vmax.f32 %v6914_v50, 0.0  ;;  %v6916_v45 = vld [vmem:[#allocation192_spill] sm:$0xff] }
 0x1df   : > { %6898 = vst [vmem:[#allocation160_spill] sm:$0xff] %v4653_v48  ;;  %v4663_v58 = vmax.f32 %v6905_v40, %v6903_v0  ;;  %v6913_v33 = vmax.f32 %v6912_v30, 0.0  ;;  %v6920_v40 = vld [vmem:[#allocation193_spill] sm:$0xff] }
 0x1e0   : > { %6902 = vst [vmem:[#allocation12_spill] sm:$0xff] %v4658_v13  ;;  %v4668_v60 = vmax.f32 %v6909_v37, %v6907_v28  ;;  %v4678_v36 = vmax.f32 %v6915_v54, %v4088_v59  ;;  %v6917_v13 = vld [vmem:[#allocation49_spill] sm:$0xff]  ;;  %v6923_v37 = vld [vmem:[#allocation50_spill] sm:$0xff]  ;;  %v6928_v54 = vld [vmem:[#allocation52_spill] sm:$0xff] }
 0x1e1   : > { %6906 = vst [vmem:[#allocation161_spill] sm:$0xff] %v4663_v58  ;;  %v4673_v46 = vmax.f32 %v6913_v33, %v6911_v43  ;;  %v6918_v31 = vmax.f32 %v6917_v13, 0.0  ;;  %v6921_v58 = vld [vmem:[#allocation103_spill] sm:$0xff]  ;;  %v6924_v30 = vmax.f32 %v6923_v37, 0.0  ;;  %v6929_v13 = vmax.f32 %v6928_v54, 0.0 }
 0x1e2   : > { %6910 = vst [vmem:[#allocation13_spill] sm:$0xff] %v4668_v60  ;;  %v6922_v57 = vmax.f32 %v6921_v58, 0.0  ;;  %v6925_v33 = vld [vmem:[#allocation51_spill] sm:$0xff]  ;;  %v7120_v25 = vld [vmem:[#allocation158_spill] sm:$0xff] }
 0x1e3   : > { %v4683_v0 = vmax.f32 %v6918_v31, %v6916_v45  ;;  %v4693_v43 = vmax.f32 %v6924_v30, %v4100_v41  ;;  %v6926_v50 = vmax.f32 %v6925_v33, 0.0  ;;  %v4703_v45 = vmax.f32 %v6929_v13, %v4108_v51  ;;  %v6931_v31 = vld [vmem:[#allocation194_spill] sm:$0xff]  ;;  %v6943_v13 = vld [vmem:[#allocation196_spill] sm:$0xff] }
 0x1e4   : > { %v4688_v28 = vmax.f32 %v6922_v57, %v6920_v40  ;;  %v6934_v57 = vld [vmem:[#allocation53_spill] sm:$0xff]  ;;  %v6936_v30 = vld [vmem:[#allocation54_spill] sm:$0xff]  ;;  %v7123_v20 = vld [vmem:[#allocation159_spill] sm:$0xff] }
 0x1e5   : > { %6919 = vst [vmem:[#allocation162_spill] sm:$0xff] %v4683_v0  ;;  %v4698_v59 = vmax.f32 %v6926_v50, %v4104_v56  ;;  %v6932_v0 = vld [vmem:[#allocation104_spill] sm:$0xff]  ;;  %v6935_v37 = vmax.f32 %v6934_v57, 0.0  ;;  %v6937_v33 = vmax.f32 %v6936_v30, 0.0  ;;  %v6939_v50 = vld [vmem:[#allocation195_spill] sm:$0xff]  ;;  %v7121_v44 = vld [vmem:[#allocation10_spill] sm:$0xff] }
 0x1e6   : > { %6930 = vst [vmem:[#allocation163_spill] sm:$0xff] %v4703_v45  ;;  %v6933_v58 = vmax.f32 %v6932_v0, 0.0  ;;  %v6944_v45 = vld [vmem:[#allocation105_spill] sm:$0xff]  ;;  %v7124_v47 = vld [vmem:[#allocation11_spill] sm:$0xff] }
 0x1e7   : > { %6927 = vst [vmem:[#allocation14_spill] sm:$0xff] %v4698_v59  ;;  %v4713_v41 = vmax.f32 %v6935_v37, %v4116_v5  ;;  %v4718_v56 = vmax.f32 %v6937_v33, %v4120_v53  ;;  %v6940_v59 = vld [vmem:[#allocation55_spill] sm:$0xff]  ;;  %v6945_v0 = vmax.f32 %v6944_v45, 0.0  ;;  %v6950_v37 = vld [vmem:[#allocation57_spill] sm:$0xff]  ;;  %v6952_v33 = vld [vmem:[#allocation58_spill] sm:$0xff] }
 0x1e8   : > { %v4708_v40 = vmax.f32 %v6933_v58, %v6931_v31  ;;  %v6941_v54 = vmax.f32 %v6940_v59, 0.0  ;;  %v6947_v58 = vld [vmem:[#allocation56_spill] sm:$0xff]  ;;  %v6951_v30 = vmax.f32 %v6950_v37, 0.0  ;;  %v6953_v59 = vmax.f32 %v6952_v33, 0.0 }
 0x1e9   : > { %6938 = vst [vmem:[#allocation15_spill] sm:$0xff] %v4718_v56  ;;  %v4728_v31 = vmax.f32 %v6945_v0, %v6943_v13  ;;  %v6948_v57 = vmax.f32 %v6947_v58, 0.0  ;;  %v6957_v0 = vld [vmem:[#allocation197_spill] sm:$0xff] }
 0x1ea   : > { %v4723_v51 = vmax.f32 %v6941_v54, %v6939_v50  ;;  %v4738_v53 = vmax.f32 %v6951_v30, %v4136_v1  ;;  %v4743_v50 = vmax.f32 %v6953_v59, %v4140_v26  ;;  %v6954_v54 = vld [vmem:[#allocation106_spill] sm:$0xff]  ;;  %v6964_v30 = vld [vmem:[#allocation61_spill] sm:$0xff] }
 0x1eb   : > { %6946 = vst [vmem:[#allocation16_spill] sm:$0xff] %v4728_v31  ;;  %v4733_v5 = vmax.f32 %v6948_v57, %v4132_v4  ;;  %v6955_v45 = vmax.f32 %v6954_v54, 0.0  ;;  %v6958_v31 = vld [vmem:[#allocation59_spill] sm:$0xff]  ;;  %v6961_v57 = vld [vmem:[#allocation60_spill] sm:$0xff]  ;;  %v6965_v33 = vmax.f32 %v6964_v30, 0.0  ;;  %v6967_v59 = vld [vmem:[#allocation62_spill] sm:$0xff] }
 0x1ec   : > { %6942 = vst [vmem:[#allocation164_spill] sm:$0xff] %v4723_v51  ;;  %v6959_v58 = vmax.f32 %v6958_v31, 0.0  ;;  %v6962_v37 = vmax.f32 %v6961_v57, 0.0  ;;  %v6968_v54 = vmax.f32 %v6967_v59, 0.0  ;;  %v7212_v51 = vld [vmem:[#allocation102_spill] sm:$0xff] }
 0x1ed   : > { %6949 = vst [vmem:[#allocation165_spill] sm:$0xff] %v4733_v5  ;;  %v4748_v13 = vmax.f32 %v6955_v45, %v4144_v32  ;;  %v4763_v26 = vmax.f32 %v6965_v33, %v4156_v49  ;;  %v6970_v45 = vld [vmem:[#allocation63_spill] sm:$0xff]  ;;  %v6976_v33 = vld [vmem:[#allocation66_spill] sm:$0xff] }
 0x1ee   : > { %v4753_v4 = vmax.f32 %v6959_v58, %v6957_v0  ;;  %v4758_v1 = vmax.f32 %v6962_v37, %v4152_v3  ;;  %v4768_v32 = vmax.f32 %v6968_v54, %v4160_v39  ;;  %v6971_v31 = vmax.f32 %v6970_v45, 0.0  ;;  %v6972_v58 = vld [vmem:[#allocation64_spill] sm:$0xff]  ;;  %v6974_v37 = vld [vmem:[#allocation65_spill] sm:$0xff]  ;;  %v6979_v54 = vld [vmem:[#allocation107_spill] sm:$0xff] }
 0x1ef   : > { %6956 = vst [vmem:[#allocation17_spill] sm:$0xff] %v4748_v13  ;;  %v6973_v57 = vmax.f32 %v6972_v58, 0.0  ;;  %v6975_v30 = vmax.f32 %v6974_v37, 0.0  ;;  %v6977_v59 = vmax.f32 %v6976_v33, 0.0  ;;  %v6980_v45 = vmax.f32 %v6979_v54, 0.0  ;;  %v7125_v22 = vld [vmem:[#allocation14_spill] sm:$0xff] }
 0x1f0   : > { %6960 = vst [vmem:[#allocation166_spill] sm:$0xff] %v4753_v4  ;;  %v4773_v0 = vmax.f32 %v6971_v31, %v4164_v7  ;;  %v6982_v31 = vld [vmem:[#allocation67_spill] sm:$0xff] }
 0x1f1   : > { %6963 = vst [vmem:[#allocation18_spill] sm:$0xff] %v4758_v1  ;;  %v4778_v3 = vmax.f32 %v6973_v57, %v4168_v8  ;;  %v4783_v49 = vmax.f32 %v6975_v30, %v4172_v14  ;;  %v4788_v39 = vmax.f32 %v6977_v59, %v4176_v61  ;;  %v4793_v7 = vmax.f32 %v6980_v45, %v4180_v10  ;;  %v6985_v57 = vld [vmem:[#allocation68_spill] sm:$0xff]  ;;  %v6991_v59 = vld [vmem:[#allocation109_spill] sm:$0xff]  ;;  %v6993_v45 = vld [vmem:[#allocation198_spill] sm:$0xff] }
 0x1f2   : > { %6966 = vst [vmem:[#allocation167_spill] sm:$0xff] %v4763_v26  ;;  %v6983_v58 = vmax.f32 %v6982_v31, 0.0  ;;  %v6986_v37 = vmax.f32 %v6985_v57, 0.0  ;;  %v6988_v30 = vld [vmem:[#allocation108_spill] sm:$0xff]  ;;  %v6992_v54 = vmax.f32 %v6991_v59, 0.0 }
 0x1f3   : > { %6969 = vst [vmem:[#allocation19_spill] sm:$0xff] %v4768_v32  ;;  %v6989_v33 = vmax.f32 %v6988_v30, 0.0 }
 0x1f4   : > { %6978 = vst [vmem:[#allocation168_spill] sm:$0xff] %v4788_v39  ;;  %v4798_v8 = vmax.f32 %v6983_v58, %v4184_v11  ;;  %v4803_v14 = vmax.f32 %v6986_v37, %v4188_v42  ;;  %v4813_v10 = vmax.f32 %v6992_v54, %v4196_v15  ;;  %v6996_v58 = vld [vmem:[#allocation199_spill] sm:$0xff]  ;;  %v6999_v37 = vld [vmem:[#allocation200_spill] sm:$0xff]  ;;  %v7006_v54 = vld [vmem:[#allocation202_spill] sm:$0xff] }
 0x1f5   : > { %6981 = vst [vmem:[#allocation20_spill] sm:$0xff] %v4793_v7  ;;  %v4808_v61 = vmax.f32 %v6989_v33, %v4192_v34  ;;  %v6994_v7 = vld [vmem:[#allocation110_spill] sm:$0xff]  ;;  %v7003_v33 = vld [vmem:[#allocation201_spill] sm:$0xff] }
 0x1f6   : > { %6984 = vst [vmem:[#allocation169_spill] sm:$0xff] %v4798_v8  ;;  %v6995_v31 = vmax.f32 %v6994_v7, 0.0  ;;  %v6997_v8 = vld [vmem:[#allocation69_spill] sm:$0xff]  ;;  %v7007_v39 = vld [vmem:[#allocation70_spill] sm:$0xff] }
 0x1f7   : > { %6987 = vst [vmem:[#allocation21_spill] sm:$0xff] %v4803_v14  ;;  %v6998_v57 = vmax.f32 %v6997_v8, 0.0  ;;  %v7000_v14 = vld [vmem:[#allocation111_spill] sm:$0xff]  ;;  %v7008_v7 = vmax.f32 %v7007_v39, 0.0 }
 0x1f8   : > { %6990 = vst [vmem:[#allocation170_spill] sm:$0xff] %v4808_v61  ;;  %v4818_v11 = vmax.f32 %v6995_v31, %v6993_v45  ;;  %v7001_v30 = vmax.f32 %v7000_v14, 0.0  ;;  %v7004_v61 = vld [vmem:[#allocation112_spill] sm:$0xff]  ;;  %v7009_v31 = vld [vmem:[#allocation71_spill] sm:$0xff] }
 0x1f9   : > { %v4823_v42 = vmax.f32 %v6998_v57, %v6996_v58  ;;  %v7005_v59 = vmax.f32 %v7004_v61, 0.0  ;;  %v4838_v45 = vmax.f32 %v7008_v7, %v7006_v54  ;;  %v7010_v8 = vmax.f32 %v7009_v31, 0.0  ;;  %v7011_v57 = vld [vmem:[#allocation113_spill] sm:$0xff]  ;;  %v7019_v7 = vld [vmem:[#allocation116_spill] sm:$0xff] }
 0x1fa   : > { %v4828_v34 = vmax.f32 %v7001_v30, %v6999_v37  ;;  %v7012_v14 = vmax.f32 %v7011_v57, 0.0  ;;  %v7014_v30 = vld [vmem:[#allocation203_spill] sm:$0xff]  ;;  %v7020_v31 = vmax.f32 %v7019_v7, 0.0  ;;  %v1505_v60 = vmax.f32 %v4778_v3, %v4818_v11 }
 0x1fb   : > { %v4833_v15 = vmax.f32 %v7005_v59, %v7003_v33  ;;  %v4843_v58 = vmax.f32 %v7010_v8, %v4220_v9  ;;  %v7017_v59 = vld [vmem:[#allocation115_spill] sm:$0xff]  ;;  %v7021_v8 = vld [vmem:[#allocation72_spill] sm:$0xff] }
 0x1fc   : > { %7002 = vst [vmem:[#allocation22_spill] sm:$0xff] %v4828_v34  ;;  %v4848_v37 = vmax.f32 %v7012_v14, %v4224_v63  ;;  %v7015_v34 = vld [vmem:[#allocation114_spill] sm:$0xff]  ;;  %v7018_v39 = vmax.f32 %v7017_v59, 0.0  ;;  %v4863_v9 = vmax.f32 %v7020_v31, %v4236_v2  ;;  %v7022_v57 = vmax.f32 %v7021_v8, 0.0  ;;  %v7024_v14 = vld [vmem:[#allocation117_spill] sm:$0xff]  ;;  %v7033_v31 = vld [vmem:[#allocation120_spill] sm:$0xff] }
 0x1fd   : > { %v7016_v61 = vmax.f32 %v7015_v34, 0.0  ;;  %v7025_v34 = vmax.f32 %v7024_v14, 0.0  ;;  %v7034_v8 = vmax.f32 %v7033_v31, 0.0  ;;  %v7129_v21 = vld [vmem:[#allocation168_spill] sm:$0xff]  ;;  %v7131_v48 = vld [vmem:[#allocation169_spill] sm:$0xff]  ;;  %v7150_v11 = vld [vmem:[#allocation75_spill] sm:$0xff] }
 0x1fe   : > { %7013 = vst [vmem:[#allocation171_spill] sm:$0xff] %v4848_v37  ;;  %v4858_v54 = vmax.f32 %v7018_v39, %v4232_v12  ;;  %v4868_v63 = vmax.f32 %v7022_v57, %v4240_v52  ;;  %v7030_v39 = vld [vmem:[#allocation119_spill] sm:$0xff]  ;;  %v7036_v57 = vld [vmem:[#allocation121_spill] sm:$0xff]  ;;  %v7130_v35 = vld [vmem:[#allocation20_spill] sm:$0xff]  ;;  %v1509_v26 = vmax.f32 %v7131_v48, %v4838_v45 }
 0x1ff   : > { %v4853_v33 = vmax.f32 %v7016_v61, %v7014_v30  ;;  %v4873_v30 = vmax.f32 %v7025_v34, %v4244_v27  ;;  %v7027_v61 = vld [vmem:[#allocation118_spill] sm:$0xff]  ;;  %v7031_v7 = vmax.f32 %v7030_v39, 0.0  ;;  %v4888_v52 = vmax.f32 %v7034_v8, %v4256_v19  ;;  %v7045_v8 = vld [vmem:[#allocation204_spill] sm:$0xff]  ;;  %v7132_v5 = vld [vmem:[#allocation21_spill] sm:$0xff] }
 0x200   : > { %7023 = vst [vmem:[#allocation23_spill] sm:$0xff] %v4868_v63  ;;  %v7028_v59 = vmax.f32 %v7027_v61, 0.0  ;;  %v7037_v14 = vmax.f32 %v7036_v57, 0.0  ;;  %v7038_v34 = vld [vmem:[#allocation122_spill] sm:$0xff]  ;;  %v1508_v1 = vmax.f32 %v7130_v35, %v4833_v15  ;;  %v1510_v32 = vmax.f32 %v7132_v5, %v4843_v58  ;;  %v7167_v15 = vld [vmem:[#allocation87_spill] sm:$0xff]  ;;  %v7174_v63 = vld [vmem:[#allocation92_spill] sm:$0xff] }
 0x201   : > { %7026 = vst [vmem:[#allocation172_spill] sm:$0xff] %v4873_v30  ;;  %v4883_v2 = vmax.f32 %v7031_v7, %v4252_v38  ;;  %v7039_v61 = vmax.f32 %v7038_v34, 0.0  ;;  %v7042_v7 = vld [vmem:[#allocation124_spill] sm:$0xff] }
 0x202   : > { %v4878_v12 = vmax.f32 %v7028_v59, %v4248_v62  ;;  %7035 = vst [vmem:[#allocation25_spill] sm:$0xff] %v4888_v52  ;;  %v4893_v27 = vmax.f32 %v7037_v14, %v4260_v24  ;;  %v7040_v59 = vld [vmem:[#allocation123_spill] sm:$0xff]  ;;  %v7043_v31 = vmax.f32 %v7042_v7, 0.0  ;;  %v7046_v52 = vld [vmem:[#allocation125_spill] sm:$0xff]  ;;  %v7049_v14 = vld [vmem:[#allocation126_spill] sm:$0xff] }
 0x203   : > { %7032 = vst [vmem:[#allocation173_spill] sm:$0xff] %v4883_v2  ;;  %v4898_v62 = vmax.f32 %v7039_v61, %v4264_v16  ;;  %v7041_v39 = vmax.f32 %v7040_v59, 0.0  ;;  %v7047_v57 = vmax.f32 %v7046_v52, 0.0  ;;  %v7050_v34 = vmax.f32 %v7049_v14, 0.0  ;;  %v7052_v61 = vld [vmem:[#allocation127_spill] sm:$0xff]  ;;  %v7056_v2 = vld [vmem:[#allocation128_spill] sm:$0xff] }
 0x204   : > { %7029 = vst [vmem:[#allocation24_spill] sm:$0xff] %v4878_v12  ;;  %v4908_v19 = vmax.f32 %v7043_v31, %v4272_v18  ;;  %v7053_v59 = vmax.f32 %v7052_v61, 0.0  ;;  %v7057_v7 = vmax.f32 %v7056_v2, 0.0  ;;  %v7106_v12 = vld [vmem:[#allocation79_spill] sm:$0xff]  ;;  %v7110_v52 = vld [vmem:[#allocation2_spill] sm:$0xff]  ;;  %v7115_v14 = vld [vmem:[#allocation12_spill] sm:$0xff]  ;;  %v1512_v3 = vmax.f32 %v4853_v33, %v4893_v27 }
 0x205   : > { %v4903_v38 = vmax.f32 %v7041_v39, %v4268_v17  ;;  %v4913_v24 = vmax.f32 %v7047_v57, %v7045_v8  ;;  %v4918_v16 = vmax.f32 %v7050_v34, %v4280_v23  ;;  %v7055_v39 = vld [vmem:[#allocation205_spill] sm:$0xff]  ;;  %v7089_v57 = vld [vmem:[#allocation96_spill] sm:$0xff]  ;;  %v7113_v23 = vld [vmem:[#allocation3_spill] sm:$0xff] }
 0x206   : > { %7044 = vst [vmem:[#allocation174_spill] sm:$0xff] %v4908_v19  ;;  %v4923_v17 = vmax.f32 %v7053_v59, %v4284_v29  ;;  %v4928_v18 = vmax.f32 %v7057_v7, %v7055_v39  ;;  %v7102_v8 = vld [vmem:[#allocation148_spill] sm:$0xff]  ;;  %v7108_v7 = vld [vmem:[#allocation150_spill] sm:$0xff]  ;;  %v7118_v2 = vld [vmem:[#allocation157_spill] sm:$0xff]  ;;  %v1504_v29 = vmax.f32 %v4773_v0, %v4813_v10 }
 0x207   : > { %7048 = vst [vmem:[#allocation26_spill] sm:$0xff] %v4913_v24  ;;  %v7114_v34 = vld [vmem:[#allocation156_spill] sm:$0xff]  ;;  %v7122_v31 = vld [vmem:[#allocation162_spill] sm:$0xff]  ;;  %v7126_v39 = vld [vmem:[#allocation163_spill] sm:$0xff] }
 0x208   : > { %7051 = vst [vmem:[#allocation27_spill] sm:$0xff] %v4918_v16  ;;  %v7116_v59 = vld [vmem:[#allocation8_spill] sm:$0xff]  ;;  %v1506_v16 = vmax.f32 %v4783_v49, %v4823_v42  ;;  %v7128_v13 = vld [vmem:[#allocation22_spill] sm:$0xff]  ;;  %v1513_v49 = vmax.f32 %v4858_v54, %v4898_v62  ;;  %v7141_v54 = vld [vmem:[#allocation83_spill] sm:$0xff] }
 0x209   : > { %7054 = vst [vmem:[#allocation175_spill] sm:$0xff] %v4923_v17  ;;  %v7093_v17 = vld [vmem:[#allocation97_spill] sm:$0xff]  ;;  %v1507_v4 = vmax.f32 %v7129_v21, %v7128_v13  ;;  %v1514_v21 = vmax.f32 %v4863_v9, %v4903_v38  ;;  %v7140_v10 = vld [vmem:[#allocation206_spill] sm:$0xff]  ;;  %v7144_v38 = vld [vmem:[#allocation84_spill] sm:$0xff] }
 0x20a   : > { %7058 = vst [vmem:[#allocation28_spill] sm:$0xff] %v4928_v18  ;;  %v7119_v18 = vld [vmem:[#allocation9_spill] sm:$0xff]  ;;  %v7142_v62 = vmax.f32 %v7140_v10, %v7141_v54  ;;  %v7146_v61 = vld [vmem:[#allocation74_spill] sm:$0xff]  ;;  %v7154_v42 = vld [vmem:[#allocation76_spill] sm:$0xff] }
 0x20b   : > { %v7143_v9 = vld [vmem:[#allocation73_spill] sm:$0xff]  ;;  %v7155_v27 = vld [vmem:[#allocation130_spill] sm:$0xff]  ;;  %v7158_v10 = vld [vmem:[#allocation80_spill] sm:$0xff] }
 0x20c   : > { %v1584_v37 = vperm.slane %v7142_v62, 0  ;;  %v7145_v0 = vmax.f32 %v7143_v9, %v7144_v38  ;;  %v7147_v19 = vld [vmem:[#allocation129_spill] sm:$0xff]  ;;  %v7156_v58 = vmax.f32 %v7154_v42, %v7155_v27  ;;  %v7159_v54 = vld [vmem:[#allocation86_spill] sm:$0xff]  ;;  %v7163_v38 = vld [vmem:[#allocation131_spill] sm:$0xff] }
 0x20d   : > { %v7148_v48 = vmax.f32 %v7146_v61, %v7147_v19  ;;  %v7151_v13 = vld [vmem:[#allocation85_spill] sm:$0xff]  ;;  %v7160_v62 = vmax.f32 %v7158_v10, %v7159_v54  ;;  %v7171_v30 = vld [vmem:[#allocation136_spill] sm:$0xff] }
 0x20e   : > { %v1585_v35 = vperm.slane %v7145_v0, 0  ;;  %v7152_v5 = vmax.f32 %v7150_v11, %v7151_v13  ;;  %v5077_v33 = vperm.slane %v7156_v58, 0  ;;  %v7162_v0 = vld [vmem:[#allocation81_spill] sm:$0xff]  ;;  %v7170_v11 = vld [vmem:[#allocation132_spill] sm:$0xff] }
 0x20f   : > { %v5067_v24 = vperm.slane %v7148_v48, 0  ;;  %v5082_v9 = vperm.slane %v7160_v62, 0  ;;  %v7164_v19 = vmax.f32 %v7162_v0, %v7163_v38  ;;  %v7166_v48 = vld [vmem:[#allocation82_spill] sm:$0xff]  ;;  %v7172_v42 = vmax.f32 %v7170_v11, %v7171_v30  ;;  %v7173_v27 = vld [vmem:[#allocation88_spill] sm:$0xff]  ;;  %v7176_v54 = vld [vmem:[#allocation133_spill] sm:$0xff] }
 0x210   : > { %v5072_v45 = vperm.slane %v7152_v5, 0  ;;  %7157 = vst [vmem:[#allocation177_spill] sm:$0xff] %v5077_v33  ;;  %v7168_v13 = vmax.f32 %v7166_v48, %v7167_v15  ;;  %v7175_v33 = vmax.f32 %v7173_v27, %v7174_v63  ;;  %v7177_v62 = vld [vmem:[#allocation137_spill] sm:$0xff]  ;;  %v7183_v15 = vld [vmem:[#allocation134_spill] sm:$0xff]  ;;  %v7191_v63 = vld [vmem:[#allocation135_spill] sm:$0xff] }
 0x211   : > { %7149 = vst [vmem:[#allocation176_spill] sm:$0xff] %v5067_v24  ;;  %v5087_v61 = vperm.slane %v7164_v19, 0  ;;  %v1592_v58 = vperm.slane %v7172_v42, 0  ;;  %v7179_v0 = vld [vmem:[#allocation89_spill] sm:$0xff]  ;;  %v7184_v48 = vld [vmem:[#allocation138_spill] sm:$0xff] }
 0x212   : > { %7153 = vst [vmem:[#allocation29_spill] sm:$0xff] %v5072_v45  ;;  %v5092_v5 = vperm.slane %v7168_v13, 0  ;;  %v1593_v10 = vperm.slane %v7175_v33, 0  ;;  %v7180_v38 = vld [vmem:[#allocation93_spill] sm:$0xff]  ;;  %v7185_v13 = vmax.f32 %v7183_v15, %v7184_v48  ;;  %v7187_v30 = vld [vmem:[#allocation90_spill] sm:$0xff]  ;;  %v7192_v33 = vld [vmem:[#allocation139_spill] sm:$0xff] }
 0x213   : > { %7161 = vst [vmem:[#allocation30_spill] sm:$0xff] %v5082_v9  ;;  %v7178_v9 = vmax.f32 %v7176_v54, %v7177_v62  ;;  %v7181_v19 = vmax.f32 %v7179_v0, %v7180_v38  ;;  %v7188_v11 = vld [vmem:[#allocation94_spill] sm:$0xff]  ;;  %v7193_v27 = vmax.f32 %v7191_v63, %v7192_v33  ;;  %v7196_v62 = vld [vmem:[#allocation95_spill] sm:$0xff]  ;;  %v7206_v63 = vld [vmem:[#allocation101_spill] sm:$0xff] }
 0x214   : > { %7165 = vst [vmem:[#allocation31_spill] sm:$0xff] %v5087_v61  ;;  %v7189_v42 = vmax.f32 %v7187_v30, %v7188_v11  ;;  %v7203_v11 = vld [vmem:[#allocation141_spill] sm:$0xff]  ;;  %v7207_v33 = vmax.f32 %v7093_v17, %v7206_v63  ;;  %v7222_v17 = vld [vmem:[#allocation152_spill] sm:$0xff] }
 0x215   : > { %7169 = vst [vmem:[#allocation178_spill] sm:$0xff] %v5092_v5  ;;  %v1594_v45 = vperm.slane %v7178_v9, 0  ;;  %v5106_v61 = vperm.slane %v7181_v19, 0  ;;  %v5111_v5 = vperm.slane %v7185_v13, 0  ;;  %v5121_v54 = vperm.slane %v7193_v27, 0  ;;  %v7195_v9 = vld [vmem:[#allocation91_spill] sm:$0xff] }
 0x216   : > { %v5116_v24 = vperm.slane %v7189_v42, 0  ;;  %v7197_v0 = vmax.f32 %v7195_v9, %v7196_v62  ;;  %v7199_v19 = vld [vmem:[#allocation144_spill] sm:$0xff]  ;;  %v7204_v42 = vld [vmem:[#allocation145_spill] sm:$0xff]  ;;  %v1603_v27 = vperm.slane %v7207_v33, 0  ;;  %v7209_v9 = vld [vmem:[#allocation146_spill] sm:$0xff]  ;;  %v7223_v63 = vmax.f32 %v7102_v8, %v7222_v17 }
 0x217   : > { %7182 = vst [vmem:[#allocation32_spill] sm:$0xff] %v5106_v61  ;;  %v7200_v15 = vmax.f32 %v7087_v55, %v7199_v19  ;;  %v7201_v13 = vld [vmem:[#allocation100_spill] sm:$0xff]  ;;  %v7224_v33 = vld [vmem:[#allocation78_spill] sm:$0xff] }
 0x218   : > { %7186 = vst [vmem:[#allocation179_spill] sm:$0xff] %v5111_v5  ;;  %v5126_v38 = vperm.slane %v7197_v0, 0  ;;  %v7202_v5 = vmax.f32 %v7089_v57, %v7201_v13  ;;  %v7216_v57 = vld [vmem:[#allocation147_spill] sm:$0xff] }
 0x219   : > { %7190 = vst [vmem:[#allocation33_spill] sm:$0xff] %v5116_v24  ;;  %v1600_v48 = vperm.slane %v7200_v15, 0  ;;  %v7205_v24 = vmax.f32 %v7203_v11, %v7204_v42  ;;  %v7215_v15 = vld [vmem:[#allocation143_spill] sm:$0xff] }
 0x21a   : > { %7194 = vst [vmem:[#allocation180_spill] sm:$0xff] %v5121_v54  ;;  %v1601_v30 = vperm.slane %v7202_v5, 0  ;;  %v7208_v54 = vld [vmem:[#allocation142_spill] sm:$0xff]  ;;  %v7217_v5 = vmax.f32 %v7215_v15, %v7216_v57  ;;  %v7230_v15 = vld [vmem:[#allocation5_spill] sm:$0xff] }
 0x21b   : > { %7198 = vst [vmem:[#allocation34_spill] sm:$0xff] %v5126_v38  ;;  %v1602_v61 = vperm.slane %v7205_v24, 0  ;;  %v7210_v62 = vmax.f32 %v7208_v54, %v7209_v9  ;;  %v7211_v38 = vld [vmem:[#allocation98_spill] sm:$0xff]  ;;  %v7219_v24 = vld [vmem:[#allocation77_spill] sm:$0xff]  ;;  %v1608_v54 = vperm.slane %v7223_v63, 0  ;;  %v7225_v9 = vld [vmem:[#allocation4_spill] sm:$0xff]  ;;  %v7231_v57 = vmax.f32 %v7106_v12, %v7230_v15 }
 0x21c   : > { %v7213_v55 = vmax.f32 %v7211_v38, %v7212_v51  ;;  %v5151_v13 = vperm.slane %v7217_v5, 0  ;;  %v7220_v11 = vmax.f32 %v7101_v6, %v7219_v24  ;;  %v7227_v38 = vld [vmem:[#allocation149_spill] sm:$0xff]  ;;  %v7232_v6 = vld [vmem:[#allocation154_spill] sm:$0xff]  ;;  %v7236_v63 = vld [vmem:[#allocation151_spill] sm:$0xff] }
 0x21d   : > { %v1604_v0 = vperm.slane %v7210_v62, 0  ;;  %v7226_v62 = vmax.f32 %v7224_v33, %v7225_v9  ;;  %v1611_v5 = vperm.slane %v7231_v57, 0  ;;  %v7233_v24 = vmax.f32 %v7108_v7, %v7232_v6  ;;  %v7241_v12 = vld [vmem:[#allocation160_spill] sm:$0xff] }
 0x21e   : > { %v5146_v19 = vperm.slane %v7213_v55, 0  ;;  %7218 = vst [vmem:[#allocation181_spill] sm:$0xff] %v5151_v13  ;;  %v5156_v42 = vperm.slane %v7220_v11, 0  ;;  %v7228_v55 = vld [vmem:[#allocation153_spill] sm:$0xff]  ;;  %v7237_v13 = vld [vmem:[#allocation155_spill] sm:$0xff]  ;;  %v7243_v7 = vmax.f32 %v7116_v59, %v7115_v14  ;;  %v7250_v14 = vmax.f32 %v7123_v20, %v7122_v31 }
 0x21f   : > { %v1609_v51 = vperm.slane %v7226_v62, 0  ;;  %v1612_v11 = vperm.slane %v7233_v24, 0  ;;  %v7238_v33 = vmax.f32 %v7236_v63, %v7237_v13  ;;  %v7239_v62 = vld [vmem:[#allocation7_spill] sm:$0xff]  ;;  %v7246_v13 = vld [vmem:[#allocation13_spill] sm:$0xff] }
 0x220   : > { %7214 = vst [vmem:[#allocation35_spill] sm:$0xff] %v5146_v19  ;;  %v7229_v19 = vmax.f32 %v7227_v38, %v7228_v55  ;;  %v7242_v55 = vmax.f32 %v7114_v34, %v7241_v12  ;;  %v1617_v57 = vperm.slane %v7243_v7, 0  ;;  %v7247_v24 = vmax.f32 %v7119_v18, %v7246_v13  ;;  %v7256_v20 = vld [vmem:[#allocation17_spill] sm:$0xff] }
 0x221   : > { %7221 = vst [vmem:[#allocation36_spill] sm:$0xff] %v5156_v42  ;;  %v7234_v42 = vld [vmem:[#allocation6_spill] sm:$0xff]  ;;  %v5179_v9 = vperm.slane %v7238_v33, 0  ;;  %v7249_v34 = vmax.f32 %v7121_v44, %v4678_v36  ;;  %v5213_v59 = vperm.slane %v7250_v14, 0  ;;  %v7251_v18 = vmax.f32 %v7124_v47, %v4688_v28 }
 0x222   : > { %v1610_v56 = vperm.slane %v7229_v19, 0  ;;  %v7235_v8 = vmax.f32 %v7110_v52, %v7234_v42  ;;  %v7240_v19 = vmax.f32 %v7113_v23, %v7239_v62  ;;  %v1616_v15 = vperm.slane %v7242_v55, 0  ;;  %v7244_v52 = vld [vmem:[#allocation161_spill] sm:$0xff]  ;;  %v7258_v47 = vld [vmem:[#allocation166_spill] sm:$0xff] }
 0x223   : > { %v7245_v42 = vmax.f32 %v7118_v2, %v7244_v52  ;;  %v7248_v23 = vmax.f32 %v7120_v25, %v4673_v46  ;;  %v5208_v33 = vperm.slane %v7249_v34, 0  ;;  %v5218_v2 = vperm.slane %v7251_v18, 0  ;;  %v7252_v62 = vld [vmem:[#allocation165_spill] sm:$0xff]  ;;  %v7260_v52 = vld [vmem:[#allocation15_spill] sm:$0xff] }
 0x224   : > { %v1613_v17 = vperm.slane %v7235_v8, 0  ;;  %v5184_v38 = vperm.slane %v7240_v19, 0  ;;  %v5198_v8 = vperm.slane %v7247_v24, 0  ;;  %v7253_v25 = vmax.f32 %v4693_v43, %v7252_v62  ;;  %v7261_v43 = vld [vmem:[#allocation18_spill] sm:$0xff] }
 0x225   : > { %v1618_v6 = vperm.slane %v7245_v42, 0  ;;  %v5203_v63 = vperm.slane %v7248_v23, 0  ;;  %v7254_v19 = vmax.f32 %v7125_v22, %v4738_v53  ;;  %v7255_v36 = vmax.f32 %v7126_v39, %v4743_v50  ;;  %v7263_v22 = vld [vmem:[#allocation164_spill] sm:$0xff]  ;;  %v7264_v53 = vld [vmem:[#allocation167_spill] sm:$0xff] }
 0x226   : > { %v1624_v46 = vperm.slane %v7253_v25, 0  ;;  %v7257_v31 = vmax.f32 %v4708_v40, %v7256_v20  ;;  %v7259_v28 = vmax.f32 %v4713_v41, %v7258_v47  ;;  %v7262_v42 = vmax.f32 %v7260_v52, %v7261_v43  ;;  %v7266_v20 = vld [vmem:[#allocation176_spill] sm:$0xff]  ;;  %v7273_v47 = vld [vmem:[#allocation174_spill] sm:$0xff] }
 0x227   : > { %v1625_v44 = vperm.slane %v7254_v19, 0  ;;  %v1626_v12 = vperm.slane %v7255_v36, 0  ;;  %v7265_v24 = vmax.f32 %v7263_v22, %v7264_v53  ;;  %v1632_v50 = vperm.slane %v1504_v29, 0  ;;  %v7275_v43 = vld [vmem:[#allocation172_spill] sm:$0xff] }
 0x228   : > { %v1627_v55 = vperm.slane %v7257_v31, 0  ;;  %v5235_v7 = vperm.slane %v7259_v28, 0  ;;  %v5240_v13 = vperm.slane %v7262_v42, 0  ;;  %v1633_v39 = vperm.slane %v1505_v60, 0  ;;  %v7276_v42 = vld [vmem:[#allocation26_spill] sm:$0xff] }
 0x229   : > { %v5245_v23 = vperm.slane %v7265_v24, 0  ;;  %v1634_v34 = vperm.slane %v1506_v16, 0  ;;  %v1635_v40 = vperm.slane %v1507_v4, 0  ;;  %v1636_v14 = vperm.slane %v1508_v1, 0  ;;  %v7279_v24 = vld [vmem:[#allocation35_spill] sm:$0xff] }
 0x22a   : > { %v1637_v18 = vperm.slane %v1509_v26, 0  ;;  %v5247_v62 = vperm.slane %v1510_v32, 0  ;;  %v1640_v41 = vperm.slane %v1512_v3, 0  ;;  %v1641_v25 = vperm.slane %v1513_v49, 0  ;;  %v7267_v32 = vld [vmem:[#allocation29_spill] sm:$0xff] }
 0x22b   : > { %v1642_v19 = vperm.slane %v1514_v21, 0  ;;  %v1649_v36 = vsel %vm1648_vm0, %v1585_v35, %v1584_v37  ;;  %v1662_v4 = vsel %vm1648_vm0, %v1593_v10, %v1592_v58  ;;  %v1669_v1 = vsel %vm1648_vm0, %v1601_v30, %v1600_v48  ;;  %v7268_v49 = vld [vmem:[#allocation177_spill] sm:$0xff]  ;;  %v7269_v35 = vld [vmem:[#allocation32_spill] sm:$0xff]  ;;  %v7270_v48 = vld [vmem:[#allocation30_spill] sm:$0xff] }
 0x22c   : > { %v1651_v60 = vsel %vm1650_vm1, %v7266_v20, %v1649_v36  ;;  %v1676_v26 = vsel %vm1648_vm0, %v1609_v51, %v1608_v54  ;;  %v1663_v29 = vsel %vm1650_vm1, %v1594_v45, %v1662_v4  ;;  %v1670_v3 = vsel %vm1650_vm1, %v1602_v61, %v1669_v1  ;;  %v7271_v54 = vld [vmem:[#allocation179_spill] sm:$0xff]  ;;  %v7280_v20 = vld [vmem:[#allocation24_spill] sm:$0xff] }
 0x22d   : > { %v1653_v16 = vsel %vm1652_vm2, %v7267_v32, %v1651_v60  ;;  %v1677_v37 = vsel %vm1650_vm1, %v1610_v56, %v1676_v26  ;;  %v1664_v31 = vsel %vm1652_vm2, %v7269_v35, %v1663_v29  ;;  %v1671_v58 = vsel %vm1652_vm2, %v1603_v27, %v1670_v3  ;;  %v7272_v51 = vld [vmem:[#allocation23_spill] sm:$0xff]  ;;  %v7287_v3 = vld [vmem:[#allocation180_spill] sm:$0xff] }
 0x22e   : > { %v1655_v21 = vsel %vm1654_vm3, %v7268_v49, %v1653_v16  ;;  %v1678_v10 = vsel %vm1652_vm2, %v1611_v5, %v1677_v37  ;;  %v1665_v45 = vsel %vm1654_vm3, %v7271_v54, %v1664_v31  ;;  %v1672_v61 = vsel %vm1654_vm3, %v1604_v0, %v1671_v58  ;;  %v7278_v5 = vld [vmem:[#allocation33_spill] sm:$0xff]  ;;  %v7281_v60 = vld [vmem:[#allocation27_spill] sm:$0xff] }
 0x22f   : > { %v1657_v30 = vsel %vm1656_vm4, %v7270_v48, %v1655_v21  ;;  %v1679_v56 = vsel %vm1654_vm3, %v1612_v11, %v1678_v10  ;;  %v7274_v28 = vmax.f32 %v7272_v51, %v7273_v47  ;;  %v7277_v22 = vmax.f32 %v7275_v43, %v7276_v42  ;;  %v7283_v11 = vld [vmem:[#allocation173_spill] sm:$0xff]  ;;  %v7284_v1 = vld [vmem:[#allocation175_spill] sm:$0xff]  ;;  %v7294_v47 = vld [vmem:[#allocation170_spill] sm:$0xff] }
 0x230   : > { %v1666_v53 = vsel %vm1656_vm4, %v7278_v5, %v1665_v45  ;;  %v1673_v36 = vsel %vm1656_vm4, %v7279_v24, %v1672_v61  ;;  %v7282_v0 = vmax.f32 %v7280_v20, %v7281_v60  ;;  %v7285_v26 = vmax.f32 %v7283_v11, %v7284_v1  ;;  %v7286_v16 = vld [vmem:[#allocation31_spill] sm:$0xff]  ;;  %v7288_v49 = vld [vmem:[#allocation181_spill] sm:$0xff]  ;;  %v7297_v43 = vld [vmem:[#allocation36_spill] sm:$0xff] }
 0x231   : > { %v1643_v52 = vperm.slane %v7274_v28, 0  ;;  %v1644_v27 = vperm.slane %v7277_v22, 0  ;;  %v1659_v29 = vsel %vm1658_vm5, %v7286_v16, %v1657_v30  ;;  %v1667_v37 = vsel %vm1658_vm5, %v7287_v3, %v1666_v53  ;;  %v7295_v28 = vld [vmem:[#allocation171_spill] sm:$0xff]  ;;  %v7298_v42 = vld [vmem:[#allocation25_spill] sm:$0xff]  ;;  %v7299_v22 = vld [vmem:[#allocation28_spill] sm:$0xff] }
 0x232   : > { %v1645_v4 = vperm.slane %v7282_v0, 0  ;;  %v1646_v32 = vperm.slane %v7285_v26, 0  ;;  %v1674_v21 = vsel %vm1658_vm5, %v7288_v49, %v1673_v36  ;;  %v1680_v35 = vsel %vm1656_vm4, %v1613_v17, %v1679_v56 }
 0x233   : > { %v1683_v31 = vsel %vm1648_vm0, %v1617_v57, %v1616_v15  ;;  %v1690_v10 = vsel %vm1648_vm0, %v1625_v44, %v1624_v46  ;;  %v1697_v48 = vsel %vm1648_vm0, %v1633_v39, %v1632_v50  ;;  %v1704_v54 = vsel %vm1648_vm0, %v1641_v25, %v1640_v41  ;;  %v7293_v25 = vld [vmem:[#allocation34_spill] sm:$0xff] }
 0x234   : > { %v1684_v58 = vsel %vm1650_vm1, %v1618_v6, %v1683_v31  ;;  %v1691_v45 = vsel %vm1650_vm1, %v1626_v12, %v1690_v10  ;;  %v1698_v61 = vsel %vm1650_vm1, %v1634_v34, %v1697_v48  ;;  %v1705_v17 = vsel %vm1650_vm1, %v1642_v19, %v1704_v54 }
 0x235   : > { %v1685_v30 = vsel %vm1652_vm2, %v5198_v8, %v1684_v58  ;;  %v1692_v57 = vsel %vm1652_vm2, %v1627_v55, %v1691_v45  ;;  %v1699_v6 = vsel %vm1652_vm2, %v1635_v40, %v1698_v61  ;;  %v1706_v46 = vsel %vm1652_vm2, %v1643_v52, %v1705_v17  ;;  %v7291_v40 = vld [vmem:[#allocation19_spill] sm:$0xff] }
 0x236   : > { %v1686_v15 = vsel %vm1654_vm3, %v5203_v63, %v1685_v30  ;;  %v1693_v8 = vsel %vm1654_vm3, %v5235_v7, %v1692_v57  ;;  %v1700_v12 = vsel %vm1654_vm3, %v1636_v14, %v1699_v6  ;;  %v1707_v50 = vsel %vm1654_vm3, %v1644_v27, %v1706_v46  ;;  %v7289_v63 = vld [vmem:[#allocation178_spill] sm:$0xff]  ;;  %v7290_v7 = vld [vmem:[#allocation16_spill] sm:$0xff] }
 0x237   : > { %v1687_v44 = vsel %vm1656_vm4, %v5208_v33, %v1686_v15  ;;  %v1661_v55 = vsel %vm1660_vm6, %v7289_v63, %v1659_v29  ;;  %v1681_v39 = vsel %vm1658_vm5, %v5179_v9, %v1680_v35  ;;  %v1694_v33 = vsel %vm1656_vm4, %v5240_v13, %v1693_v8 }
 0x238   : > { %v1701_v34 = vsel %vm1656_vm4, %v1637_v18, %v1700_v12  ;;  %v7292_v14 = vmax.f32 %v7290_v7, %v7291_v40  ;;  %v1668_v19 = vsel %vm1660_vm6, %v7293_v25, %v1667_v37  ;;  %v1688_v56 = vsel %vm1658_vm5, %v5213_v59, %v1687_v44  ;;  %1720 = vst.msk [vmem:[%s167_s25] sm:$0xff] %vm1719_vm7, %v1661_v55 }
 0x239   : > { %v1708_v51 = vsel %vm1656_vm4, %v1645_v4, %v1707_v50  ;;  %v7296_v9 = vmax.f32 %v7294_v47, %v7295_v28  ;;  %v1675_v13 = vsel %vm1660_vm6, %v7297_v43, %v1674_v21  ;;  %v1695_v18 = vsel %vm1658_vm5, %v5245_v23, %v1694_v33  ;;  %1721 = vst.msk [vmem:[%s167_s25 + $0x8] sm:$0xff] %vm1719_vm7, %v1668_v19 }
 0x23a   : > { %v1631_v41 = vperm.slane %v7292_v14, 0  ;;  %v7300_v27 = vmax.f32 %v7298_v42, %v7299_v22  ;;  %v1682_v59 = vsel %vm1660_vm6, %v5184_v38, %v1681_v39  ;;  %v1702_v53 = vsel %vm1658_vm5, %v5247_v62, %v1701_v34  ;;  %1722 = vst.msk [vmem:[%s167_s25 + $0x10] sm:$0xff] %vm1719_vm7, %v1675_v13 }
 0x23b   : > { %v1639_v52 = vperm.slane %v7296_v9, 0  ;;  %v1689_v24 = vsel %vm1660_vm6, %v5218_v2, %v1688_v56  ;;  %v1709_v36 = vsel %vm1658_vm5, %v1646_v32, %v1708_v51  ;;  %1723 = vst.msk [vmem:[%s167_s25 + $0x18] sm:$0xff] %vm1719_vm7, %v1682_v59 }
 0x23c   : > { %v1647_v5 = vperm.slane %v7300_v27, 0  ;;  %v1696_v23 = vsel %vm1660_vm6, %v1631_v41, %v1695_v18  ;;  %1724 = vst.msk [vmem:[%s167_s25 + $0x20] sm:$0xff] %vm1719_vm7, %v1689_v24 }
 0x23d   : > { %v1703_v20 = vsel %vm1660_vm6, %v1639_v52, %v1702_v53  ;;  %1725 = vst.msk [vmem:[%s167_s25 + $0x28] sm:$0xff] %vm1719_vm7, %v1696_v23 }
 0x23e   : > { %v1710_v38 = vsel %vm1660_vm6, %v1647_v5, %v1709_v36  ;;  %1726 = vst.msk [vmem:[%s167_s25 + $0x30] sm:$0xff] %vm1719_vm7, %v1703_v20 }
 0x23f   : > { %1727 = vst.msk [vmem:[%s167_s25 + $0x38] sm:$0xff] %vm1719_vm7, %v1710_v38 }
 0x240 PF: > { %s13_s12 = sadd.s32 1, %s1938_s12  }
 0x241   : > { %p10_p4 = scmp.ge.s32.totalorder %s13_s12, 4  }
 0x243   :  { %12 = sbr.rel (!%p10_p4) target bundleno = 1 (0x1), region = 62 }

// kernel: encoder_block_v1_forward.4
= control target key start
LH: loop header
LB: loop body
LE: loop exit
PB: predicated region body
PF: predicated region fallthrough
CT: control target
= control target key end

     0   :  { %s4638_s27 = smov 0   ;;  %s6428_s0 = inlined_call_operand.vmem [shape: bf16[2,288,128], index: 0, kind: input, shape index: {}]   ;;  %s6429_s1 = inlined_call_operand.vmem [shape: f32[1,128], index: 1, kind: input, shape index: {}]   ;;  %s6430_s2 = inlined_call_operand.vmem [shape: f32[1,128], index: 2, kind: input, shape index: {}]   ;;  %s6431_s3 = inlined_call_operand.vmem [shape: bf16[3,256,128], index: 3, kind: input, shape index: {}]   ;;  %s6432_s4 = inlined_call_operand.vmem [shape: bf16[3,128,128], index: 4, kind: input, shape index: {}]   ;;  %s6433_s5 = inlined_call_operand.vmem [shape: f32[288,1], index: 5, kind: input, shape index: {}]   ;;  %s6434_s6 = inlined_call_operand.vmem [shape: bf16[2,288,128], index: 6, kind: output, shape index: {0}]   ;;  %s6435_s7 = inlined_call_operand.vmem [shape: f32[2,1,128], index: 7, kind: output, shape index: {1}]   ;;  %s6436_s8 = inlined_call_operand.vmem [shape: f32[2,1,128], index: 8, kind: output, shape index: {2}]  }
   0x1 LB: > { %s3879_s28 = sadd.s32 4294967295, %s4589_s27   ;;  %p3883_p0 = scmp.ge.s32.totalorder %s4589_s27, 1  ;;  %s4589_s27 = sphi %s4638_s27, %s19_s27  }
   0x2   : > { %p267_p1 = scmp.lt.s32.totalorder %s4589_s27, 3 }
   0x4   : > { %p268_p2 = pnand %p3883_p0, %p267_p1 }
   0x6   : > { %271 = sbr.rel (%p268_p2) target bundleno = 994 (0x3e2), region = 44 }
   0xb   : > { %v344_v0 = vld [vmem:[%s6433_s5 + $0xa8] sm:$0xff]  ;;  %v342_v1 = vld [vmem:[%s6433_s5 + $0x98] sm:$0xff]  ;;  %v4591_v3 = vmov 0   ;;  %v343_v5 = vld [vmem:[%s6433_s5 + $0xa0] sm:$0xff]  ;;  %p307_p3 = scmp.lt.s32.totalorder %s3879_s28, 1  ;;  %vm811_vm0 = vcmask 1042432  }
   0xc   : > { %v340_v2 = vld [vmem:[%s6433_s5 + $0x88] sm:$0xff]  ;;  %4577 = vset.pattern.permute.xlu2 %v4591_v3  ;;  %4576 = vset.pattern.permute.xlu1 %v4591_v3  ;;  %v330_v4 = vld [vmem:[%s6433_s5 + $0x38] sm:$0xff]  ;;  %v341_v6 = vld [vmem:[%s6433_s5 + $0x90] sm:$0xff]  ;;  %vm957_vm1 = vcmask 1041408   ;;  %vm1282_vm2 = vcmask 1046528   ;;  %vm1964_vm3 = vcmask 1045504  }
   0xd   : > { %4575 = vset.pattern.permute.xlu0 %v4591_v3  ;;  %654 = vperm.xlu2 %4577, %v344_v0   ;;  %v333_v7 = vld [vmem:[%s6433_s5 + $0x50] sm:$0xff]  ;;  %v332_v8 = vld [vmem:[%s6433_s5 + $0x48] sm:$0xff]  ;;  %v331_v9 = vld [vmem:[%s6433_s5 + $0x40] sm:$0xff]  ;;  %s6706_s28 = smov (!%p307_p3, %s3879_s28), 1  ;;  %vm2865_vm4 = vcmask 1044480  }
   0xe   : > { %644 = vperm.xlu1 %4576, %v342_v1   ;;  %634 = vperm.xlu0 %4575, %v340_v2   ;;  %v324_v10 = vld [vmem:[%s6433_s5 + $0x8] sm:$0xff]  ;;  %v334_v11 = vld [vmem:[%s6433_s5 + $0x58] sm:$0xff]  ;;  %v323_v12 = vld [vmem:[%s6433_s5] sm:$0xff]  ;;  %s4564_s9 = smul.u32 144, %s6706_s28  ;;  %s319_s25 = scalar_lea.vmem %s6435_s7, %s6706_s28 }
   0xf   : > { %v335_v13 = vld [vmem:[%s6433_s5 + $0x60] sm:$0xff]  ;;  %v345_v14 = vld [vmem:[%s6433_s5 + $0xb0] sm:$0xff]  ;;  %v346_v15 = vld [vmem:[%s6433_s5 + $0xb8] sm:$0xff]  ;;  %s322_s30 = scalar_lea.vmem %s6436_s8, %s6706_s28 }
  0x10   : > { %v326_v16 = vld [vmem:[%s6433_s5 + $0x18] sm:$0xff]  ;;  %v336_v17 = vld [vmem:[%s6433_s5 + $0x68] sm:$0xff]  ;;  %v325_v18 = vld [vmem:[%s6433_s5 + $0x10] sm:$0xff]  ;;  %s4786_s14 = scalar_lea.vmem %s6428_s0, %s4564_s9  ;;  %s6185_s23 = scalar_lea.vmem %s6434_s6, %s4564_s9 }
  0x11   : > { %v350_v19 = vld [vmem:[%s6433_s5 + $0xd8] sm:$0xff]  ;;  %v347_v20 = vld [vmem:[%s6433_s5 + $0xc0] sm:$0xff]  ;;  %v348_v21 = vld [vmem:[%s6433_s5 + $0xc8] sm:$0xff] }
  0x12   : > { %v353_v22 = vld [vmem:[%s6433_s5 + $0xf0] sm:$0xff]  ;;  %v351_v23 = vld [vmem:[%s6433_s5 + $0xe0] sm:$0xff]  ;;  %v352_v24 = vld [vmem:[%s6433_s5 + $0xe8] sm:$0xff] }
  0x13   : > { %v338_v25 = vld [vmem:[%s6433_s5 + $0x78] sm:$0xff]  ;;  %v337_v27 = vld [vmem:[%s6433_s5 + $0x70] sm:$0xff]  ;;  %v327_v30 = vld [vmem:[%s6433_s5 + $0x20] sm:$0xff] }
  0x14   : > { %v354_v26 = vld [vmem:[%s6433_s5 + $0xf8] sm:$0xff]  ;;  %v349_v28 = vld [vmem:[%s6433_s5 + $0xd0] sm:$0xff]  ;;  %v328_v31 = vld [vmem:[%s6433_s5 + $0x28] sm:$0xff] }
  0x15   : > { %584 = vperm.xlu2 %4577, %v330_v4   ;;  %v4295_v29 = vld [vmem:[%s6432_s4 + $0x38] sm:$0xff]  ;;  %v4294_v32 = vld [vmem:[%s6432_s4 + $0x30] sm:$0xff]  ;;  %v339_v33 = vld [vmem:[%s6433_s5 + $0x80] sm:$0xff] }
  0x16   : > { %649 = vperm.xlu1 %4576, %v343_v5   ;;  %639 = vperm.xlu0 %4575, %v341_v6   ;;  %v4293_v34 = vld [vmem:[%s6432_s4 + $0x28] sm:$0xff]  ;;  %v355_v35 = vld [vmem:[%s6433_s5 + $0x100] sm:$0xff]  ;;  %v358_v38 = vld [vmem:[%s6433_s5 + $0x118] sm:$0xff] }
  0x17   : > { %4541 = vmatpush.bf16.msra.mxu2 %v4295_v29  ;;  %1386 = vmatpush.bf16.msra.mxu0 %v4295_v29  ;;  %v356_v36 = vld [vmem:[%s6433_s5 + $0x108] sm:$0xff]  ;;  %v4292_v37 = vld [vmem:[%s6432_s4 + $0x20] sm:$0xff]  ;;  %v329_v39 = vld [vmem:[%s6433_s5 + $0x30] sm:$0xff] }
  0x18   : > { %4540 = vmatpush.bf16.msra.mxu1 %v4295_v29  ;;  %4542 = vmatpush.bf16.msra.mxu3 %v4295_v29  ;;  %v357_v40 = vld [vmem:[%s6433_s5 + $0x110] sm:$0xff]  ;;  %v4291_v42 = vld [vmem:[%s6432_s4 + $0x18] sm:$0xff]  ;;  %v4795_v47 = vld [vmem:[%s4786_s14 + $0x28] sm:$0xff]  }
  0x19   : > { %v4290_v43 = vld [vmem:[%s6432_s4 + $0x10] sm:$0xff]  ;;  %v4792_v46 = vld [vmem:[%s4786_s14 + $0x18] sm:$0xff]   ;;  %v4289_v48 = vld [vmem:[%s6432_s4 + $0x8] sm:$0xff]  ;;  %v4366_v52 = vunpack.c.l.bf16 %v4795_v47 }
  0x1a   : > { %v4515_v44 = vld [vmem:[%s4786_s14 + $0x50] sm:$0xff]   ;;  %v4514_v50 = vld [vmem:[%s4786_s14 + $0x48] sm:$0xff]   ;;  %v4359_v51 = vunpack.c.h.bf16 %v4792_v46  ;;  %v4804_v53 = vld [vmem:[%s4786_s14 + $0x40] sm:$0xff]  }
  0x1b   : > { %4544 = vmatpush.bf16.msra.mxu2 %v4294_v32  ;;  %1387 = vmatpush.bf16.msra.mxu0 %v4294_v32  ;;  %v4387_v49 = vunpack.c.h.bf16 %v4515_v44  ;;  %v4809_v54 = vld [vmem:[%s6429_s1] ss:$0 sm:$0xff]  ;;  %v4383_v55 = vunpack.c.h.bf16 %v4514_v50  ;;  %v4379_v59 = vunpack.c.h.bf16 %v4804_v53  ;;  %v4830_v1 = vld [vmem:[%s4786_s14 + $0x30] sm:$0xff]   ;;  %v4386_v3 = vunpack.c.l.bf16 %v4515_v44 }
  0x1c   : > { %4543 = vmatpush.bf16.msra.mxu1 %v4294_v32  ;;  %4545 = vmatpush.bf16.msra.mxu3 %v4294_v32  ;;  %v4812_v56 = vld [vmem:[%s4786_s14] sm:$0xff]   ;;  %v442_v60 = vmul.f32 %v4809_v54, %v4359_v51  ;;  %v445_v62 = vmul.f32 %v4809_v54, %v4366_v52  ;;  %v4382_v4 = vunpack.c.l.bf16 %v4514_v50 }
  0x1d   : > { %599 = vperm.xlu2 %4577, %v333_v7   ;;  %v4288_v57 = vld [vmem:[%s6432_s4] sm:$0xff]  ;;  %v456_v58 = vmul.f32 %v4809_v54, %v4387_v49  ;;  %v4347_v0 = vunpack.c.h.bf16 %v4812_v56  ;;  %v454_v2 = vmul.f32 %v4809_v54, %v4383_v55  ;;  %v452_v7 = vmul.f32 %v4809_v54, %v4379_v59 }
  0x1e   : > { %594 = vperm.xlu1 %4576, %v332_v8   ;;  %589 = vperm.xlu0 %4575, %v331_v9   ;;  %v4826_v63 = vld [vmem:[%s6430_s2] ss:$0 sm:$0xff] }
  0x1f   : > { %4547 = vmatpush.bf16.msra.mxu2 %v4293_v34  ;;  %1388 = vmatpush.bf16.msra.mxu0 %v4293_v34  ;;  %v4509_v5 = vld [vmem:[%s4786_s14 + $0x20] sm:$0xff]   ;;  %v496_v6 = vadd.f32 %v4826_v63, %v456_v58  ;;  %v482_v8 = vadd.f32 %v4826_v63, %v442_v60  ;;  %v485_v9 = vadd.f32 %v4826_v63, %v445_v62 }
  0x20   : > { %4546 = vmatpush.bf16.msra.mxu1 %v4293_v34  ;;  %4548 = vmatpush.bf16.msra.mxu3 %v4293_v34 }
  0x23   : > { %4550 = vmatpush.bf16.msra.mxu2 %v4292_v37  ;;  %1389 = vmatpush.bf16.msra.mxu0 %v4292_v37 }
  0x24   : > { %4549 = vmatpush.bf16.msra.mxu1 %v4292_v37  ;;  %4551 = vmatpush.bf16.msra.mxu3 %v4292_v37  ;;  %v4592_v37 = vmov 0.0  }
  0x25   : > { %554 = vperm.xlu2 %4577, %v324_v10   ;;  %v4370_v10 = vunpack.c.l.bf16 %v4830_v1  ;;  %768 = vst [vmem:[#allocation2 + $0x150] sm:$0x7] %v4592_v37 }
  0x26   : > { %604 = vperm.xlu0 %4575, %v334_v11   ;;  %549 = vperm.xlu1 %4576, %v323_v12   ;;  %v436_v11 = vmul.f32 %v4809_v54, %v4347_v0  ;;  %v4363_v12 = vunpack.c.h.bf16 %v4509_v5  ;;  %763 = vst [vmem:[#allocation2 + $0x100] sm:$0xff] %v4592_v37 }
  0x27   : > { %4553 = vmatpush.bf16.msra.mxu2 %v4291_v42  ;;  %1390 = vmatpush.bf16.msra.mxu0 %v4291_v42  ;;  %767 = vst [vmem:[#allocation2 + $0x140] sm:$0x7] %v4592_v37 }
  0x28   : > { %4552 = vmatpush.bf16.msra.mxu1 %v4291_v42  ;;  %4554 = vmatpush.bf16.msra.mxu3 %v4291_v42  ;;  %769 = vst [vmem:[#allocation2 + $0x50] sm:$0xfc] %v4592_v37 }
  0x29   : > { %770 = vst [vmem:[#allocation2 + $0x1b0] sm:$0xfc] %v4592_v37 }
  0x2a   : > { %773 = vst [vmem:[#allocation2 + $0x210] sm:$0xff] %v4592_v37 }
  0x2b   : > { %4556 = vmatpush.bf16.msra.mxu2 %v4290_v43  ;;  %1391 = vmatpush.bf16.msra.mxu0 %v4290_v43  ;;  %774 = vst [vmem:[#allocation2 + $0x230] sm:$0xff] %v4592_v37 }
  0x2c   : > { %4555 = vmatpush.bf16.msra.mxu1 %v4290_v43  ;;  %4557 = vmatpush.bf16.msra.mxu3 %v4290_v43 }
  0x2d   : > { %609 = vperm.xlu2 %4577, %v335_v13   ;;  %v4362_v13 = vunpack.c.l.bf16 %v4509_v5 }
  0x2e   : > { %659 = vperm.xlu0 %4575, %v345_v14   ;;  %664 = vperm.xlu1 %4576, %v346_v15   ;;  %v494_v14 = vadd.f32 %v4826_v63, %v454_v2  ;;  %v455_v15 = vmul.f32 %v4809_v54, %v4386_v3 }
  0x2f   : > { %4559 = vmatpush.bf16.msra.mxu2 %v4289_v48  ;;  %1392 = vmatpush.bf16.msra.mxu0 %v4289_v48 }
  0x30   : > { %4558 = vmatpush.bf16.msra.mxu1 %v4289_v48  ;;  %4560 = vmatpush.bf16.msra.mxu3 %v4289_v48 }
  0x33   : > { %4562 = vmatpush.bf16.msra.mxu2 %v4288_v57  ;;  %1393 = vmatpush.bf16.msra.mxu0 %v4288_v57 }
  0x34   : > { %4561 = vmatpush.bf16.msra.mxu1 %v4288_v57  ;;  %4563 = vmatpush.bf16.msra.mxu3 %v4288_v57 }
  0x35   : > { %564 = vperm.xlu2 %4577, %v326_v16   ;;  %v453_v16 = vmul.f32 %v4809_v54, %v4382_v4 }
  0x36   : > { %614 = vperm.xlu0 %4575, %v336_v17   ;;  %559 = vperm.xlu1 %4576, %v325_v18   ;;  %v4844_v17 = vld [vmem:[%s4786_s14 + $0x8] sm:$0xff]   ;;  %v532_v18 = vmax.f32 %v496_v6, 0.0 }
  0x37   : > { %v4351_v29 = vunpack.c.h.bf16 %v4844_v17  ;;  %v493_v32 = vadd.f32 %v4826_v63, %v453_v16 }
  0x39   : > { %v529_v50 = vmax.f32 %v493_v32, 0.0 }
  0x3d   : > { %684 = vperm.xlu2 %4577, %v350_v19   ;;  %v492_v19 = vadd.f32 %v4826_v63, %v452_v7 }
  0x3e   : > { %669 = vperm.xlu0 %4575, %v347_v20   ;;  %674 = vperm.xlu1 %4576, %v348_v21   ;;  %v518_v20 = vmax.f32 %v482_v8, 0.0  ;;  %v521_v21 = vmax.f32 %v485_v9, 0.0 }
  0x3f   : > { %v528_v34 = vmax.f32 %v492_v19, 0.0 }
  0x45   : > { %699 = vperm.xlu2 %4577, %v353_v22  }
  0x46   : > { %689 = vperm.xlu0 %4575, %v351_v23   ;;  %694 = vperm.xlu1 %4576, %v352_v24   ;;  %v447_v23 = vmul.f32 %v4809_v54, %v4370_v10 }
  0x4d   : > { %624 = vperm.xlu2 %4577, %v338_v25  }
  0x4e   : > { %704 = vperm.xlu0 %4575, %v354_v26   ;;  %619 = vperm.xlu1 %4576, %v337_v27   ;;  %v4855_v26 = vadd.f32 %v4826_v63, %v436_v11  ;;  %v444_v27 = vmul.f32 %v4809_v54, %v4363_v12  ;;  %v4516_v12 = vld [vmem:[%s4786_s14 + $0x58] sm:$0xff]  }
  0x50   : > { %v512_v42 = vmax.f32 %v4855_v26, 0.0  ;;  %v4878_v43 = vadd.f32 %v4826_v63, %v444_v27 }
  0x52   : > { %v520_v5 = vmax.f32 %v4878_v43, 0.0 }
  0x55   : > { %679 = vperm.xlu2 %4577, %v349_v28   ;;  %v443_v28 = vmul.f32 %v4809_v54, %v4362_v13 }
  0x56   : > { %569 = vperm.xlu0 %4575, %v327_v30   ;;  %574 = vperm.xlu1 %4576, %v328_v31   ;;  %v530_v30 = vmax.f32 %v494_v14, 0.0  ;;  %v495_v31 = vadd.f32 %v4826_v63, %v455_v15 }
  0x57   : > { %v4881_v44 = vadd.f32 %v4826_v63, %v443_v28  ;;  %v4390_v28 = vunpack.c.l.bf16 %v4516_v12 }
  0x58   : > { %v531_v49 = vmax.f32 %v495_v31, 0.0 }
  0x59   : > { %v519_v6 = vmax.f32 %v4881_v44, 0.0 }
  0x5d   : > { %629 = vperm.xlu2 %4577, %v339_v33  }
  0x5e   : > { %709 = vperm.xlu0 %4575, %v355_v35   ;;  %714 = vperm.xlu1 %4576, %v356_v36   ;;  %v4367_v35 = vunpack.c.h.bf16 %v4795_v47  ;;  %v4867_v36 = vld [vmem:[%s4786_s14 + $0x68] sm:$0xff]   ;;  %v438_v47 = vmul.f32 %v4809_v54, %v4351_v29  ;;  %v4391_v29 = vunpack.c.h.bf16 %v4516_v12 }
  0x5f   : > { %v4399_v51 = vunpack.c.h.bf16 %v4867_v36 }
  0x60   : > { %v4910_v7 = vadd.f32 %v4826_v63, %v438_v47 }
  0x61   : > { %v462_v11 = vmul.f32 %v4809_v54, %v4399_v51 }
  0x65   : > { %724 = vperm.xlu2 %4577, %v358_v38   ;;  %v4346_v38 = vunpack.c.l.bf16 %v4812_v56  ;;  %v446_v56 = vmul.f32 %v4809_v54, %v4367_v35  ;;  %v4936_v35 = vld [vmem:[%s4786_s14 + $0x78] sm:$0xff]  }
  0x66   : > { %579 = vperm.xlu0 %4575, %v329_v39   ;;  %719 = vperm.xlu1 %4576, %v357_v40   ;;  %v4874_v40 = vadd.f32 %v4826_v63, %v447_v23  ;;  %v4406_v12 = vunpack.c.l.bf16 %v4936_v35 }
  0x67   : > { %v4772_v41 = vpop.permute.xlu2 %654  ;;  %v435_v57 = vmul.f32 %v4809_v54, %v4346_v38  ;;  %v4920_v15 = vadd.f32 %v4826_v63, %v446_v56  ;;  %v4955_v56 = vld [vmem:[%s4786_s14 + $0x38] sm:$0xff]  }
  0x68   : > { %6498 = vst [vmem:[#allocation3_spill] sm:$0xff] %v4772_v41  ;;  %v4863_v33 = vmul.f32 %v4772_v41, %v532_v18  ;;  %v523_v0 = vmax.f32 %v4874_v40, 0.0 }
  0x69   : > { %v4923_v16 = vadd.f32 %v4826_v63, %v435_v57  ;;  %v522_v37 = vmax.f32 %v4920_v15, 0.0 }
  0x6a   : > { %v853_v52 = vrot.slane %v4863_v33, 5  ;;  %v6447_v58 = vrot.slane %v4863_v33, 6 }
  0x6f   : > { %v4789_v45 = vpop.permute.xlu2 %584 }
  0x70   : > { %6499 = vst [vmem:[#allocation4_spill] sm:$0xff] %v4789_v45  ;;  %v4871_v39 = vmul.f32 %v4789_v45, %v518_v20 }
  0x72   : > { %v6439_v59 = vrot.slane %v4871_v39, 5  ;;  %v6438_v60 = vrot.slane %v4871_v39, 6 }
  0x77   : > { %v4820_v61 = vpop.permute.xlu2 %599 }
  0x78   : > { %6500 = vst [vmem:[#allocation5_spill] sm:$0xff] %v4820_v61  ;;  %v4885_v48 = vmul.f32 %v4820_v61, %v521_v21 }
  0x7a   : > { %v831_v8 = vrot.slane %v4885_v48, 5  ;;  %v977_v13 = vrot.slane %v4885_v48, 6 }
  0x7f   : > { %v4847_v22 = vpop.permute.xlu2 %554 }
  0x80   : > { %6501 = vst [vmem:[#allocation6_spill] sm:$0xff] %v4847_v22  ;;  %v4850_v24 = vpop.permute.xlu1 %644  ;;  %v4852_v25 = vpop.permute.xlu0 %634 }
  0x81   : > { %6502 = vst [vmem:[#allocation7_spill] sm:$0xff] %v4850_v24  ;;  %v4890_v55 = vmul.f32 %v4850_v24, %v530_v30  ;;  %v4901_v2 = vmul.f32 %v4852_v25, %v528_v34  ;;  %v4933_v34 = vadd.f32 %v4826_v63, %v462_v11  ;;  %v457_v11 = vmul.f32 %v4809_v54, %v4390_v28 }
  0x82   : > { %6503 = vst [vmem:[#allocation8_spill] sm:$0xff] %v4852_v25 }
  0x83   : > { %v849_v14 = vrot.slane %v4890_v55, 5  ;;  %v995_v18 = vrot.slane %v4890_v55, 6  ;;  %v6441_v23 = vrot.slane %v4901_v2, 5  ;;  %v6440_v38 = vrot.slane %v4901_v2, 6 }
  0x87   : > { %v4897_v62 = vpop.permute.xlu2 %609 }
  0x88   : > { %6504 = vst [vmem:[#allocation9_spill] sm:$0xff] %v4897_v62  ;;  %v4903_v3 = vpop.permute.xlu1 %649  ;;  %v4905_v4 = vpop.permute.xlu0 %639 }
  0x89   : > { %6505 = vst [vmem:[#allocation10_spill] sm:$0xff] %v4903_v3  ;;  %v747_v9 = vmul.f32 %v4903_v3, %v531_v49  ;;  %v745_v10 = vmul.f32 %v4905_v4, %v529_v50  ;;  %v511_v50 = vmax.f32 %v4923_v16, 0.0 }
  0x8a   : > { %6506 = vst [vmem:[#allocation11_spill] sm:$0xff] %v4905_v4 }
  0x8b   : > { %v851_v19 = vrot.slane %v747_v9, 5  ;;  %v997_v20 = vrot.slane %v747_v9, 6  ;;  %v847_v21 = vrot.slane %v745_v10, 5  ;;  %v993_v27 = vrot.slane %v745_v10, 6 }
  0x8d   : > { %v852_v30 = vsel %vm811_vm0, %v849_v14, %v851_v19  ;;  %v854_v31 = vsel %vm811_vm0, %v851_v19, %v853_v52  ;;  %v998_v32 = vsel %vm957_vm1, %v995_v18, %v997_v20  ;;  %v1000_v43 = vsel %vm957_vm1, %v997_v20, %v6447_v58 }
  0x8e   : > { %940 = vst [vmem:[#allocation2 + $0xf0] sm:$0xff] %v852_v30  ;;  %v848_v44 = vsel %vm811_vm0, %v6441_v23, %v847_v21  ;;  %v850_v47 = vsel %vm811_vm0, %v847_v21, %v849_v14  ;;  %v4952_v55 = vpack.c.bf16 %v854_v31, %v852_v30  ;;  %v994_v57 = vsel %vm957_vm1, %v6440_v38, %v993_v27 }
  0x8f   : > { %941 = vst [vmem:[#allocation2 + $0x228] sm:$0xff] %v854_v31  ;;  %v4946_v49 = vpop.permute.xlu2 %564  ;;  %v4950_v51 = vpack.c.bf16 %v850_v47, %v848_v44  ;;  %v458_v14 = vmul.f32 %v4809_v54, %v4391_v29  ;;  %v4974_v21 = vmul.f32 %v4847_v22, %v512_v42  ;;  %v996_v28 = vsel %vm957_vm1, %v993_v27, %v995_v18 }
  0x90   : > { %6507 = vst [vmem:[#allocation12_spill] sm:$0xff] %v4946_v49  ;;  %v4960_v9 = vpop.permute.xlu1 %594  ;;  %v4962_v10 = vpop.permute.xlu0 %589  ;;  %v6442_v20 = vrot.slane %v4952_v55, 1  ;;  %v4371_v30 = vunpack.c.h.bf16 %v4830_v1  ;;  %v4375_v29 = vunpack.c.h.bf16 %v4955_v56  ;;  %v4985_v42 = vadd.f32 %v4826_v63, %v457_v11 }
  0x91   : > { %1086 = vst [vmem:[#allocation2 + $0x40] sm:$0xff] %v998_v32  ;;  %v736_v15 = vmul.f32 %v4960_v9, %v520_v5  ;;  %v735_v16 = vmul.f32 %v4962_v10, %v519_v6  ;;  %v6437_v19 = vrot.slane %v4950_v51, 1  ;;  %v465_v18 = vmul.f32 %v4809_v54, %v4406_v12 }
  0x92   : > { %6508 = vst [vmem:[#allocation13_spill] sm:$0xff] %v4960_v9  ;;  %v4350_v1 = vunpack.c.l.bf16 %v4844_v17  ;;  %v5004_v17 = vmul.f32 %v4897_v62, %v523_v0  ;;  %v448_v11 = vmul.f32 %v4809_v54, %v4371_v30  ;;  %v450_v0 = vmul.f32 %v4809_v54, %v4375_v29 }
  0x93   : > { %6509 = vst [vmem:[#allocation14_spill] sm:$0xff] %v4962_v10  ;;  %v829_v5 = vrot.slane %v736_v15, 5  ;;  %v975_v31 = vrot.slane %v736_v15, 6  ;;  %v827_v6 = vrot.slane %v735_v16, 5  ;;  %v973_v32 = vrot.slane %v735_v16, 6 }
  0x94   : > { %1087 = vst [vmem:[#allocation2 + $0x1f0] sm:$0xff] %v1000_v43  ;;  %v1305_v26 = vsel %vm1282_vm2, %v6437_v19, %v6442_v20  ;;  %v514_v15 = vmax.f32 %v4910_v7, 0.0  ;;  %v6443_v16 = vrot.slane %v4974_v21, 5  ;;  %v437_v7 = vmul.f32 %v4809_v54, %v4350_v1 }
  0x95   : > { %938 = vst [vmem:[#allocation2 + $0x68] sm:$0xff] %v848_v44  ;;  %v832_v27 = vsel %vm811_vm0, %v829_v5, %v831_v8  ;;  %v978_v43 = vsel %vm957_vm1, %v975_v31, %v977_v13  ;;  %v828_v44 = vsel %vm811_vm0, %v6439_v59, %v827_v6  ;;  %1444 = vmatmul.bf16.vlgmr.msra.gmra.mxu2 %v1305_v26  ;;  %v533_v29 = vmax.f32 %v4985_v42, 0.0 }
  0x96   : > { %939 = vst [vmem:[#allocation2 + $0x1f8] sm:$0xff] %v850_v47  ;;  %v4999_v47 = vadd.f32 %v4826_v63, %v458_v14  ;;  %v974_v12 = vsel %vm957_vm1, %v6438_v60, %v973_v32  ;;  %v976_v30 = vsel %vm957_vm1, %v973_v32, %v975_v31  ;;  %v5028_v19 = vadd.f32 %v4826_v63, %v465_v18  ;;  %v4517_v60 = vld [vmem:[%s4786_s14 + $0x60] sm:$0xff]  }
  0x97   : > { %1084 = vst [vmem:[#allocation2 + $0x138] sm:$0xff] %v994_v57  ;;  %v830_v57 = vsel %vm811_vm0, %v827_v6, %v829_v5  ;;  %v5012_v14 = vpop.permute.xlu2 %684  ;;  %v6446_v59 = vrot.slane %v5004_v17, 5  ;;  %v6445_v31 = vrot.slane %v5004_v17, 6  ;;  %v5035_v1 = vadd.f32 %v4826_v63, %v448_v11 }
  0x98   : > { %1085 = vst [vmem:[#allocation2 + $0xd0] sm:$0xff] %v996_v28  ;;  %v6444_v28 = vrot.slane %v4974_v21, 6  ;;  %v5019_v5 = vpop.permute.xlu0 %604  ;;  %v5021_v6 = vpop.permute.xlu1 %549  ;;  %v534_v32 = vmax.f32 %v4999_v47, 0.0  ;;  %v5038_v42 = vadd.f32 %v4826_v63, %v450_v0  ;;  %v5041_v18 = vmul.f32 %v4946_v49, %v514_v15  ;;  %v4287_v47 = vld [vmem:[%s6431_s3 + $0x78] sm:$0xff] }
  0x99   : > { %930 = vst [vmem:[#allocation2 + $0x108] sm:$0xff] %v832_v27  ;;  %v738_v26 = vmul.f32 %v5019_v5, %v522_v37  ;;  %v5044_v23 = vadd.f32 %v4826_v63, %v437_v7  ;;  %v5046_v20 = vpack.c.bf16 %v830_v57, %v828_v44  ;;  %1680 = vmatpush.bf16.msrb.mxu2 %v4287_v47 }
  0x9a   : > { %1076 = vst [vmem:[#allocation2 + $0x180] sm:$0xff] %v978_v43  ;;  %v727_v43 = vmul.f32 %v5021_v6, %v511_v50 }
  0x9b   : > { %6510 = vst [vmem:[#allocation15_spill] sm:$0xff] %v5012_v14  ;;  %v833_v37 = vrot.slane %v738_v26, 5  ;;  %v979_v38 = vrot.slane %v738_v26, 6  ;;  %v4395_v26 = vunpack.c.h.bf16 %v4517_v60  ;;  %v6448_v47 = vrot.slane %v5046_v20, 1 }
  0x9c   : > { %928 = vst [vmem:[#allocation2 + $0x130] sm:$0xff] %v828_v44  ;;  %v812_v50 = vrot.slane %v727_v43, 5  ;;  %v958_v44 = vrot.slane %v727_v43, 6 }
  0x9d   : > { %6511 = vst [vmem:[#allocation16_spill] sm:$0xff] %v5019_v5  ;;  %v834_v11 = vsel %vm811_vm0, %v831_v8, %v833_v37  ;;  %v5057_v0 = vsel %vm811_vm0, %v833_v37, %v6446_v59  ;;  %v980_v15 = vsel %vm957_vm1, %v977_v13, %v979_v38  ;;  %v4398_v8 = vunpack.c.l.bf16 %v4867_v36 }
  0x9e   : > { %6512 = vst [vmem:[#allocation17_spill] sm:$0xff] %v5021_v6  ;;  %v5065_v7 = vpack.c.bf16 %v834_v11, %v832_v27  ;;  %v814_v48 = vsel %vm811_vm0, %v812_v50, %v6443_v16  ;;  %v524_v37 = vmax.f32 %v5035_v1, 0.0  ;;  %v960_v1 = vsel %vm957_vm1, %v958_v44, %v6444_v28 }
  0x9f   : > { %929 = vst [vmem:[#allocation2 + $0x240] sm:$0xff] %v830_v57  ;;  %v1243_v57 = vld [vmem:[#allocation2 + $0x100] sm:$0xfc]  ;;  %v5072_v13 = vpop.permute.xlu2 %699  ;;  %v460_v16 = vmul.f32 %v4809_v54, %v4395_v26 }
  0xa0   : > { %1074 = vst [vmem:[#allocation2 + $0x208] sm:$0xff] %v974_v12  ;;  %v4394_v12 = vunpack.c.l.bf16 %v4517_v60  ;;  %v5077_v27 = vpop.permute.xlu0 %659  ;;  %v5079_v36 = vpop.permute.xlu1 %664  ;;  %v1245_v60 = vpack.c.bf16 0.0, %v1243_v57  ;;  %v513_v57 = vmax.f32 %v5044_v23, 0.0 }
  0xa1   : > { %1075 = vst [vmem:[#allocation2 + $0x218] sm:$0xff] %v976_v30  ;;  %v982_v30 = vsel %vm957_vm1, %v979_v38, %v6445_v31  ;;  %v5090_v43 = vmul.f32 %v5079_v36, %v534_v32  ;;  %v4519_v38 = vld [vmem:[%s4786_s14 + $0x70] sm:$0xff]  }
  0xa2   : > { %920 = vst [vmem:[#allocation2 + $0x140] sm:$0xf8] %v812_v50  ;;  %v459_v50 = vmul.f32 %v4809_v54, %v4394_v12  ;;  %v1283_v59 = vrot.slane %v1245_v60, 1  ;;  %v4402_v58 = vunpack.c.l.bf16 %v4519_v38  ;;  %v4403_v60 = vunpack.c.h.bf16 %v4519_v38 }
  0xa3   : > { %931 = vst [vmem:[#allocation2 + $0x98] sm:$0xff] %v834_v11  ;;  %v6451_v11 = vrot.slane %v5065_v7, 1  ;;  %v6450_v32 = vrot.slane %v5090_v43, 5  ;;  %v6449_v31 = vrot.slane %v5090_v43, 6  ;;  %v4407_v38 = vunpack.c.h.bf16 %v4936_v35 }
  0xa4   : > { %932 = vst [vmem:[#allocation2 + $0x1e8] sm:$0xff] %v5057_v0  ;;  %v5104_v40 = vadd.f32 %v4826_v63, %v459_v50 }
  0xa5   : > { %6513 = vst [vmem:[#allocation18_spill] sm:$0xff] %v5072_v13  ;;  %v1295_v12 = vsel %vm1282_vm2, %v6448_v47, %v6451_v11  ;;  %v4378_v47 = vunpack.c.l.bf16 %v4804_v53 }
  0xa6   : > { %1077 = vst [vmem:[#allocation2 + $0xc8] sm:$0xff] %v980_v15  ;;  %v749_v15 = vmul.f32 %v5077_v27, %v533_v29  ;;  %1419 = vmatmul.bf16.vlgmr.msra.gmra.mxu1 %v1295_v12  ;;  %v464_v12 = vmul.f32 %v4809_v54, %v4403_v60 }
  0xa7   : > { %6514 = vst [vmem:[#allocation19_spill] sm:$0xff] %v5077_v27  ;;  %v5240_v27 = vld [vmem:[%s4786_s14 + $0x10] sm:$0xff]  }
  0xa8   : > { %6515 = vst [vmem:[#allocation20_spill] sm:$0xff] %v5079_v36  ;;  %v855_v28 = vrot.slane %v749_v15, 5  ;;  %v1001_v29 = vrot.slane %v749_v15, 6  ;;  %v5148_v35 = vpop.permute.xlu1 %559 }
  0xa9   : > { %1078 = vst [vmem:[#allocation2 + $0x1a0] sm:$0xff] %v982_v30  ;;  %v461_v30 = vmul.f32 %v4809_v54, %v4398_v8  ;;  %v1107_v23 = vld [vmem:[#allocation2 + $0x140] sm:$0xff]  ;;  %v6516_v8 = vrot.slane %v4863_v33, 6  ;;  %v4279_v33 = vld [vmem:[%s6431_s3 + $0x38] sm:$0xff] }
  0xaa   : > { %921 = vst [vmem:[#allocation2 + $0x190] sm:$0xff] %v814_v48  ;;  %v1004_v50 = vsel %vm957_vm1, %v1001_v29, %v6449_v31  ;;  %v5119_v53 = vpack.c.bf16 %v814_v48, %v1107_v23  ;;  %v6517_v48 = vmax.f32 %v4933_v34, 0.0  ;;  %v5139_v23 = vpop.permute.xlu2 %624  ;;  %v5144_v31 = vld [vmem:[%s4786_s14 + $0x88] sm:$0xff]   ;;  %1581 = vmatpush.bf16.msrb.mxu1 %v4279_v33 }
  0xab   : > { %1066 = vst [vmem:[#allocation2 + $0x150] sm:$0xfc] %v958_v44  ;;  %v856_v44 = vsel %vm811_vm0, %v853_v52, %v855_v28  ;;  %v1002_v26 = vsel %vm957_vm1, %v6516_v8, %v1001_v29  ;;  %v4303_v52 = vld [vmem:[%s6431_s3 + $0xb8] sm:$0xff]  ;;  %v500_v8 = vadd.f32 %v4826_v63, %v460_v16  ;;  %v4415_v33 = vunpack.c.h.bf16 %v5144_v31 }
  0xac   : > { %1067 = vst [vmem:[#allocation2 + $0xe8] sm:$0xff] %v960_v1  ;;  %v858_v1 = vsel %vm811_vm0, %v855_v28, %v6450_v32  ;;  %v4286_v28 = vld [vmem:[%s6431_s3 + $0x70] sm:$0xff]  ;;  %v5137_v29 = vmul.f32 %v5012_v14, %v6517_v48  ;;  %v5146_v32 = vpop.permute.xlu0 %614  ;;  %v6452_v11 = vrot.slane %v5119_v53, 1  ;;  %v463_v48 = vmul.f32 %v4809_v54, %v4402_v58  ;;  %2394 = vmatpush.bf16.msrb.mxu0 %v4303_v52 }
  0xad   : > { %942 = vst [vmem:[#allocation2 + $0x170] sm:$0xff] %v856_v44  ;;  %v5121_v15 = vpack.c.bf16 %v858_v1, %v856_v44  ;;  %v501_v44 = vadd.f32 %v4826_v63, %v461_v30  ;;  %v5155_v16 = vmul.f32 %v5146_v32, %v524_v37  ;;  %v729_v30 = vmul.f32 %v5148_v35, %v513_v57 }
  0xae   : > { %1088 = vst [vmem:[#allocation2 + $0x10] sm:$0xff] %v1002_v26  ;;  %v451_v26 = vmul.f32 %v4809_v54, %v4378_v47  ;;  %1681 = vmatpush.bf16.msrb.mxu2 %v4286_v28  ;;  %v1285_v34 = vsel %vm1282_vm2, %v1283_v59, %v6452_v11  ;;  %v6522_v47 = vrot.slane %v4952_v55, 1  ;;  %v466_v37 = vmul.f32 %v4809_v54, %v4407_v38 }
  0xaf   : > { %6518 = vst [vmem:[#allocation21_spill] sm:$0xff] %v5139_v23  ;;  %v6521_v58 = vrot.slane %v5121_v15, 1  ;;  %v6454_v57 = vrot.slane %v5155_v16, 5  ;;  %v815_v60 = vrot.slane %v729_v30, 5  ;;  %v961_v52 = vrot.slane %v729_v30, 6  ;;  %1394 = vmatmul.bf16.vlgmr.msra.gmra.mxu0 %v1285_v34 }
  0xb0   : > { %943 = vst [vmem:[#allocation2 + $0xb0] sm:$0xff] %v858_v1  ;;  %v535_v1 = vmax.f32 %v5104_v40, 0.0  ;;  %v6455_v40 = vrot.slane %v5155_v16, 6  ;;  %v537_v28 = vmax.f32 %v501_v44, 0.0  ;;  %v536_v59 = vmax.f32 %v500_v8, 0.0 }
  0xb1   : > { %6519 = vst [vmem:[#allocation22_spill] sm:$0xff] %v5146_v32  ;;  %v5173_v11 = vadd.f32 %v4826_v63, %v463_v48  ;;  %v5176_v14 = vadd.f32 %v4826_v63, %v451_v26  ;;  %v6523_v38 = vrot.slane %v5004_v17, 5  ;;  %v6524_v30 = vrot.slane %v5004_v17, 6  ;;  %v4278_v17 = vld [vmem:[%s6431_s3 + $0x30] sm:$0xff]  ;;  %v5231_v26 = vpop.permute.xlu1 %674 }
  0xb2   : > { %6520 = vst [vmem:[#allocation23_spill] sm:$0xff] %v5148_v35  ;;  %v6525_v44 = vrot.slane %v4974_v21, 5  ;;  %v4374_v48 = vunpack.c.l.bf16 %v4955_v56  ;;  %v4302_v56 = vld [vmem:[%s6431_s3 + $0xb0] sm:$0xff]  ;;  %1582 = vmatpush.bf16.msrb.mxu1 %v4278_v17  ;;  %v752_v36 = vmul.f32 %v5231_v26, %v536_v59  ;;  %v6532_v17 = vrot.slane %v5065_v7, 1  ;;  %v4301_v59 = vld [vmem:[%s6431_s3 + $0xa8] sm:$0xff] }
  0xb3   : > { %1089 = vst [vmem:[#allocation2 + $0x1d0] sm:$0xff] %v1004_v50  ;;  %v1307_v50 = vsel %vm1282_vm2, %v6522_v47, %v6521_v58  ;;  %v838_v58 = vsel %vm811_vm0, %v6523_v38, %v6454_v57  ;;  %v984_v34 = vsel %vm957_vm1, %v6524_v30, %v6455_v40  ;;  %v4285_v30 = vld [vmem:[%s6431_s3 + $0x68] sm:$0xff]  ;;  %v470_v40 = vmul.f32 %v4809_v54, %v4415_v33 }
  0xb4   : > { %1449 = vmatmul.bf16.gmra.mxu2 %v1307_v50  ;;  %v816_v8 = vsel %vm811_vm0, %v6525_v44, %v815_v60  ;;  %933 = vst [vmem:[#allocation2 + $0x188] sm:$0xff] %v838_v58  ;;  %v6526_v50 = vrot.slane %v5041_v18, 5  ;;  %v5198_v57 = vpack.c.bf16 %v838_v58, %v5057_v0  ;;  %v6527_v44 = vrot.slane %v4974_v21, 6  ;;  %v5214_v0 = vpop.permute.xlu2 %679  ;;  %v5228_v21 = vpop.permute.xlu0 %669  ;;  %2395 = vmatpush.bf16.msrb.mxu0 %v4302_v56 }
  0xb5   : > { %1079 = vst [vmem:[#allocation2 + $0xc0] sm:$0xff] %v984_v34  ;;  %v5217_v58 = vadd.f32 %v4826_v63, %v464_v12  ;;  %v6529_v47 = vrot.slane %v5041_v18, 6  ;;  %v539_v12 = vmax.f32 %v5173_v11, 0.0  ;;  %v751_v33 = vmul.f32 %v5228_v21, %v535_v1  ;;  %1682 = vmatpush.bf16.msrb.mxu2 %v4285_v30 }
  0xb6   : > { %v818_v38 = vsel %vm811_vm0, %v815_v60, %v6526_v50  ;;  %v5212_v60 = vsel %vm957_vm1, %v6527_v44, %v961_v52  ;;  %6528 = vst [vmem:[#allocation24_spill] sm:$0xff] %v5214_v0  ;;  %v5220_v50 = vadd.f32 %v4826_v63, %v466_v37  ;;  %v753_v44 = vmul.f32 %v5214_v0, %v537_v28 }
  0xb7   : > { %922 = vst [vmem:[#allocation2 + $0x198] sm:$0xff] %v816_v8  ;;  %v5226_v34 = vsel %vm957_vm1, %v961_v52, %v6529_v47  ;;  %v6459_v37 = vrot.slane %v5198_v57, 1  ;;  %v527_v52 = vmax.f32 %v5176_v14, 0.0  ;;  %v449_v47 = vmul.f32 %v4809_v54, %v4374_v48  ;;  %v4277_v14 = vld [vmem:[%s6431_s3 + $0x28] sm:$0xff] }
  0xb8   : > { %6530 = vst [vmem:[#allocation25_spill] sm:$0xff] %v5228_v21  ;;  %v863_v28 = vrot.slane %v753_v44, 5  ;;  %v1009_v11 = vrot.slane %v753_v44, 6  ;;  %v5243_v0 = vpack.c.bf16 %v818_v38, %v816_v8  ;;  %v6533_v48 = vmax.f32 %v5038_v42, 0.0  ;;  %1583 = vmatpush.bf16.msrb.mxu1 %v4277_v14  ;;  %2396 = vmatpush.bf16.msrb.mxu0 %v4301_v59 }
  0xb9   : > { %6531 = vst [vmem:[#allocation26_spill] sm:$0xff] %v5231_v26  ;;  %v1297_v1 = vsel %vm1282_vm2, %v6532_v17, %v6459_v37  ;;  %v859_v8 = vrot.slane %v751_v33, 5  ;;  %v861_v30 = vrot.slane %v752_v36, 5  ;;  %v6534_v44 = vrot.slane %v5137_v29, 5 }
  0xba   : > { %923 = vst [vmem:[#allocation2] sm:$0xff] %v818_v38  ;;  %v5259_v56 = vmul.f32 %v5139_v23, %v6533_v48  ;;  %v1005_v38 = vrot.slane %v751_v33, 6  ;;  %1424 = vmatmul.bf16.gmra.mxu1 %v1297_v1  ;;  %v1007_v37 = vrot.slane %v752_v36, 6  ;;  %v540_v26 = vmax.f32 %v5217_v58, 0.0 }
  0xbb   : > { %1068 = vst [vmem:[#allocation2 + $0x160] sm:$0xff] %v5212_v60  ;;  %v5265_v17 = vsel %vm811_vm0, %v863_v28, %v6534_v44  ;;  %v4354_v21 = vunpack.c.l.bf16 %v5240_v27  ;;  %v6535_v42 = vrot.slane %v5090_v43, 5  ;;  %v6536_v33 = vrot.slane %v5090_v43, 6 }
  0xbc   : > { %1069 = vst [vmem:[#allocation2 + $0x30] sm:$0xff] %v5226_v34  ;;  %v6537_v44 = vrot.slane %v5137_v29, 6  ;;  %v862_v58 = vsel %vm811_vm0, %v859_v8, %v861_v30  ;;  %v5281_v14 = vrot.slane %v5243_v0, 1  ;;  %v864_v3 = vsel %vm811_vm0, %v861_v30, %v863_v28  ;;  %v5296_v59 = vpop.permute.xlu0 %689 }
  0xbd   : > { %v860_v48 = vsel %vm811_vm0, %v6535_v42, %v859_v8  ;;  %v1006_v1 = vsel %vm957_vm1, %v6536_v33, %v1005_v38  ;;  %947 = vst [vmem:[#allocation2 + $0x118] sm:$0xff] %v5265_v17  ;;  %v510_v42 = vadd.f32 %v4826_v63, %v470_v40  ;;  %v5293_v8 = vadd.f32 %v4826_v63, %v449_v47 }
  0xbe   : > { %v1012_v36 = vsel %vm957_vm1, %v1009_v11, %v6537_v44  ;;  %944 = vst [vmem:[#allocation2 + $0x20] sm:$0xff] %v860_v48  ;;  %v5285_v41 = vpack.c.bf16 %v862_v58, %v860_v48  ;;  %v5290_v44 = vpop.permute.xlu2 %629  ;;  %v1008_v24 = vsel %vm957_vm1, %v1005_v38, %v1007_v37  ;;  %v5299_v48 = vpop.permute.xlu1 %694  ;;  %v1010_v28 = vsel %vm957_vm1, %v1007_v37, %v1009_v11 }
  0xbf   : > { %1090 = vst [vmem:[#allocation2 + $0xe0] sm:$0xff] %v1006_v1  ;;  %v743_v40 = vmul.f32 %v5290_v44, %v527_v52  ;;  %v4355_v1 = vunpack.c.h.bf16 %v5240_v27  ;;  %v755_v30 = vmul.f32 %v5296_v59, %v539_v12  ;;  %v756_v47 = vmul.f32 %v5299_v48, %v540_v26  ;;  %v4284_v26 = vld [vmem:[%s6431_s3 + $0x60] sm:$0xff] }
  0xc0   : > { %6538 = vst [vmem:[#allocation27_spill] sm:$0xff] %v5290_v44  ;;  %v439_v38 = vmul.f32 %v4809_v54, %v4354_v21  ;;  %v6541_v52 = vrot.slane %v5119_v53, 1  ;;  %v6542_v27 = vrot.slane %v5285_v41, 1  ;;  %v4319_v21 = vld [vmem:[%s6432_s4 + $0x78] sm:$0xff]  ;;  %v6544_v12 = vmax.f32 %v5028_v19, 0.0  ;;  %1683 = vmatpush.bf16.msrb.mxu2 %v4284_v26 }
  0xc1   : > { %1093 = vst [vmem:[#allocation2 + $0x1b8] sm:$0xff] %v1012_v36  ;;  %v843_v36 = vrot.slane %v743_v40, 5  ;;  %v989_v33 = vrot.slane %v743_v40, 6  ;;  %v867_v40 = vrot.slane %v755_v30, 5  ;;  %v869_v19 = vrot.slane %v756_v47, 5  ;;  %2068 = vmatpush.bf16.msrb.mxu3 %v4319_v21 }
  0xc2   : > { %6539 = vst [vmem:[#allocation28_spill] sm:$0xff] %v5296_v59  ;;  %v1287_v43 = vsel %vm1282_vm2, %v6541_v52, %v5281_v14  ;;  %v5325_v11 = vmul.f32 %v5072_v13, %v6544_v12  ;;  %v1013_v52 = vrot.slane %v755_v30, 6  ;;  %v6545_v59 = vrot.slane %v5259_v56, 5 }
  0xc3   : > { %6540 = vst [vmem:[#allocation29_spill] sm:$0xff] %v5299_v48  ;;  %1399 = vmatmul.bf16.gmra.mxu0 %v1287_v43  ;;  %v546_v48 = vmax.f32 %v510_v42, 0.0  ;;  %v525_v12 = vmax.f32 %v5293_v8, 0.0  ;;  %v6546_v43 = vrot.slane %v5137_v29, 5  ;;  %v6547_v30 = vrot.slane %v5137_v29, 6 }
  0xc4   : > { %945 = vst [vmem:[#allocation2 + $0x88] sm:$0xff] %v862_v58  ;;  %v6543_v58 = vrot.slane %v5121_v15, 1  ;;  %v5334_v4 = vsel %vm811_vm0, %v6545_v59, %v843_v36  ;;  %v5351_v59 = vadd.f32 %v4826_v63, %v439_v38  ;;  %v6549_v8 = vrot.slane %v5259_v56, 6 }
  0xc5   : > { %946 = vst [vmem:[#allocation2 + $0xf8] sm:$0xff] %v864_v3  ;;  %v868_v42 = vsel %vm811_vm0, %v6546_v43, %v867_v40  ;;  %v1015_v43 = vrot.slane %v756_v47, 6  ;;  %v870_v38 = vsel %vm811_vm0, %v867_v40, %v869_v19 }
  0xc6   : > { %v1309_v37 = vsel %vm1282_vm2, %v6543_v58, %v6542_v27  ;;  %1091 = vst [vmem:[#allocation2 + $0xd8] sm:$0xff] %v1008_v24  ;;  %v4521_v27 = vld [vmem:[%s4786_s14 + $0x80] sm:$0xff]   ;;  %v440_v24 = vmul.f32 %v4809_v54, %v4355_v1  ;;  %v990_v1 = vsel %vm957_vm1, %v6549_v8, %v989_v33  ;;  %v5360_v44 = vpop.permute.xlu2 %724  ;;  %v5364_v8 = vpop.permute.xlu0 %704 }
  0xc7   : > { %1454 = vmatmul.bf16.gmra.mxu2 %v1309_v37  ;;  %v4276_v58 = vld [vmem:[%s6431_s3 + $0x20] sm:$0xff]  ;;  %1092 = vst [vmem:[#allocation2 + $0x90] sm:$0xff] %v1010_v28  ;;  %v1014_v37 = vsel %vm957_vm1, %v6547_v30, %v1013_v52  ;;  %v6548_v28 = vrot.slane %v4901_v2, 5  ;;  %v4410_v25 = vunpack.c.l.bf16 %v4521_v27  ;;  %v4411_v29 = vunpack.c.h.bf16 %v4521_v27  ;;  %v5369_v26 = vpop.permute.xlu1 %619 }
  0xc8   : > { %936 = vst [vmem:[#allocation2 + $0x260] sm:$0xff] %v5334_v4  ;;  %v871_v30 = vrot.slane %v5325_v11, 5  ;;  %1584 = vmatpush.bf16.msrb.mxu1 %v4276_v58  ;;  %v5367_v47 = vmul.f32 %v5360_v44, %v546_v48  ;;  %v480_v21 = vadd.f32 %v4826_v63, %v440_v24  ;;  %v6554_v58 = vmax.f32 %v5220_v50, 0.0 }
  0xc9   : > { %v5347_v13 = vsel %vm811_vm0, %v843_v36, %v6548_v28  ;;  %948 = vst [vmem:[#allocation2 + $0xa8] sm:$0xff] %v868_v42  ;;  %v6550_v36 = vrot.slane %v4901_v2, 6  ;;  %v5373_v2 = vpack.c.bf16 %v5265_v17, %v864_v3  ;;  %v741_v48 = vmul.f32 %v5369_v26, %v525_v12 }
  0xca   : > { %1094 = vst [vmem:[#allocation2 + $0x288] sm:$0xff] %v1014_v37  ;;  %v872_v27 = vsel %vm811_vm0, %v869_v19, %v871_v30  ;;  %v5380_v40 = vmul.f32 %v5364_v8, %v6554_v58  ;;  %v1016_v37 = vsel %vm957_vm1, %v1013_v52, %v1015_v43  ;;  %v515_v24 = vmax.f32 %v5351_v59, 0.0 }
  0xcb   : > { %v992_v28 = vsel %vm957_vm1, %v989_v33, %v6550_v36  ;;  %6551 = vst [vmem:[#allocation30_spill] sm:$0xff] %v5360_v44  ;;  %v1017_v33 = vrot.slane %v5325_v11, 6  ;;  %v467_v3 = vmul.f32 %v4809_v54, %v4410_v25  ;;  %v468_v17 = vmul.f32 %v4809_v54, %v4411_v29  ;;  %v4283_v11 = vld [vmem:[%s6431_s3 + $0x58] sm:$0xff] }
  0xcc   : > { %937 = vst [vmem:[#allocation2 + $0x1c8] sm:$0xff] %v5347_v13  ;;  %v6472_v19 = vrot.slane %v5380_v40, 5  ;;  %v6471_v12 = vrot.slane %v5380_v40, 6  ;;  %v6473_v52 = vrot.slane %v5367_v47, 5  ;;  %v516_v59 = vmax.f32 %v480_v21, 0.0  ;;  %1684 = vmatpush.bf16.msrb.mxu2 %v4283_v11 }
  0xcd   : > { %6552 = vst [vmem:[#allocation31_spill] sm:$0xff] %v5364_v8  ;;  %v1018_v50 = vsel %vm957_vm1, %v1015_v43, %v1017_v33  ;;  %v5395_v36 = vpack.c.bf16 %v870_v38, %v868_v42  ;;  %v6556_v21 = vrot.slane %v5259_v56, 5  ;;  %v4318_v42 = vld [vmem:[%s6432_s4 + $0x70] sm:$0xff] }
  0xce   : > { %6553 = vst [vmem:[#allocation32_spill] sm:$0xff] %v5369_v26  ;;  %v874_v29 = vsel %vm811_vm0, %v871_v30, %v6472_v19  ;;  %v1020_v43 = vsel %vm957_vm1, %v1017_v33, %v6471_v12  ;;  %v4300_v30 = vld [vmem:[%s6431_s3 + $0xa0] sm:$0xff]  ;;  %v985_v33 = vrot.slane %v741_v48, 6  ;;  %2069 = vmatpush.bf16.msrb.mxu3 %v4318_v42  ;;  %v5434_v12 = vpop.permute.xlu0 %569  ;;  %v6559_v42 = vrot.slane %v5373_v2, 1 }
  0xcf   : > { %1082 = vst [vmem:[#allocation2 + $0x70] sm:$0xff] %v990_v1  ;;  %v839_v1 = vrot.slane %v741_v48, 5  ;;  %v5418_v11 = vpack.c.bf16 %v874_v29, %v872_v27  ;;  %v4358_v48 = vunpack.c.l.bf16 %v4792_v46  ;;  %2397 = vmatpush.bf16.msrb.mxu0 %v4300_v30  ;;  %v5436_v19 = vpop.permute.xlu1 %574  ;;  %v4299_v46 = vld [vmem:[%s6431_s3 + $0x98] sm:$0xff]  ;;  %v6560_v30 = vrot.slane %v5285_v41, 1 }
  0xd0   : > { %1083 = vst [vmem:[#allocation2 + $0x1e0] sm:$0xff] %v992_v28  ;;  %v6555_v28 = vrot.slane %v5155_v16, 5 }
  0xd1   : > { %949 = vst [vmem:[#allocation2 + $0x1a8] sm:$0xff] %v870_v38  ;;  %v842_v25 = vsel %vm811_vm0, %v839_v1, %v6556_v21  ;;  %v5427_v21 = vadd.f32 %v4826_v63, %v467_v3  ;;  %v6561_v3 = vrot.slane %v5367_v47, 6 }
  0xd2   : > { %950 = vst [vmem:[#allocation2 + $0x110] sm:$0xff] %v872_v27  ;;  %v840_v58 = vsel %vm811_vm0, %v6555_v28, %v839_v1  ;;  %v4275_v1 = vld [vmem:[%s6431_s3 + $0x18] sm:$0xff]  ;;  %v4282_v28 = vld [vmem:[%s6431_s3 + $0x50] sm:$0xff]  ;;  %v4414_v27 = vunpack.c.l.bf16 %v5144_v31 }
  0xd3   : > { %1095 = vst [vmem:[#allocation2 + $0x220] sm:$0xff] %v1016_v37  ;;  %v5416_v37 = vpack.c.bf16 %v842_v25, %v840_v58  ;;  %1585 = vmatpush.bf16.msrb.mxu1 %v4275_v1  ;;  %1685 = vmatpush.bf16.msrb.mxu2 %v4282_v28  ;;  %v1311_v1 = vsel %vm1282_vm2, %v6560_v30, %v6559_v42  ;;  %v6562_v28 = vrot.slane %v5155_v16, 6  ;;  %v6565_v42 = vrot.slane %v5418_v11, 1  ;;  %v4317_v16 = vld [vmem:[%s6432_s4 + $0x68] sm:$0xff] }
  0xd4   : > { %1096 = vst [vmem:[#allocation2 + $0x48] sm:$0xff] %v1018_v50  ;;  %v5430_v50 = vadd.f32 %v4826_v63, %v468_v17  ;;  %v731_v17 = vmul.f32 %v5434_v12, %v515_v24  ;;  %v6566_v30 = vrot.slane %v5395_v36, 1  ;;  %2398 = vmatpush.bf16.msrb.mxu0 %v4299_v46  ;;  %2070 = vmatpush.bf16.msrb.mxu3 %v4317_v16 }
  0xd5   : > { %951 = vst [vmem:[#allocation2 + $0xb8] sm:$0xff] %v874_v29  ;;  %v5439_v38 = vrot.slane %v5416_v37, 1  ;;  %v5464_v31 = vsel %vm957_vm1, %v6562_v28, %v985_v33 }
  0xd6   : > { %1097 = vst [vmem:[#allocation2 + $0x1d8] sm:$0xff] %v1020_v43  ;;  %v5452_v43 = vmul.f32 %v5436_v19, %v516_v59  ;;  %v6564_v59 = vrot.slane %v5198_v57, 1  ;;  %v544_v44 = vmax.f32 %v5430_v50, 0.0  ;;  %v5530_v16 = vpop.permute.xlu0 %709 }
  0xd7   : > { %6557 = vst [vmem:[#allocation33_spill] sm:$0xff] %v5434_v12  ;;  %1459 = vmatmul.bf16.gmra.mxu2 %v1311_v1  ;;  %v6567_v1 = vrot.slane %v5041_v18, 5 }
  0xd8   : > { %6558 = vst [vmem:[#allocation34_spill] sm:$0xff] %v5436_v19  ;;  %v1299_v29 = vsel %vm1282_vm2, %v6564_v59, %v5439_v38  ;;  %v6477_v28 = vrot.slane %v5452_v43, 5  ;;  %v6476_v59 = vrot.slane %v5452_v43, 6 }
  0xd9   : > { %956 = vst [vmem:[#allocation2 + $0x50] sm:$0x7] %v6473_v52  ;;  %v6563_v52 = vrot.slane %v5259_v56, 6  ;;  %v4274_v56 = vld [vmem:[%s6431_s3 + $0x10] sm:$0xff]  ;;  %1429 = vmatmul.bf16.gmra.mxu1 %v1299_v29 }
  0xda   : > { %1102 = vst [vmem:[#allocation2 + $0x1b0] sm:$0x3] %v6561_v3  ;;  %v1315_v3 = vsel %vm1282_vm2, %v6566_v30, %v6565_v42  ;;  %v4281_v42 = vld [vmem:[%s6431_s3 + $0x48] sm:$0xff]  ;;  %v543_v30 = vmax.f32 %v5427_v21, 0.0  ;;  %v4298_v29 = vld [vmem:[%s6431_s3 + $0x90] sm:$0xff]  ;;  %v6568_v21 = vrot.slane %v5041_v18, 6  ;;  %1586 = vmatpush.bf16.msrb.mxu1 %v4274_v56 }
  0xdb   : > { %v5469_v24 = vsel %vm957_vm1, %v985_v33, %v6563_v52  ;;  %934 = vst [vmem:[#allocation2 + $0x78] sm:$0xff] %v840_v58  ;;  %v819_v52 = vrot.slane %v731_v17, 5  ;;  %v965_v33 = vrot.slane %v731_v17, 6  ;;  %1469 = vmatmul.bf16.vlgmr.msra.gmra.mxu3 %v1315_v3  ;;  %v441_v58 = vmul.f32 %v4809_v54, %v4358_v48  ;;  %v4316_v18 = vld [vmem:[%s6432_s4 + $0x60] sm:$0xff]  ;;  %1686 = vmatpush.bf16.msrb.mxu2 %v4281_v42  ;;  %v4297_v42 = vld [vmem:[%s6431_s3 + $0x88] sm:$0xff] }
  0xdc   : > { %935 = vst [vmem:[#allocation2 + $0x280] sm:$0xff] %v842_v25  ;;  %v469_v17 = vmul.f32 %v4809_v54, %v4414_v27  ;;  %v4280_v3 = vld [vmem:[%s6431_s3 + $0x40] sm:$0xff]  ;;  %2399 = vmatpush.bf16.msrb.mxu0 %v4298_v29  ;;  %2071 = vmatpush.bf16.msrb.mxu3 %v4316_v18  ;;  %v6590_v5 = vpack.c.bf16 %v5469_v24, %v5464_v31 }
  0xdd   : > { %1080 = vst [vmem:[#allocation2 + $0x248] sm:$0xff] %v5464_v31  ;;  %v820_v25 = vsel %vm811_vm0, %v6567_v1, %v819_v52  ;;  %v5505_v50 = vsel %vm957_vm1, %v6568_v21, %v965_v33  ;;  %v822_v54 = vsel %vm811_vm0, %v819_v52, %v6477_v28  ;;  %v5513_v48 = vsel %vm957_vm1, %v965_v33, %v6476_v59  ;;  %v4273_v52 = vld [vmem:[%s6431_s3 + $0x8] sm:$0xff]  ;;  %v5532_v33 = vpop.permute.xlu1 %714  ;;  %v4272_v18 = vld [vmem:[%s6431_s3] sm:$0xff]  ;;  %v4314_v28 = vld [vmem:[%s6432_s4 + $0x50] sm:$0xff] }
  0xde   : > { %1081 = vst [vmem:[#allocation2 + $0x178] sm:$0xff] %v5469_v24  ;;  %v5516_v27 = vpack.c.bf16 %v822_v54, %v820_v25  ;;  %v481_v56 = vadd.f32 %v4826_v63, %v441_v58  ;;  %v759_v21 = vmul.f32 %v5530_v16, %v543_v30  ;;  %v5543_v46 = vmul.f32 %v5532_v33, %v544_v44  ;;  %v4580_v63 = vld [vmem:[%s6430_s2] ss:$0 sm:$0xff]  ;;  %v4315_v30 = vld [vmem:[%s6432_s4 + $0x58] sm:$0xff] }
  0xdf   : > { %924 = vst [vmem:[#allocation2 + $0x200] sm:$0xff] %v820_v25  ;;  %v509_v58 = vadd.f32 %v4580_v63, %v469_v17  ;;  %1587 = vmatpush.bf16.msrb.mxu1 %v4273_v52  ;;  %1687 = vmatpush.bf16.msrb.mxu2 %v4280_v3  ;;  %v4296_v52 = vld [vmem:[%s6431_s3 + $0x80] sm:$0xff]  ;;  %v6572_v3 = vrot.slane %v5380_v40, 6  ;;  %v4307_v24 = vld [vmem:[%s6431_s3 + $0xd8] sm:$0xff] }
  0xe0   : > { %1070 = vst [vmem:[#allocation2 + $0x250] sm:$0xff] %v5505_v50  ;;  %v6475_v1 = vrot.slane %v5516_v27, 1  ;;  %v875_v44 = vrot.slane %v759_v21, 5  ;;  %v877_v25 = vrot.slane %v5543_v46, 5  ;;  %v1023_v17 = vrot.slane %v5543_v46, 6  ;;  %2400 = vmatpush.bf16.msrb.mxu0 %v4297_v42  ;;  %2072 = vmatpush.bf16.msrb.mxu3 %v4315_v30 }
  0xe1   : > { %6569 = vst [vmem:[#allocation35_spill] sm:$0xff] %v5530_v16  ;;  %v517_v63 = vmax.f32 %v481_v56, 0.0 }
  0xe2   : > { %6570 = vst [vmem:[#allocation36_spill] sm:$0xff] %v5532_v33  ;;  %v5553_v29 = vsel %vm1282_vm2, %v5281_v14, %v6475_v1  ;;  %v5563_v1 = vpack.c.bf16 %v5347_v13, %v5334_v4  ;;  %v878_v4 = vsel %vm811_vm0, %v875_v44, %v877_v25  ;;  %v545_v13 = vmax.f32 %v509_v58, 0.0 }
  0xe3   : > { %925 = vst [vmem:[#allocation2 + $0x158] sm:$0xff] %v822_v54  ;;  %v1021_v54 = vrot.slane %v759_v21, 6  ;;  %1404 = vmatmul.bf16.gmra.mxu0 %v5553_v29  ;;  %v6571_v21 = vrot.slane %v5380_v40, 5  ;;  %1588 = vmatpush.bf16.msrb.mxu1 %v4272_v18  ;;  %v6575_v18 = vrot.slane %v5395_v36, 1 }
  0xe4   : > { %1071 = vst [vmem:[#allocation2 + $0x278] sm:$0xff] %v5513_v48  ;;  %2401 = vmatpush.bf16.msrb.mxu0 %v4296_v52  ;;  %2073 = vmatpush.bf16.msrb.mxu3 %v4314_v28  ;;  %v6580_v28 = vrot.slane %v5452_v43, 6 }
  0xe5   : > { %v876_v46 = vsel %vm811_vm0, %v6571_v21, %v875_v44  ;;  %v1022_v56 = vsel %vm957_vm1, %v6572_v3, %v1021_v54  ;;  %v1024_v42 = vsel %vm957_vm1, %v1021_v54, %v1023_v17  ;;  %953 = vst [vmem:[#allocation2 + $0x238] sm:$0xff] %v878_v4  ;;  %v5584_v21 = vpop.permute.xlu0 %579  ;;  %v5586_v40 = vpop.permute.xlu1 %719  ;;  %v1300_v44 = vrot.slane %v5563_v1, 1 }
  0xe6   : > { %952 = vst [vmem:[#allocation2 + $0xa0] sm:$0xff] %v876_v46  ;;  %v5579_v59 = vpack.c.bf16 %v878_v4, %v876_v46  ;;  %v733_v54 = vmul.f32 %v5584_v21, %v517_v63  ;;  %v761_v30 = vmul.f32 %v5586_v40, %v545_v13  ;;  %v6576_v3 = vrot.slane %v5373_v2, 1  ;;  %v4313_v63 = vld [vmem:[%s6432_s4 + $0x48] sm:$0xff] }
  0xe7   : > { %1098 = vst [vmem:[#allocation2 + $0x268] sm:$0xff] %v1022_v56  ;;  %v1301_v46 = vsel %vm1282_vm2, %v5439_v38, %v1300_v44  ;;  %v6577_v4 = vrot.slane %v5418_v11, 1 }
  0xe8   : > { %6573 = vst [vmem:[#allocation37_spill] sm:$0xff] %v5584_v21  ;;  %v1316_v58 = vrot.slane %v5579_v59, 1  ;;  %v1313_v56 = vsel %vm1282_vm2, %v6576_v3, %v6575_v18  ;;  %v823_v52 = vrot.slane %v733_v54, 5  ;;  %v879_v16 = vrot.slane %v761_v30, 5  ;;  %2074 = vmatpush.bf16.msrb.mxu3 %v4313_v63  ;;  %v4327_v63 = vld [vmem:[%s6431_s3 + $0x138] sm:$0xff] }
  0xe9   : > { %6574 = vst [vmem:[#allocation38_spill] sm:$0xff] %v5586_v40  ;;  %1434 = vmatmul.bf16.gmra.mxu1 %v1301_v46  ;;  %1464 = vmatmul.bf16.gmra.mxu2 %v1313_v56  ;;  %v1025_v13 = vrot.slane %v761_v30, 6  ;;  %v6578_v40 = vrot.slane %v5452_v43, 5  ;;  %v6579_v3 = vrot.slane %v4871_v39, 5  ;;  %v6581_v46 = vrot.slane %v4871_v39, 6  ;;  %v4343_v43 = vld [vmem:[%s6432_s4 + $0xb8] sm:$0xff] }
  0xea   : > { %1099 = vst [vmem:[#allocation2 + $0x168] sm:$0xff] %v1024_v42  ;;  %v1317_v33 = vsel %vm1282_vm2, %v6577_v4, %v1316_v58  ;;  %v969_v42 = vrot.slane %v733_v54, 6  ;;  %v4311_v39 = vld [vmem:[%s6431_s3 + $0xf8] sm:$0xff]  ;;  %2969 = vmatpush.bf16.msra.mxu2 %v4343_v43 }
  0xeb   : > { %1474 = vmatmul.bf16.gmra.mxu3 %v1317_v33  ;;  %v824_v18 = vsel %vm811_vm0, %v6578_v40, %v823_v52  ;;  %v826_v4 = vsel %vm811_vm0, %v823_v52, %v6579_v3  ;;  %v880_v33 = vsel %vm811_vm0, %v877_v25, %v879_v16  ;;  %v4312_v40 = vld [vmem:[%s6432_s4 + $0x40] sm:$0xff]  ;;  %v6582_v25 = vrot.slane %v5367_v47, 5  ;;  %2493 = vmatpush.bf16.msra.mxu1 %v4311_v39 }
  0xec   : > { %v5614_v54 = vsel %vm957_vm1, %v6580_v28, %v969_v42  ;;  %v5619_v56 = vsel %vm957_vm1, %v969_v42, %v6581_v46  ;;  %926 = vst [vmem:[#allocation2 + $0x80] sm:$0xff] %v824_v18  ;;  %v5622_v30 = vpack.c.bf16 %v826_v4, %v824_v18  ;;  %v1026_v18 = vsel %vm957_vm1, %v1023_v17, %v1025_v13  ;;  %v4335_v17 = vld [vmem:[%s6431_s3 + $0x178] sm:$0xff] }
  0xed   : > { %927 = vst [vmem:[#allocation2 + $0x60] sm:$0xff] %v826_v4  ;;  %v882_v42 = vsel %vm811_vm0, %v879_v16, %v6582_v25  ;;  %v6583_v4 = vrot.slane %v5367_v47, 6  ;;  %v6584_v16 = vrot.slane %v5516_v27, 1  ;;  %2075 = vmatpush.bf16.msrb.mxu3 %v4312_v40  ;;  %3411 = vmatpush.bf16.msra.mxu0 %v4335_v17  ;;  %v1110_v17 = vld [vmem:[#allocation2 + $0xe8] sm:$0xff] }
  0xee   : > { %1072 = vst [vmem:[#allocation2 + $0x148] sm:$0xff] %v5614_v54  ;;  %v5645_v3 = vrot.slane %v5622_v30, 1 }
  0xef   : > { %1073 = vst [vmem:[#allocation2 + $0x58] sm:$0xff] %v5619_v56  ;;  %v1028_v28 = vsel %vm957_vm1, %v1025_v13, %v6583_v4  ;;  %v6585_v13 = vrot.slane %v4950_v51, 1  ;;  %v1781_v4 = vld [vmem:[#allocation2 + $0x190] sm:$0xff] }
  0xf0   : > { %954 = vst [vmem:[#allocation2 + $0x128] sm:$0xff] %v880_v33  ;;  %v1291_v46 = vsel %vm1282_vm2, %v6584_v16, %v5645_v3  ;;  %v4581_v33 = vld [vmem:[#allocation2 + $0x100] sm:$0xff]  ;;  %v1108_v16 = vld [vmem:[#allocation2 + $0x150] sm:$0xff] }
  0xf1   : > { %955 = vst [vmem:[#allocation2 + $0x1c0] sm:$0xff] %v882_v42  ;;  %3312 = vmatpush.bf16.msra.mxu3 %v4327_v63  ;;  %v1176_v47 = vpack.c.bf16 %v4581_v33, %v4581_v33  ;;  %v1303_v39 = vsel %vm1282_vm2, %v1300_v44, %v6585_v13  ;;  %v6586_v63 = vrot.slane %v5046_v20, 1  ;;  %v1178_v52 = vpack.c.bf16 %v1110_v17, %v1108_v16 }
  0xf2   : > { %1100 = vst [vmem:[#allocation2 + $0x38] sm:$0xff] %v1026_v18  ;;  %v1966_v44 = vrot.slane %v5243_v0, 2  ;;  %v6588_v16 = vpack.c.bf16 %v5513_v48, %v5505_v50 }
  0xf3   : > { %1409 = vmatmul.bf16.gmra.mxu0 %v1291_v46  ;;  %1101 = vst [vmem:[#allocation2 + $0x18] sm:$0xff] %v1028_v28  ;;  %v1293_v18 = vsel %vm1282_vm2, %v5645_v3, %v6586_v63  ;;  %v1924_v28 = vld [vmem:[#allocation2 + $0x140] sm:$0xf0] }
  0xf4   : > { %v1926_v33 = vpack.c.bf16 %v1781_v4, %v1924_v28  ;;  %v1970_v28 = vrot.slane %v5622_v30, 2 }
  0xf6   : > { %v1965_v13 = vrot.slane %v1926_v33, 2  ;;  %v1797_v33 = vld [vmem:[#allocation2 + $0x240] sm:$0xff] }
  0xf7   : > { %v1244_v43 = vld [vmem:[#allocation2 + $0x128] sm:$0x3] }
  0xf8   : > { %v1246_v25 = vpack.c.bf16 %v1244_v43, %v1244_v43  ;;  %v1779_v43 = vld [vmem:[#allocation2 + $0x140] sm:$0xfc] }
  0xf9   : > { %1439 = vmatmul.bf16.gmra.mxu1 %v1303_v39  ;;  %1688 = vmatmul.bf16.vlgmr.msrb.gmra.mxu2 %v1176_v47  ;;  %v1967_v39 = vsel %vm1964_vm3, %v1965_v13, %v1966_v44 }
  0xfa   : > { %v1318_v40 = vrot.slane %v1246_v25, 1 }
  0xfc   : > { %v1319_v42 = vsel %vm1282_vm2, %v1316_v58, %v1318_v40  ;;  %v1853_v58 = vpack.c.bf16 %v1781_v4, %v1779_v43  ;;  %v4342_v40 = vld [vmem:[%s6432_s4 + $0xb0] sm:$0xff]  ;;  %v6589_v43 = vpack.c.bf16 %v5619_v56, %v5614_v54  ;;  %v1799_v56 = vld [vmem:[#allocation2 + $0x108] sm:$0xff] }
  0xfd   : > { %1479 = vmatmul.bf16.gmra.mxu3 %v1319_v42  ;;  %v4326_v42 = vld [vmem:[%s6431_s3 + $0x130] sm:$0xff]  ;;  %2970 = vmatpush.bf16.msra.mxu2 %v4342_v40  ;;  %v4333_v40 = vld [vmem:[%s6431_s3 + $0x168] sm:$0xff] }
  0xfe   : > { %v2188_v25 = vrot.slane %v1853_v58, 1  ;;  %3313 = vmatpush.bf16.msra.mxu3 %v4326_v42 }
 0x100   : > { %v2190_v63 = vsel %vm1282_vm2, %v2188_v25, %v5281_v14  ;;  %v6587_v14 = vpack.c.bf16 %v5226_v34, %v5212_v60  ;;  %v4341_v34 = vld [vmem:[%s6432_s4 + $0xa8] sm:$0xff] }
 0x101   : > { %2971 = vmatpush.bf16.msra.mxu2 %v4341_v34 }
 0x103   : > { %1414 = vmatmul.bf16.gmra.mxu0 %v1293_v18  ;;  %v1968_v18 = vrot.slane %v5516_v27, 2 }
 0x105   : > { %v1969_v4 = vsel %vm1964_vm3, %v1966_v44, %v1968_v18  ;;  %v4309_v44 = vld [vmem:[%s6431_s3 + $0xe8] sm:$0xff] }
 0x109   : > { %1589 = vmatmul.bf16.vlgmr.msrb.gmra.mxu1 %v1176_v47  ;;  %1693 = vmatmul.bf16.gmra.mxu2 %v1178_v52  ;;  %v4310_v52 = vld [vmem:[%s6431_s3 + $0xf0] sm:$0xff] }
 0x10a   : > { %v4334_v47 = vld [vmem:[%s6431_s3 + $0x170] sm:$0xff]  ;;  %2494 = vmatpush.bf16.msra.mxu1 %v4310_v52 }
 0x10b   : > { %3412 = vmatpush.bf16.msra.mxu0 %v4334_v47 }
 0x10d   : > { %2076 = vmatmul.bf16.vlgmr.msrb.gmra.mxu3 %v1967_v39 }
 0x10e   : > { %2495 = vmatpush.bf16.msra.mxu1 %v4309_v44  ;;  %v1803_v44 = vld [vmem:[#allocation2 + $0x1e8] sm:$0xff] }
 0x10f   : > { %3413 = vmatpush.bf16.msra.mxu0 %v4333_v40  ;;  %v4340_v40 = vld [vmem:[%s6432_s4 + $0xa0] sm:$0xff] }
 0x110   : > { %2972 = vmatpush.bf16.msra.mxu2 %v4340_v40 }
 0x113   : > { %2402 = vmatmul.bf16.vlgmr.msrb.gmra.mxu0 %v2190_v63  ;;  %v1801_v63 = vld [vmem:[#allocation2 + $0x98] sm:$0xff] }
 0x118   : > { %v5693_v17 = vpop.f32.mrf.mxu2 }
 0x119   : > { %1594 = vmatmul.bf16.gmra.mxu1 %v5119_v53  ;;  %1698 = vmatmul.bf16.gmra.mxu2 %v6587_v14  ;;  %v1971_v53 = vsel %vm1964_vm3, %v1968_v18, %v1970_v28  ;;  %v1124_v18 = vld [vmem:[#allocation2 + $0x208] sm:$0xff]  ;;  %v1126_v14 = vld [vmem:[#allocation2 + $0x218] sm:$0xff] }
 0x11d   : > { %2081 = vmatmul.bf16.gmra.mxu3 %v1969_v4  ;;  %v1863_v4 = vpack.c.bf16 %v1801_v63, %v1799_v56 }
 0x120   : > { %v5704_v50 = vpop.f32.mrf.mxu2 }
 0x123   : > { %2407 = vmatmul.bf16.gmra.mxu0 %v5553_v29  ;;  %v5696_v60 = vpop.f32.mrf.mxu1  ;;  %v1795_v29 = vld [vmem:[#allocation2 + $0x130] sm:$0xff] }
 0x124   : > { %v1861_v48 = vpack.c.bf16 %v1797_v33, %v1795_v29 }
 0x126   : > { %v1972_v58 = vrot.slane %v1861_v48, 2  ;;  %v2202_v42 = vrot.slane %v1861_v48, 1  ;;  %v1805_v48 = vld [vmem:[#allocation2 + $0x188] sm:$0xff] }
 0x128   : > { %v1973_v39 = vsel %vm1964_vm3, %v1970_v28, %v1972_v58  ;;  %v1186_v28 = vpack.c.bf16 %v1126_v14, %v1124_v18 }
 0x129   : > { %1599 = vmatmul.bf16.gmra.mxu1 %v5243_v0  ;;  %1703 = vmatmul.bf16.gmra.mxu2 %v6588_v16  ;;  %v4325_v0 = vld [vmem:[%s6431_s3 + $0x128] sm:$0xff]  ;;  %v1974_v16 = vrot.slane %v1863_v4, 2 }
 0x12a   : > { %3314 = vmatpush.bf16.msra.mxu3 %v4325_v0  ;;  %v2206_v0 = vrot.slane %v1863_v4, 1 }
 0x12b   : > { %v5715_v13 = vpop.f32.mrf.mxu1 }
 0x12c   : > { %v2207_v33 = vsel %vm1282_vm2, %v2202_v42, %v2206_v0 }
 0x12d   : > { %2086 = vmatmul.bf16.gmra.mxu3 %v1971_v53 }
 0x133   : > { %2412 = vmatmul.bf16.gmra.mxu0 %v1291_v46  ;;  %v5709_v46 = vpop.f32.mrf.mxu0 }
 0x137   : > { %v5718_v25 = vpop.f32.mrf.mxu2  ;;  %v5727_v52 = vpop.f32.mrf.mxu1 }
 0x139   : > { %1604 = vmatmul.bf16.gmra.mxu1 %v5516_v27  ;;  %1708 = vmatmul.bf16.gmra.mxu2 %v6589_v43  ;;  %v2203_v27 = vsel %vm1282_vm2, %v5645_v3, %v2202_v42  ;;  %v1975_v3 = vsel %vm1964_vm3, %v1972_v58, %v1974_v16  ;;  %v4324_v58 = vld [vmem:[%s6431_s3 + $0x120] sm:$0xff] }
 0x13a   : > { %v1128_v42 = vld [vmem:[#allocation2 + $0x180] sm:$0xff]  ;;  %3315 = vmatpush.bf16.msra.mxu3 %v4324_v58 }
 0x13b   : > { %v5725_v54 = vpop.f32.mrf.mxu0 }
 0x13d   : > { %2091 = vmatmul.bf16.gmra.mxu3 %v1973_v39  ;;  %v1130_v39 = vld [vmem:[#allocation2 + $0xc8] sm:$0xff] }
 0x13e   : > { %v1188_v56 = vpack.c.bf16 %v1130_v39, %v1128_v42 }
 0x13f   : > { %v5729_v47 = vpop.f32.mrf.mxu2  ;;  %v5737_v29 = vpop.f32.mrf.mxu1 }
 0x143   : > { %2417 = vmatmul.bf16.gmra.mxu0 %v2203_v27  ;;  %v5732_v53 = vpop.f32.mrf.mxu0 }
 0x149   : > { %1609 = vmatmul.bf16.gmra.mxu1 %v5622_v30  ;;  %1713 = vmatmul.bf16.gmra.mxu2 %v1186_v28  ;;  %v1865_v30 = vpack.c.bf16 %v1805_v48, %v1803_v44 }
 0x14a   : > { %v5735_v34 = vpop.f32.mrf.mxu2 }
 0x14b   : > { %v5748_v27 = vpop.f32.mrf.mxu0  ;;  %v1976_v18 = vrot.slane %v1865_v30, 2 }
 0x14d   : > { %2096 = vmatmul.bf16.gmra.mxu3 %v1975_v3  ;;  %v1977_v14 = vsel %vm1964_vm3, %v1974_v16, %v1976_v18  ;;  %v2210_v3 = vrot.slane %v1865_v30, 1  ;;  %v1134_v30 = vld [vmem:[#allocation2 + $0xc0] sm:$0xff] }
 0x14f   : > { %v2211_v16 = vsel %vm1282_vm2, %v2206_v0, %v2210_v3  ;;  %v2215_v26 = vsel %vm1282_vm2, %v2210_v3, %v5439_v38 }
 0x152   : > { %v5740_v43 = vpop.f32.mrf.mxu2 }
 0x153   : > { %2422 = vmatmul.bf16.gmra.mxu0 %v2207_v33  ;;  %v4308_v33 = vld [vmem:[%s6431_s3 + $0xe0] sm:$0xff] }
 0x154   : > { %2496 = vmatpush.bf16.msra.mxu1 %v4308_v33  ;;  %v1978_v33 = vrot.slane %v5416_v37, 2 }
 0x156   : > { %v5750_v63 = vpop.f32.mrf.mxu1  ;;  %v1979_v0 = vsel %vm1964_vm3, %v1976_v18, %v1978_v33 }
 0x158   : > { %2497 = vmatpush.bf16.msra.mxu1 %v4307_v24 }
 0x159   : > { %1614 = vmatmul.bf16.gmra.mxu1 %v5046_v20  ;;  %1718 = vmatmul.bf16.gmra.mxu2 %v1188_v56  ;;  %v4332_v20 = vld [vmem:[%s6431_s3 + $0x160] sm:$0xff] }
 0x15a   : > { %v5754_v4 = vpop.f32.mrf.mxu2  ;;  %3414 = vmatpush.bf16.msra.mxu0 %v4332_v20  ;;  %v1132_v56 = vld [vmem:[#allocation2 + $0x1a0] sm:$0xff] }
 0x15d   : > { %2101 = vmatmul.bf16.gmra.mxu3 %v1977_v14  ;;  %v1190_v14 = vpack.c.bf16 %v1134_v30, %v1132_v56  ;;  %v1811_v30 = vld [vmem:[#allocation2 + $0x260] sm:$0xff]  ;;  %v1813_v56 = vld [vmem:[#allocation2 + $0x1c8] sm:$0xff] }
 0x15e   : > { %v5756_v28 = vpop.f32.mrf.mxu3  ;;  %v5763_v44 = vpop.f32.mrf.mxu1 }
 0x160   : > { %v5761_v48 = vpop.f32.mrf.mxu0 }
 0x162   : > { %v5769_v39 = vpop.f32.mrf.mxu2 }
 0x163   : > { %2427 = vmatmul.bf16.gmra.mxu0 %v2211_v16 }
 0x166   : > { %v5771_v40 = vpop.f32.mrf.mxu3  ;;  %v5775_v42 = vpop.f32.mrf.mxu1 }
 0x168   : > { %v5773_v58 = vpop.f32.mrf.mxu0 }
 0x169   : > { %1619 = vmatmul.bf16.gmra.mxu1 %v5065_v7  ;;  %1723 = vmatmul.bf16.gmra.mxu2 %v1190_v14  ;;  %v1869_v7 = vpack.c.bf16 %v1813_v56, %v1811_v30  ;;  %v4339_v30 = vld [vmem:[%s6432_s4 + $0x98] sm:$0xff] }
 0x16a   : > { %v4323_v56 = vld [vmem:[%s6431_s3 + $0x118] sm:$0xff]  ;;  %2973 = vmatpush.bf16.msra.mxu2 %v4339_v30  ;;  %v1140_v30 = vld [vmem:[#allocation2 + $0x70] sm:$0xff] }
 0x16b   : > { %v1980_v62 = vrot.slane %v1869_v7, 2  ;;  %3316 = vmatpush.bf16.msra.mxu3 %v4323_v56  ;;  %v1142_v56 = vld [vmem:[#allocation2 + $0x1e0] sm:$0xff] }
 0x16c   : > { %v5780_v16 = vpop.f32.mrf.mxu2  ;;  %v1194_v12 = vpack.c.bf16 %v1142_v56, %v1140_v30  ;;  %v1819_v30 = vld [vmem:[#allocation2 + $0xf0] sm:$0xff]  ;;  %v1144_v56 = vld [vmem:[#allocation2 + $0x138] sm:$0xff] }
 0x16d   : > { %2106 = vmatmul.bf16.gmra.mxu3 %v1979_v0  ;;  %v1981_v3 = vsel %vm1964_vm3, %v1978_v33, %v1980_v62  ;;  %v4331_v33 = vld [vmem:[%s6431_s3 + $0x158] sm:$0xff] }
 0x16e   : > { %v5782_v20 = vpop.f32.mrf.mxu3  ;;  %v5784_v8 = vpop.f32.mrf.mxu1  ;;  %3415 = vmatpush.bf16.msra.mxu0 %v4331_v33 }
 0x170   : > { %v5786_v23 = vpop.f32.mrf.mxu0 }
 0x173   : > { %2432 = vmatmul.bf16.gmra.mxu0 %v2215_v26  ;;  %v2218_v26 = vrot.slane %v1869_v7, 1  ;;  %v1815_v7 = vld [vmem:[#allocation2 + $0x68] sm:$0xff] }
 0x174   : > { %v5790_v32 = vpop.f32.mrf.mxu2 }
 0x175   : > { %v2219_v31 = vsel %vm1282_vm2, %v5439_v38, %v2218_v26 }
 0x176   : > { %v5792_v14 = vpop.f32.mrf.mxu3  ;;  %v5794_v18 = vpop.f32.mrf.mxu1 }
 0x178   : > { %v5796_v0 = vpop.f32.mrf.mxu0 }
 0x179   : > { %1624 = vmatmul.bf16.gmra.mxu1 %v5198_v57  ;;  %1728 = vmatmul.bf16.gmra.mxu2 %v6590_v5 }
 0x17c   : > { %v1689_v61 = vpop.f32.mrf.mxu2 }
 0x17d   : > { %2111 = vmatmul.bf16.gmra.mxu3 %v1981_v3  ;;  %v1817_v3 = vld [vmem:[#allocation2 + $0x1f8] sm:$0xff] }
 0x17e   : > { %v5809_v9 = vpop.f32.mrf.mxu1  ;;  %v1871_v21 = vpack.c.bf16 %v1817_v3, %v1815_v7 }
 0x180   : > { %v5811_v57 = vpop.f32.mrf.mxu0  ;;  %v5813_v5 = vpop.f32.mrf.mxu3  ;;  %v1982_v35 = vrot.slane %v1871_v21, 2  ;;  %v2222_v6 = vrot.slane %v1871_v21, 1 }
 0x181   : > { %6591 = vst [vmem:[#allocation39_spill] sm:$0xff] %v5813_v5 }
 0x182   : > { %v1983_v24 = vsel %vm1964_vm3, %v1980_v62, %v1982_v35  ;;  %v1146_v62 = vld [vmem:[#allocation2 + $0xd0] sm:$0xff] }
 0x183   : > { %2437 = vmatmul.bf16.gmra.mxu0 %v2219_v31 }
 0x184   : > { %v1691_v10 = vpop.f32.mrf.mxu2 }
 0x186   : > { %v1590_v45 = vpop.f32.mrf.mxu1 }
 0x187   : > { %v1591_v38 = vadd.f32 %v1590_v45, %v5709_v46 }
 0x188   : > { %v5823_v19 = vpop.f32.mrf.mxu0  ;;  %v5826_v49 = vpop.f32.mrf.mxu3 }
 0x189   : > { %6592 = vst [vmem:[#allocation40_spill] sm:$0xff] %v5826_v49  ;;  %v5828_v31 = vadd.f32 %v1689_v61, %v1591_v38  ;;  %1629 = vmatmul.bf16.gmra.mxu1 %v5416_v37  ;;  %1733 = vmatmul.bf16.gmra.mxu2 %v1194_v12  ;;  %v2223_v61 = vsel %vm1282_vm2, %v2218_v26, %v2222_v6  ;;  %v1821_v37 = vld [vmem:[#allocation2 + $0x228] sm:$0xff] }
 0x18a   : > { %v1873_v38 = vpack.c.bf16 %v1821_v37, %v1819_v30 }
 0x18b   : > { %6593 = vst [vmem:[#allocation41_spill] sm:$0xff] %v5828_v31 }
 0x18c   : > { %v1694_v22 = vpop.f32.mrf.mxu2  ;;  %v1984_v49 = vrot.slane %v1873_v38, 2 }
 0x18d   : > { %2116 = vmatmul.bf16.gmra.mxu3 %v1983_v24 }
 0x18e   : > { %v1592_v33 = vpop.f32.mrf.mxu1  ;;  %v1985_v26 = vsel %vm1964_vm3, %v1982_v35, %v1984_v49 }
 0x18f   : > { %v1593_v7 = vadd.f32 %v1592_v33, %v5725_v54  ;;  %v1196_v33 = vpack.c.bf16 %v1146_v62, %v1144_v56  ;;  %v1823_v62 = vld [vmem:[#allocation2 + $0x170] sm:$0xff] }
 0x190   : > { %v2403_v3 = vpop.f32.mrf.mxu0  ;;  %v2077_v5 = vpop.f32.mrf.mxu3 }
 0x191   : > { %v5833_v45 = vadd.f32 %v1691_v10, %v1593_v7  ;;  %v5835_v46 = vadd.f32 %v2403_v3, %v2077_v5  ;;  %v2226_v3 = vrot.slane %v1873_v38, 1  ;;  %v1825_v38 = vld [vmem:[#allocation2 + $0xb0] sm:$0xff] }
 0x193   : > { %2442 = vmatmul.bf16.gmra.mxu0 %v2223_v61  ;;  %v2227_v35 = vsel %vm1282_vm2, %v2222_v6, %v2226_v3 }
 0x194   : > { %v1696_v12 = vpop.f32.mrf.mxu2 }
 0x196   : > { %v1595_v24 = vpop.f32.mrf.mxu1 }
 0x197   : > { %v1596_v31 = vadd.f32 %v1595_v24, %v5732_v53 }
 0x198   : > { %v2405_v54 = vpop.f32.mrf.mxu0  ;;  %v2079_v21 = vpop.f32.mrf.mxu3 }
 0x199   : > { %v5839_v10 = vadd.f32 %v1694_v22, %v1596_v31  ;;  %v5841_v5 = vadd.f32 %v2405_v54, %v2079_v21  ;;  %1634 = vmatmul.bf16.gmra.mxu1 %v5563_v1  ;;  %1738 = vmatmul.bf16.gmra.mxu2 %v1196_v33  ;;  %v4338_v22 = vld [vmem:[%s6432_s4 + $0x90] sm:$0xff]  ;;  %v1148_v54 = vld [vmem:[#allocation2 + $0x40] sm:$0xff]  ;;  %v1875_v21 = vpack.c.bf16 %v1825_v38, %v1823_v62 }
 0x19a   : > { %v4322_v31 = vld [vmem:[%s6431_s3 + $0x110] sm:$0xff]  ;;  %2974 = vmatpush.bf16.msra.mxu2 %v4338_v22 }
 0x19b   : > { %3317 = vmatpush.bf16.msra.mxu3 %v4322_v31  ;;  %v1150_v33 = vld [vmem:[#allocation2 + $0x1f0] sm:$0xff] }
 0x19c   : > { %v1699_v7 = vpop.f32.mrf.mxu2 }
 0x19d   : > { %2121 = vmatmul.bf16.gmra.mxu3 %v1985_v26 }
 0x19e   : > { %v1597_v61 = vpop.f32.mrf.mxu1 }
 0x19f   : > { %v1598_v30 = vadd.f32 %v1597_v61, %v5748_v27  ;;  %v4306_v27 = vld [vmem:[%s6431_s3 + $0xd0] sm:$0xff] }
 0x1a0   : > { %v2408_v53 = vpop.f32.mrf.mxu0  ;;  %v2082_v37 = vpop.f32.mrf.mxu3  ;;  %2498 = vmatpush.bf16.msra.mxu1 %v4306_v27 }
 0x1a1   : > { %v5852_v1 = vadd.f32 %v1696_v12, %v1598_v30  ;;  %v5854_v56 = vadd.f32 %v2408_v53, %v2082_v37  ;;  %v1198_v30 = vpack.c.bf16 %v1150_v33, %v1148_v54  ;;  %v1986_v53 = vrot.slane %v1875_v21, 2  ;;  %v4330_v37 = vld [vmem:[%s6431_s3 + $0x150] sm:$0xff] }
 0x1a2   : > { %3416 = vmatpush.bf16.msra.mxu0 %v4330_v37 }
 0x1a3   : > { %6594 = vst [vmem:[#allocation42_spill] sm:$0xff] %v5852_v1  ;;  %2447 = vmatmul.bf16.gmra.mxu0 %v2227_v35  ;;  %v1987_v31 = vsel %vm1964_vm3, %v1984_v49, %v1986_v53  ;;  %v1154_v49 = vld [vmem:[#allocation2 + $0x1d0] sm:$0xff] }
 0x1a4   : > { %v1701_v24 = vpop.f32.mrf.mxu2 }
 0x1a6   : > { %v1600_v12 = vpop.f32.mrf.mxu1 }
 0x1a7   : > { %v1601_v26 = vadd.f32 %v1600_v12, %v5761_v48  ;;  %v2230_v48 = vrot.slane %v1875_v21, 1 }
 0x1a8   : > { %v2410_v61 = vpop.f32.mrf.mxu0  ;;  %v2084_v6 = vpop.f32.mrf.mxu3 }
 0x1a9   : > { %v5864_v22 = vadd.f32 %v1699_v7, %v1601_v26  ;;  %v5866_v35 = vadd.f32 %v2410_v61, %v2084_v6  ;;  %1639 = vmatmul.bf16.gmra.mxu1 %v4950_v51  ;;  %1743 = vmatmul.bf16.gmra.mxu2 %v1198_v30  ;;  %v2231_v26 = vsel %vm1282_vm2, %v2226_v3, %v2230_v48  ;;  %v1827_v61 = vld [vmem:[#allocation2 + $0x20] sm:$0xff]  ;;  %v1829_v51 = vld [vmem:[#allocation2 + $0x88] sm:$0xff]  ;;  %v1152_v6 = vld [vmem:[#allocation2 + $0x10] sm:$0xff] }
 0x1aa   : > { %v1877_v37 = vpack.c.bf16 %v1829_v51, %v1827_v61 }
 0x1ab   : > { %6595 = vst [vmem:[#allocation43_spill] sm:$0xff] %v5864_v22 }
 0x1ac   : > { %v1704_v62 = vpop.f32.mrf.mxu2  ;;  %v1988_v1 = vrot.slane %v1877_v37, 2 }
 0x1ad   : > { %2126 = vmatmul.bf16.gmra.mxu3 %v1987_v31 }
 0x1ae   : > { %v1602_v38 = vpop.f32.mrf.mxu1  ;;  %v1989_v3 = vsel %vm1964_vm3, %v1986_v53, %v1988_v1  ;;  %v4321_v53 = vld [vmem:[%s6431_s3 + $0x108] sm:$0xff] }
 0x1af   : > { %v1603_v27 = vadd.f32 %v1602_v38, %v5773_v58  ;;  %v1200_v58 = vpack.c.bf16 %v1154_v49, %v1152_v6  ;;  %3318 = vmatpush.bf16.msra.mxu3 %v4321_v53 }
 0x1b0   : > { %v2413_v54 = vpop.f32.mrf.mxu0  ;;  %v2087_v33 = vpop.f32.mrf.mxu3 }
 0x1b1   : > { %v5871_v12 = vadd.f32 %v1701_v24, %v1603_v27  ;;  %v5873_v7 = vadd.f32 %v2413_v54, %v2087_v33  ;;  %v2234_v33 = vrot.slane %v1877_v37, 1  ;;  %v1156_v37 = vld [vmem:[#allocation2 + $0xe0] sm:$0xff] }
 0x1b3   : > { %2452 = vmatmul.bf16.gmra.mxu0 %v2231_v26 }
 0x1b4   : > { %v1706_v30 = vpop.f32.mrf.mxu2 }
 0x1b6   : > { %v1605_v31 = vpop.f32.mrf.mxu1 }
 0x1b7   : > { %v1606_v21 = vadd.f32 %v1605_v31, %v5786_v23  ;;  %v1833_v31 = vld [vmem:[#allocation2 + $0x118] sm:$0xff] }
 0x1b8   : > { %v2415_v22 = vpop.f32.mrf.mxu0  ;;  %v2089_v38 = vpop.f32.mrf.mxu3 }
 0x1b9   : > { %v5877_v24 = vadd.f32 %v1704_v62, %v1606_v21  ;;  %v5879_v27 = vadd.f32 %v2415_v22, %v2089_v38  ;;  %1644 = vmatmul.bf16.gmra.mxu1 %v4952_v55  ;;  %1748 = vmatmul.bf16.gmra.mxu2 %v1200_v58  ;;  %v2235_v22 = vsel %vm1282_vm2, %v2230_v48, %v2234_v33  ;;  %v1831_v62 = vld [vmem:[#allocation2 + $0xf8] sm:$0xff]  ;;  %v4337_v55 = vld [vmem:[%s6432_s4 + $0x88] sm:$0xff] }
 0x1ba   : > { %v1158_v21 = vld [vmem:[#allocation2 + $0xd8] sm:$0xff]  ;;  %2975 = vmatpush.bf16.msra.mxu2 %v4337_v55 }
 0x1bc   : > { %v1709_v54 = vpop.f32.mrf.mxu2 }
 0x1bd   : > { %2131 = vmatmul.bf16.gmra.mxu3 %v1989_v3  ;;  %v1202_v3 = vpack.c.bf16 %v1158_v21, %v1156_v37 }
 0x1be   : > { %v1607_v26 = vpop.f32.mrf.mxu1 }
 0x1bf   : > { %v1608_v61 = vadd.f32 %v1607_v26, %v5796_v0 }
 0x1c0   : > { %v2418_v23 = vpop.f32.mrf.mxu0  ;;  %v2092_v51 = vpop.f32.mrf.mxu3 }
 0x1c1   : > { %v5884_v6 = vadd.f32 %v1706_v30, %v1608_v61  ;;  %v5886_v49 = vadd.f32 %v2418_v23, %v2092_v51  ;;  %v1879_v30 = vpack.c.bf16 %v1833_v31, %v1831_v62 }
 0x1c3   : > { %6596 = vst [vmem:[#allocation44_spill] sm:$0xff] %v5884_v6  ;;  %2457 = vmatmul.bf16.gmra.mxu0 %v2235_v22  ;;  %v1990_v61 = vrot.slane %v1879_v30, 2  ;;  %v4305_v22 = vld [vmem:[%s6431_s3 + $0xc8] sm:$0xff] }
 0x1c4   : > { %v1711_v0 = vpop.f32.mrf.mxu2  ;;  %2499 = vmatpush.bf16.msra.mxu1 %v4305_v22 }
 0x1c5   : > { %v1991_v62 = vsel %vm1964_vm3, %v1988_v1, %v1990_v61  ;;  %v1835_v1 = vld [vmem:[#allocation2 + $0xa8] sm:$0xff] }
 0x1c6   : > { %v1610_v58 = vpop.f32.mrf.mxu1 }
 0x1c7   : > { %v1611_v48 = vadd.f32 %v1610_v58, %v5811_v57  ;;  %v2238_v57 = vrot.slane %v1879_v30, 1 }
 0x1c8   : > { %v2420_v38 = vpop.f32.mrf.mxu0  ;;  %v2094_v26 = vpop.f32.mrf.mxu3 }
 0x1c9   : > { %v5896_v23 = vadd.f32 %v1709_v54, %v1611_v48  ;;  %v5898_v51 = vadd.f32 %v2420_v38, %v2094_v26  ;;  %1649 = vmatmul.bf16.gmra.mxu1 %v5121_v15  ;;  %1753 = vmatmul.bf16.gmra.mxu2 %v1202_v3  ;;  %v4329_v54 = vld [vmem:[%s6431_s3 + $0x148] sm:$0xff]  ;;  %v2239_v48 = vsel %vm1282_vm2, %v2234_v33, %v2238_v57  ;;  %v1160_v3 = vld [vmem:[#allocation2 + $0x90] sm:$0xff]  ;;  %v1162_v26 = vld [vmem:[#allocation2 + $0x1b8] sm:$0xff] }
 0x1ca   : > { %3417 = vmatpush.bf16.msra.mxu0 %v4329_v54  ;;  %v1837_v38 = vld [vmem:[#allocation2 + $0x1a8] sm:$0xff] }
 0x1cb   : > { %6597 = vst [vmem:[#allocation45_spill] sm:$0xff] %v5896_v23  ;;  %v1881_v22 = vpack.c.bf16 %v1837_v38, %v1835_v1 }
 0x1cc   : > { %v1714_v31 = vpop.f32.mrf.mxu2 }
 0x1cd   : > { %2136 = vmatmul.bf16.gmra.mxu3 %v1991_v62  ;;  %v1992_v6 = vrot.slane %v1881_v22, 2 }
 0x1ce   : > { %v1612_v55 = vpop.f32.mrf.mxu1 }
 0x1cf   : > { %v1613_v53 = vadd.f32 %v1612_v55, %v5823_v19  ;;  %v1204_v55 = vpack.c.bf16 %v1162_v26, %v1160_v3  ;;  %v1993_v33 = vsel %vm1964_vm3, %v1990_v61, %v1992_v6  ;;  %v1166_v61 = vld [vmem:[#allocation2 + $0x220] sm:$0xff] }
 0x1d0   : > { %v2423_v37 = vpop.f32.mrf.mxu0  ;;  %v2097_v15 = vpop.f32.mrf.mxu3 }
 0x1d1   : > { %v5909_v21 = vadd.f32 %v1711_v0, %v1613_v53  ;;  %v5911_v58 = vadd.f32 %v2423_v37, %v2097_v15  ;;  %v2242_v15 = vrot.slane %v1881_v22, 1 }
 0x1d3   : > { %2462 = vmatmul.bf16.gmra.mxu0 %v2239_v48 }
 0x1d4   : > { %v1716_v30 = vpop.f32.mrf.mxu2 }
 0x1d6   : > { %v1615_v62 = vpop.f32.mrf.mxu1 }
 0x1d7   : > { %v1616_v23 = vadd.f32 %v1615_v62, %v5696_v60 }
 0x1d8   : > { %v2425_v19 = vpop.f32.mrf.mxu0  ;;  %v2099_v54 = vpop.f32.mrf.mxu3 }
 0x1d9   : > { %v5915_v0 = vadd.f32 %v1714_v31, %v1616_v23  ;;  %v5917_v53 = vadd.f32 %v2425_v19, %v2099_v54  ;;  %1654 = vmatmul.bf16.gmra.mxu1 %v5285_v41  ;;  %1758 = vmatmul.bf16.gmra.mxu2 %v1204_v55  ;;  %v2243_v23 = vsel %vm1282_vm2, %v2238_v57, %v2242_v15  ;;  %v1841_v31 = vld [vmem:[#allocation2 + $0xb8] sm:$0xff]  ;;  %v1839_v41 = vld [vmem:[#allocation2 + $0x110] sm:$0xff]  ;;  %v1164_v19 = vld [vmem:[#allocation2 + $0x288] sm:$0xff] }
 0x1da   : > { %v1883_v55 = vpack.c.bf16 %v1841_v31, %v1839_v41  ;;  %v4320_v57 = vld [vmem:[%s6431_s3 + $0x100] sm:$0xff] }
 0x1db   : > { %6598 = vst [vmem:[#allocation46_spill] sm:$0xff] %v5915_v0  ;;  %3319 = vmatpush.bf16.msra.mxu3 %v4320_v57  ;;  %v4304_v31 = vld [vmem:[%s6431_s3 + $0xc0] sm:$0xff]  ;;  %v1168_v57 = vld [vmem:[#allocation2 + $0x48] sm:$0xff] }
 0x1dc   : > { %v1719_v37 = vpop.f32.mrf.mxu2  ;;  %v1994_v0 = vrot.slane %v1883_v55, 2  ;;  %2500 = vmatpush.bf16.msra.mxu1 %v4304_v31 }
 0x1dd   : > { %2141 = vmatmul.bf16.gmra.mxu3 %v1993_v33 }
 0x1de   : > { %v1617_v48 = vpop.f32.mrf.mxu1 }
 0x1df   : > { %v1618_v1 = vadd.f32 %v1617_v48, %v5715_v13  ;;  %v1206_v13 = vpack.c.bf16 %v1166_v61, %v1164_v19 }
 0x1e0   : > { %v2428_v60 = vpop.f32.mrf.mxu0  ;;  %v2102_v38 = vpop.f32.mrf.mxu3 }
 0x1e1   : > { %v5922_v3 = vadd.f32 %v1716_v30, %v1618_v1  ;;  %v5924_v26 = vadd.f32 %v2428_v60, %v2102_v38  ;;  %v4336_v30 = vld [vmem:[%s6432_s4 + $0x80] sm:$0xff] }
 0x1e2   : > { %2976 = vmatpush.bf16.msra.mxu2 %v4336_v30 }
 0x1e3   : > { %2467 = vmatmul.bf16.gmra.mxu0 %v2243_v23  ;;  %v2246_v23 = vrot.slane %v1883_v55, 1 }
 0x1e4   : > { %v1721_v62 = vpop.f32.mrf.mxu2 }
 0x1e5   : > { %v2247_v55 = vsel %vm1282_vm2, %v2242_v15, %v2246_v23 }
 0x1e6   : > { %v1620_v54 = vpop.f32.mrf.mxu1 }
 0x1e7   : > { %v1621_v22 = vadd.f32 %v1620_v54, %v5727_v52  ;;  %v1995_v52 = vsel %vm1964_vm3, %v1992_v6, %v1994_v0 }
 0x1e8   : > { %v2430_v33 = vpop.f32.mrf.mxu0  ;;  %v2104_v48 = vpop.f32.mrf.mxu3 }
 0x1e9   : > { %v5934_v1 = vadd.f32 %v1719_v37, %v1621_v22  ;;  %v5936_v60 = vadd.f32 %v2430_v33, %v2104_v48  ;;  %1659 = vmatmul.bf16.gmra.mxu1 %v5373_v2  ;;  %1763 = vmatmul.bf16.gmra.mxu2 %v1206_v13  ;;  %v4328_v2 = vld [vmem:[%s6431_s3 + $0x140] sm:$0xff]  ;;  %v1845_v33 = vld [vmem:[#allocation2 + $0x238] sm:$0xff] }
 0x1ea   : > { %v1843_v22 = vld [vmem:[#allocation2 + $0xa0] sm:$0xff]  ;;  %3418 = vmatpush.bf16.msra.mxu0 %v4328_v2  ;;  %v1170_v48 = vld [vmem:[#allocation2 + $0x1d8] sm:$0xff] }
 0x1eb   : > { %6599 = vst [vmem:[#allocation47_spill] sm:$0xff] %v5934_v1 }
 0x1ec   : > { %v1724_v38 = vpop.f32.mrf.mxu2 }
 0x1ed   : > { %2146 = vmatmul.bf16.gmra.mxu3 %v1995_v52 }
 0x1ee   : > { %v1622_v41 = vpop.f32.mrf.mxu1 }
 0x1ef   : > { %v1623_v37 = vadd.f32 %v1622_v41, %v5737_v29  ;;  %v1885_v29 = vpack.c.bf16 %v1845_v33, %v1843_v22  ;;  %v1208_v41 = vpack.c.bf16 %v1170_v48, %v1168_v57  ;;  %v1849_v57 = vld [vmem:[#allocation2 + $0x1c0] sm:$0xff] }
 0x1f0   : > { %v2433_v19 = vpop.f32.mrf.mxu0  ;;  %v2107_v61 = vpop.f32.mrf.mxu3 }
 0x1f1   : > { %v5947_v54 = vadd.f32 %v1721_v62, %v1623_v37  ;;  %v5949_v6 = vadd.f32 %v2433_v19, %v2107_v61  ;;  %v1996_v62 = vrot.slane %v1885_v29, 2  ;;  %v2250_v2 = vrot.slane %v1885_v29, 1 }
 0x1f3   : > { %2472 = vmatmul.bf16.gmra.mxu0 %v2247_v55  ;;  %v1997_v15 = vsel %vm1964_vm3, %v1994_v0, %v1996_v62  ;;  %v1174_v0 = vld [vmem:[#allocation2 + $0x168] sm:$0xff] }
 0x1f4   : > { %v1726_v13 = vpop.f32.mrf.mxu2 }
 0x1f6   : > { %v1625_v30 = vpop.f32.mrf.mxu1 }
 0x1f7   : > { %v1626_v52 = vadd.f32 %v1625_v30, %v5750_v63 }
 0x1f8   : > { %v2435_v31 = vpop.f32.mrf.mxu0  ;;  %v2109_v1 = vpop.f32.mrf.mxu3 }
 0x1f9   : > { %v5953_v37 = vadd.f32 %v1724_v38, %v1626_v52  ;;  %v5955_v19 = vadd.f32 %v2435_v31, %v2109_v1  ;;  %1664 = vmatmul.bf16.gmra.mxu1 %v5395_v36  ;;  %1768 = vmatmul.bf16.gmra.mxu2 %v1208_v41  ;;  %v2251_v1 = vsel %vm1282_vm2, %v2246_v23, %v2250_v2  ;;  %v1847_v38 = vld [vmem:[#allocation2 + $0x128] sm:$0xff] }
 0x1fa   : > { %v1172_v52 = vld [vmem:[#allocation2 + $0x268] sm:$0xff]  ;;  %v5965_v31 = vpack.c.bf16 %v1849_v57, %v1847_v38  ;;  %v2775_v38 = vld [vmem:[#allocation2 + $0x200] sm:$0xff] }
 0x1fb   : > { %6600 = vst [vmem:[#allocation48_spill] sm:$0xff] %v5953_v37 }
 0x1fc   : > { %v1729_v61 = vpop.f32.mrf.mxu2 }
 0x1fd   : > { %2151 = vmatmul.bf16.gmra.mxu3 %v1997_v15  ;;  %v1210_v15 = vpack.c.bf16 %v1174_v0, %v1172_v52 }
 0x1fe   : > { %v1627_v55 = vpop.f32.mrf.mxu1 }
 0x1ff   : > { %v1628_v22 = vadd.f32 %v1627_v55, %v5763_v44 }
 0x200   : > { %v2438_v63 = vpop.f32.mrf.mxu0  ;;  %v2112_v33 = vpop.f32.mrf.mxu3 }
 0x201   : > { %v5960_v48 = vadd.f32 %v1726_v13, %v1628_v22  ;;  %v5962_v30 = vadd.f32 %v2438_v63, %v2112_v33  ;;  %v1998_v13 = vrot.slane %v5965_v31, 2 }
 0x203   : > { %6601 = vst [vmem:[#allocation49_spill] sm:$0xff] %v5960_v48  ;;  %2477 = vmatmul.bf16.gmra.mxu0 %v2251_v1  ;;  %v1999_v23 = vsel %vm1964_vm3, %v1996_v62, %v1998_v13  ;;  %v2254_v1 = vrot.slane %v5965_v31, 1 }
 0x204   : > { %6602 = vst [vmem:[#allocation50_spill] sm:$0xff] %v5962_v30  ;;  %v1731_v36 = vpop.f32.mrf.mxu2 }
 0x205   : > { %v2255_v62 = vsel %vm1282_vm2, %v2250_v2, %v2254_v1 }
 0x206   : > { %v1630_v29 = vpop.f32.mrf.mxu1 }
 0x207   : > { %v1631_v41 = vadd.f32 %v1630_v29, %v5775_v42  ;;  %v2776_v42 = vld [vmem:[#allocation2 + $0x158] sm:$0xff] }
 0x208   : > { %v2440_v44 = vpop.f32.mrf.mxu0  ;;  %v2114_v55 = vpop.f32.mrf.mxu3  ;;  %v2773_v29 = vld [vmem:[#allocation2 + $0x198] sm:$0xc0] }
 0x209   : > { %v5969_v22 = vadd.f32 %v1729_v61, %v1631_v41  ;;  %v5971_v63 = vadd.f32 %v2440_v44, %v2114_v55  ;;  %1669 = vmatmul.bf16.gmra.mxu1 %v5418_v11  ;;  %1773 = vmatmul.bf16.gmra.mxu2 %v1210_v15  ;;  %v5977_v61 = vld [vmem:[#allocation2] sm:$0xff]  ;;  %v5979_v44 = vpack.c.bf16 %v2776_v42, %v2775_v38  ;;  %v1925_v55 = vld [vmem:[#allocation2 + $0x50] sm:$0xf] }
 0x20a   : > { %v2810_v31 = vpack.c.bf16 %v5977_v61, %v2773_v29 }
 0x20b   : > { %6603 = vst [vmem:[#allocation51_spill] sm:$0xff] %v5969_v22  ;;  %v1927_v22 = vpack.c.bf16 %v1925_v55, %v1925_v55  ;;  %v1784_v55 = vld [vmem:[#allocation2 + $0x160] sm:$0xff] }
 0x20c   : > { %6604 = vst [vmem:[#allocation52_spill] sm:$0xff] %v5971_v63  ;;  %v1734_v33 = vpop.f32.mrf.mxu2  ;;  %v2866_v48 = vrot.slane %v2810_v31, 3 }
 0x20d   : > { %2156 = vmatmul.bf16.gmra.mxu3 %v1999_v23  ;;  %v2000_v29 = vrot.slane %v1927_v22, 2 }
 0x20e   : > { %v1632_v57 = vpop.f32.mrf.mxu1 }
 0x20f   : > { %v1633_v52 = vadd.f32 %v1632_v57, %v5784_v8  ;;  %v2867_v8 = vrot.slane %v5979_v44, 3 }
 0x210   : > { %v2443_v0 = vpop.f32.mrf.mxu0  ;;  %v2117_v41 = vpop.f32.mrf.mxu3 }
 0x211   : > { %v5981_v11 = vadd.f32 %v1731_v36, %v1633_v52  ;;  %v5983_v15 = vadd.f32 %v2443_v0, %v2117_v41  ;;  %v2868_v42 = vsel %vm2865_vm4, %v2866_v48, %v2867_v8  ;;  %v1851_v52 = vld [vmem:[#allocation2 + $0x50] sm:$0x3] }
 0x212   : > { %v1889_v41 = vpack.c.bf16 %v1851_v52, %v1851_v52 }
 0x213   : > { %6605 = vst [vmem:[#allocation53_spill] sm:$0xff] %v5981_v11  ;;  %2482 = vmatmul.bf16.gmra.mxu0 %v2255_v62  ;;  %v2001_v62 = vsel %vm1964_vm3, %v1998_v13, %v2000_v29  ;;  %v2778_v11 = vld [vmem:[#allocation2 + $0x60] sm:$0xff] }
 0x214   : > { %6606 = vst [vmem:[#allocation54_spill] sm:$0xff] %v5983_v15  ;;  %v1736_v23 = vpop.f32.mrf.mxu2 }
 0x216   : > { %v1635_v57 = vpop.f32.mrf.mxu1 }
 0x217   : > { %v1636_v63 = vadd.f32 %v1635_v57, %v5794_v18  ;;  %v1786_v18 = vld [vmem:[#allocation2 + $0x30] sm:$0xff]  ;;  %v2777_v57 = vld [vmem:[#allocation2 + $0x80] sm:$0xff] }
 0x218   : > { %v2445_v38 = vpop.f32.mrf.mxu0  ;;  %v2119_v36 = vpop.f32.mrf.mxu3 }
 0x219   : > { %v5990_v0 = vadd.f32 %v1734_v33, %v1636_v63  ;;  %v5992_v2 = vadd.f32 %v2445_v38, %v2119_v36  ;;  %1674 = vmatmul.bf16.gmra.mxu1 %v5579_v59  ;;  %2977 = vmatmul.bf16.vlgmr.msra.gmra.mxu2 %v2868_v42  ;;  %v2258_v33 = vrot.slane %v1889_v41, 1  ;;  %v1780_v38 = vld [vmem:[#allocation2 + $0x150] sm:$0xfc]  ;;  %v1782_v36 = vld [vmem:[#allocation2 + $0xe8] sm:$0xff]  ;;  %v1856_v59 = vpack.c.bf16 %v1786_v18, %v1784_v55 }
 0x21a   : > { %v5997_v42 = vpack.c.bf16 %v2778_v11, %v2777_v57  ;;  %v1854_v29 = vpack.c.bf16 %v1782_v36, %v1780_v38  ;;  %v2633_v55 = vld [vmem:[#allocation2 + $0x250] sm:$0xff]  ;;  %v2635_v11 = vld [vmem:[#allocation2 + $0x278] sm:$0xff] }
 0x21b   : > { %6607 = vst [vmem:[#allocation55_spill] sm:$0xff] %v5990_v0  ;;  %v2259_v52 = vsel %vm1282_vm2, %v2254_v1, %v2258_v33  ;;  %v2192_v37 = vrot.slane %v1856_v59, 1  ;;  %v2629_v33 = vld [vmem:[#allocation2 + $0x160] sm:$0xf0] }
 0x21c   : > { %6608 = vst [vmem:[#allocation56_spill] sm:$0xff] %v5992_v2  ;;  %v1739_v31 = vpop.f32.mrf.mxu2  ;;  %v2191_v41 = vrot.slane %v1854_v29, 1 }
 0x21d   : > { %2161 = vmatmul.bf16.gmra.mxu3 %v2001_v62  ;;  %v2628_v62 = vld [vmem:[#allocation2 + $0x198] sm:$0xf0] }
 0x21e   : > { %v1637_v15 = vpop.f32.mrf.mxu1  ;;  %v2702_v30 = vpack.c.bf16 %v5977_v61, %v2628_v62  ;;  %v2705_v61 = vpack.c.bf16 %v2635_v11, %v2633_v55 }
 0x21f   : > { %v1638_v48 = vadd.f32 %v1637_v15, %v5809_v9  ;;  %v2869_v9 = vrot.slane %v5997_v42, 3 }
 0x220   : > { %v2448_v63 = vpop.f32.mrf.mxu0  ;;  %v2122_v0 = vpop.f32.mrf.mxu3  ;;  %v3106_v59 = vrot.slane %v2702_v30, 2  ;;  %v3110_v62 = vrot.slane %v2705_v61, 2  ;;  %v2196_v11 = vrot.slane %v2705_v61, 1 }
 0x221   : > { %v5999_v22 = vadd.f32 %v1736_v23, %v1638_v48  ;;  %v6001_v13 = vadd.f32 %v2448_v63, %v2122_v0  ;;  %v2193_v48 = vsel %vm1282_vm2, %v2191_v41, %v2192_v37  ;;  %v2870_v1 = vsel %vm2865_vm4, %v2867_v8, %v2869_v9 }
 0x222   : > { %v3107_v63 = vrot.slane %v5979_v44, 2 }
 0x223   : > { %6609 = vst [vmem:[#allocation57_spill] sm:$0xff] %v5999_v22  ;;  %2487 = vmatmul.bf16.gmra.mxu0 %v2259_v52  ;;  %v2703_v52 = vpack.c.bf16 %v1786_v18, %v2629_v33  ;;  %v2779_v22 = vld [vmem:[#allocation2 + $0x130] sm:$0xff]  ;;  %v2639_v33 = vld [vmem:[#allocation2 + $0x58] sm:$0xff] }
 0x224   : > { %v1741_v2 = vpop.f32.mrf.mxu2 }
 0x225   : > { %v3109_v44 = vrot.slane %v2703_v52, 2 }
 0x226   : > { %v1640_v15 = vpop.f32.mrf.mxu1 }
 0x227   : > { %v1641_v23 = vadd.f32 %v1640_v15, %v5693_v17  ;;  %v3108_v17 = vsel %vm1964_vm3, %v3106_v59, %v3107_v63  ;;  %v3111_v30 = vsel %vm1964_vm3, %v3109_v44, %v3110_v62 }
 0x228   : > { %v2450_v57 = vpop.f32.mrf.mxu0  ;;  %v2124_v0 = vpop.f32.mrf.mxu3 }
 0x229   : > { %v6010_v38 = vadd.f32 %v1739_v31, %v1641_v23  ;;  %v6012_v36 = vadd.f32 %v2450_v57, %v2124_v0  ;;  %2501 = vmatmul.bf16.vlgmr.msra.gmra.mxu1 %v2193_v48  ;;  %2982 = vmatmul.bf16.gmra.mxu2 %v2870_v1  ;;  %v2780_v31 = vld [vmem:[#allocation2 + $0x240] sm:$0xff] }
 0x22a   : > { %v6021_v18 = vpack.c.bf16 %v2780_v31, %v2779_v22 }
 0x22c   : > { %v1744_v29 = vpop.f32.mrf.mxu2  ;;  %v2871_v1 = vrot.slane %v6021_v18, 3 }
 0x22d   : > { %3320 = vmatmul.bf16.vlgmr.msra.gmra.mxu3 %v3108_v17 }
 0x22e   : > { %v1642_v15 = vpop.f32.mrf.mxu1 }
 0x22f   : > { %v1643_v8 = vadd.f32 %v1642_v15, %v5704_v50  ;;  %v2637_v50 = vld [vmem:[#allocation2 + $0x148] sm:$0xff]  ;;  %v2872_v15 = vsel %vm2865_vm4, %v2869_v9, %v2871_v1 }
 0x230   : > { %v2453_v41 = vpop.f32.mrf.mxu0  ;;  %v2127_v23 = vpop.f32.mrf.mxu3  ;;  %v2707_v61 = vpack.c.bf16 %v2639_v33, %v2637_v50  ;;  %v2781_v9 = vld [vmem:[#allocation2 + $0x108] sm:$0xff] }
 0x231   : > { %v6016_v57 = vadd.f32 %v1741_v2, %v1643_v8  ;;  %v6018_v0 = vadd.f32 %v2453_v41, %v2127_v23  ;;  %v2197_v2 = vsel %vm1282_vm2, %v2192_v37, %v2196_v11  ;;  %v3112_v8 = vrot.slane %v5997_v42, 2  ;;  %v2782_v23 = vld [vmem:[#allocation2 + $0x98] sm:$0xff] }
 0x232   : > { %v6034_v42 = vpack.c.bf16 %v2782_v23, %v2781_v9  ;;  %v2200_v33 = vrot.slane %v2707_v61, 1  ;;  %v2784_v9 = vld [vmem:[#allocation2 + $0x188] sm:$0xff] }
 0x233   : > { %6610 = vst [vmem:[#allocation58_spill] sm:$0xff] %v6016_v57  ;;  %3419 = vmatmul.bf16.vlgmr.msra.gmra.mxu0 %v3111_v30  ;;  %v3113_v44 = vsel %vm1964_vm3, %v3107_v63, %v3112_v8 }
 0x234   : > { %v1746_v55 = vpop.f32.mrf.mxu2 }
 0x236   : > { %v1645_v48 = vpop.f32.mrf.mxu1 }
 0x237   : > { %v1646_v59 = vadd.f32 %v1645_v48, %v5718_v25  ;;  %v3114_v25 = vrot.slane %v2707_v61, 2 }
 0x238   : > { %v2455_v52 = vpop.f32.mrf.mxu0  ;;  %v2129_v17 = vpop.f32.mrf.mxu3 }
 0x239   : > { %v6028_v41 = vadd.f32 %v1744_v29, %v1646_v59  ;;  %v6030_v22 = vadd.f32 %v2455_v52, %v2129_v17  ;;  %2506 = vmatmul.bf16.gmra.mxu1 %v2197_v2  ;;  %2987 = vmatmul.bf16.gmra.mxu2 %v2872_v15  ;;  %v3115_v50 = vsel %vm1964_vm3, %v3110_v62, %v3114_v25  ;;  %v2873_v52 = vrot.slane %v6034_v42, 3 }
 0x23a   : > { %v3116_v62 = vrot.slane %v6021_v18, 2 }
 0x23b   : > { %v2874_v23 = vsel %vm2865_vm4, %v2871_v1, %v2873_v52 }
 0x23c   : > { %v1749_v31 = vpop.f32.mrf.mxu2 }
 0x23d   : > { %3325 = vmatmul.bf16.gmra.mxu3 %v3113_v44  ;;  %v2201_v44 = vsel %vm1282_vm2, %v2196_v11, %v2200_v33 }
 0x23e   : > { %v1647_v30 = vpop.f32.mrf.mxu1 }
 0x23f   : > { %v1648_v37 = vadd.f32 %v1647_v30, %v5729_v47  ;;  %v2643_v30 = vld [vmem:[#allocation2 + $0x218] sm:$0xff] }
 0x240   : > { %v2458_v48 = vpop.f32.mrf.mxu0  ;;  %v2132_v57 = vpop.f32.mrf.mxu3 }
 0x241   : > { %v6036_v29 = vadd.f32 %v1746_v55, %v1648_v37  ;;  %v6038_v59 = vadd.f32 %v2458_v48, %v2132_v57  ;;  %v2641_v55 = vld [vmem:[#allocation2 + $0x208] sm:$0xff]  ;;  %v3117_v48 = vsel %vm1964_vm3, %v3112_v8, %v3116_v62 }
 0x242   : > { %v2709_v61 = vpack.c.bf16 %v2643_v30, %v2641_v55  ;;  %v2647_v30 = vld [vmem:[#allocation2 + $0xc8] sm:$0xff] }
 0x243   : > { %6611 = vst [vmem:[#allocation59_spill] sm:$0xff] %v6036_v29  ;;  %3424 = vmatmul.bf16.gmra.mxu0 %v3115_v50  ;;  %v2783_v29 = vld [vmem:[#allocation2 + $0x1e8] sm:$0xff] }
 0x244   : > { %v1751_v63 = vpop.f32.mrf.mxu2  ;;  %v2204_v55 = vrot.slane %v2709_v61, 1 }
 0x246   : > { %v1650_v17 = vpop.f32.mrf.mxu1 }
 0x247   : > { %v1651_v2 = vadd.f32 %v1650_v17, %v5735_v34  ;;  %v3118_v17 = vrot.slane %v2709_v61, 2 }
 0x248   : > { %v2460_v47 = vpop.f32.mrf.mxu0  ;;  %v2134_v15 = vpop.f32.mrf.mxu3 }
 0x249   : > { %v6045_v57 = vadd.f32 %v1749_v31, %v1651_v2  ;;  %v6047_v37 = vadd.f32 %v2460_v47, %v2134_v15  ;;  %2511 = vmatmul.bf16.gmra.mxu1 %v2201_v44  ;;  %2992 = vmatmul.bf16.gmra.mxu2 %v2874_v23  ;;  %v6052_v2 = vpack.c.bf16 %v2784_v9, %v2783_v29  ;;  %v3120_v9 = vrot.slane %v6034_v42, 2 }
 0x24a   : > { %v3119_v18 = vsel %vm1964_vm3, %v3114_v25, %v3118_v17  ;;  %v2205_v29 = vsel %vm1282_vm2, %v2200_v33, %v2204_v55 }
 0x24b   : > { %6612 = vst [vmem:[#allocation60_spill] sm:$0xff] %v6045_v57  ;;  %v2875_v44 = vrot.slane %v6052_v2, 3  ;;  %v3121_v61 = vsel %vm1964_vm3, %v3116_v62, %v3120_v9 }
 0x24c   : > { %v1754_v34 = vpop.f32.mrf.mxu2 }
 0x24d   : > { %3330 = vmatmul.bf16.gmra.mxu3 %v3117_v48 }
 0x24e   : > { %v1652_v50 = vpop.f32.mrf.mxu1 }
 0x24f   : > { %v1653_v11 = vadd.f32 %v1652_v50, %v5740_v43 }
 0x250   : > { %v2463_v1 = vpop.f32.mrf.mxu0  ;;  %v2137_v31 = vpop.f32.mrf.mxu3 }
 0x251   : > { %v6054_v47 = vadd.f32 %v1751_v63, %v1653_v11  ;;  %v6056_v15 = vadd.f32 %v2463_v1, %v2137_v31  ;;  %v2876_v63 = vsel %vm2865_vm4, %v2873_v52, %v2875_v44  ;;  %v2645_v11 = vld [vmem:[#allocation2 + $0x180] sm:$0xff] }
 0x252   : > { %v2711_v31 = vpack.c.bf16 %v2647_v30, %v2645_v11 }
 0x253   : > { %6613 = vst [vmem:[#allocation61_spill] sm:$0xff] %v6054_v47  ;;  %3429 = vmatmul.bf16.gmra.mxu0 %v3119_v18  ;;  %v2786_v47 = vld [vmem:[#allocation2 + $0x280] sm:$0xff] }
 0x254   : > { %6614 = vst [vmem:[#allocation62_spill] sm:$0xff] %v6056_v15  ;;  %v1756_v8 = vpop.f32.mrf.mxu2 }
 0x256   : > { %v1655_v23 = vpop.f32.mrf.mxu1 }
 0x257   : > { %v1656_v43 = vadd.f32 %v1655_v23, %v5754_v4  ;;  %v3122_v4 = vrot.slane %v2711_v31, 2  ;;  %v2785_v23 = vld [vmem:[#allocation2 + $0x78] sm:$0xff] }
 0x258   : > { %v2465_v48 = vpop.f32.mrf.mxu0  ;;  %v2139_v50 = vpop.f32.mrf.mxu3  ;;  %v6070_v15 = vpack.c.bf16 %v2786_v47, %v2785_v23  ;;  %v2649_v23 = vld [vmem:[#allocation2 + $0x1a0] sm:$0xff] }
 0x259   : > { %v6064_v1 = vadd.f32 %v1754_v34, %v1656_v43  ;;  %v6066_v25 = vadd.f32 %v2465_v48, %v2139_v50  ;;  %2516 = vmatmul.bf16.gmra.mxu1 %v2205_v29  ;;  %2997 = vmatmul.bf16.gmra.mxu2 %v2876_v63  ;;  %v3123_v30 = vsel %vm1964_vm3, %v3118_v17, %v3122_v4  ;;  %v2208_v48 = vrot.slane %v2711_v31, 1  ;;  %v2651_v63 = vld [vmem:[#allocation2 + $0xc0] sm:$0xff] }
 0x25a   : > { %v2877_v50 = vrot.slane %v6070_v15, 3  ;;  %v2713_v31 = vpack.c.bf16 %v2651_v63, %v2649_v23 }
 0x25b   : > { %6615 = vst [vmem:[#allocation63_spill] sm:$0xff] %v6064_v1  ;;  %v2209_v47 = vsel %vm1282_vm2, %v2204_v55, %v2208_v48 }
 0x25c   : > { %v1759_v18 = vpop.f32.mrf.mxu2 }
 0x25d   : > { %3335 = vmatmul.bf16.gmra.mxu3 %v3121_v61 }
 0x25e   : > { %v1657_v33 = vpop.f32.mrf.mxu1 }
 0x25f   : > { %v1658_v52 = vadd.f32 %v1657_v33, %v5769_v39 }
 0x260   : > { %v2468_v57 = vpop.f32.mrf.mxu0  ;;  %v2142_v42 = vpop.f32.mrf.mxu3 }
 0x261   : > { %v6072_v34 = vadd.f32 %v1756_v8, %v1658_v52  ;;  %v6074_v43 = vadd.f32 %v2468_v57, %v2142_v42  ;;  %v2878_v8 = vsel %vm2865_vm4, %v2875_v44, %v2877_v50  ;;  %v3124_v57 = vrot.slane %v6052_v2, 2  ;;  %v2787_v44 = vld [vmem:[#allocation2 + $0x260] sm:$0xff] }
 0x263   : > { %6616 = vst [vmem:[#allocation64_spill] sm:$0xff] %v6072_v34  ;;  %3434 = vmatmul.bf16.gmra.mxu0 %v3123_v30  ;;  %v3125_v52 = vsel %vm1964_vm3, %v3120_v9, %v3124_v57  ;;  %v2788_v34 = vld [vmem:[#allocation2 + $0x1c8] sm:$0xff] }
 0x264   : > { %v1761_v62 = vpop.f32.mrf.mxu2  ;;  %v6093_v63 = vpack.c.bf16 %v2788_v34, %v2787_v44 }
 0x266   : > { %v1660_v29 = vpop.f32.mrf.mxu1 }
 0x267   : > { %v1661_v11 = vadd.f32 %v1660_v29, %v5780_v16  ;;  %v3126_v16 = vrot.slane %v2713_v31, 2 }
 0x268   : > { %v2470_v39 = vpop.f32.mrf.mxu0  ;;  %v2144_v61 = vpop.f32.mrf.mxu3 }
 0x269   : > { %v6082_v33 = vadd.f32 %v1759_v18, %v1661_v11  ;;  %v6084_v17 = vadd.f32 %v2470_v39, %v2144_v61  ;;  %2521 = vmatmul.bf16.gmra.mxu1 %v2209_v47  ;;  %3002 = vmatmul.bf16.gmra.mxu2 %v2878_v8  ;;  %v3127_v11 = vsel %vm1964_vm3, %v3122_v4, %v3126_v16  ;;  %v2212_v39 = vrot.slane %v2713_v31, 1  ;;  %v2653_v8 = vld [vmem:[#allocation2 + $0x248] sm:$0xff] }
 0x26a   : > { %v2879_v47 = vrot.slane %v6093_v63, 3  ;;  %v3128_v4 = vrot.slane %v6070_v15, 2 }
 0x26b   : > { %6617 = vst [vmem:[#allocation65_spill] sm:$0xff] %v6082_v33 }
 0x26c   : > { %v1764_v42 = vpop.f32.mrf.mxu2  ;;  %v3129_v44 = vsel %vm1964_vm3, %v3124_v57, %v3128_v4 }
 0x26d   : > { %3340 = vmatmul.bf16.gmra.mxu3 %v3125_v52 }
 0x26e   : > { %v1662_v30 = vpop.f32.mrf.mxu1 }
 0x26f   : > { %v1663_v55 = vadd.f32 %v1662_v30, %v5790_v32  ;;  %v2655_v32 = vld [vmem:[#allocation2 + $0x178] sm:$0xff] }
 0x270   : > { %v2473_v29 = vpop.f32.mrf.mxu0  ;;  %v2147_v2 = vpop.f32.mrf.mxu3  ;;  %v2715_v31 = vpack.c.bf16 %v2655_v32, %v2653_v8 }
 0x271   : > { %v6088_v1 = vadd.f32 %v1761_v62, %v1663_v55  ;;  %v6090_v18 = vadd.f32 %v2473_v29, %v2147_v2  ;;  %v2213_v62 = vsel %vm1282_vm2, %v2208_v48, %v2212_v39  ;;  %v2880_v55 = vsel %vm2865_vm4, %v2877_v50, %v2879_v47  ;;  %v2790_v50 = vld [vmem:[#allocation2 + $0x1f8] sm:$0xff] }
 0x272   : > { %v2216_v32 = vrot.slane %v2715_v31, 1 }
 0x273   : > { %6618 = vst [vmem:[#allocation66_spill] sm:$0xff] %v6088_v1  ;;  %3439 = vmatmul.bf16.gmra.mxu0 %v3127_v11  ;;  %v2789_v1 = vld [vmem:[#allocation2 + $0x68] sm:$0xff] }
 0x274   : > { %v1766_v9 = vpop.f32.mrf.mxu2  ;;  %v6111_v8 = vpack.c.bf16 %v2790_v50, %v2789_v1  ;;  %v3132_v1 = vrot.slane %v6093_v63, 2  ;;  %v2791_v50 = vld [vmem:[#allocation2 + $0xf0] sm:$0xff] }
 0x276   : > { %v1665_v61 = vpop.f32.mrf.mxu1 }
 0x277   : > { %v1666_v23 = vadd.f32 %v1665_v61, %v5756_v28  ;;  %v3130_v28 = vrot.slane %v2715_v31, 2 }
 0x278   : > { %v2475_v52 = vpop.f32.mrf.mxu0  ;;  %v2149_v30 = vpop.f32.mrf.mxu3 }
 0x279   : > { %v6100_v29 = vadd.f32 %v1764_v42, %v1666_v23  ;;  %v6102_v34 = vadd.f32 %v2475_v52, %v2149_v30  ;;  %2526 = vmatmul.bf16.gmra.mxu1 %v2213_v62  ;;  %3007 = vmatmul.bf16.gmra.mxu2 %v2880_v55  ;;  %v3131_v23 = vsel %vm1964_vm3, %v3126_v16, %v3130_v28  ;;  %v2881_v30 = vrot.slane %v6111_v8, 3 }
 0x27b   : > { %6619 = vst [vmem:[#allocation67_spill] sm:$0xff] %v6100_v29 }
 0x27c   : > { %v1769_v2 = vpop.f32.mrf.mxu2 }
 0x27d   : > { %3345 = vmatmul.bf16.gmra.mxu3 %v3129_v44  ;;  %v2217_v44 = vsel %vm1282_vm2, %v2212_v39, %v2216_v32 }
 0x27e   : > { %v1667_v11 = vpop.f32.mrf.mxu1 }
 0x27f   : > { %v1668_v61 = vadd.f32 %v1667_v11, %v5771_v40  ;;  %v2659_v11 = vld [vmem:[#allocation2 + $0x1e0] sm:$0xff] }
 0x280   : > { %v2478_v48 = vpop.f32.mrf.mxu0  ;;  %v2152_v33 = vpop.f32.mrf.mxu3 }
 0x281   : > { %v6106_v15 = vadd.f32 %v1766_v9, %v1668_v61  ;;  %v6108_v42 = vadd.f32 %v2478_v48, %v2152_v33  ;;  %v2882_v9 = vsel %vm2865_vm4, %v2879_v47, %v2881_v30  ;;  %v2657_v33 = vld [vmem:[#allocation2 + $0x70] sm:$0xff]  ;;  %v3133_v48 = vsel %vm1964_vm3, %v3128_v4, %v3132_v1 }
 0x282   : > { %v2717_v31 = vpack.c.bf16 %v2659_v11, %v2657_v33  ;;  %v6625_v11 = vld [vmem:[#allocation39_spill] sm:$0xff] }
 0x283   : > { %6620 = vst [vmem:[#allocation68_spill] sm:$0xff] %v6106_v15  ;;  %3444 = vmatmul.bf16.gmra.mxu0 %v3131_v23  ;;  %v2792_v23 = vld [vmem:[#allocation2 + $0x228] sm:$0xff] }
 0x284   : > { %v1771_v57 = vpop.f32.mrf.mxu2  ;;  %v3134_v15 = vrot.slane %v2717_v31, 2  ;;  %v2220_v33 = vrot.slane %v2717_v31, 1 }
 0x286   : > { %v1670_v52 = vpop.f32.mrf.mxu1  ;;  %v3135_v63 = vsel %vm1964_vm3, %v3130_v28, %v3134_v15  ;;  %v3136_v28 = vrot.slane %v6111_v8, 2 }
 0x287   : > { %v1671_v40 = vadd.f32 %v1670_v52, %v5782_v20 }
 0x288   : > { %v2480_v62 = vpop.f32.mrf.mxu0  ;;  %v2154_v55 = vpop.f32.mrf.mxu3  ;;  %v3137_v31 = vsel %vm1964_vm3, %v3132_v1, %v3136_v28 }
 0x289   : > { %v6117_v61 = vadd.f32 %v1769_v2, %v1671_v40  ;;  %v6119_v16 = vadd.f32 %v2480_v62, %v2154_v55  ;;  %2531 = vmatmul.bf16.gmra.mxu1 %v2217_v44  ;;  %3012 = vmatmul.bf16.gmra.mxu2 %v2882_v9  ;;  %v6124_v40 = vpack.c.bf16 %v2792_v23, %v2791_v50  ;;  %v2663_v23 = vld [vmem:[#allocation2 + $0xd0] sm:$0xff] }
 0x28b   : > { %6621 = vst [vmem:[#allocation69_spill] sm:$0xff] %v6117_v61  ;;  %v2883_v44 = vrot.slane %v6124_v40, 3  ;;  %v2221_v61 = vsel %vm1282_vm2, %v2216_v32, %v2220_v33 }
 0x28c   : > { %6622 = vst [vmem:[#allocation70_spill] sm:$0xff] %v6119_v16  ;;  %v1774_v20 = vpop.f32.mrf.mxu2 }
 0x28d   : > { %3350 = vmatmul.bf16.gmra.mxu3 %v3133_v48  ;;  %v2884_v50 = vsel %vm2865_vm4, %v2881_v30, %v2883_v44 }
 0x28e   : > { %v1672_v39 = vpop.f32.mrf.mxu1 }
 0x28f   : > { %v1673_v47 = vadd.f32 %v1672_v39, %v5792_v14 }
 0x290   : > { %v2483_v52 = vpop.f32.mrf.mxu0  ;;  %v2157_v2 = vpop.f32.mrf.mxu3 }
 0x291   : > { %v6126_v62 = vadd.f32 %v1771_v57, %v1673_v47  ;;  %v6128_v55 = vadd.f32 %v2483_v52, %v2157_v2  ;;  %v2661_v57 = vld [vmem:[#allocation2 + $0x138] sm:$0xff] }
 0x292   : > { %v2719_v2 = vpack.c.bf16 %v2663_v23, %v2661_v57  ;;  %v2665_v23 = vld [vmem:[#allocation2 + $0x40] sm:$0xff] }
 0x293   : > { %6623 = vst [vmem:[#allocation71_spill] sm:$0xff] %v6126_v62  ;;  %3449 = vmatmul.bf16.gmra.mxu0 %v3135_v63  ;;  %v6628_v62 = vld [vmem:[#allocation40_spill] sm:$0xff] }
 0x294   : > { %6624 = vst [vmem:[#allocation72_spill] sm:$0xff] %v6128_v55  ;;  %v1776_v4 = vpop.f32.mrf.mxu2  ;;  %v3138_v16 = vrot.slane %v2719_v2, 2  ;;  %v2224_v57 = vrot.slane %v2719_v2, 1 }
 0x296   : > { %v1675_v9 = vpop.f32.mrf.mxu1  ;;  %v3139_v8 = vsel %vm1964_vm3, %v3134_v15, %v3138_v16  ;;  %v6632_v15 = vld [vmem:[#allocation41_spill] sm:$0xff] }
 0x297   : > { %v1676_v48 = vadd.f32 %v1675_v9, %v6625_v11  ;;  %v2793_v9 = vld [vmem:[#allocation2 + $0x170] sm:$0xff] }
 0x298   : > { %v2485_v14 = vpop.f32.mrf.mxu0  ;;  %v2159_v39 = vpop.f32.mrf.mxu3  ;;  %v2794_v11 = vld [vmem:[#allocation2 + $0xb0] sm:$0xff] }
 0x299   : > { %v6135_v47 = vadd.f32 %v1774_v20, %v1676_v48  ;;  %v6137_v52 = vadd.f32 %v2485_v14, %v2159_v39  ;;  %2536 = vmatmul.bf16.gmra.mxu1 %v2221_v61  ;;  %3017 = vmatmul.bf16.gmra.mxu2 %v2884_v50  ;;  %v6142_v48 = vpack.c.bf16 %v2794_v11, %v2793_v9 }
 0x29a   : > { %v2225_v9 = vsel %vm1282_vm2, %v2220_v33, %v2224_v57  ;;  %v2796_v33 = vld [vmem:[#allocation2 + $0x88] sm:$0xff] }
 0x29b   : > { %6626 = vst [vmem:[#allocation39_spill] sm:$0xff] %v6135_v47  ;;  %v2885_v39 = vrot.slane %v6142_v48, 3 }
 0x29c   : > { %6627 = vst [vmem:[#allocation73_spill] sm:$0xff] %v6137_v52  ;;  %v2978_v63 = vpop.f32.mrf.mxu2 }
 0x29d   : > { %3355 = vmatmul.bf16.gmra.mxu3 %v3137_v31  ;;  %v2667_v31 = vld [vmem:[#allocation2 + $0x1f0] sm:$0xff] }
 0x29e   : > { %v1677_v32 = vpop.f32.mrf.mxu1 }
 0x29f   : > { %v1678_v30 = vadd.f32 %v1677_v32, %v6628_v62 }
 0x2a0   : > { %v2488_v55 = vpop.f32.mrf.mxu0  ;;  %v2162_v20 = vpop.f32.mrf.mxu3 }
 0x2a1   : > { %v6144_v14 = vadd.f32 %v1776_v4, %v1678_v30  ;;  %v6146_v61 = vadd.f32 %v2488_v55, %v2162_v20  ;;  %v2886_v4 = vsel %vm2865_vm4, %v2883_v44, %v2885_v39  ;;  %v3140_v55 = vrot.slane %v6124_v40, 2 }
 0x2a2   : > { %v6157_v20 = vpack.c.bf16 %v2667_v31, %v2665_v23 }
 0x2a3   : > { %6629 = vst [vmem:[#allocation40_spill] sm:$0xff] %v6144_v14  ;;  %3454 = vmatmul.bf16.gmra.mxu0 %v3139_v8  ;;  %v3141_v2 = vsel %vm1964_vm3, %v3136_v28, %v3140_v55 }
 0x2a4   : > { %6630 = vst [vmem:[#allocation74_spill] sm:$0xff] %v6146_v61  ;;  %v2980_v1 = vpop.f32.mrf.mxu2 }
 0x2a6   : > { %v2502_v50 = vpop.f32.mrf.mxu1 }
 0x2a7   : > { %v2503_v32 = vadd.f32 %v2502_v50, %v5835_v46  ;;  %v3142_v46 = vrot.slane %v6157_v20, 2  ;;  %v2795_v50 = vld [vmem:[#allocation2 + $0x20] sm:$0xff] }
 0x2a8   : > { %v2490_v62 = vpop.f32.mrf.mxu0  ;;  %v2164_v47 = vpop.f32.mrf.mxu3 }
 0x2a9   : > { %v6154_v11 = vadd.f32 %v2490_v62, %v2164_v47  ;;  %v2592_v30 = vadd.f32 %v2503_v32, %v6632_v15  ;;  %2541 = vmatmul.bf16.gmra.mxu1 %v2225_v9  ;;  %3022 = vmatmul.bf16.gmra.mxu2 %v2886_v4  ;;  %v6162_v62 = vpack.c.bf16 %v2796_v33, %v2795_v50  ;;  %v2228_v4 = vrot.slane %v6157_v20, 1 }
 0x2aa   : > { %v3143_v23 = vsel %vm1964_vm3, %v3138_v16, %v3142_v46 }
 0x2ab   : > { %6631 = vst [vmem:[#allocation75_spill] sm:$0xff] %v6154_v11  ;;  %v2887_v15 = vrot.slane %v6162_v62, 3  ;;  %v2671_v11 = vld [vmem:[#allocation2 + $0x1d0] sm:$0xff] }
 0x2ac   : > { %v2983_v8 = vpop.f32.mrf.mxu2 }
 0x2ad   : > { %3360 = vmatmul.bf16.gmra.mxu3 %v3141_v2  ;;  %v2669_v2 = vld [vmem:[#allocation2 + $0x10] sm:$0xff]  ;;  %v2888_v16 = vsel %vm2865_vm4, %v2885_v39, %v2887_v15  ;;  %v2798_v39 = vld [vmem:[#allocation2 + $0x118] sm:$0xff] }
 0x2ae   : > { %v2504_v14 = vpop.f32.mrf.mxu1  ;;  %v6169_v50 = vpack.c.bf16 %v2671_v11, %v2669_v2 }
 0x2af   : > { %v2505_v44 = vadd.f32 %v2504_v14, %v5841_v5 }
 0x2b0   : > { %v3420_v40 = vpop.f32.mrf.mxu0  ;;  %v3321_v47 = vpop.f32.mrf.mxu3 }
 0x2b1   : > { %v3322_v32 = vadd.f32 %v3321_v47, %v2978_v63  ;;  %v2593_v9 = vadd.f32 %v2505_v44, %v5833_v45  ;;  %v2229_v45 = vsel %vm1282_vm2, %v2224_v57, %v2228_v4  ;;  %v3144_v44 = vrot.slane %v6142_v48, 2 }
 0x2b3   : > { %3459 = vmatmul.bf16.gmra.mxu0 %v3143_v23  ;;  %v3421_v28 = vadd.f32 %v3420_v40, %v3322_v32  ;;  %v6633_v32 = vld [vmem:[#allocation17_spill] sm:$0xff]  ;;  %v2797_v23 = vld [vmem:[#allocation2 + $0xf8] sm:$0xff] }
 0x2b4   : > { %v2985_v31 = vpop.f32.mrf.mxu2 }
 0x2b5   : > { %v3510_v63 = vadd.f32 %v3421_v28, %v2592_v30  ;;  %v3146_v30 = vrot.slane %v6169_v50, 2 }
 0x2b6   : > { %v2507_v61 = vpop.f32.mrf.mxu1 }
 0x2b7   : > { %v2508_v5 = vadd.f32 %v2507_v61, %v5854_v56  ;;  %v3618_v56 = vmul.f32 %v3510_v63, %v6633_v32  ;;  %v3145_v61 = vsel %vm1964_vm3, %v3140_v55, %v3144_v44 }
 0x2b8   : > { %v3422_v14 = vpop.f32.mrf.mxu0  ;;  %v3323_v33 = vpop.f32.mrf.mxu3 }
 0x2b9   : > { %v3324_v20 = vadd.f32 %v3323_v33, %v2980_v1  ;;  %v2594_v40 = vadd.f32 %v2508_v5, %v5839_v10  ;;  %2546 = vmatmul.bf16.gmra.mxu1 %v2229_v45  ;;  %3027 = vmatmul.bf16.gmra.mxu2 %v2888_v16  ;;  %v6634_v1 = vld [vmem:[#allocation6_spill] sm:$0xff]  ;;  %v3696_v5 = vmul.f32 %v3618_v56, %v3510_v63 }
 0x2ba   : > { %v6190_v33 = vpack.c.bf16 %v2798_v39, %v2797_v23  ;;  %v6636_v39 = vld [vmem:[#allocation23_spill] sm:$0xff] }
 0x2bb   : > { %v3423_v47 = vadd.f32 %v3422_v14, %v3324_v20 }
 0x2bc   : > { %v6177_v11 = vpop.f32.mrf.mxu2 }
 0x2bd   : > { %v3511_v57 = vadd.f32 %v3423_v47, %v2593_v9  ;;  %3365 = vmatmul.bf16.gmra.mxu3 %v3145_v61  ;;  %v3147_v9 = vsel %vm1964_vm3, %v3142_v46, %v3146_v30  ;;  %v6635_v47 = vld [vmem:[#allocation42_spill] sm:$0xff]  ;;  %v2675_v46 = vld [vmem:[#allocation2 + $0xd8] sm:$0xff] }
 0x2be   : > { %v2509_v10 = vpop.f32.mrf.mxu1 }
 0x2bf   : > { %v4419_v48 = vpack.c.bf16 %v3511_v57, %v3510_v63  ;;  %v3619_v28 = vmul.f32 %v3511_v57, %v6634_v1  ;;  %v2510_v55 = vadd.f32 %v2509_v10, %v5866_v35  ;;  %v2232_v35 = vrot.slane %v6169_v50, 1  ;;  %v2673_v1 = vld [vmem:[#allocation2 + $0xe0] sm:$0xff] }
 0x2c0   : > { %v3425_v2 = vpop.f32.mrf.mxu0  ;;  %v3326_v14 = vpop.f32.mrf.mxu3  ;;  %v2889_v63 = vrot.slane %v6190_v33, 3 }
 0x2c1   : > { %4420 = vst [vmem:[%s6185_s23] sm:$0xff] %v4419_v48   ;;  %v3654_v45 = vadd.f32 %v3619_v28, %v3618_v56  ;;  %v3697_v16 = vmul.f32 %v3619_v28, %v3511_v57  ;;  %v3327_v20 = vadd.f32 %v3326_v14, %v2983_v8  ;;  %v2595_v32 = vadd.f32 %v2510_v55, %v6635_v47 }
 0x2c2   : > { %v2233_v28 = vsel %vm1282_vm2, %v2228_v4, %v2232_v35  ;;  %v2890_v55 = vsel %vm2865_vm4, %v2887_v15, %v2889_v63 }
 0x2c3   : > { %3464 = vmatmul.bf16.gmra.mxu0 %v3147_v9  ;;  %v3732_v61 = vadd.f32 %v3697_v16, %v3696_v5  ;;  %v3426_v52 = vadd.f32 %v3425_v2, %v3327_v20  ;;  %v3148_v2 = vrot.slane %v6162_v62, 2  ;;  %v6203_v5 = vpack.c.bf16 %v2675_v46, %v2673_v1  ;;  %v2799_v62 = vld [vmem:[#allocation2 + $0xa8] sm:$0xff] }
 0x2c4   : > { %v6194_v29 = vpop.f32.mrf.mxu2  ;;  %v2800_v1 = vld [vmem:[#allocation2 + $0x1a8] sm:$0xff] }
 0x2c5   : > { %v3512_v10 = vadd.f32 %v3426_v52, %v2594_v40  ;;  %v6637_v40 = vld [vmem:[#allocation43_spill] sm:$0xff]  ;;  %v3150_v4 = vrot.slane %v6203_v5, 2 }
 0x2c6   : > { %v2512_v23 = vpop.f32.mrf.mxu1 }
 0x2c7   : > { %v3620_v48 = vmul.f32 %v3512_v10, %v6636_v39  ;;  %v2513_v56 = vadd.f32 %v2512_v23, %v5873_v7  ;;  %v3149_v7 = vsel %vm1964_vm3, %v3144_v44, %v3148_v2 }
 0x2c8   : > { %v3427_v8 = vpop.f32.mrf.mxu0  ;;  %v3328_v57 = vpop.f32.mrf.mxu3 }
 0x2c9   : > { %v3655_v50 = vadd.f32 %v3654_v45, %v3620_v48  ;;  %v3698_v14 = vmul.f32 %v3620_v48, %v3512_v10  ;;  %v3329_v52 = vadd.f32 %v3328_v57, %v2985_v31  ;;  %v2596_v9 = vadd.f32 %v2513_v56, %v6637_v40  ;;  %2551 = vmatmul.bf16.gmra.mxu1 %v2233_v28  ;;  %v6638_v31 = vld [vmem:[#allocation12_spill] sm:$0xff] }
 0x2ca   : > { %3032 = vmatmul.bf16.gmra.mxu2 %v2890_v55  ;;  %v3151_v56 = vsel %vm1964_vm3, %v3146_v30, %v3150_v4  ;;  %v2677_v30 = vld [vmem:[#allocation2 + $0x90] sm:$0xff] }
 0x2cb   : > { %v3733_v16 = vadd.f32 %v3732_v61, %v3698_v14  ;;  %v3428_v20 = vadd.f32 %v3427_v8, %v3329_v52  ;;  %v6213_v8 = vpack.c.bf16 %v2800_v1, %v2799_v62  ;;  %v6639_v62 = vld [vmem:[#allocation33_spill] sm:$0xff] }
 0x2cc   : > { %v6207_v47 = vpop.f32.mrf.mxu2 }
 0x2cd   : > { %v3513_v15 = vadd.f32 %v3428_v20, %v2595_v32  ;;  %3370 = vmatmul.bf16.gmra.mxu3 %v3149_v7  ;;  %v2891_v52 = vrot.slane %v6213_v8, 3  ;;  %v2679_v20 = vld [vmem:[#allocation2 + $0x1b8] sm:$0xff] }
 0x2ce   : > { %v2514_v45 = vpop.f32.mrf.mxu1 }
 0x2cf   : > { %v4424_v46 = vpack.c.bf16 %v3513_v15, %v3512_v10  ;;  %v3621_v23 = vmul.f32 %v3513_v15, %v6638_v31  ;;  %v2515_v39 = vadd.f32 %v2514_v45, %v5879_v27  ;;  %v2236_v27 = vrot.slane %v6203_v5, 1 }
 0x2d0   : > { %v3430_v48 = vpop.f32.mrf.mxu0  ;;  %v3331_v61 = vpop.f32.mrf.mxu3  ;;  %v3152_v45 = vrot.slane %v6190_v33, 2 }
 0x2d1   : > { %4523 = vst [vmem:[%s6185_s23 + $0x8] sm:$0xff] %v4424_v46   ;;  %v3656_v44 = vadd.f32 %v3655_v50, %v3621_v23  ;;  %v3699_v57 = vmul.f32 %v3621_v23, %v3513_v15  ;;  %v3332_v32 = vadd.f32 %v3331_v61, %v6177_v11  ;;  %v2597_v28 = vadd.f32 %v2515_v39, %v5871_v12  ;;  %v2802_v61 = vld [vmem:[#allocation2 + $0xb8] sm:$0xff] }
 0x2d2   : > { %v2237_v12 = vsel %vm1282_vm2, %v2232_v35, %v2236_v27  ;;  %v6227_v46 = vpack.c.bf16 %v2679_v20, %v2677_v30 }
 0x2d3   : > { %3469 = vmatmul.bf16.gmra.mxu0 %v3151_v56  ;;  %v3734_v55 = vadd.f32 %v3733_v16, %v3699_v57  ;;  %v3431_v10 = vadd.f32 %v3430_v48, %v3332_v32  ;;  %v2892_v16 = vsel %vm2865_vm4, %v2889_v63, %v2891_v52  ;;  %v3153_v48 = vsel %vm1964_vm3, %v3148_v2, %v3152_v45  ;;  %v6640_v57 = vld [vmem:[#allocation34_spill] sm:$0xff] }
 0x2d4   : > { %v6218_v14 = vpop.f32.mrf.mxu2  ;;  %v3154_v63 = vrot.slane %v6227_v46, 2 }
 0x2d5   : > { %v3514_v40 = vadd.f32 %v3431_v10, %v2596_v9  ;;  %v2801_v10 = vld [vmem:[#allocation2 + $0x110] sm:$0xff] }
 0x2d6   : > { %v2517_v7 = vpop.f32.mrf.mxu1  ;;  %v3155_v30 = vsel %vm1964_vm3, %v3150_v4, %v3154_v63  ;;  %v6238_v20 = vpack.c.bf16 %v2802_v61, %v2801_v10  ;;  %v2681_v4 = vld [vmem:[#allocation2 + $0x288] sm:$0xff]  ;;  %v3156_v61 = vrot.slane %v6213_v8, 2  ;;  %v2803_v10 = vld [vmem:[#allocation2 + $0xa0] sm:$0xff] }
 0x2d7   : > { %v3622_v50 = vmul.f32 %v3514_v40, %v6639_v62  ;;  %v2518_v15 = vadd.f32 %v2517_v7, %v5886_v49  ;;  %v6641_v62 = vld [vmem:[#allocation44_spill] sm:$0xff] }
 0x2d8   : > { %v3432_v11 = vpop.f32.mrf.mxu0  ;;  %v3333_v1 = vpop.f32.mrf.mxu3 }
 0x2d9   : > { %v3657_v5 = vadd.f32 %v3656_v44, %v3622_v50  ;;  %v3700_v31 = vmul.f32 %v3622_v50, %v3514_v40  ;;  %v3334_v9 = vadd.f32 %v3333_v1, %v6194_v29  ;;  %v2598_v23 = vadd.f32 %v2518_v15, %v5877_v24  ;;  %2556 = vmatmul.bf16.gmra.mxu1 %v2237_v12 }
 0x2da   : > { %3037 = vmatmul.bf16.gmra.mxu2 %v2892_v16  ;;  %v2893_v1 = vrot.slane %v6238_v20, 3  ;;  %v2683_v16 = vld [vmem:[#allocation2 + $0x220] sm:$0xff] }
 0x2db   : > { %v3735_v39 = vadd.f32 %v3734_v55, %v3700_v31  ;;  %v3433_v49 = vadd.f32 %v3432_v11, %v3334_v9  ;;  %v6642_v9 = vld [vmem:[#allocation37_spill] sm:$0xff] }
 0x2dc   : > { %v6232_v35 = vpop.f32.mrf.mxu2 }
 0x2dd   : > { %v3515_v33 = vadd.f32 %v3433_v49, %v2597_v28  ;;  %3375 = vmatmul.bf16.gmra.mxu3 %v3153_v48 }
 0x2de   : > { %v2519_v56 = vpop.f32.mrf.mxu1 }
 0x2df   : > { %v4429_v44 = vpack.c.bf16 %v3515_v33, %v3514_v40  ;;  %v3623_v29 = vmul.f32 %v3515_v33, %v6640_v57  ;;  %v2520_v24 = vadd.f32 %v2519_v56, %v5898_v51  ;;  %v2240_v51 = vrot.slane %v6227_v46, 1  ;;  %v6643_v57 = vld [vmem:[#allocation45_spill] sm:$0xff] }
 0x2e0   : > { %v3435_v32 = vpop.f32.mrf.mxu0  ;;  %v3336_v55 = vpop.f32.mrf.mxu3  ;;  %v6252_v56 = vpack.c.bf16 %v2683_v16, %v2681_v4 }
 0x2e1   : > { %4524 = vst [vmem:[%s6185_s23 + $0x10] sm:$0xff] %v4429_v44   ;;  %v3658_v2 = vadd.f32 %v3657_v5, %v3623_v29  ;;  %v3701_v7 = vmul.f32 %v3623_v29, %v3515_v33  ;;  %v3337_v28 = vadd.f32 %v3336_v55, %v6207_v47  ;;  %v2599_v50 = vadd.f32 %v2520_v24, %v6641_v62  ;;  %v2804_v55 = vld [vmem:[#allocation2 + $0x238] sm:$0xff] }
 0x2e2   : > { %v2241_v33 = vsel %vm1282_vm2, %v2236_v27, %v2240_v51  ;;  %v6263_v4 = vpack.c.bf16 %v2804_v55, %v2803_v10 }
 0x2e3   : > { %3474 = vmatmul.bf16.gmra.mxu0 %v3155_v30  ;;  %v3736_v40 = vadd.f32 %v3735_v39, %v3701_v7  ;;  %v3436_v15 = vadd.f32 %v3435_v32, %v3337_v28  ;;  %v2894_v39 = vsel %vm2865_vm4, %v2891_v52, %v2893_v1  ;;  %v3157_v32 = vsel %vm1964_vm3, %v3152_v45, %v3156_v61 }
 0x2e4   : > { %v6243_v11 = vpop.f32.mrf.mxu2  ;;  %v3158_v52 = vrot.slane %v6252_v56, 2 }
 0x2e5   : > { %v3516_v12 = vadd.f32 %v3436_v15, %v2598_v23 }
 0x2e6   : > { %v2522_v31 = vpop.f32.mrf.mxu1  ;;  %v3159_v15 = vsel %vm1964_vm3, %v3154_v63, %v3158_v52  ;;  %v2687_v63 = vld [vmem:[#allocation2 + $0x1d8] sm:$0xff] }
 0x2e7   : > { %v3624_v5 = vmul.f32 %v3516_v12, %v6642_v9  ;;  %v2523_v49 = vadd.f32 %v2522_v31, %v5911_v58 }
 0x2e8   : > { %v3437_v47 = vpop.f32.mrf.mxu0  ;;  %v3338_v48 = vpop.f32.mrf.mxu3 }
 0x2e9   : > { %v3659_v46 = vadd.f32 %v3658_v2, %v3624_v5  ;;  %v3702_v44 = vmul.f32 %v3624_v5, %v3516_v12  ;;  %v3339_v23 = vadd.f32 %v3338_v48, %v6218_v14  ;;  %v2600_v29 = vadd.f32 %v2523_v49, %v6643_v57  ;;  %2561 = vmatmul.bf16.gmra.mxu1 %v2241_v33  ;;  %v6644_v14 = vld [vmem:[#allocation4_spill] sm:$0xff]  ;;  %v6645_v33 = vld [vmem:[#allocation14_spill] sm:$0xff] }
 0x2ea   : > { %3042 = vmatmul.bf16.gmra.mxu2 %v2894_v39  ;;  %v2895_v49 = vrot.slane %v6263_v4, 3 }
 0x2eb   : > { %v3737_v24 = vadd.f32 %v3736_v40, %v3702_v44  ;;  %v3438_v58 = vadd.f32 %v3437_v47, %v3339_v23 }
 0x2ec   : > { %v6257_v27 = vpop.f32.mrf.mxu2  ;;  %v2896_v57 = vsel %vm2865_vm4, %v2893_v1, %v2895_v49 }
 0x2ed   : > { %v3517_v8 = vadd.f32 %v3438_v58, %v2599_v50  ;;  %3380 = vmatmul.bf16.gmra.mxu3 %v3157_v32 }
 0x2ee   : > { %v2524_v30 = vpop.f32.mrf.mxu1 }
 0x2ef   : > { %v4434_v2 = vpack.c.bf16 %v3517_v8, %v3516_v12  ;;  %v3625_v7 = vmul.f32 %v3517_v8, %v6644_v14  ;;  %v2525_v28 = vadd.f32 %v2524_v30, %v5917_v53  ;;  %v2244_v53 = vrot.slane %v6252_v56, 1  ;;  %v2806_v14 = vld [vmem:[#allocation2 + $0x1c0] sm:$0xff] }
 0x2f0   : > { %v3440_v62 = vpop.f32.mrf.mxu0  ;;  %v3341_v40 = vpop.f32.mrf.mxu3 }
 0x2f1   : > { %4525 = vst [vmem:[%s6185_s23 + $0x18] sm:$0xff] %v4434_v2   ;;  %v3660_v45 = vadd.f32 %v3659_v46, %v3625_v7  ;;  %v3703_v16 = vmul.f32 %v3625_v7, %v3517_v8  ;;  %v3342_v50 = vadd.f32 %v3341_v40, %v6232_v35  ;;  %v2601_v31 = vadd.f32 %v2525_v28, %v5909_v21  ;;  %v2685_v35 = vld [vmem:[#allocation2 + $0x48] sm:$0xff] }
 0x2f2   : > { %v2245_v21 = vsel %vm1282_vm2, %v2240_v51, %v2244_v53  ;;  %v6277_v58 = vpack.c.bf16 %v2687_v63, %v2685_v35  ;;  %v6646_v8 = vld [vmem:[#allocation46_spill] sm:$0xff]  ;;  %v6648_v35 = vld [vmem:[#allocation5_spill] sm:$0xff] }
 0x2f3   : > { %3479 = vmatmul.bf16.gmra.mxu0 %v3159_v15  ;;  %v3738_v9 = vadd.f32 %v3737_v24, %v3703_v16  ;;  %v3441_v12 = vadd.f32 %v3440_v62, %v3342_v50  ;;  %v3160_v24 = vrot.slane %v6238_v20, 2  ;;  %v2805_v20 = vld [vmem:[#allocation2 + $0x128] sm:$0xff]  ;;  %v6647_v62 = vld [vmem:[#allocation13_spill] sm:$0xff] }
 0x2f4   : > { %v6268_v5 = vpop.f32.mrf.mxu2  ;;  %v3162_v1 = vrot.slane %v6277_v58, 2  ;;  %v6286_v50 = vpack.c.bf16 %v2806_v14, %v2805_v20 }
 0x2f5   : > { %v3518_v47 = vadd.f32 %v3441_v12, %v2600_v29  ;;  %v3161_v30 = vsel %vm1964_vm3, %v3156_v61, %v3160_v24 }
 0x2f6   : > { %v2527_v48 = vpop.f32.mrf.mxu1  ;;  %v3163_v16 = vsel %vm1964_vm3, %v3158_v52, %v3162_v1  ;;  %v2689_v52 = vld [vmem:[#allocation2 + $0x268] sm:$0xff] }
 0x2f7   : > { %v3626_v39 = vmul.f32 %v3518_v47, %v6645_v33  ;;  %v2528_v46 = vadd.f32 %v2527_v48, %v5924_v26  ;;  %v2897_v33 = vrot.slane %v6286_v50, 3 }
 0x2f8   : > { %v3442_v44 = vpop.f32.mrf.mxu0  ;;  %v3343_v23 = vpop.f32.mrf.mxu3 }
 0x2f9   : > { %v3661_v56 = vadd.f32 %v3660_v45, %v3626_v39  ;;  %v3704_v32 = vmul.f32 %v3626_v39, %v3518_v47  ;;  %v3344_v29 = vadd.f32 %v3343_v23, %v6243_v11  ;;  %v2602_v10 = vadd.f32 %v2528_v46, %v6646_v8  ;;  %2566 = vmatmul.bf16.gmra.mxu1 %v2245_v21  ;;  %v2691_v46 = vld [vmem:[#allocation2 + $0x168] sm:$0xff] }
 0x2fa   : > { %3047 = vmatmul.bf16.gmra.mxu2 %v2896_v57 }
 0x2fb   : > { %v3739_v26 = vadd.f32 %v3738_v9, %v3704_v32  ;;  %v3443_v55 = vadd.f32 %v3442_v44, %v3344_v29  ;;  %v3164_v32 = vrot.slane %v6263_v4, 2  ;;  %v6300_v29 = vpack.c.bf16 %v2691_v46, %v2689_v52  ;;  %v2693_v52 = vld [vmem:[#allocation2 + $0x38] sm:$0xff] }
 0x2fc   : > { %v3008_v51 = vpop.f32.mrf.mxu2 }
 0x2fd   : > { %v3519_v2 = vadd.f32 %v3443_v55, %v2601_v31  ;;  %3385 = vmatmul.bf16.gmra.mxu3 %v3161_v30 }
 0x2fe   : > { %v2529_v7 = vpop.f32.mrf.mxu1 }
 0x2ff   : > { %v4439_v28 = vpack.c.bf16 %v3519_v2, %v3518_v47  ;;  %v3627_v11 = vmul.f32 %v3519_v2, %v6647_v62  ;;  %v2530_v40 = vadd.f32 %v2529_v7, %v5936_v60  ;;  %v2248_v60 = vrot.slane %v6277_v58, 1  ;;  %v6650_v7 = vld [vmem:[#allocation16_spill] sm:$0xff] }
 0x300   : > { %v3445_v15 = vpop.f32.mrf.mxu0  ;;  %v3346_v45 = vpop.f32.mrf.mxu3 }
 0x301   : > { %4526 = vst [vmem:[%s6185_s23 + $0x20] sm:$0xff] %v4439_v28   ;;  %v3662_v61 = vadd.f32 %v3661_v56, %v3627_v11  ;;  %v3705_v9 = vmul.f32 %v3627_v11, %v3519_v2  ;;  %v3347_v31 = vadd.f32 %v3346_v45, %v6257_v27  ;;  %v2603_v12 = vadd.f32 %v2530_v40, %v5922_v3  ;;  %v2807_v11 = vld [vmem:[#allocation2 + $0x50] sm:$0xff] }
 0x302   : > { %v2249_v3 = vsel %vm1282_vm2, %v2244_v53, %v2248_v60  ;;  %v2898_v56 = vsel %vm2865_vm4, %v2895_v49, %v2897_v33  ;;  %v3165_v2 = vsel %vm1964_vm3, %v3160_v24, %v3164_v32  ;;  %v3166_v49 = vrot.slane %v6300_v29, 2 }
 0x303   : > { %3484 = vmatmul.bf16.gmra.mxu0 %v3163_v16  ;;  %v3740_v63 = vadd.f32 %v3739_v26, %v3705_v9  ;;  %v3446_v47 = vadd.f32 %v3445_v15, %v3347_v31  ;;  %v6649_v26 = vld [vmem:[#allocation47_spill] sm:$0xff]  ;;  %v6311_v9 = vld [vmem:[#allocation2 + $0x100] sm:$0xff] }
 0x304   : > { %v6291_v48 = vpop.f32.mrf.mxu2  ;;  %v3167_v15 = vsel %vm1964_vm3, %v3162_v1, %v3166_v49  ;;  %v6314_v31 = vpack.c.bf16 %v6311_v9, %v2807_v11  ;;  %v2695_v1 = vld [vmem:[#allocation2 + $0x18] sm:$0xff] }
 0x305   : > { %v3520_v39 = vadd.f32 %v3446_v47, %v2602_v10  ;;  %v2252_v47 = vrot.slane %v6300_v29, 1 }
 0x306   : > { %v2532_v44 = vpop.f32.mrf.mxu1 }
 0x307   : > { %v3628_v23 = vmul.f32 %v3520_v39, %v6648_v35  ;;  %v2533_v21 = vadd.f32 %v2532_v44, %v5949_v6  ;;  %v2899_v44 = vrot.slane %v6314_v31, 3 }
 0x308   : > { %v3447_v27 = vpop.f32.mrf.mxu0  ;;  %v3348_v57 = vpop.f32.mrf.mxu3 }
 0x309   : > { %v3663_v58 = vadd.f32 %v3662_v61, %v3628_v23  ;;  %v3706_v8 = vmul.f32 %v3628_v23, %v3520_v39  ;;  %v3349_v10 = vadd.f32 %v3348_v57, %v6268_v5  ;;  %v2604_v55 = vadd.f32 %v2533_v21, %v6649_v26  ;;  %2571 = vmatmul.bf16.gmra.mxu1 %v2249_v3  ;;  %v6653_v26 = vld [vmem:[#allocation48_spill] sm:$0xff] }
 0x30a   : > { %3052 = vmatmul.bf16.gmra.mxu2 %v2898_v56  ;;  %v2253_v57 = vsel %vm1282_vm2, %v2248_v60, %v2252_v47  ;;  %v2900_v3 = vsel %vm2865_vm4, %v2897_v33, %v2899_v44  ;;  %v3168_v56 = vrot.slane %v6286_v50, 2  ;;  %v2809_v50 = vld [vmem:[#allocation2 + $0x210] sm:$0x3f] }
 0x30b   : > { %v3741_v6 = vadd.f32 %v3740_v63, %v3706_v8  ;;  %v3448_v30 = vadd.f32 %v3447_v27, %v3349_v10 }
 0x30c   : > { %v3013_v53 = vpop.f32.mrf.mxu2 }
 0x30d   : > { %v3521_v20 = vadd.f32 %v3448_v30, %v2603_v12  ;;  %3390 = vmatmul.bf16.gmra.mxu3 %v3165_v2  ;;  %v3169_v2 = vsel %vm1964_vm3, %v3164_v32, %v3168_v56 }
 0x30e   : > { %v2534_v4 = vpop.f32.mrf.mxu1 }
 0x30f   : > { %v4444_v14 = vpack.c.bf16 %v3521_v20, %v3520_v39  ;;  %v3629_v28 = vmul.f32 %v3521_v20, %v6650_v7  ;;  %v2535_v5 = vadd.f32 %v2534_v4, %v5955_v19  ;;  %v6654_v7 = vld [vmem:[#allocation22_spill] sm:$0xff] }
 0x310   : > { %v3450_v62 = vpop.f32.mrf.mxu0  ;;  %v3351_v40 = vpop.f32.mrf.mxu3 }
 0x311   : > { %4527 = vst [vmem:[%s6185_s23 + $0x28] sm:$0xff] %v4444_v14   ;;  %v3664_v45 = vadd.f32 %v3663_v58, %v3629_v28  ;;  %v3707_v16 = vmul.f32 %v3629_v28, %v3521_v20  ;;  %v3352_v24 = vadd.f32 %v3351_v40, %v3008_v51  ;;  %v2605_v61 = vadd.f32 %v2535_v5, %v5947_v54  ;;  %v6651_v51 = vld [vmem:[#allocation9_spill] sm:$0xff]  ;;  %v6652_v54 = vld [vmem:[#allocation50_spill] sm:$0xff] }
 0x312   : > { %v6323_v58 = vpack.c.bf16 %v2695_v1, %v2693_v52 }
 0x313   : > { %3489 = vmatmul.bf16.gmra.mxu0 %v3167_v15  ;;  %v3742_v12 = vadd.f32 %v3741_v6, %v3707_v16  ;;  %v3451_v63 = vadd.f32 %v3450_v62, %v3352_v24  ;;  %v2828_v15 = vpack.c.bf16 %v2809_v50, %v2809_v50  ;;  %v6656_v24 = vld [vmem:[#allocation49_spill] sm:$0xff] }
 0x314   : > { %v3015_v19 = vpop.f32.mrf.mxu2  ;;  %v3170_v33 = vrot.slane %v6323_v58, 2 }
 0x315   : > { %v3522_v39 = vadd.f32 %v3451_v63, %v2604_v55  ;;  %v2901_v1 = vrot.slane %v2828_v15, 3 }
 0x316   : > { %v2537_v46 = vpop.f32.mrf.mxu1  ;;  %v3171_v40 = vsel %vm1964_vm3, %v3166_v49, %v3170_v33 }
 0x317   : > { %v3630_v35 = vmul.f32 %v3522_v39, %v6651_v51  ;;  %v2538_v23 = vadd.f32 %v2537_v46, %v6652_v54 }
 0x318   : > { %v3452_v21 = vpop.f32.mrf.mxu0  ;;  %v3353_v27 = vpop.f32.mrf.mxu3 }
 0x319   : > { %v3665_v29 = vadd.f32 %v3664_v45, %v3630_v35  ;;  %v3708_v8 = vmul.f32 %v3630_v35, %v3522_v39  ;;  %v3354_v10 = vadd.f32 %v3353_v27, %v6291_v48  ;;  %v2606_v55 = vadd.f32 %v2538_v23, %v6653_v26  ;;  %2576 = vmatmul.bf16.gmra.mxu1 %v2253_v57  ;;  %v6655_v48 = vld [vmem:[#allocation52_spill] sm:$0xff]  ;;  %v6658_v23 = vld [vmem:[#allocation54_spill] sm:$0xff]  ;;  %v2697_v27 = vld [vmem:[#allocation2 + $0x1b0] sm:$0xff] }
 0x31a   : > { %3057 = vmatmul.bf16.gmra.mxu2 %v2900_v3  ;;  %v6657_v35 = vld [vmem:[#allocation32_spill] sm:$0xff]  ;;  %v2902_v3 = vsel %vm2865_vm4, %v2899_v44, %v2901_v1  ;;  %v6659_v26 = vld [vmem:[#allocation51_spill] sm:$0xff] }
 0x31b   : > { %v3743_v6 = vadd.f32 %v3742_v12, %v3708_v8  ;;  %v3453_v30 = vadd.f32 %v3452_v21, %v3354_v10 }
 0x31c   : > { %v3018_v60 = vpop.f32.mrf.mxu2 }
 0x31d   : > { %v3523_v20 = vadd.f32 %v3453_v30, %v2605_v61  ;;  %3395 = vmatmul.bf16.gmra.mxu3 %v3169_v2 }
 0x31e   : > { %v2539_v4 = vpop.f32.mrf.mxu1 }
 0x31f   : > { %v4449_v14 = vpack.c.bf16 %v3523_v20, %v3522_v39  ;;  %v3631_v28 = vmul.f32 %v3523_v20, %v6654_v7  ;;  %v2540_v5 = vadd.f32 %v2539_v4, %v6655_v48  ;;  %v2256_v39 = vrot.slane %v6323_v58, 1 }
 0x320   : > { %v3455_v62 = vpop.f32.mrf.mxu0  ;;  %v3356_v11 = vpop.f32.mrf.mxu3  ;;  %v3172_v58 = vrot.slane %v6314_v31, 2 }
 0x321   : > { %4528 = vst [vmem:[%s6185_s23 + $0x30] sm:$0xff] %v4449_v14   ;;  %v3666_v45 = vadd.f32 %v3665_v29, %v3631_v28  ;;  %v3709_v32 = vmul.f32 %v3631_v28, %v3523_v20  ;;  %v3357_v16 = vadd.f32 %v3356_v11, %v3013_v53  ;;  %v2607_v12 = vadd.f32 %v2540_v5, %v6656_v24  ;;  %v6661_v28 = vld [vmem:[#allocation56_spill] sm:$0xff] }
 0x322   : > { %v2257_v53 = vsel %vm1282_vm2, %v2252_v47, %v2256_v39  ;;  %v3173_v20 = vsel %vm1964_vm3, %v3168_v56, %v3172_v58  ;;  %v6662_v56 = vld [vmem:[#allocation53_spill] sm:$0xff] }
 0x323   : > { %3494 = vmatmul.bf16.gmra.mxu0 %v3171_v40  ;;  %v3744_v61 = vadd.f32 %v3743_v6, %v3709_v32  ;;  %v3456_v63 = vadd.f32 %v3455_v62, %v3357_v16  ;;  %v1852_v62 = vld [vmem:[#allocation2 + $0x1b0] sm:$0x3] }
 0x324   : > { %v3020_v52 = vpop.f32.mrf.mxu2  ;;  %v2700_v32 = vld [vmem:[#allocation2 + $0x210] sm:$0xf]  ;;  %v1890_v16 = vpack.c.bf16 %v1852_v62, %v1852_v62  ;;  %v6666_v62 = vld [vmem:[#allocation57_spill] sm:$0xff] }
 0x325   : > { %v3524_v46 = vadd.f32 %v3456_v63, %v2606_v55  ;;  %v2737_v55 = vpack.c.bf16 %v6311_v9, %v2697_v27  ;;  %v2738_v63 = vpack.c.bf16 %v2700_v32, %v2700_v32 }
 0x326   : > { %v2542_v51 = vpop.f32.mrf.mxu1 }
 0x327   : > { %v3632_v54 = vmul.f32 %v3524_v46, %v6657_v35  ;;  %v2543_v49 = vadd.f32 %v2542_v51, %v6658_v23  ;;  %v3174_v4 = vrot.slane %v2737_v55, 2  ;;  %v2260_v35 = vrot.slane %v1890_v16, 1 }
 0x328   : > { %v3457_v21 = vpop.f32.mrf.mxu0  ;;  %v3358_v57 = vpop.f32.mrf.mxu3  ;;  %v3176_v27 = vrot.slane %v2738_v63, 2 }
 0x329   : > { %v3667_v29 = vadd.f32 %v3666_v45, %v3632_v54  ;;  %v3710_v8 = vmul.f32 %v3632_v54, %v3524_v46  ;;  %v3359_v10 = vadd.f32 %v3358_v57, %v3015_v19  ;;  %v2608_v6 = vadd.f32 %v2543_v49, %v6659_v26  ;;  %2581 = vmatmul.bf16.gmra.mxu1 %v2257_v53  ;;  %v6660_v19 = vld [vmem:[#allocation21_spill] sm:$0xff]  ;;  %v6663_v54 = vld [vmem:[#allocation27_spill] sm:$0xff] }
 0x32a   : > { %3062 = vmatmul.bf16.gmra.mxu2 %v2902_v3  ;;  %v3175_v9 = vsel %vm1964_vm3, %v3170_v33, %v3174_v4  ;;  %v3177_v55 = vsel %vm1964_vm3, %v3172_v58, %v3176_v27 }
 0x32b   : > { %v3745_v30 = vadd.f32 %v3744_v61, %v3710_v8  ;;  %v3458_v2 = vadd.f32 %v3457_v21, %v3359_v10  ;;  %v6664_v8 = vld [vmem:[#allocation55_spill] sm:$0xff] }
 0x32c   : > { %v3023_v50 = vpop.f32.mrf.mxu2 }
 0x32d   : > { %v3525_v47 = vadd.f32 %v3458_v2, %v2607_v12  ;;  %3400 = vmatmul.bf16.gmra.mxu3 %v3173_v20 }
 0x32e   : > { %v2544_v44 = vpop.f32.mrf.mxu1 }
 0x32f   : > { %v4454_v14 = vpack.c.bf16 %v3525_v47, %v3524_v46  ;;  %v3633_v7 = vmul.f32 %v3525_v47, %v6660_v19  ;;  %v2545_v48 = vadd.f32 %v2544_v44, %v6661_v28  ;;  %v2701_v46 = vld [vmem:[#allocation2 + $0x230] sm:$0xf] }
 0x330   : > { %v3460_v5 = vpop.f32.mrf.mxu0  ;;  %v3361_v31 = vpop.f32.mrf.mxu3  ;;  %v2739_v57 = vpack.c.bf16 %v2701_v46, %v2701_v46 }
 0x331   : > { %4529 = vst [vmem:[%s6185_s23 + $0x38] sm:$0xff] %v4454_v14   ;;  %v3668_v11 = vadd.f32 %v3667_v29, %v3633_v7  ;;  %v3711_v40 = vmul.f32 %v3633_v7, %v3525_v47  ;;  %v3362_v15 = vadd.f32 %v3361_v31, %v3018_v60  ;;  %v2609_v45 = vadd.f32 %v2545_v48, %v6662_v56  ;;  %v6667_v56 = vld [vmem:[#allocation11_spill] sm:$0xff] }
 0x332   : > { %v2261_v60 = vsel %vm1282_vm2, %v2256_v39, %v2260_v35  ;;  %v3178_v2 = vrot.slane %v2739_v57, 2  ;;  %v6665_v39 = vld [vmem:[#allocation8_spill] sm:$0xff] }
 0x333   : > { %3499 = vmatmul.bf16.gmra.mxu0 %v3175_v9  ;;  %v3746_v24 = vadd.f32 %v3745_v30, %v3711_v40  ;;  %v3461_v12 = vadd.f32 %v3460_v5, %v3362_v15 }
 0x334   : > { %v3025_v61 = vpop.f32.mrf.mxu2  ;;  %v3179_v7 = vsel %vm1964_vm3, %v3174_v4, %v3178_v2 }
 0x335   : > { %v3526_v1 = vadd.f32 %v3461_v12, %v2608_v6 }
 0x336   : > { %v2547_v51 = vpop.f32.mrf.mxu1 }
 0x337   : > { %v3634_v23 = vmul.f32 %v3526_v1, %v6663_v54  ;;  %v2548_v33 = vadd.f32 %v2547_v51, %v6001_v13 }
 0x338   : > { %v3462_v49 = vpop.f32.mrf.mxu0  ;;  %v3363_v21 = vpop.f32.mrf.mxu3 }
 0x339   : > { %v3669_v53 = vadd.f32 %v3668_v11, %v3634_v23  ;;  %v3712_v3 = vmul.f32 %v3634_v23, %v3526_v1  ;;  %v3364_v29 = vadd.f32 %v3363_v21, %v3020_v52  ;;  %v2610_v10 = vadd.f32 %v2548_v33, %v6664_v8  ;;  %2586 = vmatmul.bf16.gmra.mxu1 %v2261_v60  ;;  %v6668_v23 = vld [vmem:[#allocation7_spill] sm:$0xff] }
 0x33b   : > { %v3747_v26 = vadd.f32 %v3746_v24, %v3712_v3  ;;  %v3463_v6 = vadd.f32 %v3462_v49, %v3364_v29 }
 0x33c   : > { %v3028_v30 = vpop.f32.mrf.mxu2 }
 0x33d   : > { %v3527_v13 = vadd.f32 %v3463_v6, %v2609_v45  ;;  %3405 = vmatmul.bf16.gmra.mxu3 %v3177_v55 }
 0x33e   : > { %v2549_v20 = vpop.f32.mrf.mxu1 }
 0x33f   : > { %v4459_v47 = vpack.c.bf16 %v3527_v13, %v3526_v1  ;;  %v3635_v44 = vmul.f32 %v3527_v13, %v6665_v39  ;;  %v2550_v14 = vadd.f32 %v2549_v20, %v6012_v36 }
 0x340   : > { %v3465_v19 = vpop.f32.mrf.mxu0  ;;  %v3366_v52 = vpop.f32.mrf.mxu3 }
 0x341   : > { %4530 = vst [vmem:[%s6185_s23 + $0x40] sm:$0xff] %v4459_v47   ;;  %v3670_v28 = vadd.f32 %v3669_v53, %v3635_v44  ;;  %v3713_v48 = vmul.f32 %v3635_v44, %v3527_v13  ;;  %v3367_v5 = vadd.f32 %v3366_v52, %v3023_v50  ;;  %v2611_v58 = vadd.f32 %v2550_v14, %v6666_v62  ;;  %v6669_v53 = vld [vmem:[#allocation58_spill] sm:$0xff] }
 0x343   : > { %3504 = vmatmul.bf16.gmra.mxu0 %v3179_v7  ;;  %v3748_v31 = vadd.f32 %v3747_v26, %v3713_v48  ;;  %v3466_v9 = vadd.f32 %v3465_v19, %v3367_v5  ;;  %v6670_v26 = vld [vmem:[#allocation10_spill] sm:$0xff] }
 0x344   : > { %v3030_v11 = vpop.f32.mrf.mxu2 }
 0x345   : > { %v3528_v40 = vadd.f32 %v3466_v9, %v2610_v10 }
 0x346   : > { %v2552_v15 = vpop.f32.mrf.mxu1 }
 0x347   : > { %v3636_v45 = vmul.f32 %v3528_v40, %v6667_v56  ;;  %v2553_v36 = vadd.f32 %v2552_v15, %v6018_v0 }
 0x348   : > { %v3467_v32 = vpop.f32.mrf.mxu0  ;;  %v3368_v16 = vpop.f32.mrf.mxu3 }
 0x349   : > { %v3671_v4 = vadd.f32 %v3670_v28, %v3636_v45  ;;  %v3714_v24 = vmul.f32 %v3636_v45, %v3528_v40  ;;  %v3369_v12 = vadd.f32 %v3368_v16, %v3025_v61  ;;  %v2612_v50 = vadd.f32 %v2553_v36, %v6010_v38  ;;  %v6671_v28 = vld [vmem:[#allocation3_spill] sm:$0xff] }
 0x34b   : > { %v3749_v63 = vadd.f32 %v3748_v31, %v3714_v24  ;;  %v3468_v1 = vadd.f32 %v3467_v32, %v3369_v12  ;;  %v6673_v32 = vld [vmem:[#allocation19_spill] sm:$0xff] }
 0x34d   : > { %v3529_v46 = vadd.f32 %v3468_v1, %v2611_v58  ;;  %v3033_v51 = vpop.f32.mrf.mxu2 }
 0x34e   : > { %v2554_v35 = vpop.f32.mrf.mxu1 }
 0x34f   : > { %v4464_v54 = vpack.c.bf16 %v3529_v46, %v3528_v40  ;;  %v3637_v33 = vmul.f32 %v3529_v46, %v6668_v23  ;;  %v2555_v49 = vadd.f32 %v2554_v35, %v6030_v22  ;;  %v6672_v40 = vld [vmem:[#allocation59_spill] sm:$0xff] }
 0x350   : > { %v3470_v21 = vpop.f32.mrf.mxu0  ;;  %v3371_v0 = vpop.f32.mrf.mxu3 }
 0x351   : > { %4531 = vst [vmem:[%s6185_s23 + $0x48] sm:$0xff] %v4464_v54   ;;  %v3672_v60 = vadd.f32 %v3671_v4, %v3637_v33  ;;  %v3715_v27 = vmul.f32 %v3637_v33, %v3529_v46  ;;  %v3372_v57 = vadd.f32 %v3371_v0, %v3028_v30  ;;  %v2613_v61 = vadd.f32 %v2555_v49, %v6669_v53  ;;  %v6674_v4 = vld [vmem:[#allocation62_spill] sm:$0xff]  ;;  %v6675_v46 = vld [vmem:[#allocation60_spill] sm:$0xff] }
 0x352   : > { %v6676_v0 = vld [vmem:[#allocation20_spill] sm:$0xff] }
 0x353   : > { %v3750_v3 = vadd.f32 %v3749_v63, %v3715_v27  ;;  %v3471_v38 = vadd.f32 %v3470_v21, %v3372_v57 }
 0x355   : > { %v3530_v29 = vadd.f32 %v3471_v38, %v2612_v50  ;;  %v3035_v8 = vpop.f32.mrf.mxu2 }
 0x356   : > { %v2557_v10 = vpop.f32.mrf.mxu1 }
 0x357   : > { %v3638_v6 = vmul.f32 %v3530_v29, %v6670_v26  ;;  %v2558_v55 = vadd.f32 %v2557_v10, %v6038_v59 }
 0x358   : > { %v3472_v2 = vpop.f32.mrf.mxu0  ;;  %v3373_v22 = vpop.f32.mrf.mxu3 }
 0x359   : > { %v3673_v13 = vadd.f32 %v3672_v60, %v3638_v6  ;;  %v3716_v20 = vmul.f32 %v3638_v6, %v3530_v29  ;;  %v3374_v47 = vadd.f32 %v3373_v22, %v3030_v11  ;;  %v2614_v39 = vadd.f32 %v2558_v55, %v6028_v41 }
 0x35b   : > { %v3751_v30 = vadd.f32 %v3750_v3, %v3716_v20  ;;  %v3473_v44 = vadd.f32 %v3472_v2, %v3374_v47  ;;  %v6678_v2 = vld [vmem:[#allocation25_spill] sm:$0xff] }
 0x35d   : > { %v3531_v14 = vadd.f32 %v3473_v44, %v2613_v61  ;;  %v3038_v19 = vpop.f32.mrf.mxu2 }
 0x35e   : > { %v2559_v52 = vpop.f32.mrf.mxu1 }
 0x35f   : > { %v4469_v7 = vpack.c.bf16 %v3531_v14, %v3530_v29  ;;  %v3639_v48 = vmul.f32 %v3531_v14, %v6671_v28  ;;  %v2560_v5 = vadd.f32 %v2559_v52, %v6047_v37  ;;  %v6677_v29 = vld [vmem:[#allocation61_spill] sm:$0xff] }
 0x360   : > { %v3475_v62 = vpop.f32.mrf.mxu0  ;;  %v3376_v59 = vpop.f32.mrf.mxu3 }
 0x361   : > { %4532 = vst [vmem:[%s6185_s23 + $0x50] sm:$0xff] %v4469_v7   ;;  %v3674_v58 = vadd.f32 %v3673_v13, %v3639_v48  ;;  %v3717_v31 = vmul.f32 %v3639_v48, %v3531_v14  ;;  %v3377_v9 = vadd.f32 %v3376_v59, %v3033_v51  ;;  %v2615_v11 = vadd.f32 %v2560_v5, %v6672_v40  ;;  %v6679_v14 = vld [vmem:[#allocation63_spill] sm:$0xff] }
 0x363   : > { %v3752_v15 = vadd.f32 %v3751_v30, %v3717_v31  ;;  %v3476_v41 = vadd.f32 %v3475_v62, %v3377_v9  ;;  %v6680_v62 = vld [vmem:[#allocation26_spill] sm:$0xff] }
 0x365   : > { %v3532_v56 = vadd.f32 %v3476_v41, %v2614_v39  ;;  %v3040_v45 = vpop.f32.mrf.mxu2  ;;  %v6681_v41 = vld [vmem:[#allocation64_spill] sm:$0xff] }
 0x366   : > { %v2562_v36 = vpop.f32.mrf.mxu1 }
 0x367   : > { %v3640_v16 = vmul.f32 %v3532_v56, %v6673_v32  ;;  %v2563_v24 = vadd.f32 %v2562_v36, %v6674_v4  ;;  %v6682_v4 = vld [vmem:[#allocation24_spill] sm:$0xff] }
 0x368   : > { %v3477_v12 = vpop.f32.mrf.mxu0  ;;  %v3378_v37 = vpop.f32.mrf.mxu3 }
 0x369   : > { %v3675_v50 = vadd.f32 %v3674_v58, %v3640_v16  ;;  %v3718_v63 = vmul.f32 %v3640_v16, %v3532_v56  ;;  %v3379_v1 = vadd.f32 %v3378_v37, %v3035_v8  ;;  %v2616_v35 = vadd.f32 %v2563_v24, %v6675_v46  ;;  %v6683_v46 = vld [vmem:[#allocation65_spill] sm:$0xff] }
 0x36b   : > { %v3753_v51 = vadd.f32 %v3752_v15, %v3718_v63  ;;  %v3478_v54 = vadd.f32 %v3477_v12, %v3379_v1 }
 0x36d   : > { %v3533_v23 = vadd.f32 %v3478_v54, %v2615_v11  ;;  %v3043_v33 = vpop.f32.mrf.mxu2 }
 0x36e   : > { %v2564_v49 = vpop.f32.mrf.mxu1 }
 0x36f   : > { %v4474_v21 = vpack.c.bf16 %v3533_v23, %v3532_v56  ;;  %v3641_v60 = vmul.f32 %v3533_v23, %v6676_v0  ;;  %v2565_v27 = vadd.f32 %v2564_v49, %v6066_v25  ;;  %v6684_v0 = vld [vmem:[#allocation15_spill] sm:$0xff] }
 0x370   : > { %v3480_v57 = vpop.f32.mrf.mxu0  ;;  %v3381_v53 = vpop.f32.mrf.mxu3 }
 0x371   : > { %4533 = vst [vmem:[%s6185_s23 + $0x58] sm:$0xff] %v4474_v21   ;;  %v3676_v61 = vadd.f32 %v3675_v50, %v3641_v60  ;;  %v3719_v3 = vmul.f32 %v3641_v60, %v3533_v23  ;;  %v3382_v38 = vadd.f32 %v3381_v53, %v3038_v19  ;;  %v2617_v8 = vadd.f32 %v2565_v27, %v6677_v29 }
 0x373   : > { %v3754_v10 = vadd.f32 %v3753_v51, %v3719_v3  ;;  %v3481_v26 = vadd.f32 %v3480_v57, %v3382_v38  ;;  %v6685_v38 = vld [vmem:[#allocation66_spill] sm:$0xff] }
 0x375   : > { %v3534_v6 = vadd.f32 %v3481_v26, %v2616_v35  ;;  %v3045_v13 = vpop.f32.mrf.mxu2 }
 0x376   : > { %v2567_v55 = vpop.f32.mrf.mxu1 }
 0x377   : > { %v3642_v22 = vmul.f32 %v3534_v6, %v6678_v2  ;;  %v2568_v20 = vadd.f32 %v2567_v55, %v6074_v43  ;;  %v6686_v2 = vld [vmem:[#allocation28_spill] sm:$0xff] }
 0x378   : > { %v3482_v47 = vpop.f32.mrf.mxu0  ;;  %v3383_v25 = vpop.f32.mrf.mxu3 }
 0x379   : > { %v3677_v39 = vadd.f32 %v3676_v61, %v3642_v22  ;;  %v3720_v30 = vmul.f32 %v3642_v22, %v3534_v6  ;;  %v3384_v44 = vadd.f32 %v3383_v25, %v3040_v45  ;;  %v2618_v52 = vadd.f32 %v2568_v20, %v6679_v14 }
 0x37b   : > { %v3755_v19 = vadd.f32 %v3754_v10, %v3720_v30  ;;  %v3483_v7 = vadd.f32 %v3482_v47, %v3384_v44  ;;  %v6687_v30 = vld [vmem:[#allocation67_spill] sm:$0xff] }
 0x37d   : > { %v3535_v28 = vadd.f32 %v3483_v7, %v2617_v8  ;;  %v3048_v11 = vpop.f32.mrf.mxu2 }
 0x37e   : > { %v2569_v48 = vpop.f32.mrf.mxu1 }
 0x37f   : > { %v4479_v5 = vpack.c.bf16 %v3535_v28, %v3534_v6  ;;  %v3643_v59 = vmul.f32 %v3535_v28, %v6680_v62  ;;  %v2570_v58 = vadd.f32 %v2569_v48, %v6084_v17 }
 0x380   : > { %v3485_v31 = vpop.f32.mrf.mxu0  ;;  %v3386_v9 = vpop.f32.mrf.mxu3 }
 0x381   : > { %4534 = vst [vmem:[%s6185_s23 + $0x60] sm:$0xff] %v4479_v5   ;;  %v3678_v43 = vadd.f32 %v3677_v39, %v3643_v59  ;;  %v3721_v40 = vmul.f32 %v3643_v59, %v3535_v28  ;;  %v3387_v15 = vadd.f32 %v3386_v9, %v3043_v33  ;;  %v2619_v56 = vadd.f32 %v2570_v58, %v6681_v41  ;;  %v6688_v5 = vld [vmem:[#allocation29_spill] sm:$0xff]  ;;  %v6689_v59 = vld [vmem:[#allocation70_spill] sm:$0xff] }
 0x383   : > { %v3756_v45 = vadd.f32 %v3755_v19, %v3721_v40  ;;  %v3486_v36 = vadd.f32 %v3485_v31, %v3387_v15 }
 0x385   : > { %v3536_v32 = vadd.f32 %v3486_v36, %v2618_v52  ;;  %v3050_v54 = vpop.f32.mrf.mxu2 }
 0x386   : > { %v2572_v16 = vpop.f32.mrf.mxu1 }
 0x387   : > { %v3644_v24 = vmul.f32 %v3536_v32, %v6682_v4  ;;  %v2573_v12 = vadd.f32 %v2572_v16, %v6090_v18  ;;  %v6692_v4 = vld [vmem:[#allocation72_spill] sm:$0xff] }
 0x388   : > { %v3487_v37 = vpop.f32.mrf.mxu0  ;;  %v3388_v17 = vpop.f32.mrf.mxu3 }
 0x389   : > { %v3679_v50 = vadd.f32 %v3678_v43, %v3644_v24  ;;  %v3722_v63 = vmul.f32 %v3644_v24, %v3536_v32  ;;  %v3389_v1 = vadd.f32 %v3388_v17, %v3045_v13  ;;  %v2620_v35 = vadd.f32 %v2573_v12, %v6683_v46  ;;  %v6693_v46 = vld [vmem:[#allocation69_spill] sm:$0xff] }
 0x38b   : > { %v3757_v51 = vadd.f32 %v3756_v45, %v3722_v63  ;;  %v3488_v23 = vadd.f32 %v3487_v37, %v3389_v1 }
 0x38d   : > { %v3537_v33 = vadd.f32 %v3488_v23, %v2619_v56  ;;  %v3053_v26 = vpop.f32.mrf.mxu2 }
 0x38e   : > { %v2574_v49 = vpop.f32.mrf.mxu1 }
 0x38f   : > { %v4484_v21 = vpack.c.bf16 %v3537_v33, %v3536_v32  ;;  %v3645_v60 = vmul.f32 %v3537_v33, %v6684_v0  ;;  %v2575_v27 = vadd.f32 %v2574_v49, %v6102_v34  ;;  %v6691_v32 = vld [vmem:[#allocation18_spill] sm:$0xff] }
 0x390   : > { %v3490_v57 = vpop.f32.mrf.mxu0  ;;  %v3391_v18 = vpop.f32.mrf.mxu3 }
 0x391   : > { %4535 = vst [vmem:[%s6185_s23 + $0x68] sm:$0xff] %v4484_v21   ;;  %v3680_v53 = vadd.f32 %v3679_v50, %v3645_v60  ;;  %v3723_v61 = vmul.f32 %v3645_v60, %v3537_v33  ;;  %v3392_v3 = vadd.f32 %v3391_v18, %v3048_v11  ;;  %v2621_v29 = vadd.f32 %v2575_v27, %v6685_v38  ;;  %v6690_v11 = vld [vmem:[#allocation68_spill] sm:$0xff]  ;;  %v6694_v21 = vld [vmem:[#allocation31_spill] sm:$0xff]  ;;  %v6695_v60 = vld [vmem:[#allocation73_spill] sm:$0xff] }
 0x392   : > { %v6696_v38 = vld [vmem:[#allocation71_spill] sm:$0xff] }
 0x393   : > { %v3758_v8 = vadd.f32 %v3757_v51, %v3723_v61  ;;  %v3491_v10 = vadd.f32 %v3490_v57, %v3392_v3 }
 0x395   : > { %v3538_v6 = vadd.f32 %v3491_v10, %v2620_v35  ;;  %v3055_v28 = vpop.f32.mrf.mxu2 }
 0x396   : > { %v2577_v55 = vpop.f32.mrf.mxu1 }
 0x397   : > { %v3646_v22 = vmul.f32 %v3538_v6, %v6686_v2  ;;  %v2578_v13 = vadd.f32 %v2577_v55, %v6108_v42  ;;  %v6697_v2 = vld [vmem:[#allocation35_spill] sm:$0xff] }
 0x398   : > { %v3492_v20 = vpop.f32.mrf.mxu0  ;;  %v3393_v34 = vpop.f32.mrf.mxu3 }
 0x399   : > { %v3681_v47 = vadd.f32 %v3680_v53, %v3646_v22  ;;  %v3724_v25 = vmul.f32 %v3646_v22, %v3538_v6  ;;  %v3394_v39 = vadd.f32 %v3393_v34, %v3050_v54  ;;  %v2622_v44 = vadd.f32 %v2578_v13, %v6687_v30  ;;  %v6698_v13 = vld [vmem:[#allocation74_spill] sm:$0xff] }
 0x39b   : > { %v3759_v14 = vadd.f32 %v3758_v8, %v3724_v25  ;;  %v3493_v52 = vadd.f32 %v3492_v20, %v3394_v39 }
 0x39d   : > { %v3539_v19 = vadd.f32 %v3493_v52, %v2621_v29  ;;  %v3058_v17 = vpop.f32.mrf.mxu2 }
 0x39e   : > { %v2579_v7 = vpop.f32.mrf.mxu1 }
 0x39f   : > { %v4489_v48 = vpack.c.bf16 %v3539_v19, %v3538_v6  ;;  %v3647_v62 = vmul.f32 %v3539_v19, %v6688_v5  ;;  %v2580_v58 = vadd.f32 %v2579_v7, %v6689_v59 }
 0x3a0   : > { %v3495_v31 = vpop.f32.mrf.mxu0  ;;  %v3396_v42 = vpop.f32.mrf.mxu3 }
 0x3a1   : > { %4536 = vst [vmem:[%s6185_s23 + $0x70] sm:$0xff] %v4489_v48   ;;  %v3682_v9 = vadd.f32 %v3681_v47, %v3647_v62  ;;  %v3725_v43 = vmul.f32 %v3647_v62, %v3539_v19  ;;  %v3397_v40 = vadd.f32 %v3396_v42, %v3053_v26  ;;  %v2623_v15 = vadd.f32 %v2580_v58, %v6690_v11  ;;  %v6700_v62 = vld [vmem:[#allocation36_spill] sm:$0xff]  ;;  %v6701_v58 = vld [vmem:[#allocation75_spill] sm:$0xff] }
 0x3a3   : > { %v3760_v41 = vadd.f32 %v3759_v14, %v3725_v43  ;;  %v3496_v56 = vadd.f32 %v3495_v31, %v3397_v40 }
 0x3a5   : > { %v3540_v45 = vadd.f32 %v3496_v56, %v2622_v44  ;;  %v3060_v8 = vpop.f32.mrf.mxu2  ;;  %v6699_v44 = vld [vmem:[#allocation39_spill] sm:$0xff] }
 0x3a6   : > { %v2582_v36 = vpop.f32.mrf.mxu1 }
 0x3a7   : > { %v3648_v16 = vmul.f32 %v3540_v45, %v6691_v32  ;;  %v2583_v24 = vadd.f32 %v2582_v36, %v6692_v4 }
 0x3a8   : > { %v3497_v12 = vpop.f32.mrf.mxu0  ;;  %v3398_v37 = vpop.f32.mrf.mxu3 }
 0x3a9   : > { %v3683_v50 = vadd.f32 %v3682_v9, %v3648_v16  ;;  %v3726_v63 = vmul.f32 %v3648_v16, %v3540_v45  ;;  %v3399_v1 = vadd.f32 %v3398_v37, %v3055_v28  ;;  %v2624_v35 = vadd.f32 %v2583_v24, %v6693_v46  ;;  %v6703_v16 = vld [vmem:[#allocation38_spill] sm:$0xff] }
 0x3ab   : > { %v3761_v51 = vadd.f32 %v3760_v41, %v3726_v63  ;;  %v3498_v54 = vadd.f32 %v3497_v12, %v3399_v1 }
 0x3ad   : > { %v3541_v23 = vadd.f32 %v3498_v54, %v2623_v15  ;;  %v3063_v7 = vpop.f32.mrf.mxu2  ;;  %v6702_v15 = vld [vmem:[#allocation40_spill] sm:$0xff] }
 0x3ae   : > { %v2584_v33 = vpop.f32.mrf.mxu1 }
 0x3af   : > { %v4494_v49 = vpack.c.bf16 %v3541_v23, %v3540_v45  ;;  %v3649_v0 = vmul.f32 %v3541_v23, %v6694_v21  ;;  %v2585_v27 = vadd.f32 %v2584_v33, %v6695_v60 }
 0x3b0   : > { %v3500_v57 = vpop.f32.mrf.mxu0  ;;  %v3401_v18 = vpop.f32.mrf.mxu3 }
 0x3b1   : > { %4537 = vst [vmem:[%s6185_s23 + $0x78] sm:$0xff] %v4494_v49   ;;  %v3684_v53 = vadd.f32 %v3683_v50, %v3649_v0  ;;  %v3727_v61 = vmul.f32 %v3649_v0, %v3541_v23  ;;  %v3402_v3 = vadd.f32 %v3401_v18, %v3058_v17  ;;  %v2625_v29 = vadd.f32 %v2585_v27, %v6696_v38 }
 0x3b3   : > { %v3762_v10 = vadd.f32 %v3761_v51, %v3727_v61  ;;  %v3501_v26 = vadd.f32 %v3500_v57, %v3402_v3  ;;  %v6704_v51 = vld [vmem:[#allocation30_spill] sm:$0xff] }
 0x3b5   : > { %v3542_v6 = vadd.f32 %v3501_v26, %v2624_v35  ;;  %v3065_v32 = vpop.f32.mrf.mxu2 }
 0x3b6   : > { %v2587_v55 = vpop.f32.mrf.mxu1 }
 0x3b7   : > { %v3650_v22 = vmul.f32 %v3542_v6, %v6697_v2  ;;  %v2588_v20 = vadd.f32 %v2587_v55, %v6698_v13 }
 0x3b8   : > { %v3502_v34 = vpop.f32.mrf.mxu0  ;;  %v3403_v47 = vpop.f32.mrf.mxu3 }
 0x3b9   : > { %v3685_v25 = vadd.f32 %v3684_v53, %v3650_v22  ;;  %v3728_v39 = vmul.f32 %v3650_v22, %v3542_v6  ;;  %v3404_v30 = vadd.f32 %v3403_v47, %v3060_v8  ;;  %v2626_v14 = vadd.f32 %v2588_v20, %v6699_v44 }
 0x3bb   : > { %v3763_v52 = vadd.f32 %v3762_v10, %v3728_v39  ;;  %v3503_v19 = vadd.f32 %v3502_v34, %v3404_v30 }
 0x3bd   : > { %v3543_v28 = vadd.f32 %v3503_v19, %v2625_v29 }
 0x3be   : > { %v2589_v48 = vpop.f32.mrf.mxu1 }
 0x3bf   : > { %v4499_v5 = vpack.c.bf16 %v3543_v28, %v3542_v6  ;;  %v3651_v59 = vmul.f32 %v3543_v28, %v6700_v62  ;;  %v2590_v31 = vadd.f32 %v2589_v48, %v6701_v58 }
 0x3c0   : > { %v3505_v42 = vpop.f32.mrf.mxu0  ;;  %v3406_v9 = vpop.f32.mrf.mxu3 }
 0x3c1   : > { %4538 = vst [vmem:[%s6185_s23 + $0x80] sm:$0xff] %v4499_v5   ;;  %v3686_v43 = vadd.f32 %v3685_v25, %v3651_v59  ;;  %v3729_v40 = vmul.f32 %v3651_v59, %v3543_v28  ;;  %v3407_v11 = vadd.f32 %v3406_v9, %v3063_v7  ;;  %v2627_v41 = vadd.f32 %v2590_v31, %v6702_v15 }
 0x3c3   : > { %v3764_v56 = vadd.f32 %v3763_v52, %v3729_v40  ;;  %v3506_v45 = vadd.f32 %v3505_v42, %v3407_v11 }
 0x3c5   : > { %v3544_v36 = vadd.f32 %v3506_v45, %v2626_v14 }
 0x3c7   : > { %v3652_v4 = vmul.f32 %v3544_v36, %v6703_v16 }
 0x3c8   : > { %v3408_v24 = vpop.f32.mrf.mxu3  ;;  %v3507_v12 = vpop.f32.mrf.mxu0 }
 0x3c9   : > { %v3687_v37 = vadd.f32 %v3686_v43, %v3652_v4  ;;  %v3730_v17 = vmul.f32 %v3652_v4, %v3544_v36  ;;  %v3409_v50 = vadd.f32 %v3408_v24, %v3065_v32 }
 0x3cb   : > { %v3765_v63 = vadd.f32 %v3764_v56, %v3730_v17  ;;  %v3508_v1 = vadd.f32 %v3507_v12, %v3409_v50 }
 0x3cd   : > { %v3545_v46 = vadd.f32 %v3508_v1, %v2627_v41 }
 0x3cf   : > { %v4504_v35 = vpack.c.bf16 %v3545_v46, %v3544_v36  ;;  %v3653_v54 = vmul.f32 %v3545_v46, %v6704_v51 }
 0x3d1   : > { %4539 = vst [vmem:[%s6185_s23 + $0x88] sm:$0xff] %v4504_v35   ;;  %v3688_v23 = vadd.f32 %v3687_v37, %v3653_v54  ;;  %v3731_v33 = vmul.f32 %v3653_v54, %v3545_v46 }
 0x3d3   : > { %v3689_v49 = vrot.slane %v3688_v23, 4  ;;  %v3766_v21 = vadd.f32 %v3765_v63, %v3731_v33 }
 0x3d5   : > { %v3690_v0 = vadd.f32 %v3689_v49, %v3688_v23  ;;  %v3767_v60 = vrot.slane %v3766_v21, 4 }
 0x3d7   : > { %v3691_v27 = vrot.slane %v3690_v0, 2  ;;  %v3768_v57 = vadd.f32 %v3767_v60, %v3766_v21 }
 0x3d9   : > { %v3692_v18 = vadd.f32 %v3691_v27, %v3690_v0  ;;  %v3769_v53 = vrot.slane %v3768_v57, 2 }
 0x3db   : > { %v3693_v61 = vrot.slane %v3692_v18, 1  ;;  %v3770_v3 = vadd.f32 %v3769_v53, %v3768_v57 }
 0x3dd   : > { %v3694_v38 = vadd.f32 %v3693_v61, %v3692_v18  ;;  %v3771_v29 = vrot.slane %v3770_v3, 1 }
 0x3df   : > { %3695 = vst [vmem:[%s319_s25] sm:$0x1] %v3694_v38  ;;  %v3772_v8 = vadd.f32 %v3771_v29, %v3770_v3 }
 0x3e1   : > { %3773 = vst [vmem:[%s322_s30] sm:$0x1] %v3772_v8 }
 0x3e2 PF: > { %s19_s27 = sadd.s32 1, %s4589_s27  }
 0x3e3   : > { %p16_p4 = scmp.ge.s32.totalorder %s19_s27, 4  }
 0x3e5   :  { %18 = sbr.rel (!%p16_p4) target bundleno = 1 (0x1), region = 102 }

</bundles_post_ra>
